<compile_context>
chip_gen: v6e
topology: v6e:2x2x1
jax: 0.10.0
libtpu: 0.0.40
codegen_flags: <defaults>
</compile_context>

<pallas_src>
import jax
import jax.numpy as jnp
from jax import lax
from jax.experimental import pallas as pl
from jax.experimental.pallas import tpu as pltpu

ASPECT_NUM_MAX = 8

# Per-grid-step working-set target: leaves headroom under v7x's 64 MiB physical /
# 32 MiB default scoped VMEM while still allowing near-roofline blocks on v5e/v6e.
_LSTM_VMEM_BUDGET = 20 * 1024 * 1024


def _lstm_vmem_bytes(T, bn, D, H):
    """Estimated VMEM for one LSTM grid step (double-buffered blocks + scratch)."""
    x_blk = T * bn * D * 2                 # bf16 input block
    out_blk = T * bn * H * 4               # f32 output block
    gates = T * bn * 4 * H * 4             # f32 hoisted-gates scratch (single)
    weights = D * 4 * H * 2 + H * 4 * H * 2 + 4 * H * 4 + bn * 4
    return 2 * (x_blk + out_blk + weights) + gates


def _pick_bn(N, T, D, H):
    """Largest batch tile (multiple of 16 for bf16 sublane packing) dividing N that
    fits the VMEM budget; small batches fall back to a single full block."""
    for c in (512, 256, 128, 64, 32, 16):
        if N % c == 0 and _lstm_vmem_bytes(T, c, D, H) <= _LSTM_VMEM_BUDGET:
            return c
    if N % 8 == 0 and _lstm_vmem_bytes(T, 8, D, H) <= _LSTM_VMEM_BUDGET:
        return 8
    return N


# ----------------------------------------------------------------------------
# Fused LSTM kernel: time-major, batch-tiled, input projection hoisted to one
# bf16 MXU matmul, recurrence in a fori_loop reading gate slabs from scratch.
# ----------------------------------------------------------------------------
def _lstm_kernel(x_ref, wih_ref, whh_ref, b_ref, len_ref, out_ref, gates_ref):
    T, bn, D = x_ref.shape
    H = whh_ref.shape[0]

    # Hoisted input projection for ALL time steps: one (T*bn, D) @ (D, 4H) matmul,
    # bf16 operands, f32 accumulation, result parked in VMEM scratch.
    x2 = x_ref[...].reshape(T * bn, D)                                   # bf16
    gates_ref[...] = (
        jnp.dot(x2, wih_ref[...], preferred_element_type=jnp.float32)
        + b_ref[...]
    ).reshape(T, bn, 4 * H)

    lens = len_ref[...]                                                  # (bn, 1) int32
    whh = whh_ref[...]                                                   # (H, 4H) bf16

    def step(t, carry):
        h, c = carry                                                     # f32 state
        # MXU operands bf16, accumulate + gates + state all f32.
        g = gates_ref[t] + jnp.dot(h.astype(jnp.bfloat16), whh,
                                   preferred_element_type=jnp.float32)
        i_g = jax.nn.sigmoid(g[:, 0 * H:1 * H])
        f_g = jax.nn.sigmoid(g[:, 1 * H:2 * H])
        g_g = jnp.tanh(g[:, 2 * H:3 * H])
        o_g = jax.nn.sigmoid(g[:, 3 * H:4 * H])
        c = f_g * c + i_g * g_g
        h = o_g * jnp.tanh(c)
        # pad_packed_sequence semantics: outputs beyond the sequence length are zero.
        valid = (lens > t).astype(jnp.float32)                           # (bn, 1)
        out_ref[t] = h * valid
        return h, c

    h0 = jnp.zeros((bn, H), jnp.float32)
    c0 = jnp.zeros((bn, H), jnp.float32)
    # Short sequences: full unroll for LLO scheduling; long sequences: rolled loop
    # (bounded live ranges / vreg pressure) with modest unroll.
    unroll = True if T <= 16 else 2
    lax.fori_loop(0, T, step, (h0, c0), unroll=unroll)


def lstm_tm(x_tm, wih, whh, b, lengths):
    """Time-major LSTM: x (T, N, D) -> (T, N, H) f32, outputs zeroed past `lengths`."""
    T, N, D = x_tm.shape
    H = whh.shape[0]
    bn = _pick_bn(N, T, D, H)
    grid = (N // bn,)
    vmem_limit = int(min(max(_lstm_vmem_bytes(T, bn, D, H) + (4 << 20), 16 << 20),
                         40 << 20))

    return pl.pallas_call(
        _lstm_kernel,
        out_shape=jax.ShapeDtypeStruct((T, N, H), jnp.float32),
        grid_spec=pltpu.PrefetchScalarGridSpec(
            num_scalar_prefetch=0,
            grid=grid,
            in_specs=[
                pl.BlockSpec((T, bn, D), lambda i: (0, i, 0)),     # batch-tiled input
                pl.BlockSpec((D, 4 * H), lambda i: (0, 0)),        # W_ih (resident)
                pl.BlockSpec((H, 4 * H), lambda i: (0, 0)),        # W_hh (resident)
                pl.BlockSpec((1, 4 * H), lambda i: (0, 0)),        # bias
                pl.BlockSpec((bn, 1), lambda i: (i, 0)),           # per-row lengths
            ],
            out_specs=pl.BlockSpec((T, bn, H), lambda i: (0, i, 0)),
            scratch_shapes=[pltpu.VMEM((T, bn, 4 * H), jnp.float32)],
        ),
        compiler_params=pltpu.CompilerParams(
            dimension_semantics=("parallel",),          # batch tiles are independent
            vmem_limit_bytes=vmem_limit),
    )(x_tm.astype(jnp.bfloat16), wih.astype(jnp.bfloat16),
      whh.astype(jnp.bfloat16), b.astype(jnp.float32),
      lengths.astype(jnp.int32).reshape(N, 1))


# ----------------------------------------------------------------------------
# Per-aspect attention kernel (grid over aspects, fully parallel).
#   stage 1: att1 = softmax(mask(keys_a . (cpool @ W^T)));  out_ss = att1 @ keys_a
#   stage 2: att2 = softmax(mask(pos_a * (ctx . (out_ss @ W^T))))
#            out_ts = (att2 * pos_a) @ ctx   ->  lane-dense slab of the (B, 8H) concat
# ----------------------------------------------------------------------------
def _attn_kernel(asp_ref, pos_ref, tlen_ref, ctx_ref, w_ref, xlen_ref, clen_ref,
                 out_ref):
    keys = asp_ref[...]                        # (LA, B, H) f32, this aspect's states
    pos = pos_ref[...]                         # (L,  B)    f32, position weights
    tlen = tlen_ref[...]                       # (1,  B)    int32, target length
    ctx = ctx_ref[...]                         # (L,  B, H) f32, context states
    w = w_ref[...]                             # (H,  H)    f32, bilinear weight
    LA, B, H = keys.shape
    L = ctx.shape[0]

    # Pooled-context query (reference sums over ALL L positions, divides by
    # context_len); EUP reciprocal keeps the divide off the VPU path.
    cpool = jnp.sum(ctx, axis=0) * pl.reciprocal(clen_ref[...], approx=True)   # (B, H)
    wq = lax.dot_general(cpool, w, (((1,), (1,)), ((), ())),
                         preferred_element_type=jnp.float32)                   # cpool @ W^T

    # --- stage 1: bilinear attention over this aspect's LSTM states.
    # (lane-axis reduce over H; tiny here -- re-express as a batched dot_general
    #  if XLU ever binds at production sizes.)
    s1 = jnp.sum(keys * wq[None, :, :], axis=-1)                               # (LA, B)
    m1 = lax.broadcasted_iota(jnp.int32, (LA, B), 0) < tlen
    a1 = jax.nn.softmax(jnp.where(m1, s1, -1e30), axis=0)
    out_ss = jnp.sum(a1[:, :, None] * keys, axis=0)                            # (B, H)

    # --- stage 2: bilinear attention over position-weighted context states.
    # (pos ⊙ ctx) @ W @ q == pos ⊙ (ctx . (q @ W^T))  -> no shared ctx@W precompute.
    wq2 = lax.dot_general(out_ss, w, (((1,), (1,)), ((), ())),
                          preferred_element_type=jnp.float32)                  # out_ss @ W^T
    base = jnp.sum(ctx * wq2[None, :, :], axis=-1)                             # (L, B)
    m2 = lax.broadcasted_iota(jnp.int32, (L, B), 0) < xlen_ref[...]
    a2 = jax.nn.softmax(jnp.where(m2, pos * base, -1e30), axis=0)
    wgt = a2 * pos                                                             # (L, B)

    # This aspect's out_ts slab of the (B, 8H) concat: 128-lane-dense store.
    out_ref[...] = jnp.sum(wgt[:, :, None] * ctx, axis=0)                      # (B, H)


def attention_all_aspects(asp_tm, ctx_tm, w, pos, tlen, xlen, clen):
    """asp_tm: (LA, A, B, H); ctx_tm: (L, B, H) -> (B, A*H) concat of out_ts."""
    LA, A, B, H = asp_tm.shape
    L = ctx_tm.shape[0]
    return pl.pallas_call(
        _attn_kernel,
        out_shape=jax.ShapeDtypeStruct((B, A * H), jnp.float32),
        grid_spec=pltpu.PrefetchScalarGridSpec(
            num_scalar_prefetch=0,
            grid=(A,),
            in_specs=[
                pl.BlockSpec((LA, None, B, H), lambda a: (0, a, 0, 0)),  # aspect keys (native layout)
                pl.BlockSpec((None, L, B), lambda a: (a, 0, 0)),         # aspect position weights
                pl.BlockSpec((None, 1, B), lambda a: (a, 0, 0)),         # aspect target lengths
                pl.BlockSpec((L, B, H), lambda a: (0, 0, 0)),            # context states (resident)
                pl.BlockSpec((H, H), lambda a: (0, 0)),                  # bilinear W (resident)
                pl.BlockSpec((1, B), lambda a: (0, 0)),                  # x_len
                pl.BlockSpec((B, 1), lambda a: (0, 0)),                  # context_len (f32)
            ],
            out_specs=pl.BlockSpec((B, H), lambda a: (0, a)),            # lane-dense slab per aspect
        ),
        compiler_params=pltpu.CompilerParams(dimension_semantics=("parallel",)),
    )(asp_tm, pos, tlen, ctx_tm, w, xlen, clen)


# ----------------------------------------------------------------------------
# SDGCN forward
# ----------------------------------------------------------------------------
@jax.jit
def sdgcn_forward(params, context_ids, aspect_ids, all_aspects_ids,
                  all_targets_position, targets_all, x_len):
    A = ASPECT_NUM_MAX
    B, L = context_ids.shape
    LA = all_aspects_ids.shape[-1]

    context_len = jnp.sum(context_ids != 0, axis=-1)           # (B,)
    aspect_len = jnp.sum(aspect_ids != 0, axis=-1)             # (B,)

    # TODO(synk): full BERT encoder not translated; replaced with a deterministic
    # embedding lookup producing [*, seq, bert_dim] (dropout is identity at eval;
    # the bert(aspect) output is never used downstream in the reference forward).
    emb = params["emb"]

    # Time-major gathers: only the tiny int id tensors are transposed, never the
    # (T, N, D) activations.
    context_emb = jnp.take(emb, context_ids.T, axis=0).astype(jnp.bfloat16)       # (L, B, D)
    asp_ids_tm = jnp.transpose(all_aspects_ids, (2, 1, 0)).reshape(LA, A * B)     # aspect-major fold
    aspects_emb = jnp.take(emb, asp_ids_tm, axis=0).astype(jnp.bfloat16)          # (LA, A*B, D)

    # context LSTM: reference passes length 80 (> seq len) => no output masking.
    ctx_lstm = lstm_tm(context_emb, params["lstm_ctx_wih"], params["lstm_ctx_whh"],
                       params["lstm_ctx_b"], jnp.full((B,), L, dtype=jnp.int32))  # (L, B, H)

    # all 8 aspect LSTMs batched into ONE call (aspects folded into batch).
    asp_lens = jnp.tile(aspect_len.astype(jnp.int32), A)                          # (A*B,)
    asp_lstm = lstm_tm(aspects_emb, params["lstm_asp_wih"], params["lstm_asp_whh"],
                       params["lstm_asp_b"], asp_lens)                            # (LA, A*B, H)
    H = asp_lstm.shape[-1]
    asp_lstm = asp_lstm.reshape(LA, A, B, H)                                      # free axis split

    # tiny per-aspect metadata re-laid out for per-aspect BlockSpec slabs
    targets_len = targets_all[:, :, 0]                                            # (B, A)
    pos = jnp.transpose(all_targets_position, (1, 2, 0)).astype(jnp.float32)      # (A, L, B)
    tlen = jnp.transpose(targets_len, (1, 0)).reshape(A, 1, B).astype(jnp.int32)  # (A, 1, B)
    xlen = x_len.astype(jnp.int32).reshape(1, B)
    clen = context_len.astype(jnp.float32).reshape(B, 1)

    # both bilinear attentions for all 8 aspects -> (B, 8H) concat, one launch.
    ts_concat = attention_all_aspects(asp_lstm, ctx_lstm, params["att_aspect_w"],
                                      pos, tlen, xlen, clen)

    # final concat + dense: ONE lane-dense (B, 8H) @ (8H, P) matmul (tiny; XLA glue).
    return ts_concat @ params["dense_w"] + params["dense_b"]


# ----------------------------------------------------------------------------
# Deterministic parameter / input construction
# ----------------------------------------------------------------------------
def make_params(key, vocab, bert_dim, hid, pol):
    ks = jax.random.split(key, 10)
    s = 0.1
    return {
        "emb": jax.random.normal(ks[0], (vocab, bert_dim), jnp.float32) * 0.02,
        "lstm_ctx_wih": jax.random.normal(ks[1], (bert_dim, 4 * hid), jnp.float32) * s,
        "lstm_ctx_whh": jax.random.normal(ks[2], (hid, 4 * hid), jnp.float32) * s,
        "lstm_ctx_b": jax.random.normal(ks[3], (1, 4 * hid), jnp.float32) * s,
        "lstm_asp_wih": jax.random.normal(ks[4], (bert_dim, 4 * hid), jnp.float32) * s,
        "lstm_asp_whh": jax.random.normal(ks[5], (hid, 4 * hid), jnp.float32) * s,
        "lstm_asp_b": jax.random.normal(ks[6], (1, 4 * hid), jnp.float32) * s,
        "att_aspect_w": jax.random.normal(ks[7], (hid, hid), jnp.float32) * s,
        "dense_w": jax.random.normal(ks[8], (8 * hid, pol), jnp.float32) * s,
        "dense_b": jax.random.normal(ks[9], (1, pol), jnp.float32) * s,
    }


if __name__ == "__main__":
    B, L, LA = 2, 16, 8
    A = ASPECT_NUM_MAX
    # lane-aligned hidden / bert dims (multiples of 128) per the perf review
    VOCAB, BERT_DIM, HID, POL = 50, 128, 128, 3

    key = jax.random.PRNGKey(0)
    k_ids, k_asp, k_all, k_pos, k_tlen, k_par = jax.random.split(key, 6)

    # context ids, zero padded (lengths 12 and 9)
    ctx_lens = jnp.array([12, 9], dtype=jnp.int32)
    ctx_raw = jax.random.randint(k_ids, (B, L), 1, VOCAB, dtype=jnp.int32)
    ctx_mask = lax.broadcasted_iota(jnp.int32, (B, L), 1) < ctx_lens[:, None]
    context_ids = jnp.where(ctx_mask, ctx_raw, 0)

    # aspect ids, zero padded (lengths 3 and 2)
    asp_lens = jnp.array([3, 2], dtype=jnp.int32)
    asp_raw = jax.random.randint(k_asp, (B, LA), 1, VOCAB, dtype=jnp.int32)
    asp_mask = lax.broadcasted_iota(jnp.int32, (B, LA), 1) < asp_lens[:, None]
    aspect_ids = jnp.where(asp_mask, asp_raw, 0)

    # all aspects: (B, A, LA), first 2 tokens non-zero
    all_raw = jax.random.randint(k_all, (B, A, LA), 1, VOCAB, dtype=jnp.int32)
    all_mask = lax.broadcasted_iota(jnp.int32, (B, A, LA), 2) < 2
    all_aspects_ids = jnp.where(all_mask, all_raw, 0)

    # per-target position weights over the context: (B, A, L)
    all_targets_position = jax.random.uniform(k_pos, (B, A, L), jnp.float32,
                                              minval=0.1, maxval=1.0)

    # per-target token lengths: (B, A, 1), values in [1, LA]
    targets_all = jax.random.randint(k_tlen, (B, A, 1), 1, LA + 1, dtype=jnp.int32)

    # x_len: context lengths
    x_len = ctx_lens

    params = make_params(k_par, VOCAB, BERT_DIM, HID, POL)

    out = sdgcn_forward(params, context_ids, aspect_ids, all_aspects_ids,
                        all_targets_position, targets_all, x_len)
    out = jax.block_until_ready(out)
    assert out.shape == (B, POL), out.shape
    print("KERNEL_OK")
</pallas_src>

<mosaic_0001>
module attributes {stable_mosaic.version = 11 : i64} {
  func.func @_lstm_kernel(%arg0: i32, %arg1: memref<8x16x128xbf16, #tpu.memory_space<vmem>>, %arg2: memref<128x512xbf16, #tpu.memory_space<vmem>>, %arg3: memref<128x512xbf16, #tpu.memory_space<vmem>>, %arg4: memref<1x512xf32, #tpu.memory_space<vmem>>, %arg5: memref<16x1xi32, #tpu.memory_space<vmem>>, %arg6: memref<8x16x128xf32, #tpu.memory_space<vmem>>, %arg7: memref<8x16x512xf32, #tpu.memory_space<vmem>>) attributes {dimension_semantics = [#tpu.dimension_semantics<parallel>], iteration_bounds = array<i64: 1>, scalar_prefetch = 0 : i64, scratch_operands = 1 : i64, tpu.core_type = #tpu.core_type<tc>, window_params = [{transform_indices = @transform_0, window_bounds = array<i64: 8, 16, 128>}, {pipeline_mode = #tpu.pipeline_mode<synchronous>, transform_indices = @transform_1, window_bounds = array<i64: 128, 512>}, {pipeline_mode = #tpu.pipeline_mode<synchronous>, transform_indices = @transform_2, window_bounds = array<i64: 128, 512>}, {pipeline_mode = #tpu.pipeline_mode<synchronous>, transform_indices = @transform_3, window_bounds = array<i64: 1, 512>}, {transform_indices = @transform_4, window_bounds = array<i64: 16, 1>}, {transform_indices = @transform_5, window_bounds = array<i64: 8, 16, 128>}]} {
    %c0 = arith.constant 0 : index
    %c0_0 = arith.constant 0 : index
    %c0_1 = arith.constant 0 : index
    %0 = vector.load %arg1[%c0, %c0_0, %c0_1] : memref<8x16x128xbf16, #tpu.memory_space<vmem>>, vector<8x16x128xbf16>
    %1 = vector.shape_cast %0 : vector<8x16x128xbf16> to vector<128x128xbf16>
    %c0_2 = arith.constant 0 : index
    %c0_3 = arith.constant 0 : index
    %2 = vector.load %arg2[%c0_2, %c0_3] : memref<128x512xbf16, #tpu.memory_space<vmem>>, vector<128x512xbf16>
    %cst = arith.constant dense<0.000000e+00> : vector<128x512xf32>
    %3 = tpu.matmul %1, %2, %cst {dimension_numbers = #tpu.dot_dimension_numbers<[1], [0], [0], [1], [0, 0, 1, 1], [], []>} : vector<128x128xbf16>, vector<128x512xbf16>, vector<128x512xf32> -> vector<128x512xf32>
    %c0_4 = arith.constant 0 : index
    %c0_5 = arith.constant 0 : index
    %4 = vector.load %arg4[%c0_4, %c0_5] : memref<1x512xf32, #tpu.memory_space<vmem>>, vector<1x512xf32>
    %5 = vector.broadcast %4 : vector<1x512xf32> to vector<128x512xf32>
    %6 = arith.addf %3, %5 : vector<128x512xf32>
    %7 = vector.shape_cast %6 : vector<128x512xf32> to vector<8x16x512xf32>
    %c0_6 = arith.constant 0 : index
    %c0_7 = arith.constant 0 : index
    %c0_8 = arith.constant 0 : index
    %8 = vector.load %arg7[%c0_6, %c0_7, %c0_8] : memref<8x16x512xf32, #tpu.memory_space<vmem>>, vector<8x16x512xf32>
    tpu.vector_store %arg7[%c0_6, %c0_7, %c0_8], %7 {strides = array<i32>} : memref<8x16x512xf32, #tpu.memory_space<vmem>>, vector<8x16x512xf32>,
    %c0_9 = arith.constant 0 : index
    %c0_10 = arith.constant 0 : index
    %9 = vector.load %arg5[%c0_9, %c0_10] : memref<16x1xi32, #tpu.memory_space<vmem>>, vector<16x1xi32>
    %c0_11 = arith.constant 0 : index
    %c0_12 = arith.constant 0 : index
    %10 = vector.load %arg3[%c0_11, %c0_12] : memref<128x512xbf16, #tpu.memory_space<vmem>>, vector<128x512xbf16>
    %cst_13 = arith.constant 0.000000e+00 : f32
    %11 = vector.broadcast %cst_13 : f32 to vector<16x128xf32>
    %cst_14 = arith.constant 0.000000e+00 : f32
    %12 = vector.broadcast %cst_14 : f32 to vector<16x128xf32>
    %c0_i32 = arith.constant 0 : i32
    %13 = arith.index_cast %c0_i32 : i32 to index
    %c0_15 = arith.constant 0 : index
    %c0_16 = arith.constant 0 : index
    %14 = vector.load %arg7[%13, %c0_15, %c0_16] : memref<8x16x512xf32, #tpu.memory_space<vmem>>, vector<1x16x512xf32>
    %15 = vector.shape_cast %14 : vector<1x16x512xf32> to vector<16x512xf32>
    %16 = arith.truncf %11 : vector<16x128xf32> to vector<16x128xbf16>
    %cst_17 = arith.constant dense<0.000000e+00> : vector<16x512xf32>
    %17 = tpu.matmul %16, %10, %cst_17 {dimension_numbers = #tpu.dot_dimension_numbers<[1], [0], [0], [1], [0, 0, 1, 1], [], []>} : vector<16x128xbf16>, vector<128x512xbf16>, vector<16x512xf32> -> vector<16x512xf32>
    %18 = arith.addf %15, %17 : vector<16x512xf32>
    %19 = vector.extract_strided_slice %18 {offsets = [0, 0], sizes = [16, 128], strides = [1, 1]} : vector<16x512xf32> to vector<16x128xf32>
    %20 = arith.negf %19 : vector<16x128xf32>
    %21 = math.exp %20 : vector<16x128xf32>
    %cst_18 = arith.constant 1.000000e+00 : f32
    %22 = vector.broadcast %cst_18 : f32 to vector<16x128xf32>
    %23 = arith.addf %22, %21 : vector<16x128xf32>
    %24 = arith.divf %22, %23 : vector<16x128xf32>
    %25 = vector.extract_strided_slice %18 {offsets = [0, 128], sizes = [16, 128], strides = [1, 1]} : vector<16x512xf32> to vector<16x128xf32>
    %26 = arith.negf %25 : vector<16x128xf32>
    %27 = math.exp %26 : vector<16x128xf32>
    %cst_19 = arith.constant 1.000000e+00 : f32
    %28 = vector.broadcast %cst_19 : f32 to vector<16x128xf32>
    %29 = arith.addf %28, %27 : vector<16x128xf32>
    %30 = arith.divf %28, %29 : vector<16x128xf32>
    %31 = vector.extract_strided_slice %18 {offsets = [0, 256], sizes = [16, 128], strides = [1, 1]} : vector<16x512xf32> to vector<16x128xf32>
    %32 = math.tanh %31 : vector<16x128xf32>
    %33 = vector.extract_strided_slice %18 {offsets = [0, 384], sizes = [16, 128], strides = [1, 1]} : vector<16x512xf32> to vector<16x128xf32>
    %34 = arith.negf %33 : vector<16x128xf32>
    %35 = math.exp %34 : vector<16x128xf32>
    %cst_20 = arith.constant 1.000000e+00 : f32
    %36 = vector.broadcast %cst_20 : f32 to vector<16x128xf32>
    %37 = arith.addf %36, %35 : vector<16x128xf32>
    %38 = arith.divf %36, %37 : vector<16x128xf32>
    %39 = arith.mulf %30, %12 : vector<16x128xf32>
    %40 = arith.mulf %24, %32 : vector<16x128xf32>
    %41 = arith.addf %39, %40 : vector<16x128xf32>
    %42 = math.tanh %41 : vector<16x128xf32>
    %43 = arith.mulf %38, %42 : vector<16x128xf32>
    %44 = vector.broadcast %c0_i32 : i32 to vector<16x1xi32>
    %45 = arith.cmpi sgt, %9, %44 : vector<16x1xi32>
    %46 = arith.extui %45 : vector<16x1xi1> to vector<16x1xi32>
    %47 = arith.sitofp %46 : vector<16x1xi32> to vector<16x1xf32>
    %48 = vector.broadcast %47 : vector<16x1xf32> to vector<16x128xf32>
    %49 = arith.mulf %43, %48 : vector<16x128xf32>
    %50 = arith.index_cast %c0_i32 : i32 to index
    %c0_21 = arith.constant 0 : index
    %c0_22 = arith.constant 0 : index
    %51 = vector.load %arg6[%50, %c0_21, %c0_22] : memref<8x16x128xf32, #tpu.memory_space<vmem>>, vector<1x16x128xf32>
    %52 = vector.shape_cast %51 : vector<1x16x128xf32> to vector<16x128xf32>
    %53 = vector.shape_cast %49 : vector<16x128xf32> to vector<1x16x128xf32>
    tpu.vector_store %arg6[%50, %c0_21, %c0_22], %53 {strides = array<i32>} : memref<8x16x128xf32, #tpu.memory_space<vmem>>, vector<1x16x128xf32>,
    %c1_i32 = arith.constant 1 : i32
    %54 = arith.index_cast %c1_i32 : i32 to index
    %c0_23 = arith.constant 0 : index
    %c0_24 = arith.constant 0 : index
    %55 = vector.load %arg7[%54, %c0_23, %c0_24] : memref<8x16x512xf32, #tpu.memory_space<vmem>>, vector<1x16x512xf32>
    %56 = vector.shape_cast %55 : vector<1x16x512xf32> to vector<16x512xf32>
    %57 = arith.truncf %43 : vector<16x128xf32> to vector<16x128xbf16>
    %cst_25 = arith.constant dense<0.000000e+00> : vector<16x512xf32>
    %58 = tpu.matmul %57, %10, %cst_25 {dimension_numbers = #tpu.dot_dimension_numbers<[1], [0], [0], [1], [0, 0, 1, 1], [], []>} : vector<16x128xbf16>, vector<128x512xbf16>, vector<16x512xf32> -> vector<16x512xf32>
    %59 = arith.addf %56, %58 : vector<16x512xf32>
    %60 = vector.extract_strided_slice %59 {offsets = [0, 0], sizes = [16, 128], strides = [1, 1]} : vector<16x512xf32> to vector<16x128xf32>
    %61 = arith.negf %60 : vector<16x128xf32>
    %62 = math.exp %61 : vector<16x128xf32>
    %cst_26 = arith.constant 1.000000e+00 : f32
    %63 = vector.broadcast %cst_26 : f32 to vector<16x128xf32>
    %64 = arith.addf %63, %62 : vector<16x128xf32>
    %65 = arith.divf %63, %64 : vector<16x128xf32>
    %66 = vector.extract_strided_slice %59 {offsets = [0, 128], sizes = [16, 128], strides = [1, 1]} : vector<16x512xf32> to vector<16x128xf32>
    %67 = arith.negf %66 : vector<16x128xf32>
    %68 = math.exp %67 : vector<16x128xf32>
    %cst_27 = arith.constant 1.000000e+00 : f32
    %69 = vector.broadcast %cst_27 : f32 to vector<16x128xf32>
    %70 = arith.addf %69, %68 : vector<16x128xf32>
    %71 = arith.divf %69, %70 : vector<16x128xf32>
    %72 = vector.extract_strided_slice %59 {offsets = [0, 256], sizes = [16, 128], strides = [1, 1]} : vector<16x512xf32> to vector<16x128xf32>
    %73 = math.tanh %72 : vector<16x128xf32>
    %74 = vector.extract_strided_slice %59 {offsets = [0, 384], sizes = [16, 128], strides = [1, 1]} : vector<16x512xf32> to vector<16x128xf32>
    %75 = arith.negf %74 : vector<16x128xf32>
    %76 = math.exp %75 : vector<16x128xf32>
    %cst_28 = arith.constant 1.000000e+00 : f32
    %77 = vector.broadcast %cst_28 : f32 to vector<16x128xf32>
    %78 = arith.addf %77, %76 : vector<16x128xf32>
    %79 = arith.divf %77, %78 : vector<16x128xf32>
    %80 = arith.mulf %71, %41 : vector<16x128xf32>
    %81 = arith.mulf %65, %73 : vector<16x128xf32>
    %82 = arith.addf %80, %81 : vector<16x128xf32>
    %83 = math.tanh %82 : vector<16x128xf32>
    %84 = arith.mulf %79, %83 : vector<16x128xf32>
    %85 = vector.broadcast %c1_i32 : i32 to vector<16x1xi32>
    %86 = arith.cmpi sgt, %9, %85 : vector<16x1xi32>
    %87 = arith.extui %86 : vector<16x1xi1> to vector<16x1xi32>
    %88 = arith.sitofp %87 : vector<16x1xi32> to vector<16x1xf32>
    %89 = vector.broadcast %88 : vector<16x1xf32> to vector<16x128xf32>
    %90 = arith.mulf %84, %89 : vector<16x128xf32>
    %91 = arith.index_cast %c1_i32 : i32 to index
    %c0_29 = arith.constant 0 : index
    %c0_30 = arith.constant 0 : index
    %92 = vector.load %arg6[%91, %c0_29, %c0_30] : memref<8x16x128xf32, #tpu.memory_space<vmem>>, vector<1x16x128xf32>
    %93 = vector.shape_cast %92 : vector<1x16x128xf32> to vector<16x128xf32>
    %94 = vector.shape_cast %90 : vector<16x128xf32> to vector<1x16x128xf32>
    tpu.vector_store %arg6[%91, %c0_29, %c0_30], %94 {strides = array<i32>} : memref<8x16x128xf32, #tpu.memory_space<vmem>>, vector<1x16x128xf32>,
    %c2_i32 = arith.constant 2 : i32
    %95 = arith.index_cast %c2_i32 : i32 to index
    %c0_31 = arith.constant 0 : index
    %c0_32 = arith.constant 0 : index
    %96 = vector.load %arg7[%95, %c0_31, %c0_32] : memref<8x16x512xf32, #tpu.memory_space<vmem>>, vector<1x16x512xf32>
    %97 = vector.shape_cast %96 : vector<1x16x512xf32> to vector<16x512xf32>
    %98 = arith.truncf %84 : vector<16x128xf32> to vector<16x128xbf16>
    %cst_33 = arith.constant dense<0.000000e+00> : vector<16x512xf32>
    %99 = tpu.matmul %98, %10, %cst_33 {dimension_numbers = #tpu.dot_dimension_numbers<[1], [0], [0], [1], [0, 0, 1, 1], [], []>} : vector<16x128xbf16>, vector<128x512xbf16>, vector<16x512xf32> -> vector<16x512xf32>
    %100 = arith.addf %97, %99 : vector<16x512xf32>
    %101 = vector.extract_strided_slice %100 {offsets = [0, 0], sizes = [16, 128], strides = [1, 1]} : vector<16x512xf32> to vector<16x128xf32>
    %102 = arith.negf %101 : vector<16x128xf32>
    %103 = math.exp %102 : vector<16x128xf32>
    %cst_34 = arith.constant 1.000000e+00 : f32
    %104 = vector.broadcast %cst_34 : f32 to vector<16x128xf32>
    %105 = arith.addf %104, %103 : vector<16x128xf32>
    %106 = arith.divf %104, %105 : vector<16x128xf32>
    %107 = vector.extract_strided_slice %100 {offsets = [0, 128], sizes = [16, 128], strides = [1, 1]} : vector<16x512xf32> to vector<16x128xf32>
    %108 = arith.negf %107 : vector<16x128xf32>
    %109 = math.exp %108 : vector<16x128xf32>
    %cst_35 = arith.constant 1.000000e+00 : f32
    %110 = vector.broadcast %cst_35 : f32 to vector<16x128xf32>
    %111 = arith.addf %110, %109 : vector<16x128xf32>
    %112 = arith.divf %110, %111 : vector<16x128xf32>
    %113 = vector.extract_strided_slice %100 {offsets = [0, 256], sizes = [16, 128], strides = [1, 1]} : vector<16x512xf32> to vector<16x128xf32>
    %114 = math.tanh %113 : vector<16x128xf32>
    %115 = vector.extract_strided_slice %100 {offsets = [0, 384], sizes = [16, 128], strides = [1, 1]} : vector<16x512xf32> to vector<16x128xf32>
    %116 = arith.negf %115 : vector<16x128xf32>
    %117 = math.exp %116 : vector<16x128xf32>
    %cst_36 = arith.constant 1.000000e+00 : f32
    %118 = vector.broadcast %cst_36 : f32 to vector<16x128xf32>
    %119 = arith.addf %118, %117 : vector<16x128xf32>
    %120 = arith.divf %118, %119 : vector<16x128xf32>
    %121 = arith.mulf %112, %82 : vector<16x128xf32>
    %122 = arith.mulf %106, %114 : vector<16x128xf32>
    %123 = arith.addf %121, %122 : vector<16x128xf32>
    %124 = math.tanh %123 : vector<16x128xf32>
    %125 = arith.mulf %120, %124 : vector<16x128xf32>
    %126 = vector.broadcast %c2_i32 : i32 to vector<16x1xi32>
    %127 = arith.cmpi sgt, %9, %126 : vector<16x1xi32>
    %128 = arith.extui %127 : vector<16x1xi1> to vector<16x1xi32>
    %129 = arith.sitofp %128 : vector<16x1xi32> to vector<16x1xf32>
    %130 = vector.broadcast %129 : vector<16x1xf32> to vector<16x128xf32>
    %131 = arith.mulf %125, %130 : vector<16x128xf32>
    %132 = arith.index_cast %c2_i32 : i32 to index
    %c0_37 = arith.constant 0 : index
    %c0_38 = arith.constant 0 : index
    %133 = vector.load %arg6[%132, %c0_37, %c0_38] : memref<8x16x128xf32, #tpu.memory_space<vmem>>, vector<1x16x128xf32>
    %134 = vector.shape_cast %133 : vector<1x16x128xf32> to vector<16x128xf32>
    %135 = vector.shape_cast %131 : vector<16x128xf32> to vector<1x16x128xf32>
    tpu.vector_store %arg6[%132, %c0_37, %c0_38], %135 {strides = array<i32>} : memref<8x16x128xf32, #tpu.memory_space<vmem>>, vector<1x16x128xf32>,
    %c3_i32 = arith.constant 3 : i32
    %136 = arith.index_cast %c3_i32 : i32 to index
    %c0_39 = arith.constant 0 : index
    %c0_40 = arith.constant 0 : index
    %137 = vector.load %arg7[%136, %c0_39, %c0_40] : memref<8x16x512xf32, #tpu.memory_space<vmem>>, vector<1x16x512xf32>
    %138 = vector.shape_cast %137 : vector<1x16x512xf32> to vector<16x512xf32>
    %139 = arith.truncf %125 : vector<16x128xf32> to vector<16x128xbf16>
    %cst_41 = arith.constant dense<0.000000e+00> : vector<16x512xf32>
    %140 = tpu.matmul %139, %10, %cst_41 {dimension_numbers = #tpu.dot_dimension_numbers<[1], [0], [0], [1], [0, 0, 1, 1], [], []>} : vector<16x128xbf16>, vector<128x512xbf16>, vector<16x512xf32> -> vector<16x512xf32>
    %141 = arith.addf %138, %140 : vector<16x512xf32>
    %142 = vector.extract_strided_slice %141 {offsets = [0, 0], sizes = [16, 128], strides = [1, 1]} : vector<16x512xf32> to vector<16x128xf32>
    %143 = arith.negf %142 : vector<16x128xf32>
    %144 = math.exp %143 : vector<16x128xf32>
    %cst_42 = arith.constant 1.000000e+00 : f32
    %145 = vector.broadcast %cst_42 : f32 to vector<16x128xf32>
    %146 = arith.addf %145, %144 : vector<16x128xf32>
    %147 = arith.divf %145, %146 : vector<16x128xf32>
    %148 = vector.extract_strided_slice %141 {offsets = [0, 128], sizes = [16, 128], strides = [1, 1]} : vector<16x512xf32> to vector<16x128xf32>
    %149 = arith.negf %148 : vector<16x128xf32>
    %150 = math.exp %149 : vector<16x128xf32>
    %cst_43 = arith.constant 1.000000e+00 : f32
    %151 = vector.broadcast %cst_43 : f32 to vector<16x128xf32>
    %152 = arith.addf %151, %150 : vector<16x128xf32>
    %153 = arith.divf %151, %152 : vector<16x128xf32>
    %154 = vector.extract_strided_slice %141 {offsets = [0, 256], sizes = [16, 128], strides = [1, 1]} : vector<16x512xf32> to vector<16x128xf32>
    %155 = math.tanh %154 : vector<16x128xf32>
    %156 = vector.extract_strided_slice %141 {offsets = [0, 384], sizes = [16, 128], strides = [1, 1]} : vector<16x512xf32> to vector<16x128xf32>
    %157 = arith.negf %156 : vector<16x128xf32>
    %158 = math.exp %157 : vector<16x128xf32>
    %cst_44 = arith.constant 1.000000e+00 : f32
    %159 = vector.broadcast %cst_44 : f32 to vector<16x128xf32>
    %160 = arith.addf %159, %158 : vector<16x128xf32>
    %161 = arith.divf %159, %160 : vector<16x128xf32>
    %162 = arith.mulf %153, %123 : vector<16x128xf32>
    %163 = arith.mulf %147, %155 : vector<16x128xf32>
    %164 = arith.addf %162, %163 : vector<16x128xf32>
    %165 = math.tanh %164 : vector<16x128xf32>
    %166 = arith.mulf %161, %165 : vector<16x128xf32>
    %167 = vector.broadcast %c3_i32 : i32 to vector<16x1xi32>
    %168 = arith.cmpi sgt, %9, %167 : vector<16x1xi32>
    %169 = arith.extui %168 : vector<16x1xi1> to vector<16x1xi32>
    %170 = arith.sitofp %169 : vector<16x1xi32> to vector<16x1xf32>
    %171 = vector.broadcast %170 : vector<16x1xf32> to vector<16x128xf32>
    %172 = arith.mulf %166, %171 : vector<16x128xf32>
    %173 = arith.index_cast %c3_i32 : i32 to index
    %c0_45 = arith.constant 0 : index
    %c0_46 = arith.constant 0 : index
    %174 = vector.load %arg6[%173, %c0_45, %c0_46] : memref<8x16x128xf32, #tpu.memory_space<vmem>>, vector<1x16x128xf32>
    %175 = vector.shape_cast %174 : vector<1x16x128xf32> to vector<16x128xf32>
    %176 = vector.shape_cast %172 : vector<16x128xf32> to vector<1x16x128xf32>
    tpu.vector_store %arg6[%173, %c0_45, %c0_46], %176 {strides = array<i32>} : memref<8x16x128xf32, #tpu.memory_space<vmem>>, vector<1x16x128xf32>,
    %c4_i32 = arith.constant 4 : i32
    %177 = arith.index_cast %c4_i32 : i32 to index
    %c0_47 = arith.constant 0 : index
    %c0_48 = arith.constant 0 : index
    %178 = vector.load %arg7[%177, %c0_47, %c0_48] : memref<8x16x512xf32, #tpu.memory_space<vmem>>, vector<1x16x512xf32>
    %179 = vector.shape_cast %178 : vector<1x16x512xf32> to vector<16x512xf32>
    %180 = arith.truncf %166 : vector<16x128xf32> to vector<16x128xbf16>
    %cst_49 = arith.constant dense<0.000000e+00> : vector<16x512xf32>
    %181 = tpu.matmul %180, %10, %cst_49 {dimension_numbers = #tpu.dot_dimension_numbers<[1], [0], [0], [1], [0, 0, 1, 1], [], []>} : vector<16x128xbf16>, vector<128x512xbf16>, vector<16x512xf32> -> vector<16x512xf32>
    %182 = arith.addf %179, %181 : vector<16x512xf32>
    %183 = vector.extract_strided_slice %182 {offsets = [0, 0], sizes = [16, 128], strides = [1, 1]} : vector<16x512xf32> to vector<16x128xf32>
    %184 = arith.negf %183 : vector<16x128xf32>
    %185 = math.exp %184 : vector<16x128xf32>
    %cst_50 = arith.constant 1.000000e+00 : f32
    %186 = vector.broadcast %cst_50 : f32 to vector<16x128xf32>
    %187 = arith.addf %186, %185 : vector<16x128xf32>
    %188 = arith.divf %186, %187 : vector<16x128xf32>
    %189 = vector.extract_strided_slice %182 {offsets = [0, 128], sizes = [16, 128], strides = [1, 1]} : vector<16x512xf32> to vector<16x128xf32>
    %190 = arith.negf %189 : vector<16x128xf32>
    %191 = math.exp %190 : vector<16x128xf32>
    %cst_51 = arith.constant 1.000000e+00 : f32
    %192 = vector.broadcast %cst_51 : f32 to vector<16x128xf32>
    %193 = arith.addf %192, %191 : vector<16x128xf32>
    %194 = arith.divf %192, %193 : vector<16x128xf32>
    %195 = vector.extract_strided_slice %182 {offsets = [0, 256], sizes = [16, 128], strides = [1, 1]} : vector<16x512xf32> to vector<16x128xf32>
    %196 = math.tanh %195 : vector<16x128xf32>
    %197 = vector.extract_strided_slice %182 {offsets = [0, 384], sizes = [16, 128], strides = [1, 1]} : vector<16x512xf32> to vector<16x128xf32>
    %198 = arith.negf %197 : vector<16x128xf32>
    %199 = math.exp %198 : vector<16x128xf32>
    %cst_52 = arith.constant 1.000000e+00 : f32
    %200 = vector.broadcast %cst_52 : f32 to vector<16x128xf32>
    %201 = arith.addf %200, %199 : vector<16x128xf32>
    %202 = arith.divf %200, %201 : vector<16x128xf32>
    %203 = arith.mulf %194, %164 : vector<16x128xf32>
    %204 = arith.mulf %188, %196 : vector<16x128xf32>
    %205 = arith.addf %203, %204 : vector<16x128xf32>
    %206 = math.tanh %205 : vector<16x128xf32>
    %207 = arith.mulf %202, %206 : vector<16x128xf32>
    %208 = vector.broadcast %c4_i32 : i32 to vector<16x1xi32>
    %209 = arith.cmpi sgt, %9, %208 : vector<16x1xi32>
    %210 = arith.extui %209 : vector<16x1xi1> to vector<16x1xi32>
    %211 = arith.sitofp %210 : vector<16x1xi32> to vector<16x1xf32>
    %212 = vector.broadcast %211 : vector<16x1xf32> to vector<16x128xf32>
    %213 = arith.mulf %207, %212 : vector<16x128xf32>
    %214 = arith.index_cast %c4_i32 : i32 to index
    %c0_53 = arith.constant 0 : index
    %c0_54 = arith.constant 0 : index
    %215 = vector.load %arg6[%214, %c0_53, %c0_54] : memref<8x16x128xf32, #tpu.memory_space<vmem>>, vector<1x16x128xf32>
    %216 = vector.shape_cast %215 : vector<1x16x128xf32> to vector<16x128xf32>
    %217 = vector.shape_cast %213 : vector<16x128xf32> to vector<1x16x128xf32>
    tpu.vector_store %arg6[%214, %c0_53, %c0_54], %217 {strides = array<i32>} : memref<8x16x128xf32, #tpu.memory_space<vmem>>, vector<1x16x128xf32>,
    %c5_i32 = arith.constant 5 : i32
    %218 = arith.index_cast %c5_i32 : i32 to index
    %c0_55 = arith.constant 0 : index
    %c0_56 = arith.constant 0 : index
    %219 = vector.load %arg7[%218, %c0_55, %c0_56] : memref<8x16x512xf32, #tpu.memory_space<vmem>>, vector<1x16x512xf32>
    %220 = vector.shape_cast %219 : vector<1x16x512xf32> to vector<16x512xf32>
    %221 = arith.truncf %207 : vector<16x128xf32> to vector<16x128xbf16>
    %cst_57 = arith.constant dense<0.000000e+00> : vector<16x512xf32>
    %222 = tpu.matmul %221, %10, %cst_57 {dimension_numbers = #tpu.dot_dimension_numbers<[1], [0], [0], [1], [0, 0, 1, 1], [], []>} : vector<16x128xbf16>, vector<128x512xbf16>, vector<16x512xf32> -> vector<16x512xf32>
    %223 = arith.addf %220, %222 : vector<16x512xf32>
    %224 = vector.extract_strided_slice %223 {offsets = [0, 0], sizes = [16, 128], strides = [1, 1]} : vector<16x512xf32> to vector<16x128xf32>
    %225 = arith.negf %224 : vector<16x128xf32>
    %226 = math.exp %225 : vector<16x128xf32>
    %cst_58 = arith.constant 1.000000e+00 : f32
    %227 = vector.broadcast %cst_58 : f32 to vector<16x128xf32>
    %228 = arith.addf %227, %226 : vector<16x128xf32>
    %229 = arith.divf %227, %228 : vector<16x128xf32>
    %230 = vector.extract_strided_slice %223 {offsets = [0, 128], sizes = [16, 128], strides = [1, 1]} : vector<16x512xf32> to vector<16x128xf32>
    %231 = arith.negf %230 : vector<16x128xf32>
    %232 = math.exp %231 : vector<16x128xf32>
    %cst_59 = arith.constant 1.000000e+00 : f32
    %233 = vector.broadcast %cst_59 : f32 to vector<16x128xf32>
    %234 = arith.addf %233, %232 : vector<16x128xf32>
    %235 = arith.divf %233, %234 : vector<16x128xf32>
    %236 = vector.extract_strided_slice %223 {offsets = [0, 256], sizes = [16, 128], strides = [1, 1]} : vector<16x512xf32> to vector<16x128xf32>
    %237 = math.tanh %236 : vector<16x128xf32>
    %238 = vector.extract_strided_slice %223 {offsets = [0, 384], sizes = [16, 128], strides = [1, 1]} : vector<16x512xf32> to vector<16x128xf32>
    %239 = arith.negf %238 : vector<16x128xf32>
    %240 = math.exp %239 : vector<16x128xf32>
    %cst_60 = arith.constant 1.000000e+00 : f32
    %241 = vector.broadcast %cst_60 : f32 to vector<16x128xf32>
    %242 = arith.addf %241, %240 : vector<16x128xf32>
    %243 = arith.divf %241, %242 : vector<16x128xf32>
    %244 = arith.mulf %235, %205 : vector<16x128xf32>
    %245 = arith.mulf %229, %237 : vector<16x128xf32>
    %246 = arith.addf %244, %245 : vector<16x128xf32>
    %247 = math.tanh %246 : vector<16x128xf32>
    %248 = arith.mulf %243, %247 : vector<16x128xf32>
    %249 = vector.broadcast %c5_i32 : i32 to vector<16x1xi32>
    %250 = arith.cmpi sgt, %9, %249 : vector<16x1xi32>
    %251 = arith.extui %250 : vector<16x1xi1> to vector<16x1xi32>
    %252 = arith.sitofp %251 : vector<16x1xi32> to vector<16x1xf32>
    %253 = vector.broadcast %252 : vector<16x1xf32> to vector<16x128xf32>
    %254 = arith.mulf %248, %253 : vector<16x128xf32>
    %255 = arith.index_cast %c5_i32 : i32 to index
    %c0_61 = arith.constant 0 : index
    %c0_62 = arith.constant 0 : index
    %256 = vector.load %arg6[%255, %c0_61, %c0_62] : memref<8x16x128xf32, #tpu.memory_space<vmem>>, vector<1x16x128xf32>
    %257 = vector.shape_cast %256 : vector<1x16x128xf32> to vector<16x128xf32>
    %258 = vector.shape_cast %254 : vector<16x128xf32> to vector<1x16x128xf32>
    tpu.vector_store %arg6[%255, %c0_61, %c0_62], %258 {strides = array<i32>} : memref<8x16x128xf32, #tpu.memory_space<vmem>>, vector<1x16x128xf32>,
    %c6_i32 = arith.constant 6 : i32
    %259 = arith.index_cast %c6_i32 : i32 to index
    %c0_63 = arith.constant 0 : index
    %c0_64 = arith.constant 0 : index
    %260 = vector.load %arg7[%259, %c0_63, %c0_64] : memref<8x16x512xf32, #tpu.memory_space<vmem>>, vector<1x16x512xf32>
    %261 = vector.shape_cast %260 : vector<1x16x512xf32> to vector<16x512xf32>
    %262 = arith.truncf %248 : vector<16x128xf32> to vector<16x128xbf16>
    %cst_65 = arith.constant dense<0.000000e+00> : vector<16x512xf32>
    %263 = tpu.matmul %262, %10, %cst_65 {dimension_numbers = #tpu.dot_dimension_numbers<[1], [0], [0], [1], [0, 0, 1, 1], [], []>} : vector<16x128xbf16>, vector<128x512xbf16>, vector<16x512xf32> -> vector<16x512xf32>
    %264 = arith.addf %261, %263 : vector<16x512xf32>
    %265 = vector.extract_strided_slice %264 {offsets = [0, 0], sizes = [16, 128], strides = [1, 1]} : vector<16x512xf32> to vector<16x128xf32>
    %266 = arith.negf %265 : vector<16x128xf32>
    %267 = math.exp %266 : vector<16x128xf32>
    %cst_66 = arith.constant 1.000000e+00 : f32
    %268 = vector.broadcast %cst_66 : f32 to vector<16x128xf32>
    %269 = arith.addf %268, %267 : vector<16x128xf32>
    %270 = arith.divf %268, %269 : vector<16x128xf32>
    %271 = vector.extract_strided_slice %264 {offsets = [0, 128], sizes = [16, 128], strides = [1, 1]} : vector<16x512xf32> to vector<16x128xf32>
    %272 = arith.negf %271 : vector<16x128xf32>
    %273 = math.exp %272 : vector<16x128xf32>
    %cst_67 = arith.constant 1.000000e+00 : f32
    %274 = vector.broadcast %cst_67 : f32 to vector<16x128xf32>
    %275 = arith.addf %274, %273 : vector<16x128xf32>
    %276 = arith.divf %274, %275 : vector<16x128xf32>
    %277 = vector.extract_strided_slice %264 {offsets = [0, 256], sizes = [16, 128], strides = [1, 1]} : vector<16x512xf32> to vector<16x128xf32>
    %278 = math.tanh %277 : vector<16x128xf32>
    %279 = vector.extract_strided_slice %264 {offsets = [0, 384], sizes = [16, 128], strides = [1, 1]} : vector<16x512xf32> to vector<16x128xf32>
    %280 = arith.negf %279 : vector<16x128xf32>
    %281 = math.exp %280 : vector<16x128xf32>
    %cst_68 = arith.constant 1.000000e+00 : f32
    %282 = vector.broadcast %cst_68 : f32 to vector<16x128xf32>
    %283 = arith.addf %282, %281 : vector<16x128xf32>
    %284 = arith.divf %282, %283 : vector<16x128xf32>
    %285 = arith.mulf %276, %246 : vector<16x128xf32>
    %286 = arith.mulf %270, %278 : vector<16x128xf32>
    %287 = arith.addf %285, %286 : vector<16x128xf32>
    %288 = math.tanh %287 : vector<16x128xf32>
    %289 = arith.mulf %284, %288 : vector<16x128xf32>
    %290 = vector.broadcast %c6_i32 : i32 to vector<16x1xi32>
    %291 = arith.cmpi sgt, %9, %290 : vector<16x1xi32>
    %292 = arith.extui %291 : vector<16x1xi1> to vector<16x1xi32>
    %293 = arith.sitofp %292 : vector<16x1xi32> to vector<16x1xf32>
    %294 = vector.broadcast %293 : vector<16x1xf32> to vector<16x128xf32>
    %295 = arith.mulf %289, %294 : vector<16x128xf32>
    %296 = arith.index_cast %c6_i32 : i32 to index
    %c0_69 = arith.constant 0 : index
    %c0_70 = arith.constant 0 : index
    %297 = vector.load %arg6[%296, %c0_69, %c0_70] : memref<8x16x128xf32, #tpu.memory_space<vmem>>, vector<1x16x128xf32>
    %298 = vector.shape_cast %297 : vector<1x16x128xf32> to vector<16x128xf32>
    %299 = vector.shape_cast %295 : vector<16x128xf32> to vector<1x16x128xf32>
    tpu.vector_store %arg6[%296, %c0_69, %c0_70], %299 {strides = array<i32>} : memref<8x16x128xf32, #tpu.memory_space<vmem>>, vector<1x16x128xf32>,
    %c7_i32 = arith.constant 7 : i32
    %300 = arith.index_cast %c7_i32 : i32 to index
    %c0_71 = arith.constant 0 : index
    %c0_72 = arith.constant 0 : index
    %301 = vector.load %arg7[%300, %c0_71, %c0_72] : memref<8x16x512xf32, #tpu.memory_space<vmem>>, vector<1x16x512xf32>
    %302 = vector.shape_cast %301 : vector<1x16x512xf32> to vector<16x512xf32>
    %303 = arith.truncf %289 : vector<16x128xf32> to vector<16x128xbf16>
    %cst_73 = arith.constant dense<0.000000e+00> : vector<16x512xf32>
    %304 = tpu.matmul %303, %10, %cst_73 {dimension_numbers = #tpu.dot_dimension_numbers<[1], [0], [0], [1], [0, 0, 1, 1], [], []>} : vector<16x128xbf16>, vector<128x512xbf16>, vector<16x512xf32> -> vector<16x512xf32>
    %305 = arith.addf %302, %304 : vector<16x512xf32>
    %306 = vector.extract_strided_slice %305 {offsets = [0, 0], sizes = [16, 128], strides = [1, 1]} : vector<16x512xf32> to vector<16x128xf32>
    %307 = arith.negf %306 : vector<16x128xf32>
    %308 = math.exp %307 : vector<16x128xf32>
    %cst_74 = arith.constant 1.000000e+00 : f32
    %309 = vector.broadcast %cst_74 : f32 to vector<16x128xf32>
    %310 = arith.addf %309, %308 : vector<16x128xf32>
    %311 = arith.divf %309, %310 : vector<16x128xf32>
    %312 = vector.extract_strided_slice %305 {offsets = [0, 128], sizes = [16, 128], strides = [1, 1]} : vector<16x512xf32> to vector<16x128xf32>
    %313 = arith.negf %312 : vector<16x128xf32>
    %314 = math.exp %313 : vector<16x128xf32>
    %cst_75 = arith.constant 1.000000e+00 : f32
    %315 = vector.broadcast %cst_75 : f32 to vector<16x128xf32>
    %316 = arith.addf %315, %314 : vector<16x128xf32>
    %317 = arith.divf %315, %316 : vector<16x128xf32>
    %318 = vector.extract_strided_slice %305 {offsets = [0, 256], sizes = [16, 128], strides = [1, 1]} : vector<16x512xf32> to vector<16x128xf32>
    %319 = math.tanh %318 : vector<16x128xf32>
    %320 = vector.extract_strided_slice %305 {offsets = [0, 384], sizes = [16, 128], strides = [1, 1]} : vector<16x512xf32> to vector<16x128xf32>
    %321 = arith.negf %320 : vector<16x128xf32>
    %322 = math.exp %321 : vector<16x128xf32>
    %cst_76 = arith.constant 1.000000e+00 : f32
    %323 = vector.broadcast %cst_76 : f32 to vector<16x128xf32>
    %324 = arith.addf %323, %322 : vector<16x128xf32>
    %325 = arith.divf %323, %324 : vector<16x128xf32>
    %326 = arith.mulf %317, %287 : vector<16x128xf32>
    %327 = arith.mulf %311, %319 : vector<16x128xf32>
    %328 = arith.addf %326, %327 : vector<16x128xf32>
    %329 = math.tanh %328 : vector<16x128xf32>
    %330 = arith.mulf %325, %329 : vector<16x128xf32>
    %331 = vector.broadcast %c7_i32 : i32 to vector<16x1xi32>
    %332 = arith.cmpi sgt, %9, %331 : vector<16x1xi32>
    %333 = arith.extui %332 : vector<16x1xi1> to vector<16x1xi32>
    %334 = arith.sitofp %333 : vector<16x1xi32> to vector<16x1xf32>
    %335 = vector.broadcast %334 : vector<16x1xf32> to vector<16x128xf32>
    %336 = arith.mulf %330, %335 : vector<16x128xf32>
    %337 = arith.index_cast %c7_i32 : i32 to index
    %c0_77 = arith.constant 0 : index
    %c0_78 = arith.constant 0 : index
    %338 = vector.load %arg6[%337, %c0_77, %c0_78] : memref<8x16x128xf32, #tpu.memory_space<vmem>>, vector<1x16x128xf32>
    %339 = vector.shape_cast %338 : vector<1x16x128xf32> to vector<16x128xf32>
    %340 = vector.shape_cast %336 : vector<16x128xf32> to vector<1x16x128xf32>
    tpu.vector_store %arg6[%337, %c0_77, %c0_78], %340 {strides = array<i32>} : memref<8x16x128xf32, #tpu.memory_space<vmem>>, vector<1x16x128xf32>,
    %c8_i32 = arith.constant 8 : i32
    return
  }
  func.func @transform_0(%arg0: i32) -> (i32, i32, i32) {
    %c0_i32 = arith.constant 0 : i32
    %c0_i32_0 = arith.constant 0 : i32
    %c0_i32_1 = arith.constant 0 : i32
    return %c0_i32, %arg0, %c0_i32_0 : i32, i32, i32
  }
  func.func @transform_1(%arg0: i32) -> (i32, i32) {
    %c0_i32 = arith.constant 0 : i32
    %c0_i32_0 = arith.constant 0 : i32
    %c0_i32_1 = arith.constant 0 : i32
    return %c0_i32, %c0_i32_0 : i32, i32
  }
  func.func @transform_2(%arg0: i32) -> (i32, i32) {
    %c0_i32 = arith.constant 0 : i32
    %c0_i32_0 = arith.constant 0 : i32
    %c0_i32_1 = arith.constant 0 : i32
    return %c0_i32, %c0_i32_0 : i32, i32
  }
  func.func @transform_3(%arg0: i32) -> (i32, i32) {
    %c0_i32 = arith.constant 0 : i32
    %c0_i32_0 = arith.constant 0 : i32
    %c0_i32_1 = arith.constant 0 : i32
    return %c0_i32, %c0_i32_0 : i32, i32
  }
  func.func @transform_4(%arg0: i32) -> (i32, i32) {
    %c0_i32 = arith.constant 0 : i32
    %c0_i32_0 = arith.constant 0 : i32
    return %arg0, %c0_i32 : i32, i32
  }
  func.func @transform_5(%arg0: i32) -> (i32, i32, i32) {
    %c0_i32 = arith.constant 0 : i32
    %c0_i32_0 = arith.constant 0 : i32
    %c0_i32_1 = arith.constant 0 : i32
    return %c0_i32, %arg0, %c0_i32_0 : i32, i32, i32
  }
}

module attributes {stable_mosaic.version = 11 : i64} {
  func.func @_attn_kernel(%arg0: i32, %arg1: memref<8x1x2x128xf32, #tpu.memory_space<vmem>>, %arg2: memref<1x16x2xf32, #tpu.memory_space<vmem>>, %arg3: memref<1x1x2xi32, #tpu.memory_space<vmem>>, %arg4: memref<16x2x128xf32, #tpu.memory_space<vmem>>, %arg5: memref<128x128xf32, #tpu.memory_space<vmem>>, %arg6: memref<1x2xi32, #tpu.memory_space<vmem>>, %arg7: memref<2x1xf32, #tpu.memory_space<vmem>>, %arg8: memref<2x128xf32, #tpu.memory_space<vmem>>) attributes {dimension_semantics = [#tpu.dimension_semantics<parallel>], iteration_bounds = array<i64: 8>, scalar_prefetch = 0 : i64, scratch_operands = 0 : i64, tpu.core_type = #tpu.core_type<tc>, window_params = [{transform_indices = @transform_0, window_bounds = array<i64: 8, 1, 2, 128>}, {transform_indices = @transform_1, window_bounds = array<i64: 1, 16, 2>}, {transform_indices = @transform_2, window_bounds = array<i64: 1, 1, 2>}, {pipeline_mode = #tpu.pipeline_mode<synchronous>, transform_indices = @transform_3, window_bounds = array<i64: 16, 2, 128>}, {pipeline_mode = #tpu.pipeline_mode<synchronous>, transform_indices = @transform_4, window_bounds = array<i64: 128, 128>}, {pipeline_mode = #tpu.pipeline_mode<synchronous>, transform_indices = @transform_5, window_bounds = array<i64: 1, 2>}, {pipeline_mode = #tpu.pipeline_mode<synchronous>, transform_indices = @transform_6, window_bounds = array<i64: 2, 1>}, {transform_indices = @transform_7, window_bounds = array<i64: 2, 128>}]} {
    %c0 = arith.constant 0 : index
    %c0_0 = arith.constant 0 : index
    %c0_1 = arith.constant 0 : index
    %c0_2 = arith.constant 0 : index
    %0 = vector.load %arg1[%c0, %c0_0, %c0_1, %c0_2] : memref<8x1x2x128xf32, #tpu.memory_space<vmem>>, vector<8x1x2x128xf32>
    %1 = vector.shape_cast %0 : vector<8x1x2x128xf32> to vector<8x2x128xf32>
    %c0_3 = arith.constant 0 : index
    %c0_4 = arith.constant 0 : index
    %c0_5 = arith.constant 0 : index
    %2 = vector.load %arg2[%c0_3, %c0_4, %c0_5] : memref<1x16x2xf32, #tpu.memory_space<vmem>>, vector<1x16x2xf32>
    %3 = vector.shape_cast %2 : vector<1x16x2xf32> to vector<16x2xf32>
    %c0_6 = arith.constant 0 : index
    %c0_7 = arith.constant 0 : index
    %c0_8 = arith.constant 0 : index
    %4 = vector.load %arg3[%c0_6, %c0_7, %c0_8] : memref<1x1x2xi32, #tpu.memory_space<vmem>>, vector<1x1x2xi32>
    %5 = vector.shape_cast %4 : vector<1x1x2xi32> to vector<1x2xi32>
    %c0_9 = arith.constant 0 : index
    %c0_10 = arith.constant 0 : index
    %c0_11 = arith.constant 0 : index
    %6 = vector.load %arg4[%c0_9, %c0_10, %c0_11] : memref<16x2x128xf32, #tpu.memory_space<vmem>>, vector<16x2x128xf32>
    %c0_12 = arith.constant 0 : index
    %c0_13 = arith.constant 0 : index
    %7 = vector.load %arg5[%c0_12, %c0_13] : memref<128x128xf32, #tpu.memory_space<vmem>>, vector<128x128xf32>
    %cst = arith.constant dense<0.000000e+00> : vector<2x128xf32>
    %8 = vector.multi_reduction <add>, %6, %cst [0] : vector<16x2x128xf32> to vector<2x128xf32>
    %c0_14 = arith.constant 0 : index
    %c0_15 = arith.constant 0 : index
    %9 = vector.load %arg7[%c0_14, %c0_15] : memref<2x1xf32, #tpu.memory_space<vmem>>, vector<2x1xf32>
    %10 = tpu.reciprocal %9 {approx = true} : vector<2x1xf32> -> vector<2x1xf32>
    %11 = vector.broadcast %10 : vector<2x1xf32> to vector<2x128xf32>
    %12 = arith.mulf %8, %11 : vector<2x128xf32>
    %cst_16 = arith.constant dense<0.000000e+00> : vector<2x128xf32>
    %13 = tpu.matmul %12, %7, %cst_16 {dimension_numbers = #tpu.dot_dimension_numbers<[1], [1], [0], [0], [0, 0, 1, 0], [], []>} : vector<2x128xf32>, vector<128x128xf32>, vector<2x128xf32> -> vector<2x128xf32>
    %14 = vector.shape_cast %13 : vector<2x128xf32> to vector<1x2x128xf32>
    %15 = vector.broadcast %14 : vector<1x2x128xf32> to vector<8x2x128xf32>
    %16 = arith.mulf %1, %15 : vector<8x2x128xf32>
    %cst_17 = arith.constant dense<0.000000e+00> : vector<8x2xf32>
    %17 = vector.multi_reduction <add>, %16, %cst_17 [2] : vector<8x2x128xf32> to vector<8x2xf32>
    %18 = tpu.iota {dimensions = array<i32: 0>} : vector<8x2xi32>
    %19 = vector.broadcast %5 : vector<1x2xi32> to vector<8x2xi32>
    %20 = arith.cmpi slt, %18, %19 : vector<8x2xi32>
    %cst_18 = arith.constant -1.000000e+30 : f32
    %21 = vector.broadcast %cst_18 : f32 to vector<8x2xf32>
    %22 = arith.select %20, %17, %21 : vector<8x2xi1>, vector<8x2xf32>
    %cst_19 = arith.constant dense<0xFF800000> : vector<2xf32>
    %23 = vector.multi_reduction <maximumf>, %22, %cst_19 [0] : vector<8x2xf32> to vector<2xf32>
    %cst_20 = arith.constant 0xFF800000 : f32
    %24 = vector.broadcast %cst_20 : f32 to vector<2xf32>
    %25 = arith.maximumf %24, %23 : vector<2xf32>
    %26 = vector.shape_cast %25 : vector<2xf32> to vector<1x2xf32>
    %27 = vector.broadcast %26 : vector<1x2xf32> to vector<8x2xf32>
    %28 = arith.subf %22, %27 : vector<8x2xf32>
    %29 = math.exp %28 : vector<8x2xf32>
    %cst_21 = arith.constant dense<0.000000e+00> : vector<2xf32>
    %30 = vector.multi_reduction <add>, %29, %cst_21 [0] : vector<8x2xf32> to vector<2xf32>
    %31 = vector.shape_cast %30 : vector<2xf32> to vector<1x2xf32>
    %32 = vector.broadcast %31 : vector<1x2xf32> to vector<8x2xf32>
    %33 = arith.divf %29, %32 : vector<8x2xf32>
    %34 = vector.shape_cast %33 : vector<8x2xf32> to vector<8x2x1xf32>
    %35 = vector.broadcast %34 : vector<8x2x1xf32> to vector<8x2x128xf32>
    %36 = arith.mulf %35, %1 : vector<8x2x128xf32>
    %cst_22 = arith.constant dense<0.000000e+00> : vector<2x128xf32>
    %37 = vector.multi_reduction <add>, %36, %cst_22 [0] : vector<8x2x128xf32> to vector<2x128xf32>
    %cst_23 = arith.constant dense<0.000000e+00> : vector<2x128xf32>
    %38 = tpu.matmul %37, %7, %cst_23 {dimension_numbers = #tpu.dot_dimension_numbers<[1], [1], [0], [0], [0, 0, 1, 0], [], []>} : vector<2x128xf32>, vector<128x128xf32>, vector<2x128xf32> -> vector<2x128xf32>
    %39 = vector.shape_cast %38 : vector<2x128xf32> to vector<1x2x128xf32>
    %40 = vector.broadcast %39 : vector<1x2x128xf32> to vector<16x2x128xf32>
    %41 = arith.mulf %6, %40 : vector<16x2x128xf32>
    %cst_24 = arith.constant dense<0.000000e+00> : vector<16x2xf32>
    %42 = vector.multi_reduction <add>, %41, %cst_24 [2] : vector<16x2x128xf32> to vector<16x2xf32>
    %43 = tpu.iota {dimensions = array<i32: 0>} : vector<16x2xi32>
    %c0_25 = arith.constant 0 : index
    %c0_26 = arith.constant 0 : index
    %44 = vector.load %arg6[%c0_25, %c0_26] : memref<1x2xi32, #tpu.memory_space<vmem>>, vector<1x2xi32>
    %45 = vector.broadcast %44 : vector<1x2xi32> to vector<16x2xi32>
    %46 = arith.cmpi slt, %43, %45 : vector<16x2xi32>
    %47 = arith.mulf %3, %42 : vector<16x2xf32>
    %cst_27 = arith.constant -1.000000e+30 : f32
    %48 = vector.broadcast %cst_27 : f32 to vector<16x2xf32>
    %49 = arith.select %46, %47, %48 : vector<16x2xi1>, vector<16x2xf32>
    %cst_28 = arith.constant dense<0xFF800000> : vector<2xf32>
    %50 = vector.multi_reduction <maximumf>, %49, %cst_28 [0] : vector<16x2xf32> to vector<2xf32>
    %cst_29 = arith.constant 0xFF800000 : f32
    %51 = vector.broadcast %cst_29 : f32 to vector<2xf32>
    %52 = arith.maximumf %51, %50 : vector<2xf32>
    %53 = vector.shape_cast %52 : vector<2xf32> to vector<1x2xf32>
    %54 = vector.broadcast %53 : vector<1x2xf32> to vector<16x2xf32>
    %55 = arith.subf %49, %54 : vector<16x2xf32>
    %56 = math.exp %55 : vector<16x2xf32>
    %cst_30 = arith.constant dense<0.000000e+00> : vector<2xf32>
    %57 = vector.multi_reduction <add>, %56, %cst_30 [0] : vector<16x2xf32> to vector<2xf32>
    %58 = vector.shape_cast %57 : vector<2xf32> to vector<1x2xf32>
    %59 = vector.broadcast %58 : vector<1x2xf32> to vector<16x2xf32>
    %60 = arith.divf %56, %59 : vector<16x2xf32>
    %61 = arith.mulf %60, %3 : vector<16x2xf32>
    %62 = vector.shape_cast %61 : vector<16x2xf32> to vector<16x2x1xf32>
    %63 = vector.broadcast %62 : vector<16x2x1xf32> to vector<16x2x128xf32>
    %64 = arith.mulf %63, %6 : vector<16x2x128xf32>
    %cst_31 = arith.constant dense<0.000000e+00> : vector<2x128xf32>
    %65 = vector.multi_reduction <add>, %64, %cst_31 [0] : vector<16x2x128xf32> to vector<2x128xf32>
    %c0_32 = arith.constant 0 : index
    %c0_33 = arith.constant 0 : index
    %66 = vector.load %arg8[%c0_32, %c0_33] : memref<2x128xf32, #tpu.memory_space<vmem>>, vector<2x128xf32>
    tpu.vector_store %arg8[%c0_32, %c0_33], %65 {strides = array<i32>} : memref<2x128xf32, #tpu.memory_space<vmem>>, vector<2x128xf32>,
    return
  }
  func.func @transform_0(%arg0: i32) -> (i32, i32, i32, i32) {
    %c0_i32 = arith.constant 0 : i32
    %c0_i32_0 = arith.constant 0 : i32
    %c0_i32_1 = arith.constant 0 : i32
    %c0_i32_2 = arith.constant 0 : i32
    return %c0_i32, %arg0, %c0_i32_0, %c0_i32_1 : i32, i32, i32, i32
  }
  func.func @transform_1(%arg0: i32) -> (i32, i32, i32) {
    %c0_i32 = arith.constant 0 : i32
    %c0_i32_0 = arith.constant 0 : i32
    %c0_i32_1 = arith.constant 0 : i32
    return %arg0, %c0_i32, %c0_i32_0 : i32, i32, i32
  }
  func.func @transform_2(%arg0: i32) -> (i32, i32, i32) {
    %c0_i32 = arith.constant 0 : i32
    %c0_i32_0 = arith.constant 0 : i32
    %c0_i32_1 = arith.constant 0 : i32
    return %arg0, %c0_i32, %c0_i32_0 : i32, i32, i32
  }
  func.func @transform_3(%arg0: i32) -> (i32, i32, i32) {
    %c0_i32 = arith.constant 0 : i32
    %c0_i32_0 = arith.constant 0 : i32
    %c0_i32_1 = arith.constant 0 : i32
    %c0_i32_2 = arith.constant 0 : i32
    return %c0_i32, %c0_i32_0, %c0_i32_1 : i32, i32, i32
  }
  func.func @transform_4(%arg0: i32) -> (i32, i32) {
    %c0_i32 = arith.constant 0 : i32
    %c0_i32_0 = arith.constant 0 : i32
    %c0_i32_1 = arith.constant 0 : i32
    return %c0_i32, %c0_i32_0 : i32, i32
  }
  func.func @transform_5(%arg0: i32) -> (i32, i32) {
    %c0_i32 = arith.constant 0 : i32
    %c0_i32_0 = arith.constant 0 : i32
    %c0_i32_1 = arith.constant 0 : i32
    return %c0_i32, %c0_i32_0 : i32, i32
  }
  func.func @transform_6(%arg0: i32) -> (i32, i32) {
    %c0_i32 = arith.constant 0 : i32
    %c0_i32_0 = arith.constant 0 : i32
    %c0_i32_1 = arith.constant 0 : i32
    return %c0_i32, %c0_i32_0 : i32, i32
  }
  func.func @transform_7(%arg0: i32) -> (i32, i32) {
    %c0_i32 = arith.constant 0 : i32
    %c0_i32_0 = arith.constant 0 : i32
    return %c0_i32, %arg0 : i32, i32
  }
}

module attributes {stable_mosaic.version = 11 : i64} {
  func.func @_lstm_kernel(%arg0: i32, %arg1: memref<16x2x128xbf16, #tpu.memory_space<vmem>>, %arg2: memref<128x512xbf16, #tpu.memory_space<vmem>>, %arg3: memref<128x512xbf16, #tpu.memory_space<vmem>>, %arg4: memref<1x512xf32, #tpu.memory_space<vmem>>, %arg5: memref<2x1xi32, #tpu.memory_space<vmem>>, %arg6: memref<16x2x128xf32, #tpu.memory_space<vmem>>, %arg7: memref<16x2x512xf32, #tpu.memory_space<vmem>>) attributes {dimension_semantics = [#tpu.dimension_semantics<parallel>], iteration_bounds = array<i64: 1>, scalar_prefetch = 0 : i64, scratch_operands = 1 : i64, tpu.core_type = #tpu.core_type<tc>, window_params = [{transform_indices = @transform_0, window_bounds = array<i64: 16, 2, 128>}, {pipeline_mode = #tpu.pipeline_mode<synchronous>, transform_indices = @transform_1, window_bounds = array<i64: 128, 512>}, {pipeline_mode = #tpu.pipeline_mode<synchronous>, transform_indices = @transform_2, window_bounds = array<i64: 128, 512>}, {pipeline_mode = #tpu.pipeline_mode<synchronous>, transform_indices = @transform_3, window_bounds = array<i64: 1, 512>}, {transform_indices = @transform_4, window_bounds = array<i64: 2, 1>}, {transform_indices = @transform_5, window_bounds = array<i64: 16, 2, 128>}]} {
    %c0 = arith.constant 0 : index
    %c0_0 = arith.constant 0 : index
    %c0_1 = arith.constant 0 : index
    %0 = vector.load %arg1[%c0, %c0_0, %c0_1] : memref<16x2x128xbf16, #tpu.memory_space<vmem>>, vector<16x2x128xbf16>
    %1 = vector.shape_cast %0 : vector<16x2x128xbf16> to vector<32x128xbf16>
    %c0_2 = arith.constant 0 : index
    %c0_3 = arith.constant 0 : index
    %2 = vector.load %arg2[%c0_2, %c0_3] : memref<128x512xbf16, #tpu.memory_space<vmem>>, vector<128x512xbf16>
    %cst = arith.constant dense<0.000000e+00> : vector<32x512xf32>
    %3 = tpu.matmul %1, %2, %cst {dimension_numbers = #tpu.dot_dimension_numbers<[1], [0], [0], [1], [0, 0, 1, 1], [], []>} : vector<32x128xbf16>, vector<128x512xbf16>, vector<32x512xf32> -> vector<32x512xf32>
    %c0_4 = arith.constant 0 : index
    %c0_5 = arith.constant 0 : index
    %4 = vector.load %arg4[%c0_4, %c0_5] : memref<1x512xf32, #tpu.memory_space<vmem>>, vector<1x512xf32>
    %5 = vector.broadcast %4 : vector<1x512xf32> to vector<32x512xf32>
    %6 = arith.addf %3, %5 : vector<32x512xf32>
    %7 = vector.shape_cast %6 : vector<32x512xf32> to vector<16x2x512xf32>
    %c0_6 = arith.constant 0 : index
    %c0_7 = arith.constant 0 : index
    %c0_8 = arith.constant 0 : index
    %8 = vector.load %arg7[%c0_6, %c0_7, %c0_8] : memref<16x2x512xf32, #tpu.memory_space<vmem>>, vector<16x2x512xf32>
    tpu.vector_store %arg7[%c0_6, %c0_7, %c0_8], %7 {strides = array<i32>} : memref<16x2x512xf32, #tpu.memory_space<vmem>>, vector<16x2x512xf32>,
    %c0_9 = arith.constant 0 : index
    %c0_10 = arith.constant 0 : index
    %9 = vector.load %arg5[%c0_9, %c0_10] : memref<2x1xi32, #tpu.memory_space<vmem>>, vector<2x1xi32>
    %c0_11 = arith.constant 0 : index
    %c0_12 = arith.constant 0 : index
    %10 = vector.load %arg3[%c0_11, %c0_12] : memref<128x512xbf16, #tpu.memory_space<vmem>>, vector<128x512xbf16>
    %cst_13 = arith.constant 0.000000e+00 : f32
    %11 = vector.broadcast %cst_13 : f32 to vector<2x128xf32>
    %cst_14 = arith.constant 0.000000e+00 : f32
    %12 = vector.broadcast %cst_14 : f32 to vector<2x128xf32>
    %c0_i32 = arith.constant 0 : i32
    %13 = arith.index_cast %c0_i32 : i32 to index
    %c0_15 = arith.constant 0 : index
    %c0_16 = arith.constant 0 : index
    %14 = vector.load %arg7[%13, %c0_15, %c0_16] : memref<16x2x512xf32, #tpu.memory_space<vmem>>, vector<1x2x512xf32>
    %15 = vector.shape_cast %14 : vector<1x2x512xf32> to vector<2x512xf32>
    %16 = arith.truncf %11 : vector<2x128xf32> to vector<2x128xbf16>
    %cst_17 = arith.constant dense<0.000000e+00> : vector<2x512xf32>
    %17 = tpu.matmul %16, %10, %cst_17 {dimension_numbers = #tpu.dot_dimension_numbers<[1], [0], [0], [1], [0, 0, 1, 1], [], []>} : vector<2x128xbf16>, vector<128x512xbf16>, vector<2x512xf32> -> vector<2x512xf32>
    %18 = arith.addf %15, %17 : vector<2x512xf32>
    %19 = vector.extract_strided_slice %18 {offsets = [0, 0], sizes = [2, 128], strides = [1, 1]} : vector<2x512xf32> to vector<2x128xf32>
    %20 = arith.negf %19 : vector<2x128xf32>
    %21 = math.exp %20 : vector<2x128xf32>
    %cst_18 = arith.constant 1.000000e+00 : f32
    %22 = vector.broadcast %cst_18 : f32 to vector<2x128xf32>
    %23 = arith.addf %22, %21 : vector<2x128xf32>
    %24 = arith.divf %22, %23 : vector<2x128xf32>
    %25 = vector.extract_strided_slice %18 {offsets = [0, 128], sizes = [2, 128], strides = [1, 1]} : vector<2x512xf32> to vector<2x128xf32>
    %26 = arith.negf %25 : vector<2x128xf32>
    %27 = math.exp %26 : vector<2x128xf32>
    %cst_19 = arith.constant 1.000000e+00 : f32
    %28 = vector.broadcast %cst_19 : f32 to vector<2x128xf32>
    %29 = arith.addf %28, %27 : vector<2x128xf32>
    %30 = arith.divf %28, %29 : vector<2x128xf32>
    %31 = vector.extract_strided_slice %18 {offsets = [0, 256], sizes = [2, 128], strides = [1, 1]} : vector<2x512xf32> to vector<2x128xf32>
    %32 = math.tanh %31 : vector<2x128xf32>
    %33 = vector.extract_strided_slice %18 {offsets = [0, 384], sizes = [2, 128], strides = [1, 1]} : vector<2x512xf32> to vector<2x128xf32>
    %34 = arith.negf %33 : vector<2x128xf32>
    %35 = math.exp %34 : vector<2x128xf32>
    %cst_20 = arith.constant 1.000000e+00 : f32
    %36 = vector.broadcast %cst_20 : f32 to vector<2x128xf32>
    %37 = arith.addf %36, %35 : vector<2x128xf32>
    %38 = arith.divf %36, %37 : vector<2x128xf32>
    %39 = arith.mulf %30, %12 : vector<2x128xf32>
    %40 = arith.mulf %24, %32 : vector<2x128xf32>
    %41 = arith.addf %39, %40 : vector<2x128xf32>
    %42 = math.tanh %41 : vector<2x128xf32>
    %43 = arith.mulf %38, %42 : vector<2x128xf32>
    %44 = vector.broadcast %c0_i32 : i32 to vector<2x1xi32>
    %45 = arith.cmpi sgt, %9, %44 : vector<2x1xi32>
    %46 = arith.extui %45 : vector<2x1xi1> to vector<2x1xi32>
    %47 = arith.sitofp %46 : vector<2x1xi32> to vector<2x1xf32>
    %48 = vector.broadcast %47 : vector<2x1xf32> to vector<2x128xf32>
    %49 = arith.mulf %43, %48 : vector<2x128xf32>
    %50 = arith.index_cast %c0_i32 : i32 to index
    %c0_21 = arith.constant 0 : index
    %c0_22 = arith.constant 0 : index
    %51 = vector.load %arg6[%50, %c0_21, %c0_22] : memref<16x2x128xf32, #tpu.memory_space<vmem>>, vector<1x2x128xf32>
    %52 = vector.shape_cast %51 : vector<1x2x128xf32> to vector<2x128xf32>
    %53 = vector.shape_cast %49 : vector<2x128xf32> to vector<1x2x128xf32>
    tpu.vector_store %arg6[%50, %c0_21, %c0_22], %53 {strides = array<i32>} : memref<16x2x128xf32, #tpu.memory_space<vmem>>, vector<1x2x128xf32>,
    %c1_i32 = arith.constant 1 : i32
    %54 = arith.index_cast %c1_i32 : i32 to index
    %c0_23 = arith.constant 0 : index
    %c0_24 = arith.constant 0 : index
    %55 = vector.load %arg7[%54, %c0_23, %c0_24] : memref<16x2x512xf32, #tpu.memory_space<vmem>>, vector<1x2x512xf32>
    %56 = vector.shape_cast %55 : vector<1x2x512xf32> to vector<2x512xf32>
    %57 = arith.truncf %43 : vector<2x128xf32> to vector<2x128xbf16>
    %cst_25 = arith.constant dense<0.000000e+00> : vector<2x512xf32>
    %58 = tpu.matmul %57, %10, %cst_25 {dimension_numbers = #tpu.dot_dimension_numbers<[1], [0], [0], [1], [0, 0, 1, 1], [], []>} : vector<2x128xbf16>, vector<128x512xbf16>, vector<2x512xf32> -> vector<2x512xf32>
    %59 = arith.addf %56, %58 : vector<2x512xf32>
    %60 = vector.extract_strided_slice %59 {offsets = [0, 0], sizes = [2, 128], strides = [1, 1]} : vector<2x512xf32> to vector<2x128xf32>
    %61 = arith.negf %60 : vector<2x128xf32>
    %62 = math.exp %61 : vector<2x128xf32>
    %cst_26 = arith.constant 1.000000e+00 : f32
    %63 = vector.broadcast %cst_26 : f32 to vector<2x128xf32>
    %64 = arith.addf %63, %62 : vector<2x128xf32>
    %65 = arith.divf %63, %64 : vector<2x128xf32>
    %66 = vector.extract_strided_slice %59 {offsets = [0, 128], sizes = [2, 128], strides = [1, 1]} : vector<2x512xf32> to vector<2x128xf32>
    %67 = arith.negf %66 : vector<2x128xf32>
    %68 = math.exp %67 : vector<2x128xf32>
    %cst_27 = arith.constant 1.000000e+00 : f32
    %69 = vector.broadcast %cst_27 : f32 to vector<2x128xf32>
    %70 = arith.addf %69, %68 : vector<2x128xf32>
    %71 = arith.divf %69, %70 : vector<2x128xf32>
    %72 = vector.extract_strided_slice %59 {offsets = [0, 256], sizes = [2, 128], strides = [1, 1]} : vector<2x512xf32> to vector<2x128xf32>
    %73 = math.tanh %72 : vector<2x128xf32>
    %74 = vector.extract_strided_slice %59 {offsets = [0, 384], sizes = [2, 128], strides = [1, 1]} : vector<2x512xf32> to vector<2x128xf32>
    %75 = arith.negf %74 : vector<2x128xf32>
    %76 = math.exp %75 : vector<2x128xf32>
    %cst_28 = arith.constant 1.000000e+00 : f32
    %77 = vector.broadcast %cst_28 : f32 to vector<2x128xf32>
    %78 = arith.addf %77, %76 : vector<2x128xf32>
    %79 = arith.divf %77, %78 : vector<2x128xf32>
    %80 = arith.mulf %71, %41 : vector<2x128xf32>
    %81 = arith.mulf %65, %73 : vector<2x128xf32>
    %82 = arith.addf %80, %81 : vector<2x128xf32>
    %83 = math.tanh %82 : vector<2x128xf32>
    %84 = arith.mulf %79, %83 : vector<2x128xf32>
    %85 = vector.broadcast %c1_i32 : i32 to vector<2x1xi32>
    %86 = arith.cmpi sgt, %9, %85 : vector<2x1xi32>
    %87 = arith.extui %86 : vector<2x1xi1> to vector<2x1xi32>
    %88 = arith.sitofp %87 : vector<2x1xi32> to vector<2x1xf32>
    %89 = vector.broadcast %88 : vector<2x1xf32> to vector<2x128xf32>
    %90 = arith.mulf %84, %89 : vector<2x128xf32>
    %91 = arith.index_cast %c1_i32 : i32 to index
    %c0_29 = arith.constant 0 : index
    %c0_30 = arith.constant 0 : index
    %92 = vector.load %arg6[%91, %c0_29, %c0_30] : memref<16x2x128xf32, #tpu.memory_space<vmem>>, vector<1x2x128xf32>
    %93 = vector.shape_cast %92 : vector<1x2x128xf32> to vector<2x128xf32>
    %94 = vector.shape_cast %90 : vector<2x128xf32> to vector<1x2x128xf32>
    tpu.vector_store %arg6[%91, %c0_29, %c0_30], %94 {strides = array<i32>} : memref<16x2x128xf32, #tpu.memory_space<vmem>>, vector<1x2x128xf32>,
    %c2_i32 = arith.constant 2 : i32
    %95 = arith.index_cast %c2_i32 : i32 to index
    %c0_31 = arith.constant 0 : index
    %c0_32 = arith.constant 0 : index
    %96 = vector.load %arg7[%95, %c0_31, %c0_32] : memref<16x2x512xf32, #tpu.memory_space<vmem>>, vector<1x2x512xf32>
    %97 = vector.shape_cast %96 : vector<1x2x512xf32> to vector<2x512xf32>
    %98 = arith.truncf %84 : vector<2x128xf32> to vector<2x128xbf16>
    %cst_33 = arith.constant dense<0.000000e+00> : vector<2x512xf32>
    %99 = tpu.matmul %98, %10, %cst_33 {dimension_numbers = #tpu.dot_dimension_numbers<[1], [0], [0], [1], [0, 0, 1, 1], [], []>} : vector<2x128xbf16>, vector<128x512xbf16>, vector<2x512xf32> -> vector<2x512xf32>
    %100 = arith.addf %97, %99 : vector<2x512xf32>
    %101 = vector.extract_strided_slice %100 {offsets = [0, 0], sizes = [2, 128], strides = [1, 1]} : vector<2x512xf32> to vector<2x128xf32>
    %102 = arith.negf %101 : vector<2x128xf32>
    %103 = math.exp %102 : vector<2x128xf32>
    %cst_34 = arith.constant 1.000000e+00 : f32
    %104 = vector.broadcast %cst_34 : f32 to vector<2x128xf32>
    %105 = arith.addf %104, %103 : vector<2x128xf32>
    %106 = arith.divf %104, %105 : vector<2x128xf32>
    %107 = vector.extract_strided_slice %100 {offsets = [0, 128], sizes = [2, 128], strides = [1, 1]} : vector<2x512xf32> to vector<2x128xf32>
    %108 = arith.negf %107 : vector<2x128xf32>
    %109 = math.exp %108 : vector<2x128xf32>
    %cst_35 = arith.constant 1.000000e+00 : f32
    %110 = vector.broadcast %cst_35 : f32 to vector<2x128xf32>
    %111 = arith.addf %110, %109 : vector<2x128xf32>
    %112 = arith.divf %110, %111 : vector<2x128xf32>
    %113 = vector.extract_strided_slice %100 {offsets = [0, 256], sizes = [2, 128], strides = [1, 1]} : vector<2x512xf32> to vector<2x128xf32>
    %114 = math.tanh %113 : vector<2x128xf32>
    %115 = vector.extract_strided_slice %100 {offsets = [0, 384], sizes = [2, 128], strides = [1, 1]} : vector<2x512xf32> to vector<2x128xf32>
    %116 = arith.negf %115 : vector<2x128xf32>
    %117 = math.exp %116 : vector<2x128xf32>
    %cst_36 = arith.constant 1.000000e+00 : f32
    %118 = vector.broadcast %cst_36 : f32 to vector<2x128xf32>
    %119 = arith.addf %118, %117 : vector<2x128xf32>
    %120 = arith.divf %118, %119 : vector<2x128xf32>
    %121 = arith.mulf %112, %82 : vector<2x128xf32>
    %122 = arith.mulf %106, %114 : vector<2x128xf32>
    %123 = arith.addf %121, %122 : vector<2x128xf32>
    %124 = math.tanh %123 : vector<2x128xf32>
    %125 = arith.mulf %120, %124 : vector<2x128xf32>
    %126 = vector.broadcast %c2_i32 : i32 to vector<2x1xi32>
    %127 = arith.cmpi sgt, %9, %126 : vector<2x1xi32>
    %128 = arith.extui %127 : vector<2x1xi1> to vector<2x1xi32>
    %129 = arith.sitofp %128 : vector<2x1xi32> to vector<2x1xf32>
    %130 = vector.broadcast %129 : vector<2x1xf32> to vector<2x128xf32>
    %131 = arith.mulf %125, %130 : vector<2x128xf32>
    %132 = arith.index_cast %c2_i32 : i32 to index
    %c0_37 = arith.constant 0 : index
    %c0_38 = arith.constant 0 : index
    %133 = vector.load %arg6[%132, %c0_37, %c0_38] : memref<16x2x128xf32, #tpu.memory_space<vmem>>, vector<1x2x128xf32>
    %134 = vector.shape_cast %133 : vector<1x2x128xf32> to vector<2x128xf32>
    %135 = vector.shape_cast %131 : vector<2x128xf32> to vector<1x2x128xf32>
    tpu.vector_store %arg6[%132, %c0_37, %c0_38], %135 {strides = array<i32>} : memref<16x2x128xf32, #tpu.memory_space<vmem>>, vector<1x2x128xf32>,
    %c3_i32 = arith.constant 3 : i32
    %136 = arith.index_cast %c3_i32 : i32 to index
    %c0_39 = arith.constant 0 : index
    %c0_40 = arith.constant 0 : index
    %137 = vector.load %arg7[%136, %c0_39, %c0_40] : memref<16x2x512xf32, #tpu.memory_space<vmem>>, vector<1x2x512xf32>
    %138 = vector.shape_cast %137 : vector<1x2x512xf32> to vector<2x512xf32>
    %139 = arith.truncf %125 : vector<2x128xf32> to vector<2x128xbf16>
    %cst_41 = arith.constant dense<0.000000e+00> : vector<2x512xf32>
    %140 = tpu.matmul %139, %10, %cst_41 {dimension_numbers = #tpu.dot_dimension_numbers<[1], [0], [0], [1], [0, 0, 1, 1], [], []>} : vector<2x128xbf16>, vector<128x512xbf16>, vector<2x512xf32> -> vector<2x512xf32>
    %141 = arith.addf %138, %140 : vector<2x512xf32>
    %142 = vector.extract_strided_slice %141 {offsets = [0, 0], sizes = [2, 128], strides = [1, 1]} : vector<2x512xf32> to vector<2x128xf32>
    %143 = arith.negf %142 : vector<2x128xf32>
    %144 = math.exp %143 : vector<2x128xf32>
    %cst_42 = arith.constant 1.000000e+00 : f32
    %145 = vector.broadcast %cst_42 : f32 to vector<2x128xf32>
    %146 = arith.addf %145, %144 : vector<2x128xf32>
    %147 = arith.divf %145, %146 : vector<2x128xf32>
    %148 = vector.extract_strided_slice %141 {offsets = [0, 128], sizes = [2, 128], strides = [1, 1]} : vector<2x512xf32> to vector<2x128xf32>
    %149 = arith.negf %148 : vector<2x128xf32>
    %150 = math.exp %149 : vector<2x128xf32>
    %cst_43 = arith.constant 1.000000e+00 : f32
    %151 = vector.broadcast %cst_43 : f32 to vector<2x128xf32>
    %152 = arith.addf %151, %150 : vector<2x128xf32>
    %153 = arith.divf %151, %152 : vector<2x128xf32>
    %154 = vector.extract_strided_slice %141 {offsets = [0, 256], sizes = [2, 128], strides = [1, 1]} : vector<2x512xf32> to vector<2x128xf32>
    %155 = math.tanh %154 : vector<2x128xf32>
    %156 = vector.extract_strided_slice %141 {offsets = [0, 384], sizes = [2, 128], strides = [1, 1]} : vector<2x512xf32> to vector<2x128xf32>
    %157 = arith.negf %156 : vector<2x128xf32>
    %158 = math.exp %157 : vector<2x128xf32>
    %cst_44 = arith.constant 1.000000e+00 : f32
    %159 = vector.broadcast %cst_44 : f32 to vector<2x128xf32>
    %160 = arith.addf %159, %158 : vector<2x128xf32>
    %161 = arith.divf %159, %160 : vector<2x128xf32>
    %162 = arith.mulf %153, %123 : vector<2x128xf32>
    %163 = arith.mulf %147, %155 : vector<2x128xf32>
    %164 = arith.addf %162, %163 : vector<2x128xf32>
    %165 = math.tanh %164 : vector<2x128xf32>
    %166 = arith.mulf %161, %165 : vector<2x128xf32>
    %167 = vector.broadcast %c3_i32 : i32 to vector<2x1xi32>
    %168 = arith.cmpi sgt, %9, %167 : vector<2x1xi32>
    %169 = arith.extui %168 : vector<2x1xi1> to vector<2x1xi32>
    %170 = arith.sitofp %169 : vector<2x1xi32> to vector<2x1xf32>
    %171 = vector.broadcast %170 : vector<2x1xf32> to vector<2x128xf32>
    %172 = arith.mulf %166, %171 : vector<2x128xf32>
    %173 = arith.index_cast %c3_i32 : i32 to index
    %c0_45 = arith.constant 0 : index
    %c0_46 = arith.constant 0 : index
    %174 = vector.load %arg6[%173, %c0_45, %c0_46] : memref<16x2x128xf32, #tpu.memory_space<vmem>>, vector<1x2x128xf32>
    %175 = vector.shape_cast %174 : vector<1x2x128xf32> to vector<2x128xf32>
    %176 = vector.shape_cast %172 : vector<2x128xf32> to vector<1x2x128xf32>
    tpu.vector_store %arg6[%173, %c0_45, %c0_46], %176 {strides = array<i32>} : memref<16x2x128xf32, #tpu.memory_space<vmem>>, vector<1x2x128xf32>,
    %c4_i32 = arith.constant 4 : i32
    %177 = arith.index_cast %c4_i32 : i32 to index
    %c0_47 = arith.constant 0 : index
    %c0_48 = arith.constant 0 : index
    %178 = vector.load %arg7[%177, %c0_47, %c0_48] : memref<16x2x512xf32, #tpu.memory_space<vmem>>, vector<1x2x512xf32>
    %179 = vector.shape_cast %178 : vector<1x2x512xf32> to vector<2x512xf32>
    %180 = arith.truncf %166 : vector<2x128xf32> to vector<2x128xbf16>
    %cst_49 = arith.constant dense<0.000000e+00> : vector<2x512xf32>
    %181 = tpu.matmul %180, %10, %cst_49 {dimension_numbers = #tpu.dot_dimension_numbers<[1], [0], [0], [1], [0, 0, 1, 1], [], []>} : vector<2x128xbf16>, vector<128x512xbf16>, vector<2x512xf32> -> vector<2x512xf32>
    %182 = arith.addf %179, %181 : vector<2x512xf32>
    %183 = vector.extract_strided_slice %182 {offsets = [0, 0], sizes = [2, 128], strides = [1, 1]} : vector<2x512xf32> to vector<2x128xf32>
    %184 = arith.negf %183 : vector<2x128xf32>
    %185 = math.exp %184 : vector<2x128xf32>
    %cst_50 = arith.constant 1.000000e+00 : f32
    %186 = vector.broadcast %cst_50 : f32 to vector<2x128xf32>
    %187 = arith.addf %186, %185 : vector<2x128xf32>
    %188 = arith.divf %186, %187 : vector<2x128xf32>
    %189 = vector.extract_strided_slice %182 {offsets = [0, 128], sizes = [2, 128], strides = [1, 1]} : vector<2x512xf32> to vector<2x128xf32>
    %190 = arith.negf %189 : vector<2x128xf32>
    %191 = math.exp %190 : vector<2x128xf32>
    %cst_51 = arith.constant 1.000000e+00 : f32
    %192 = vector.broadcast %cst_51 : f32 to vector<2x128xf32>
    %193 = arith.addf %192, %191 : vector<2x128xf32>
    %194 = arith.divf %192, %193 : vector<2x128xf32>
    %195 = vector.extract_strided_slice %182 {offsets = [0, 256], sizes = [2, 128], strides = [1, 1]} : vector<2x512xf32> to vector<2x128xf32>
    %196 = math.tanh %195 : vector<2x128xf32>
    %197 = vector.extract_strided_slice %182 {offsets = [0, 384], sizes = [2, 128], strides = [1, 1]} : vector<2x512xf32> to vector<2x128xf32>
    %198 = arith.negf %197 : vector<2x128xf32>
    %199 = math.exp %198 : vector<2x128xf32>
    %cst_52 = arith.constant 1.000000e+00 : f32
    %200 = vector.broadcast %cst_52 : f32 to vector<2x128xf32>
    %201 = arith.addf %200, %199 : vector<2x128xf32>
    %202 = arith.divf %200, %201 : vector<2x128xf32>
    %203 = arith.mulf %194, %164 : vector<2x128xf32>
    %204 = arith.mulf %188, %196 : vector<2x128xf32>
    %205 = arith.addf %203, %204 : vector<2x128xf32>
    %206 = math.tanh %205 : vector<2x128xf32>
    %207 = arith.mulf %202, %206 : vector<2x128xf32>
    %208 = vector.broadcast %c4_i32 : i32 to vector<2x1xi32>
    %209 = arith.cmpi sgt, %9, %208 : vector<2x1xi32>
    %210 = arith.extui %209 : vector<2x1xi1> to vector<2x1xi32>
    %211 = arith.sitofp %210 : vector<2x1xi32> to vector<2x1xf32>
    %212 = vector.broadcast %211 : vector<2x1xf32> to vector<2x128xf32>
    %213 = arith.mulf %207, %212 : vector<2x128xf32>
    %214 = arith.index_cast %c4_i32 : i32 to index
    %c0_53 = arith.constant 0 : index
    %c0_54 = arith.constant 0 : index
    %215 = vector.load %arg6[%214, %c0_53, %c0_54] : memref<16x2x128xf32, #tpu.memory_space<vmem>>, vector<1x2x128xf32>
    %216 = vector.shape_cast %215 : vector<1x2x128xf32> to vector<2x128xf32>
    %217 = vector.shape_cast %213 : vector<2x128xf32> to vector<1x2x128xf32>
    tpu.vector_store %arg6[%214, %c0_53, %c0_54], %217 {strides = array<i32>} : memref<16x2x128xf32, #tpu.memory_space<vmem>>, vector<1x2x128xf32>,
    %c5_i32 = arith.constant 5 : i32
    %218 = arith.index_cast %c5_i32 : i32 to index
    %c0_55 = arith.constant 0 : index
    %c0_56 = arith.constant 0 : index
    %219 = vector.load %arg7[%218, %c0_55, %c0_56] : memref<16x2x512xf32, #tpu.memory_space<vmem>>, vector<1x2x512xf32>
    %220 = vector.shape_cast %219 : vector<1x2x512xf32> to vector<2x512xf32>
    %221 = arith.truncf %207 : vector<2x128xf32> to vector<2x128xbf16>
    %cst_57 = arith.constant dense<0.000000e+00> : vector<2x512xf32>
    %222 = tpu.matmul %221, %10, %cst_57 {dimension_numbers = #tpu.dot_dimension_numbers<[1], [0], [0], [1], [0, 0, 1, 1], [], []>} : vector<2x128xbf16>, vector<128x512xbf16>, vector<2x512xf32> -> vector<2x512xf32>
    %223 = arith.addf %220, %222 : vector<2x512xf32>
    %224 = vector.extract_strided_slice %223 {offsets = [0, 0], sizes = [2, 128], strides = [1, 1]} : vector<2x512xf32> to vector<2x128xf32>
    %225 = arith.negf %224 : vector<2x128xf32>
    %226 = math.exp %225 : vector<2x128xf32>
    %cst_58 = arith.constant 1.000000e+00 : f32
    %227 = vector.broadcast %cst_58 : f32 to vector<2x128xf32>
    %228 = arith.addf %227, %226 : vector<2x128xf32>
    %229 = arith.divf %227, %228 : vector<2x128xf32>
    %230 = vector.extract_strided_slice %223 {offsets = [0, 128], sizes = [2, 128], strides = [1, 1]} : vector<2x512xf32> to vector<2x128xf32>
    %231 = arith.negf %230 : vector<2x128xf32>
    %232 = math.exp %231 : vector<2x128xf32>
    %cst_59 = arith.constant 1.000000e+00 : f32
    %233 = vector.broadcast %cst_59 : f32 to vector<2x128xf32>
    %234 = arith.addf %233, %232 : vector<2x128xf32>
    %235 = arith.divf %233, %234 : vector<2x128xf32>
    %236 = vector.extract_strided_slice %223 {offsets = [0, 256], sizes = [2, 128], strides = [1, 1]} : vector<2x512xf32> to vector<2x128xf32>
    %237 = math.tanh %236 : vector<2x128xf32>
    %238 = vector.extract_strided_slice %223 {offsets = [0, 384], sizes = [2, 128], strides = [1, 1]} : vector<2x512xf32> to vector<2x128xf32>
    %239 = arith.negf %238 : vector<2x128xf32>
    %240 = math.exp %239 : vector<2x128xf32>
    %cst_60 = arith.constant 1.000000e+00 : f32
    %241 = vector.broadcast %cst_60 : f32 to vector<2x128xf32>
    %242 = arith.addf %241, %240 : vector<2x128xf32>
    %243 = arith.divf %241, %242 : vector<2x128xf32>
    %244 = arith.mulf %235, %205 : vector<2x128xf32>
    %245 = arith.mulf %229, %237 : vector<2x128xf32>
    %246 = arith.addf %244, %245 : vector<2x128xf32>
    %247 = math.tanh %246 : vector<2x128xf32>
    %248 = arith.mulf %243, %247 : vector<2x128xf32>
    %249 = vector.broadcast %c5_i32 : i32 to vector<2x1xi32>
    %250 = arith.cmpi sgt, %9, %249 : vector<2x1xi32>
    %251 = arith.extui %250 : vector<2x1xi1> to vector<2x1xi32>
    %252 = arith.sitofp %251 : vector<2x1xi32> to vector<2x1xf32>
    %253 = vector.broadcast %252 : vector<2x1xf32> to vector<2x128xf32>
    %254 = arith.mulf %248, %253 : vector<2x128xf32>
    %255 = arith.index_cast %c5_i32 : i32 to index
    %c0_61 = arith.constant 0 : index
    %c0_62 = arith.constant 0 : index
    %256 = vector.load %arg6[%255, %c0_61, %c0_62] : memref<16x2x128xf32, #tpu.memory_space<vmem>>, vector<1x2x128xf32>
    %257 = vector.shape_cast %256 : vector<1x2x128xf32> to vector<2x128xf32>
    %258 = vector.shape_cast %254 : vector<2x128xf32> to vector<1x2x128xf32>
    tpu.vector_store %arg6[%255, %c0_61, %c0_62], %258 {strides = array<i32>} : memref<16x2x128xf32, #tpu.memory_space<vmem>>, vector<1x2x128xf32>,
    %c6_i32 = arith.constant 6 : i32
    %259 = arith.index_cast %c6_i32 : i32 to index
    %c0_63 = arith.constant 0 : index
    %c0_64 = arith.constant 0 : index
    %260 = vector.load %arg7[%259, %c0_63, %c0_64] : memref<16x2x512xf32, #tpu.memory_space<vmem>>, vector<1x2x512xf32>
    %261 = vector.shape_cast %260 : vector<1x2x512xf32> to vector<2x512xf32>
    %262 = arith.truncf %248 : vector<2x128xf32> to vector<2x128xbf16>
    %cst_65 = arith.constant dense<0.000000e+00> : vector<2x512xf32>
    %263 = tpu.matmul %262, %10, %cst_65 {dimension_numbers = #tpu.dot_dimension_numbers<[1], [0], [0], [1], [0, 0, 1, 1], [], []>} : vector<2x128xbf16>, vector<128x512xbf16>, vector<2x512xf32> -> vector<2x512xf32>
    %264 = arith.addf %261, %263 : vector<2x512xf32>
    %265 = vector.extract_strided_slice %264 {offsets = [0, 0], sizes = [2, 128], strides = [1, 1]} : vector<2x512xf32> to vector<2x128xf32>
    %266 = arith.negf %265 : vector<2x128xf32>
    %267 = math.exp %266 : vector<2x128xf32>
    %cst_66 = arith.constant 1.000000e+00 : f32
    %268 = vector.broadcast %cst_66 : f32 to vector<2x128xf32>
    %269 = arith.addf %268, %267 : vector<2x128xf32>
    %270 = arith.divf %268, %269 : vector<2x128xf32>
    %271 = vector.extract_strided_slice %264 {offsets = [0, 128], sizes = [2, 128], strides = [1, 1]} : vector<2x512xf32> to vector<2x128xf32>
    %272 = arith.negf %271 : vector<2x128xf32>
    %273 = math.exp %272 : vector<2x128xf32>
    %cst_67 = arith.constant 1.000000e+00 : f32
    %274 = vector.broadcast %cst_67 : f32 to vector<2x128xf32>
    %275 = arith.addf %274, %273 : vector<2x128xf32>
    %276 = arith.divf %274, %275 : vector<2x128xf32>
    %277 = vector.extract_strided_slice %264 {offsets = [0, 256], sizes = [2, 128], strides = [1, 1]} : vector<2x512xf32> to vector<2x128xf32>
    %278 = math.tanh %277 : vector<2x128xf32>
    %279 = vector.extract_strided_slice %264 {offsets = [0, 384], sizes = [2, 128], strides = [1, 1]} : vector<2x512xf32> to vector<2x128xf32>
    %280 = arith.negf %279 : vector<2x128xf32>
    %281 = math.exp %280 : vector<2x128xf32>
    %cst_68 = arith.constant 1.000000e+00 : f32
    %282 = vector.broadcast %cst_68 : f32 to vector<2x128xf32>
    %283 = arith.addf %282, %281 : vector<2x128xf32>
    %284 = arith.divf %282, %283 : vector<2x128xf32>
    %285 = arith.mulf %276, %246 : vector<2x128xf32>
    %286 = arith.mulf %270, %278 : vector<2x128xf32>
    %287 = arith.addf %285, %286 : vector<2x128xf32>
    %288 = math.tanh %287 : vector<2x128xf32>
    %289 = arith.mulf %284, %288 : vector<2x128xf32>
    %290 = vector.broadcast %c6_i32 : i32 to vector<2x1xi32>
    %291 = arith.cmpi sgt, %9, %290 : vector<2x1xi32>
    %292 = arith.extui %291 : vector<2x1xi1> to vector<2x1xi32>
    %293 = arith.sitofp %292 : vector<2x1xi32> to vector<2x1xf32>
    %294 = vector.broadcast %293 : vector<2x1xf32> to vector<2x128xf32>
    %295 = arith.mulf %289, %294 : vector<2x128xf32>
    %296 = arith.index_cast %c6_i32 : i32 to index
    %c0_69 = arith.constant 0 : index
    %c0_70 = arith.constant 0 : index
    %297 = vector.load %arg6[%296, %c0_69, %c0_70] : memref<16x2x128xf32, #tpu.memory_space<vmem>>, vector<1x2x128xf32>
    %298 = vector.shape_cast %297 : vector<1x2x128xf32> to vector<2x128xf32>
    %299 = vector.shape_cast %295 : vector<2x128xf32> to vector<1x2x128xf32>
    tpu.vector_store %arg6[%296, %c0_69, %c0_70], %299 {strides = array<i32>} : memref<16x2x128xf32, #tpu.memory_space<vmem>>, vector<1x2x128xf32>,
    %c7_i32 = arith.constant 7 : i32
    %300 = arith.index_cast %c7_i32 : i32 to index
    %c0_71 = arith.constant 0 : index
    %c0_72 = arith.constant 0 : index
    %301 = vector.load %arg7[%300, %c0_71, %c0_72] : memref<16x2x512xf32, #tpu.memory_space<vmem>>, vector<1x2x512xf32>
    %302 = vector.shape_cast %301 : vector<1x2x512xf32> to vector<2x512xf32>
    %303 = arith.truncf %289 : vector<2x128xf32> to vector<2x128xbf16>
    %cst_73 = arith.constant dense<0.000000e+00> : vector<2x512xf32>
    %304 = tpu.matmul %303, %10, %cst_73 {dimension_numbers = #tpu.dot_dimension_numbers<[1], [0], [0], [1], [0, 0, 1, 1], [], []>} : vector<2x128xbf16>, vector<128x512xbf16>, vector<2x512xf32> -> vector<2x512xf32>
    %305 = arith.addf %302, %304 : vector<2x512xf32>
    %306 = vector.extract_strided_slice %305 {offsets = [0, 0], sizes = [2, 128], strides = [1, 1]} : vector<2x512xf32> to vector<2x128xf32>
    %307 = arith.negf %306 : vector<2x128xf32>
    %308 = math.exp %307 : vector<2x128xf32>
    %cst_74 = arith.constant 1.000000e+00 : f32
    %309 = vector.broadcast %cst_74 : f32 to vector<2x128xf32>
    %310 = arith.addf %309, %308 : vector<2x128xf32>
    %311 = arith.divf %309, %310 : vector<2x128xf32>
    %312 = vector.extract_strided_slice %305 {offsets = [0, 128], sizes = [2, 128], strides = [1, 1]} : vector<2x512xf32> to vector<2x128xf32>
    %313 = arith.negf %312 : vector<2x128xf32>
    %314 = math.exp %313 : vector<2x128xf32>
    %cst_75 = arith.constant 1.000000e+00 : f32
    %315 = vector.broadcast %cst_75 : f32 to vector<2x128xf32>
    %316 = arith.addf %315, %314 : vector<2x128xf32>
    %317 = arith.divf %315, %316 : vector<2x128xf32>
    %318 = vector.extract_strided_slice %305 {offsets = [0, 256], sizes = [2, 128], strides = [1, 1]} : vector<2x512xf32> to vector<2x128xf32>
    %319 = math.tanh %318 : vector<2x128xf32>
    %320 = vector.extract_strided_slice %305 {offsets = [0, 384], sizes = [2, 128], strides = [1, 1]} : vector<2x512xf32> to vector<2x128xf32>
    %321 = arith.negf %320 : vector<2x128xf32>
    %322 = math.exp %321 : vector<2x128xf32>
    %cst_76 = arith.constant 1.000000e+00 : f32
    %323 = vector.broadcast %cst_76 : f32 to vector<2x128xf32>
    %324 = arith.addf %323, %322 : vector<2x128xf32>
    %325 = arith.divf %323, %324 : vector<2x128xf32>
    %326 = arith.mulf %317, %287 : vector<2x128xf32>
    %327 = arith.mulf %311, %319 : vector<2x128xf32>
    %328 = arith.addf %326, %327 : vector<2x128xf32>
    %329 = math.tanh %328 : vector<2x128xf32>
    %330 = arith.mulf %325, %329 : vector<2x128xf32>
    %331 = vector.broadcast %c7_i32 : i32 to vector<2x1xi32>
    %332 = arith.cmpi sgt, %9, %331 : vector<2x1xi32>
    %333 = arith.extui %332 : vector<2x1xi1> to vector<2x1xi32>
    %334 = arith.sitofp %333 : vector<2x1xi32> to vector<2x1xf32>
    %335 = vector.broadcast %334 : vector<2x1xf32> to vector<2x128xf32>
    %336 = arith.mulf %330, %335 : vector<2x128xf32>
    %337 = arith.index_cast %c7_i32 : i32 to index
    %c0_77 = arith.constant 0 : index
    %c0_78 = arith.constant 0 : index
    %338 = vector.load %arg6[%337, %c0_77, %c0_78] : memref<16x2x128xf32, #tpu.memory_space<vmem>>, vector<1x2x128xf32>
    %339 = vector.shape_cast %338 : vector<1x2x128xf32> to vector<2x128xf32>
    %340 = vector.shape_cast %336 : vector<2x128xf32> to vector<1x2x128xf32>
    tpu.vector_store %arg6[%337, %c0_77, %c0_78], %340 {strides = array<i32>} : memref<16x2x128xf32, #tpu.memory_space<vmem>>, vector<1x2x128xf32>,
    %c8_i32 = arith.constant 8 : i32
    %341 = arith.index_cast %c8_i32 : i32 to index
    %c0_79 = arith.constant 0 : index
    %c0_80 = arith.constant 0 : index
    %342 = vector.load %arg7[%341, %c0_79, %c0_80] : memref<16x2x512xf32, #tpu.memory_space<vmem>>, vector<1x2x512xf32>
    %343 = vector.shape_cast %342 : vector<1x2x512xf32> to vector<2x512xf32>
    %344 = arith.truncf %330 : vector<2x128xf32> to vector<2x128xbf16>
    %cst_81 = arith.constant dense<0.000000e+00> : vector<2x512xf32>
    %345 = tpu.matmul %344, %10, %cst_81 {dimension_numbers = #tpu.dot_dimension_numbers<[1], [0], [0], [1], [0, 0, 1, 1], [], []>} : vector<2x128xbf16>, vector<128x512xbf16>, vector<2x512xf32> -> vector<2x512xf32>
    %346 = arith.addf %343, %345 : vector<2x512xf32>
    %347 = vector.extract_strided_slice %346 {offsets = [0, 0], sizes = [2, 128], strides = [1, 1]} : vector<2x512xf32> to vector<2x128xf32>
    %348 = arith.negf %347 : vector<2x128xf32>
    %349 = math.exp %348 : vector<2x128xf32>
    %cst_82 = arith.constant 1.000000e+00 : f32
    %350 = vector.broadcast %cst_82 : f32 to vector<2x128xf32>
    %351 = arith.addf %350, %349 : vector<2x128xf32>
    %352 = arith.divf %350, %351 : vector<2x128xf32>
    %353 = vector.extract_strided_slice %346 {offsets = [0, 128], sizes = [2, 128], strides = [1, 1]} : vector<2x512xf32> to vector<2x128xf32>
    %354 = arith.negf %353 : vector<2x128xf32>
    %355 = math.exp %354 : vector<2x128xf32>
    %cst_83 = arith.constant 1.000000e+00 : f32
    %356 = vector.broadcast %cst_83 : f32 to vector<2x128xf32>
    %357 = arith.addf %356, %355 : vector<2x128xf32>
    %358 = arith.divf %356, %357 : vector<2x128xf32>
    %359 = vector.extract_strided_slice %346 {offsets = [0, 256], sizes = [2, 128], strides = [1, 1]} : vector<2x512xf32> to vector<2x128xf32>
    %360 = math.tanh %359 : vector<2x128xf32>
    %361 = vector.extract_strided_slice %346 {offsets = [0, 384], sizes = [2, 128], strides = [1, 1]} : vector<2x512xf32> to vector<2x128xf32>
    %362 = arith.negf %361 : vector<2x128xf32>
    %363 = math.exp %362 : vector<2x128xf32>
    %cst_84 = arith.constant 1.000000e+00 : f32
    %364 = vector.broadcast %cst_84 : f32 to vector<2x128xf32>
    %365 = arith.addf %364, %363 : vector<2x128xf32>
    %366 = arith.divf %364, %365 : vector<2x128xf32>
    %367 = arith.mulf %358, %328 : vector<2x128xf32>
    %368 = arith.mulf %352, %360 : vector<2x128xf32>
    %369 = arith.addf %367, %368 : vector<2x128xf32>
    %370 = math.tanh %369 : vector<2x128xf32>
    %371 = arith.mulf %366, %370 : vector<2x128xf32>
    %372 = vector.broadcast %c8_i32 : i32 to vector<2x1xi32>
    %373 = arith.cmpi sgt, %9, %372 : vector<2x1xi32>
    %374 = arith.extui %373 : vector<2x1xi1> to vector<2x1xi32>
    %375 = arith.sitofp %374 : vector<2x1xi32> to vector<2x1xf32>
    %376 = vector.broadcast %375 : vector<2x1xf32> to vector<2x128xf32>
    %377 = arith.mulf %371, %376 : vector<2x128xf32>
    %378 = arith.index_cast %c8_i32 : i32 to index
    %c0_85 = arith.constant 0 : index
    %c0_86 = arith.constant 0 : index
    %379 = vector.load %arg6[%378, %c0_85, %c0_86] : memref<16x2x128xf32, #tpu.memory_space<vmem>>, vector<1x2x128xf32>
    %380 = vector.shape_cast %379 : vector<1x2x128xf32> to vector<2x128xf32>
    %381 = vector.shape_cast %377 : vector<2x128xf32> to vector<1x2x128xf32>
    tpu.vector_store %arg6[%378, %c0_85, %c0_86], %381 {strides = array<i32>} : memref<16x2x128xf32, #tpu.memory_space<vmem>>, vector<1x2x128xf32>,
    %c9_i32 = arith.constant 9 : i32
    %382 = arith.index_cast %c9_i32 : i32 to index
    %c0_87 = arith.constant 0 : index
    %c0_88 = arith.constant 0 : index
    %383 = vector.load %arg7[%382, %c0_87, %c0_88] : memref<16x2x512xf32, #tpu.memory_space<vmem>>, vector<1x2x512xf32>
    %384 = vector.shape_cast %383 : vector<1x2x512xf32> to vector<2x512xf32>
    %385 = arith.truncf %371 : vector<2x128xf32> to vector<2x128xbf16>
    %cst_89 = arith.constant dense<0.000000e+00> : vector<2x512xf32>
    %386 = tpu.matmul %385, %10, %cst_89 {dimension_numbers = #tpu.dot_dimension_numbers<[1], [0], [0], [1], [0, 0, 1, 1], [], []>} : vector<2x128xbf16>, vector<128x512xbf16>, vector<2x512xf32> -> vector<2x512xf32>
    %387 = arith.addf %384, %386 : vector<2x512xf32>
    %388 = vector.extract_strided_slice %387 {offsets = [0, 0], sizes = [2, 128], strides = [1, 1]} : vector<2x512xf32> to vector<2x128xf32>
    %389 = arith.negf %388 : vector<2x128xf32>
    %390 = math.exp %389 : vector<2x128xf32>
    %cst_90 = arith.constant 1.000000e+00 : f32
    %391 = vector.broadcast %cst_90 : f32 to vector<2x128xf32>
    %392 = arith.addf %391, %390 : vector<2x128xf32>
    %393 = arith.divf %391, %392 : vector<2x128xf32>
    %394 = vector.extract_strided_slice %387 {offsets = [0, 128], sizes = [2, 128], strides = [1, 1]} : vector<2x512xf32> to vector<2x128xf32>
    %395 = arith.negf %394 : vector<2x128xf32>
    %396 = math.exp %395 : vector<2x128xf32>
    %cst_91 = arith.constant 1.000000e+00 : f32
    %397 = vector.broadcast %cst_91 : f32 to vector<2x128xf32>
    %398 = arith.addf %397, %396 : vector<2x128xf32>
    %399 = arith.divf %397, %398 : vector<2x128xf32>
    %400 = vector.extract_strided_slice %387 {offsets = [0, 256], sizes = [2, 128], strides = [1, 1]} : vector<2x512xf32> to vector<2x128xf32>
    %401 = math.tanh %400 : vector<2x128xf32>
    %402 = vector.extract_strided_slice %387 {offsets = [0, 384], sizes = [2, 128], strides = [1, 1]} : vector<2x512xf32> to vector<2x128xf32>
    %403 = arith.negf %402 : vector<2x128xf32>
    %404 = math.exp %403 : vector<2x128xf32>
    %cst_92 = arith.constant 1.000000e+00 : f32
    %405 = vector.broadcast %cst_92 : f32 to vector<2x128xf32>
    %406 = arith.addf %405, %404 : vector<2x128xf32>
    %407 = arith.divf %405, %406 : vector<2x128xf32>
    %408 = arith.mulf %399, %369 : vector<2x128xf32>
    %409 = arith.mulf %393, %401 : vector<2x128xf32>
    %410 = arith.addf %408, %409 : vector<2x128xf32>
    %411 = math.tanh %410 : vector<2x128xf32>
    %412 = arith.mulf %407, %411 : vector<2x128xf32>
    %413 = vector.broadcast %c9_i32 : i32 to vector<2x1xi32>
    %414 = arith.cmpi sgt, %9, %413 : vector<2x1xi32>
    %415 = arith.extui %414 : vector<2x1xi1> to vector<2x1xi32>
    %416 = arith.sitofp %415 : vector<2x1xi32> to vector<2x1xf32>
    %417 = vector.broadcast %416 : vector<2x1xf32> to vector<2x128xf32>
    %418 = arith.mulf %412, %417 : vector<2x128xf32>
    %419 = arith.index_cast %c9_i32 : i32 to index
    %c0_93 = arith.constant 0 : index
    %c0_94 = arith.constant 0 : index
    %420 = vector.load %arg6[%419, %c0_93, %c0_94] : memref<16x2x128xf32, #tpu.memory_space<vmem>>, vector<1x2x128xf32>
    %421 = vector.shape_cast %420 : vector<1x2x128xf32> to vector<2x128xf32>
    %422 = vector.shape_cast %418 : vector<2x128xf32> to vector<1x2x128xf32>
    tpu.vector_store %arg6[%419, %c0_93, %c0_94], %422 {strides = array<i32>} : memref<16x2x128xf32, #tpu.memory_space<vmem>>, vector<1x2x128xf32>,
    %c10_i32 = arith.constant 10 : i32
    %423 = arith.index_cast %c10_i32 : i32 to index
    %c0_95 = arith.constant 0 : index
    %c0_96 = arith.constant 0 : index
    %424 = vector.load %arg7[%423, %c0_95, %c0_96] : memref<16x2x512xf32, #tpu.memory_space<vmem>>, vector<1x2x512xf32>
    %425 = vector.shape_cast %424 : vector<1x2x512xf32> to vector<2x512xf32>
    %426 = arith.truncf %412 : vector<2x128xf32> to vector<2x128xbf16>
    %cst_97 = arith.constant dense<0.000000e+00> : vector<2x512xf32>
    %427 = tpu.matmul %426, %10, %cst_97 {dimension_numbers = #tpu.dot_dimension_numbers<[1], [0], [0], [1], [0, 0, 1, 1], [], []>} : vector<2x128xbf16>, vector<128x512xbf16>, vector<2x512xf32> -> vector<2x512xf32>
    %428 = arith.addf %425, %427 : vector<2x512xf32>
    %429 = vector.extract_strided_slice %428 {offsets = [0, 0], sizes = [2, 128], strides = [1, 1]} : vector<2x512xf32> to vector<2x128xf32>
    %430 = arith.negf %429 : vector<2x128xf32>
    %431 = math.exp %430 : vector<2x128xf32>
    %cst_98 = arith.constant 1.000000e+00 : f32
    %432 = vector.broadcast %cst_98 : f32 to vector<2x128xf32>
    %433 = arith.addf %432, %431 : vector<2x128xf32>
    %434 = arith.divf %432, %433 : vector<2x128xf32>
    %435 = vector.extract_strided_slice %428 {offsets = [0, 128], sizes = [2, 128], strides = [1, 1]} : vector<2x512xf32> to vector<2x128xf32>
    %436 = arith.negf %435 : vector<2x128xf32>
    %437 = math.exp %436 : vector<2x128xf32>
    %cst_99 = arith.constant 1.000000e+00 : f32
    %438 = vector.broadcast %cst_99 : f32 to vector<2x128xf32>
    %439 = arith.addf %438, %437 : vector<2x128xf32>
    %440 = arith.divf %438, %439 : vector<2x128xf32>
    %441 = vector.extract_strided_slice %428 {offsets = [0, 256], sizes = [2, 128], strides = [1, 1]} : vector<2x512xf32> to vector<2x128xf32>
    %442 = math.tanh %441 : vector<2x128xf32>
    %443 = vector.extract_strided_slice %428 {offsets = [0, 384], sizes = [2, 128], strides = [1, 1]} : vector<2x512xf32> to vector<2x128xf32>
    %444 = arith.negf %443 : vector<2x128xf32>
    %445 = math.exp %444 : vector<2x128xf32>
    %cst_100 = arith.constant 1.000000e+00 : f32
    %446 = vector.broadcast %cst_100 : f32 to vector<2x128xf32>
    %447 = arith.addf %446, %445 : vector<2x128xf32>
    %448 = arith.divf %446, %447 : vector<2x128xf32>
    %449 = arith.mulf %440, %410 : vector<2x128xf32>
    %450 = arith.mulf %434, %442 : vector<2x128xf32>
    %451 = arith.addf %449, %450 : vector<2x128xf32>
    %452 = math.tanh %451 : vector<2x128xf32>
    %453 = arith.mulf %448, %452 : vector<2x128xf32>
    %454 = vector.broadcast %c10_i32 : i32 to vector<2x1xi32>
    %455 = arith.cmpi sgt, %9, %454 : vector<2x1xi32>
    %456 = arith.extui %455 : vector<2x1xi1> to vector<2x1xi32>
    %457 = arith.sitofp %456 : vector<2x1xi32> to vector<2x1xf32>
    %458 = vector.broadcast %457 : vector<2x1xf32> to vector<2x128xf32>
    %459 = arith.mulf %453, %458 : vector<2x128xf32>
    %460 = arith.index_cast %c10_i32 : i32 to index
    %c0_101 = arith.constant 0 : index
    %c0_102 = arith.constant 0 : index
    %461 = vector.load %arg6[%460, %c0_101, %c0_102] : memref<16x2x128xf32, #tpu.memory_space<vmem>>, vector<1x2x128xf32>
    %462 = vector.shape_cast %461 : vector<1x2x128xf32> to vector<2x128xf32>
    %463 = vector.shape_cast %459 : vector<2x128xf32> to vector<1x2x128xf32>
    tpu.vector_store %arg6[%460, %c0_101, %c0_102], %463 {strides = array<i32>} : memref<16x2x128xf32, #tpu.memory_space<vmem>>, vector<1x2x128xf32>,
    %c11_i32 = arith.constant 11 : i32
    %464 = arith.index_cast %c11_i32 : i32 to index
    %c0_103 = arith.constant 0 : index
    %c0_104 = arith.constant 0 : index
    %465 = vector.load %arg7[%464, %c0_103, %c0_104] : memref<16x2x512xf32, #tpu.memory_space<vmem>>, vector<1x2x512xf32>
    %466 = vector.shape_cast %465 : vector<1x2x512xf32> to vector<2x512xf32>
    %467 = arith.truncf %453 : vector<2x128xf32> to vector<2x128xbf16>
    %cst_105 = arith.constant dense<0.000000e+00> : vector<2x512xf32>
    %468 = tpu.matmul %467, %10, %cst_105 {dimension_numbers = #tpu.dot_dimension_numbers<[1], [0], [0], [1], [0, 0, 1, 1], [], []>} : vector<2x128xbf16>, vector<128x512xbf16>, vector<2x512xf32> -> vector<2x512xf32>
    %469 = arith.addf %466, %468 : vector<2x512xf32>
    %470 = vector.extract_strided_slice %469 {offsets = [0, 0], sizes = [2, 128], strides = [1, 1]} : vector<2x512xf32> to vector<2x128xf32>
    %471 = arith.negf %470 : vector<2x128xf32>
    %472 = math.exp %471 : vector<2x128xf32>
    %cst_106 = arith.constant 1.000000e+00 : f32
    %473 = vector.broadcast %cst_106 : f32 to vector<2x128xf32>
    %474 = arith.addf %473, %472 : vector<2x128xf32>
    %475 = arith.divf %473, %474 : vector<2x128xf32>
    %476 = vector.extract_strided_slice %469 {offsets = [0, 128], sizes = [2, 128], strides = [1, 1]} : vector<2x512xf32> to vector<2x128xf32>
    %477 = arith.negf %476 : vector<2x128xf32>
    %478 = math.exp %477 : vector<2x128xf32>
    %cst_107 = arith.constant 1.000000e+00 : f32
    %479 = vector.broadcast %cst_107 : f32 to vector<2x128xf32>
    %480 = arith.addf %479, %478 : vector<2x128xf32>
    %481 = arith.divf %479, %480 : vector<2x128xf32>
    %482 = vector.extract_strided_slice %469 {offsets = [0, 256], sizes = [2, 128], strides = [1, 1]} : vector<2x512xf32> to vector<2x128xf32>
    %483 = math.tanh %482 : vector<2x128xf32>
    %484 = vector.extract_strided_slice %469 {offsets = [0, 384], sizes = [2, 128], strides = [1, 1]} : vector<2x512xf32> to vector<2x128xf32>
    %485 = arith.negf %484 : vector<2x128xf32>
    %486 = math.exp %485 : vector<2x128xf32>
    %cst_108 = arith.constant 1.000000e+00 : f32
    %487 = vector.broadcast %cst_108 : f32 to vector<2x128xf32>
    %488 = arith.addf %487, %486 : vector<2x128xf32>
    %489 = arith.divf %487, %488 : vector<2x128xf32>
    %490 = arith.mulf %481, %451 : vector<2x128xf32>
    %491 = arith.mulf %475, %483 : vector<2x128xf32>
    %492 = arith.addf %490, %491 : vector<2x128xf32>
    %493 = math.tanh %492 : vector<2x128xf32>
    %494 = arith.mulf %489, %493 : vector<2x128xf32>
    %495 = vector.broadcast %c11_i32 : i32 to vector<2x1xi32>
    %496 = arith.cmpi sgt, %9, %495 : vector<2x1xi32>
    %497 = arith.extui %496 : vector<2x1xi1> to vector<2x1xi32>
    %498 = arith.sitofp %497 : vector<2x1xi32> to vector<2x1xf32>
    %499 = vector.broadcast %498 : vector<2x1xf32> to vector<2x128xf32>
    %500 = arith.mulf %494, %499 : vector<2x128xf32>
    %501 = arith.index_cast %c11_i32 : i32 to index
    %c0_109 = arith.constant 0 : index
    %c0_110 = arith.constant 0 : index
    %502 = vector.load %arg6[%501, %c0_109, %c0_110] : memref<16x2x128xf32, #tpu.memory_space<vmem>>, vector<1x2x128xf32>
    %503 = vector.shape_cast %502 : vector<1x2x128xf32> to vector<2x128xf32>
    %504 = vector.shape_cast %500 : vector<2x128xf32> to vector<1x2x128xf32>
    tpu.vector_store %arg6[%501, %c0_109, %c0_110], %504 {strides = array<i32>} : memref<16x2x128xf32, #tpu.memory_space<vmem>>, vector<1x2x128xf32>,
    %c12_i32 = arith.constant 12 : i32
    %505 = arith.index_cast %c12_i32 : i32 to index
    %c0_111 = arith.constant 0 : index
    %c0_112 = arith.constant 0 : index
    %506 = vector.load %arg7[%505, %c0_111, %c0_112] : memref<16x2x512xf32, #tpu.memory_space<vmem>>, vector<1x2x512xf32>
    %507 = vector.shape_cast %506 : vector<1x2x512xf32> to vector<2x512xf32>
    %508 = arith.truncf %494 : vector<2x128xf32> to vector<2x128xbf16>
    %cst_113 = arith.constant dense<0.000000e+00> : vector<2x512xf32>
    %509 = tpu.matmul %508, %10, %cst_113 {dimension_numbers = #tpu.dot_dimension_numbers<[1], [0], [0], [1], [0, 0, 1, 1], [], []>} : vector<2x128xbf16>, vector<128x512xbf16>, vector<2x512xf32> -> vector<2x512xf32>
    %510 = arith.addf %507, %509 : vector<2x512xf32>
    %511 = vector.extract_strided_slice %510 {offsets = [0, 0], sizes = [2, 128], strides = [1, 1]} : vector<2x512xf32> to vector<2x128xf32>
    %512 = arith.negf %511 : vector<2x128xf32>
    %513 = math.exp %512 : vector<2x128xf32>
    %cst_114 = arith.constant 1.000000e+00 : f32
    %514 = vector.broadcast %cst_114 : f32 to vector<2x128xf32>
    %515 = arith.addf %514, %513 : vector<2x128xf32>
    %516 = arith.divf %514, %515 : vector<2x128xf32>
    %517 = vector.extract_strided_slice %510 {offsets = [0, 128], sizes = [2, 128], strides = [1, 1]} : vector<2x512xf32> to vector<2x128xf32>
    %518 = arith.negf %517 : vector<2x128xf32>
    %519 = math.exp %518 : vector<2x128xf32>
    %cst_115 = arith.constant 1.000000e+00 : f32
    %520 = vector.broadcast %cst_115 : f32 to vector<2x128xf32>
    %521 = arith.addf %520, %519 : vector<2x128xf32>
    %522 = arith.divf %520, %521 : vector<2x128xf32>
    %523 = vector.extract_strided_slice %510 {offsets = [0, 256], sizes = [2, 128], strides = [1, 1]} : vector<2x512xf32> to vector<2x128xf32>
    %524 = math.tanh %523 : vector<2x128xf32>
    %525 = vector.extract_strided_slice %510 {offsets = [0, 384], sizes = [2, 128], strides = [1, 1]} : vector<2x512xf32> to vector<2x128xf32>
    %526 = arith.negf %525 : vector<2x128xf32>
    %527 = math.exp %526 : vector<2x128xf32>
    %cst_116 = arith.constant 1.000000e+00 : f32
    %528 = vector.broadcast %cst_116 : f32 to vector<2x128xf32>
    %529 = arith.addf %528, %527 : vector<2x128xf32>
    %530 = arith.divf %528, %529 : vector<2x128xf32>
    %531 = arith.mulf %522, %492 : vector<2x128xf32>
    %532 = arith.mulf %516, %524 : vector<2x128xf32>
    %533 = arith.addf %531, %532 : vector<2x128xf32>
    %534 = math.tanh %533 : vector<2x128xf32>
    %535 = arith.mulf %530, %534 : vector<2x128xf32>
    %536 = vector.broadcast %c12_i32 : i32 to vector<2x1xi32>
    %537 = arith.cmpi sgt, %9, %536 : vector<2x1xi32>
    %538 = arith.extui %537 : vector<2x1xi1> to vector<2x1xi32>
    %539 = arith.sitofp %538 : vector<2x1xi32> to vector<2x1xf32>
    %540 = vector.broadcast %539 : vector<2x1xf32> to vector<2x128xf32>
    %541 = arith.mulf %535, %540 : vector<2x128xf32>
    %542 = arith.index_cast %c12_i32 : i32 to index
    %c0_117 = arith.constant 0 : index
    %c0_118 = arith.constant 0 : index
    %543 = vector.load %arg6[%542, %c0_117, %c0_118] : memref<16x2x128xf32, #tpu.memory_space<vmem>>, vector<1x2x128xf32>
    %544 = vector.shape_cast %543 : vector<1x2x128xf32> to vector<2x128xf32>
    %545 = vector.shape_cast %541 : vector<2x128xf32> to vector<1x2x128xf32>
    tpu.vector_store %arg6[%542, %c0_117, %c0_118], %545 {strides = array<i32>} : memref<16x2x128xf32, #tpu.memory_space<vmem>>, vector<1x2x128xf32>,
    %c13_i32 = arith.constant 13 : i32
    %546 = arith.index_cast %c13_i32 : i32 to index
    %c0_119 = arith.constant 0 : index
    %c0_120 = arith.constant 0 : index
    %547 = vector.load %arg7[%546, %c0_119, %c0_120] : memref<16x2x512xf32, #tpu.memory_space<vmem>>, vector<1x2x512xf32>
    %548 = vector.shape_cast %547 : vector<1x2x512xf32> to vector<2x512xf32>
    %549 = arith.truncf %535 : vector<2x128xf32> to vector<2x128xbf16>
    %cst_121 = arith.constant dense<0.000000e+00> : vector<2x512xf32>
    %550 = tpu.matmul %549, %10, %cst_121 {dimension_numbers = #tpu.dot_dimension_numbers<[1], [0], [0], [1], [0, 0, 1, 1], [], []>} : vector<2x128xbf16>, vector<128x512xbf16>, vector<2x512xf32> -> vector<2x512xf32>
    %551 = arith.addf %548, %550 : vector<2x512xf32>
    %552 = vector.extract_strided_slice %551 {offsets = [0, 0], sizes = [2, 128], strides = [1, 1]} : vector<2x512xf32> to vector<2x128xf32>
    %553 = arith.negf %552 : vector<2x128xf32>
    %554 = math.exp %553 : vector<2x128xf32>
    %cst_122 = arith.constant 1.000000e+00 : f32
    %555 = vector.broadcast %cst_122 : f32 to vector<2x128xf32>
    %556 = arith.addf %555, %554 : vector<2x128xf32>
    %557 = arith.divf %555, %556 : vector<2x128xf32>
    %558 = vector.extract_strided_slice %551 {offsets = [0, 128], sizes = [2, 128], strides = [1, 1]} : vector<2x512xf32> to vector<2x128xf32>
    %559 = arith.negf %558 : vector<2x128xf32>
    %560 = math.exp %559 : vector<2x128xf32>
    %cst_123 = arith.constant 1.000000e+00 : f32
    %561 = vector.broadcast %cst_123 : f32 to vector<2x128xf32>
    %562 = arith.addf %561, %560 : vector<2x128xf32>
    %563 = arith.divf %561, %562 : vector<2x128xf32>
    %564 = vector.extract_strided_slice %551 {offsets = [0, 256], sizes = [2, 128], strides = [1, 1]} : vector<2x512xf32> to vector<2x128xf32>
    %565 = math.tanh %564 : vector<2x128xf32>
    %566 = vector.extract_strided_slice %551 {offsets = [0, 384], sizes = [2, 128], strides = [1, 1]} : vector<2x512xf32> to vector<2x128xf32>
    %567 = arith.negf %566 : vector<2x128xf32>
    %568 = math.exp %567 : vector<2x128xf32>
    %cst_124 = arith.constant 1.000000e+00 : f32
    %569 = vector.broadcast %cst_124 : f32 to vector<2x128xf32>
    %570 = arith.addf %569, %568 : vector<2x128xf32>
    %571 = arith.divf %569, %570 : vector<2x128xf32>
    %572 = arith.mulf %563, %533 : vector<2x128xf32>
    %573 = arith.mulf %557, %565 : vector<2x128xf32>
    %574 = arith.addf %572, %573 : vector<2x128xf32>
    %575 = math.tanh %574 : vector<2x128xf32>
    %576 = arith.mulf %571, %575 : vector<2x128xf32>
    %577 = vector.broadcast %c13_i32 : i32 to vector<2x1xi32>
    %578 = arith.cmpi sgt, %9, %577 : vector<2x1xi32>
    %579 = arith.extui %578 : vector<2x1xi1> to vector<2x1xi32>
    %580 = arith.sitofp %579 : vector<2x1xi32> to vector<2x1xf32>
    %581 = vector.broadcast %580 : vector<2x1xf32> to vector<2x128xf32>
    %582 = arith.mulf %576, %581 : vector<2x128xf32>
    %583 = arith.index_cast %c13_i32 : i32 to index
    %c0_125 = arith.constant 0 : index
    %c0_126 = arith.constant 0 : index
    %584 = vector.load %arg6[%583, %c0_125, %c0_126] : memref<16x2x128xf32, #tpu.memory_space<vmem>>, vector<1x2x128xf32>
    %585 = vector.shape_cast %584 : vector<1x2x128xf32> to vector<2x128xf32>
    %586 = vector.shape_cast %582 : vector<2x128xf32> to vector<1x2x128xf32>
    tpu.vector_store %arg6[%583, %c0_125, %c0_126], %586 {strides = array<i32>} : memref<16x2x128xf32, #tpu.memory_space<vmem>>, vector<1x2x128xf32>,
    %c14_i32 = arith.constant 14 : i32
    %587 = arith.index_cast %c14_i32 : i32 to index
    %c0_127 = arith.constant 0 : index
    %c0_128 = arith.constant 0 : index
    %588 = vector.load %arg7[%587, %c0_127, %c0_128] : memref<16x2x512xf32, #tpu.memory_space<vmem>>, vector<1x2x512xf32>
    %589 = vector.shape_cast %588 : vector<1x2x512xf32> to vector<2x512xf32>
    %590 = arith.truncf %576 : vector<2x128xf32> to vector<2x128xbf16>
    %cst_129 = arith.constant dense<0.000000e+00> : vector<2x512xf32>
    %591 = tpu.matmul %590, %10, %cst_129 {dimension_numbers = #tpu.dot_dimension_numbers<[1], [0], [0], [1], [0, 0, 1, 1], [], []>} : vector<2x128xbf16>, vector<128x512xbf16>, vector<2x512xf32> -> vector<2x512xf32>
    %592 = arith.addf %589, %591 : vector<2x512xf32>
    %593 = vector.extract_strided_slice %592 {offsets = [0, 0], sizes = [2, 128], strides = [1, 1]} : vector<2x512xf32> to vector<2x128xf32>
    %594 = arith.negf %593 : vector<2x128xf32>
    %595 = math.exp %594 : vector<2x128xf32>
    %cst_130 = arith.constant 1.000000e+00 : f32
    %596 = vector.broadcast %cst_130 : f32 to vector<2x128xf32>
    %597 = arith.addf %596, %595 : vector<2x128xf32>
    %598 = arith.divf %596, %597 : vector<2x128xf32>
    %599 = vector.extract_strided_slice %592 {offsets = [0, 128], sizes = [2, 128], strides = [1, 1]} : vector<2x512xf32> to vector<2x128xf32>
    %600 = arith.negf %599 : vector<2x128xf32>
    %601 = math.exp %600 : vector<2x128xf32>
    %cst_131 = arith.constant 1.000000e+00 : f32
    %602 = vector.broadcast %cst_131 : f32 to vector<2x128xf32>
    %603 = arith.addf %602, %601 : vector<2x128xf32>
    %604 = arith.divf %602, %603 : vector<2x128xf32>
    %605 = vector.extract_strided_slice %592 {offsets = [0, 256], sizes = [2, 128], strides = [1, 1]} : vector<2x512xf32> to vector<2x128xf32>
    %606 = math.tanh %605 : vector<2x128xf32>
    %607 = vector.extract_strided_slice %592 {offsets = [0, 384], sizes = [2, 128], strides = [1, 1]} : vector<2x512xf32> to vector<2x128xf32>
    %608 = arith.negf %607 : vector<2x128xf32>
    %609 = math.exp %608 : vector<2x128xf32>
    %cst_132 = arith.constant 1.000000e+00 : f32
    %610 = vector.broadcast %cst_132 : f32 to vector<2x128xf32>
    %611 = arith.addf %610, %609 : vector<2x128xf32>
    %612 = arith.divf %610, %611 : vector<2x128xf32>
    %613 = arith.mulf %604, %574 : vector<2x128xf32>
    %614 = arith.mulf %598, %606 : vector<2x128xf32>
    %615 = arith.addf %613, %614 : vector<2x128xf32>
    %616 = math.tanh %615 : vector<2x128xf32>
    %617 = arith.mulf %612, %616 : vector<2x128xf32>
    %618 = vector.broadcast %c14_i32 : i32 to vector<2x1xi32>
    %619 = arith.cmpi sgt, %9, %618 : vector<2x1xi32>
    %620 = arith.extui %619 : vector<2x1xi1> to vector<2x1xi32>
    %621 = arith.sitofp %620 : vector<2x1xi32> to vector<2x1xf32>
    %622 = vector.broadcast %621 : vector<2x1xf32> to vector<2x128xf32>
    %623 = arith.mulf %617, %622 : vector<2x128xf32>
    %624 = arith.index_cast %c14_i32 : i32 to index
    %c0_133 = arith.constant 0 : index
    %c0_134 = arith.constant 0 : index
    %625 = vector.load %arg6[%624, %c0_133, %c0_134] : memref<16x2x128xf32, #tpu.memory_space<vmem>>, vector<1x2x128xf32>
    %626 = vector.shape_cast %625 : vector<1x2x128xf32> to vector<2x128xf32>
    %627 = vector.shape_cast %623 : vector<2x128xf32> to vector<1x2x128xf32>
    tpu.vector_store %arg6[%624, %c0_133, %c0_134], %627 {strides = array<i32>} : memref<16x2x128xf32, #tpu.memory_space<vmem>>, vector<1x2x128xf32>,
    %c15_i32 = arith.constant 15 : i32
    %628 = arith.index_cast %c15_i32 : i32 to index
    %c0_135 = arith.constant 0 : index
    %c0_136 = arith.constant 0 : index
    %629 = vector.load %arg7[%628, %c0_135, %c0_136] : memref<16x2x512xf32, #tpu.memory_space<vmem>>, vector<1x2x512xf32>
    %630 = vector.shape_cast %629 : vector<1x2x512xf32> to vector<2x512xf32>
    %631 = arith.truncf %617 : vector<2x128xf32> to vector<2x128xbf16>
    %cst_137 = arith.constant dense<0.000000e+00> : vector<2x512xf32>
    %632 = tpu.matmul %631, %10, %cst_137 {dimension_numbers = #tpu.dot_dimension_numbers<[1], [0], [0], [1], [0, 0, 1, 1], [], []>} : vector<2x128xbf16>, vector<128x512xbf16>, vector<2x512xf32> -> vector<2x512xf32>
    %633 = arith.addf %630, %632 : vector<2x512xf32>
    %634 = vector.extract_strided_slice %633 {offsets = [0, 0], sizes = [2, 128], strides = [1, 1]} : vector<2x512xf32> to vector<2x128xf32>
    %635 = arith.negf %634 : vector<2x128xf32>
    %636 = math.exp %635 : vector<2x128xf32>
    %cst_138 = arith.constant 1.000000e+00 : f32
    %637 = vector.broadcast %cst_138 : f32 to vector<2x128xf32>
    %638 = arith.addf %637, %636 : vector<2x128xf32>
    %639 = arith.divf %637, %638 : vector<2x128xf32>
    %640 = vector.extract_strided_slice %633 {offsets = [0, 128], sizes = [2, 128], strides = [1, 1]} : vector<2x512xf32> to vector<2x128xf32>
    %641 = arith.negf %640 : vector<2x128xf32>
    %642 = math.exp %641 : vector<2x128xf32>
    %cst_139 = arith.constant 1.000000e+00 : f32
    %643 = vector.broadcast %cst_139 : f32 to vector<2x128xf32>
    %644 = arith.addf %643, %642 : vector<2x128xf32>
    %645 = arith.divf %643, %644 : vector<2x128xf32>
    %646 = vector.extract_strided_slice %633 {offsets = [0, 256], sizes = [2, 128], strides = [1, 1]} : vector<2x512xf32> to vector<2x128xf32>
    %647 = math.tanh %646 : vector<2x128xf32>
    %648 = vector.extract_strided_slice %633 {offsets = [0, 384], sizes = [2, 128], strides = [1, 1]} : vector<2x512xf32> to vector<2x128xf32>
    %649 = arith.negf %648 : vector<2x128xf32>
    %650 = math.exp %649 : vector<2x128xf32>
    %cst_140 = arith.constant 1.000000e+00 : f32
    %651 = vector.broadcast %cst_140 : f32 to vector<2x128xf32>
    %652 = arith.addf %651, %650 : vector<2x128xf32>
    %653 = arith.divf %651, %652 : vector<2x128xf32>
    %654 = arith.mulf %645, %615 : vector<2x128xf32>
    %655 = arith.mulf %639, %647 : vector<2x128xf32>
    %656 = arith.addf %654, %655 : vector<2x128xf32>
    %657 = math.tanh %656 : vector<2x128xf32>
    %658 = arith.mulf %653, %657 : vector<2x128xf32>
    %659 = vector.broadcast %c15_i32 : i32 to vector<2x1xi32>
    %660 = arith.cmpi sgt, %9, %659 : vector<2x1xi32>
    %661 = arith.extui %660 : vector<2x1xi1> to vector<2x1xi32>
    %662 = arith.sitofp %661 : vector<2x1xi32> to vector<2x1xf32>
    %663 = vector.broadcast %662 : vector<2x1xf32> to vector<2x128xf32>
    %664 = arith.mulf %658, %663 : vector<2x128xf32>
    %665 = arith.index_cast %c15_i32 : i32 to index
    %c0_141 = arith.constant 0 : index
    %c0_142 = arith.constant 0 : index
    %666 = vector.load %arg6[%665, %c0_141, %c0_142] : memref<16x2x128xf32, #tpu.memory_space<vmem>>, vector<1x2x128xf32>
    %667 = vector.shape_cast %666 : vector<1x2x128xf32> to vector<2x128xf32>
    %668 = vector.shape_cast %664 : vector<2x128xf32> to vector<1x2x128xf32>
    tpu.vector_store %arg6[%665, %c0_141, %c0_142], %668 {strides = array<i32>} : memref<16x2x128xf32, #tpu.memory_space<vmem>>, vector<1x2x128xf32>,
    %c16_i32 = arith.constant 16 : i32
    return
  }
  func.func @transform_0(%arg0: i32) -> (i32, i32, i32) {
    %c0_i32 = arith.constant 0 : i32
    %c0_i32_0 = arith.constant 0 : i32
    %c0_i32_1 = arith.constant 0 : i32
    return %c0_i32, %arg0, %c0_i32_0 : i32, i32, i32
  }
  func.func @transform_1(%arg0: i32) -> (i32, i32) {
    %c0_i32 = arith.constant 0 : i32
    %c0_i32_0 = arith.constant 0 : i32
    %c0_i32_1 = arith.constant 0 : i32
    return %c0_i32, %c0_i32_0 : i32, i32
  }
  func.func @transform_2(%arg0: i32) -> (i32, i32) {
    %c0_i32 = arith.constant 0 : i32
    %c0_i32_0 = arith.constant 0 : i32
    %c0_i32_1 = arith.constant 0 : i32
    return %c0_i32, %c0_i32_0 : i32, i32
  }
  func.func @transform_3(%arg0: i32) -> (i32, i32) {
    %c0_i32 = arith.constant 0 : i32
    %c0_i32_0 = arith.constant 0 : i32
    %c0_i32_1 = arith.constant 0 : i32
    return %c0_i32, %c0_i32_0 : i32, i32
  }
  func.func @transform_4(%arg0: i32) -> (i32, i32) {
    %c0_i32 = arith.constant 0 : i32
    %c0_i32_0 = arith.constant 0 : i32
    return %arg0, %c0_i32 : i32, i32
  }
  func.func @transform_5(%arg0: i32) -> (i32, i32, i32) {
    %c0_i32 = arith.constant 0 : i32
    %c0_i32_0 = arith.constant 0 : i32
    %c0_i32_1 = arith.constant 0 : i32
    return %c0_i32, %arg0, %c0_i32_0 : i32, i32, i32
  }
}

</mosaic_0001>

<bundles_post_ra>
// kernel: tile.8
= control target key start
LH: loop header
LB: loop body
LE: loop exit
PB: predicated region body
PF: predicated region fallthrough
CT: control target
= control target key end

     0   :  { %s22_s0 = inlined_call_operand.vmem [shape: s32[2], index: 0, kind: input, shape index: {}]   ;;  %s23_s1 = inlined_call_operand.vmem [shape: s32[8,2], index: 1, kind: output, shape index: {}]  }
   0x1   :  { %v4_v0 = vld [vmem:[%s22_s0] ss:$0 sm:$0xff] }
   0x2   :  { %5 = vst [vmem:[%s23_s1] sm:$0xff] %v4_v0 }

// kernel: tile.0
= control target key start
LH: loop header
LB: loop body
LE: loop exit
PB: predicated region body
PF: predicated region fallthrough
CT: control target
= control target key end

     0   :  { %vm3_vm0 = vcmask 7168   ;;  %s13_s9 = smov 127   ;;  %s33_s0 = inlined_call_operand.vmem [shape: s32[8,2], index: 0, kind: input, shape index: {}]   ;;  %s34_s1 = inlined_call_operand.vmem [shape: s32[16,1], index: 1, kind: output, shape index: {}]  }
   0x1   :  { %v2_v0 = vld [vmem:[%s33_s0] sm:$0xff]  }
   0x2   :  { %4 = vst.msk [vmem:[%s34_s1] ss:$2 sm:$0xff] %vm3_vm0, %v2_v0   ;;  %6 = vrot.lane.b32.xlu0 %v2_v0, %s13_s9 }
  0x74   :  { %v7_v1 = vpop.permute.xlu0 %6  }
  0x75   :  { %11 = vst.msk [vmem:[%s34_s1 + $0x1] ss:$2 sm:$0xff] %vm3_vm0, %v7_v1  }

// kernel: sdgcn_forward.5
= control target key start
LH: loop header
LB: loop body
LE: loop exit
PB: predicated region body
PF: predicated region fallthrough
CT: control target
= control target key end

     0   :  { %s1469_s24 = smov 0   ;;  %s1471_s25 = smov 0   ;;  %s1953_s0 = inlined_call_operand.vmem [shape: f32[8,8,2,128], index: 0, kind: input, shape index: {}]   ;;  %s1954_s1 = inlined_call_operand.vmem [shape: f32[8,16,2], index: 1, kind: input, shape index: {}]   ;;  %s1955_s2 = inlined_call_operand.vmem [shape: s32[8,1,2], index: 2, kind: input, shape index: {}]   ;;  %s1956_s3 = inlined_call_operand.vmem [shape: f32[16,2,128], index: 3, kind: input, shape index: {}]   ;;  %s1957_s4 = inlined_call_operand.vmem [shape: f32[128,128], index: 4, kind: input, shape index: {}]   ;;  %s1958_s5 = inlined_call_operand.vmem [shape: s32[1,2], index: 5, kind: input, shape index: {}]   ;;  %s1959_s6 = inlined_call_operand.vmem [shape: f32[2,1], index: 6, kind: input, shape index: {}]   ;;  %s1960_s7 = inlined_call_operand.vmem [shape: f32[2,1024], index: 7, kind: output, shape index: {}]  }
   0x1   :  { %s1473_s26 = smov 0  }
   0x2 LB: > { %s1242_s27 = sadd.s32 4294967295, %s1424_s26   ;;  %s1486_s28 = sadd.s32 1, %s1424_s26   ;;  %s1424_s26 = sphi %s1473_s26, %s1963_s26   ;;  %s1420_s25 = sphi %s1471_s25, %s1962_s25   ;;  %s1416_s24 = sphi %s1469_s24, %s1961_s24  }
   0x3   : > { %s21_s29 = ssub.s32 %s1424_s26, %s1486_s28  ;;  %s24_s30 = sadd.s32 1, %s1420_s25 }
   0x4   : > { %p22_p0 = scmp.eq.s32.totalorder %s21_s29, 0  ;;  %p31_p1 = scmp.ne.s32.totalorder %s1420_s25, %s1416_s24 }
   0x5   : > { %p32_p2 = scmp.eq.s32.totalorder %s1424_s26, 0  ;;  %p1245_p4 = scmp.ge.s32.totalorder %s1424_s26, 8 }
   0x6   : > { %s1495_s8 = scalar_select %p22_p0, %s1420_s25, %s24_s30  }
   0x7   : > { %p33_p3 = por %p32_p2, %p31_p1  ;;  %231 = sbr.rel (%p1245_p4) target bundleno = 21 (0x15), region = 32 }
   0xc   : > { %234 = sbr.rel (!%p33_p3) target bundleno = 21 (0x15), region = 36  ;;  %s236_s9 = sand.u32 (%p33_p3), 1, %s1420_s25  }
   0xd   : > { %s1247_s10 = sshll.u32 (%p33_p3), %s1424_s26, 1  ;;  %s1246_s11 = sshll.u32 (%p33_p3), %s236_s9, 4 }
   0xe   : > { %s240_s14 = scalar_lea.vmem (%p33_p3), %s1953_s0, %s1247_s10  ;;  %s238_s15 = scalar_lea.vmem (%p33_p3), [#allocation2], %s1246_s11 }
   0xf   : > { %v257_v0 = vld [vmem:[%s240_s14] sm:$0x3] (%p33_p3)  ;;  %v259_v1 = vld [vmem:[%s240_s14 + $0x10] sm:$0x3] (%p33_p3) }
  0x10   : > { %258 = vst [vmem:[%s238_s15] sm:$0x3] (%p33_p3), %v257_v0  ;;  %260 = vst [vmem:[%s238_s15 + $0x2] sm:$0x3] (%p33_p3), %v259_v1  ;;  %v261_v2 = vld [vmem:[%s240_s14 + $0x20] sm:$0x3] (%p33_p3) }
  0x11   : > { %v263_v3 = vld [vmem:[%s240_s14 + $0x30] sm:$0x3]  ;;  %v265_v4 = vld [vmem:[%s240_s14 + $0x40] sm:$0x3]  ;;  %262 = vst [vmem:[%s238_s15 + $0x4] sm:$0x3] %v261_v2 }
  0x12   : > { %264 = vst [vmem:[%s238_s15 + $0x6] sm:$0x3] %v263_v3  ;;  %266 = vst [vmem:[%s238_s15 + $0x8] sm:$0x3] %v265_v4  ;;  %v267_v5 = vld [vmem:[%s240_s14 + $0x50] sm:$0x3] }
  0x13   : > { %v269_v6 = vld [vmem:[%s240_s14 + $0x60] sm:$0x3]  ;;  %v271_v7 = vld [vmem:[%s240_s14 + $0x70] sm:$0x3]  ;;  %268 = vst [vmem:[%s238_s15 + $0xa] sm:$0x3] %v267_v5 }
  0x14   : > { %270 = vst [vmem:[%s238_s15 + $0xc] sm:$0x3] %v269_v6  ;;  %272 = vst [vmem:[%s238_s15 + $0xe] sm:$0x3] %v271_v7 }
  0x15 PF: > { %p1248_p5 = scmp.ge.s32.totalorder %s1424_s26, 1  ;;  %p325_p6 = scmp.lt.s32.totalorder %s1424_s26, 9 }
  0x17   : > { %p326_p7 = pnand %p1248_p5, %p325_p6 }
  0x18   : > { %s332_s14 = sand.u32 (!%p326_p7), 1, %s1416_s24   ;;  %p370_p8 = scmp.lt.s32.totalorder (!%p326_p7), %s1242_s27, 7 }
  0x19   : > { %329 = sbr.rel (%p326_p7) target bundleno = 1321 (0x529), region = 85  ;;  %s1249_s15 = sshll.u32 (!%p326_p7), %s332_s14, 4 }
  0x1a   : > { %s334_s16 = scalar_lea.vmem (!%p326_p7), [#allocation2], %s1249_s15 }
  0x1e   : > { %v457_v8 = vld [vmem:[%s1959_s6] sm:$0x3]  ;;  %v424_v9 = vld [vmem:[%s1957_s4 + $0x78] sm:$0xff]  ;;  %v1426_v10 = vmov 0   ;;  %v1427_v11 = vmov 0.0   ;;  %v423_v12 = vld [vmem:[%s1957_s4 + $0x70] sm:$0xff] }
  0x1f   : > { %1389 = vset.pattern.permute.xlu0 %v1426_v10  ;;  %1390 = vrcp.f32 %v457_v8  ;;  %1292 = vmatprep.subr.mxu0 %v1427_v11  ;;  %v422_v13 = vld [vmem:[%s1957_s4 + $0x68] sm:$0xff]  ;;  %v421_v14 = vld [vmem:[%s1957_s4 + $0x60] sm:$0xff]  ;;  %v420_v16 = vld [vmem:[%s1957_s4 + $0x58] sm:$0xff]  ;;  %vm1428_vm0 = vmmov 0   ;;  %vm425_vm1 = vcmask 1041408   ;;  %s1965_s27 = smov (!%p370_p8, %s1242_s27), 7 }
  0x20   : > { %1293 = vmatpush3.xpose.msra.mxu0 %v424_v9  ;;  %1327 = vmatprep.subr.mxu1 %v1427_v11  ;;  %v419_v17 = vld [vmem:[%s1957_s4 + $0x50] sm:$0xff]  ;;  %v418_v18 = vld [vmem:[%s1957_s4 + $0x48] sm:$0xff]  ;;  %v417_v19 = vld [vmem:[%s1957_s4 + $0x40] sm:$0xff]  ;;  %vm616_vm2 = vcmask 1041409   ;;  %vm618_vm3 = vcmask 1042434   ;;  %s377_s18 = scalar_lea.vmem %s1955_s2, %s1965_s27  ;;  %vm620_vm4 = vcmask 1043459  }
  0x21   : > { %1294 = vmatprep.subr.mxu0 %v1427_v11  ;;  %1328 = vmatpush3.xpose.msra.mxu1 %v424_v9  ;;  %v416_v20 = vld [vmem:[%s1957_s4 + $0x38] sm:$0xff]  ;;  %v415_v21 = vld [vmem:[%s1957_s4 + $0x30] sm:$0xff]  ;;  %v414_v22 = vld [vmem:[%s1957_s4 + $0x28] sm:$0xff]  ;;  %vm622_vm5 = vcmask 1044484   ;;  %vm624_vm6 = vcmask 1045509   ;;  %vm626_vm7 = vcmask 1046534  }
  0x22   : > { %1329 = vmatprep.subr.mxu1 %v1427_v11  ;;  %1324 = vmatprep.mubr.msk.f32.mxu0 %vm1428_vm0, %v1427_v11  ;;  %v413_v23 = vld [vmem:[%s1957_s4 + $0x20] sm:$0xff]  ;;  %v412_v24 = vld [vmem:[%s1957_s4 + $0x18] sm:$0xff]  ;;  %v411_v25 = vld [vmem:[%s1957_s4 + $0x10] sm:$0xff]  ;;  %vm628_vm8 = vcmask 1047559   ;;  %vm632_vm10 = vcmask 15360   ;;  %s1257_s26 = sshll.u32 %s1965_s27, 4 }
  0x23   : > { %1359 = vmatprep.mubr.msk.f32.mxu1 %vm1428_vm0, %v1427_v11  ;;  %v410_v26 = vld [vmem:[%s1957_s4 + $0x8] sm:$0xff]  ;;  %v409_v27 = vld [vmem:[%s1957_s4] sm:$0xff]  ;;  %v1649_v50 = vld [vmem:[%s1956_s3 + $0x10] sm:$0x3]  ;;  %s374_s21 = scalar_lea.vmem %s1954_s1, %s1257_s26  ;;  %s1252_s29 = sshll.u32 %s1965_s27, 1 }
  0x24   : > { %1295 = vmatpush3.xpose.msra.mxu0 %v423_v12  ;;  %v1593_v28 = vld [vmem:[%s1956_s3] sm:$0x3]  ;;  %v1598_v29 = vld [vmem:[%s1956_s3 + $0x2] sm:$0x3]  ;;  %v1607_v32 = vld [vmem:[%s1956_s3 + $0x4] sm:$0x3]  ;;  %s381_s10 = scalar_lea.vmem %s1960_s7, %s1252_s29 }
  0x25   : > { %1296 = vmatprep.subr.mxu0 %v1427_v11  ;;  %1330 = vmatpush3.xpose.msra.mxu1 %v423_v12  ;;  %v426_v30 = vsel %vm425_vm1, %v1593_v28, 0.0  ;;  %v427_v31 = vsel %vm425_vm1, %v1598_v29, 0.0  ;;  %v429_v34 = vsel %vm425_vm1, %v1607_v32, 0.0  ;;  %v1614_v35 = vld [vmem:[%s1956_s3 + $0x6] sm:$0x3]  ;;  %v441_v52 = vsel %vm425_vm1, %v1649_v50, 0.0 }
  0x26   : > { %1331 = vmatprep.subr.mxu1 %v1427_v11  ;;  %v428_v33 = vadd.f32 %v427_v31, %v426_v30  ;;  %v431_v37 = vsel %vm425_vm1, %v1614_v35, 0.0  ;;  %v1621_v38 = vld [vmem:[%s1956_s3 + $0x8] sm:$0x3]  ;;  %v1628_v41 = vld [vmem:[%s1956_s3 + $0xa] sm:$0x3] }
  0x27   : > { %v433_v40 = vsel %vm425_vm1, %v1621_v38, 0.0  ;;  %v435_v43 = vsel %vm425_vm1, %v1628_v41, 0.0  ;;  %v1635_v44 = vld [vmem:[%s1956_s3 + $0xc] sm:$0x3]  ;;  %v1642_v47 = vld [vmem:[%s1956_s3 + $0xe] sm:$0x3] }
  0x28   : > { %1297 = vmatpush3.xpose.msra.mxu0 %v422_v13  ;;  %v430_v36 = vadd.f32 %v429_v34, %v428_v33  ;;  %v437_v46 = vsel %vm425_vm1, %v1635_v44, 0.0  ;;  %v439_v49 = vsel %vm425_vm1, %v1642_v47, 0.0  ;;  %v1656_v53 = vld [vmem:[%s1956_s3 + $0x12] sm:$0x3]  ;;  %v1663_v56 = vld [vmem:[%s1956_s3 + $0x14] sm:$0x3] }
  0x29   : > { %1298 = vmatprep.subr.mxu0 %v1427_v11  ;;  %1332 = vmatpush3.xpose.msra.mxu1 %v422_v13  ;;  %v443_v55 = vsel %vm425_vm1, %v1656_v53, 0.0  ;;  %v445_v58 = vsel %vm425_vm1, %v1663_v56, 0.0  ;;  %v1670_v59 = vld [vmem:[%s1956_s3 + $0x16] sm:$0x3]  ;;  %v1677_v62 = vld [vmem:[%s1956_s3 + $0x18] sm:$0x3] }
  0x2a   : > { %1333 = vmatprep.subr.mxu1 %v1427_v11  ;;  %v432_v39 = vadd.f32 %v431_v37, %v430_v36  ;;  %v447_v61 = vsel %vm425_vm1, %v1670_v59, 0.0  ;;  %v449_v0 = vsel %vm425_vm1, %v1677_v62, 0.0  ;;  %v1684_v1 = vld [vmem:[%s1956_s3 + $0x1a] sm:$0x3]  ;;  %v1691_v4 = vld [vmem:[%s1956_s3 + $0x1c] sm:$0x3] }
  0x2b   : > { %v451_v3 = vsel %vm425_vm1, %v1684_v1, 0.0  ;;  %v453_v6 = vsel %vm425_vm1, %v1691_v4, 0.0  ;;  %v1698_v7 = vld [vmem:[%s1956_s3 + $0x1e] sm:$0x3]  ;;  %v1703_v13 = vld [vmem:[%s334_s16 + $0x2] sm:$0x3] }
  0x2c   : > { %v1391_v15 = vpop.eup %1390  ;;  %1299 = vmatpush3.xpose.msra.mxu0 %v421_v14  ;;  %v434_v42 = vadd.f32 %v433_v40, %v432_v39  ;;  %v455_v9 = vsel %vm425_vm1, %v1698_v7, 0.0  ;;  %v1722_v31 = vld [vmem:[%s334_s16 + $0xa] sm:$0x3]  ;;  %v1726_v36 = vld [vmem:[%s334_s16 + $0xc] sm:$0x3] }
  0x2d   : > { %461 = vperm.xlu0 %1389, %v1391_v15   ;;  %1300 = vmatprep.subr.mxu0 %v1427_v11  ;;  %v1730_v40 = vld [vmem:[%s334_s16 + $0xe] sm:$0x3] }
  0x2e   : > { %1334 = vmatpush3.xpose.msra.mxu1 %v421_v14  ;;  %v436_v45 = vadd.f32 %v435_v43, %v434_v42  ;;  %v1705_v14 = vld [vmem:[%s334_s16] sm:$0x3] }
  0x2f   : > { %1335 = vmatprep.subr.mxu1 %v1427_v11 }
  0x30   : > { %1301 = vmatpush3.xpose.msra.mxu0 %v420_v16  ;;  %v438_v48 = vadd.f32 %v437_v46, %v436_v45 }
  0x31   : > { %1302 = vmatprep.subr.mxu0 %v1427_v11 }
  0x32   : > { %1336 = vmatpush3.xpose.msra.mxu1 %v420_v16  ;;  %v440_v51 = vadd.f32 %v439_v49, %v438_v48  ;;  %v1707_v16 = vld [vmem:[%s334_s16 + $0x4] sm:$0x3]  ;;  %v567_v49 = vlaneseq }
  0x33   : > { %1337 = vmatprep.subr.mxu1 %v1427_v11 }
  0x34   : > { %1303 = vmatpush3.xpose.msra.mxu0 %v419_v17  ;;  %v442_v54 = vadd.f32 %v441_v52, %v440_v51  ;;  %v1735_v52 = vshrl.u32 %v567_v49, 7 }
  0x35   : > { %1304 = vmatprep.subr.mxu0 %v1427_v11 }
  0x36   : > { %1338 = vmatpush3.xpose.msra.mxu1 %v419_v17  ;;  %v444_v57 = vadd.f32 %v443_v55, %v442_v54  ;;  %v583_v54 = vand.u32 127, %v567_v49 }
  0x37   : > { %1339 = vmatprep.subr.mxu1 %v1427_v11 }
  0x38   : > { %1305 = vmatpush3.xpose.msra.mxu0 %v418_v18  ;;  %v446_v60 = vadd.f32 %v445_v58, %v444_v57  ;;  %v1740_v57 = vsub.s32 %v583_v54, %v1735_v52 }
  0x39   : > { %1306 = vmatprep.subr.mxu0 %v1427_v11 }
  0x3a   : > { %1340 = vmatpush3.xpose.msra.mxu1 %v418_v18  ;;  %v448_v63 = vadd.f32 %v447_v61, %v446_v60 }
  0x3b   : > { %1341 = vmatprep.subr.mxu1 %v1427_v11 }
  0x3c   : > { %1307 = vmatpush3.xpose.msra.mxu0 %v417_v19  ;;  %v450_v2 = vadd.f32 %v449_v0, %v448_v63 }
  0x3d   : > { %1308 = vmatprep.subr.mxu0 %v1427_v11 }
  0x3e   : > { %1342 = vmatpush3.xpose.msra.mxu1 %v417_v19  ;;  %v452_v5 = vadd.f32 %v451_v3, %v450_v2 }
  0x3f   : > { %1343 = vmatprep.subr.mxu1 %v1427_v11 }
  0x40   : > { %1309 = vmatpush3.xpose.msra.mxu0 %v416_v20  ;;  %v454_v8 = vadd.f32 %v453_v6, %v452_v5 }
  0x41   : > { %1310 = vmatprep.subr.mxu0 %v1427_v11 }
  0x42   : > { %1344 = vmatpush3.xpose.msra.mxu1 %v416_v20  ;;  %v456_v10 = vadd.f32 %v455_v9, %v454_v8 }
  0x43   : > { %1345 = vmatprep.subr.mxu1 %v1427_v11 }
  0x44   : > { %1311 = vmatpush3.xpose.msra.mxu0 %v415_v21 }
  0x45   : > { %1312 = vmatprep.subr.mxu0 %v1427_v11 }
  0x46   : > { %1346 = vmatpush3.xpose.msra.mxu1 %v415_v21 }
  0x47   : > { %1347 = vmatprep.subr.mxu1 %v1427_v11 }
  0x48   : > { %1313 = vmatpush3.xpose.msra.mxu0 %v414_v22 }
  0x49   : > { %1314 = vmatprep.subr.mxu0 %v1427_v11 }
  0x4a   : > { %1348 = vmatpush3.xpose.msra.mxu1 %v414_v22 }
  0x4b   : > { %1349 = vmatprep.subr.mxu1 %v1427_v11 }
  0x4c   : > { %1315 = vmatpush3.xpose.msra.mxu0 %v413_v23 }
  0x4d   : > { %1316 = vmatprep.subr.mxu0 %v1427_v11 }
  0x4e   : > { %1350 = vmatpush3.xpose.msra.mxu1 %v413_v23  ;;  %v1714_v23 = vld [vmem:[%s334_s16 + $0x6] sm:$0x3] }
  0x4f   : > { %1351 = vmatprep.subr.mxu1 %v1427_v11 }
  0x50   : > { %1317 = vmatpush3.xpose.msra.mxu0 %v412_v24 }
  0x51   : > { %1318 = vmatprep.subr.mxu0 %v1427_v11 }
  0x52   : > { %1352 = vmatpush3.xpose.msra.mxu1 %v412_v24 }
  0x53   : > { %1353 = vmatprep.subr.mxu1 %v1427_v11 }
  0x54   : > { %1319 = vmatpush3.xpose.msra.mxu0 %v411_v25 }
  0x55   : > { %1320 = vmatprep.subr.mxu0 %v1427_v11 }
  0x56   : > { %1354 = vmatpush3.xpose.msra.mxu1 %v411_v25 }
  0x57   : > { %1355 = vmatprep.subr.mxu1 %v1427_v11 }
  0x58   : > { %1321 = vmatpush3.xpose.msra.mxu0 %v410_v26 }
  0x59   : > { %1322 = vmatprep.subr.mxu0 %v1427_v11 }
  0x5a   : > { %1356 = vmatpush3.xpose.msra.mxu1 %v410_v26  ;;  %v1718_v26 = vld [vmem:[%s334_s16 + $0x8] sm:$0x3] }
  0x5b   : > { %1357 = vmatprep.subr.mxu1 %v1427_v11 }
  0x5c   : > { %1323 = vmatpush3.xpose.msra.mxu0 %v409_v27 }
  0x5e   : > { %1358 = vmatpush3.xpose.msra.mxu1 %v409_v27 }
  0xa8   : > { %v462_v11 = vpop.permute.xlu0 %461 }
  0xa9   : > { %v464_v12 = vmul.f32 %v462_v11, %v456_v10  ;;  %v1253_v11 = vld [vmem:[%s377_s18] ss:$0 sm:$0xff] }
  0xaa   : > { %vm573_vm9 = vcmp.lt.s32.totalorder %v1735_v52, %v1253_v11 }
  0xab   : > { %1325 = vmatmul.mubr.f32.vlgmr.msra.gmra.mxu0 %v464_v12 }
 0x16b   : > { %v531_v15 = vpop.f32.mrf.mxu0 }
 0x16c   : > { %v536_v17 = vmul.f32 %v531_v15, %v1703_v13  ;;  %v535_v18 = vmul.f32 %v531_v15, %v1705_v14  ;;  %v537_v22 = vmul.f32 %v531_v15, %v1707_v16  ;;  %v538_v25 = vmul.f32 %v531_v15, %v1714_v23 }
 0x16d   : > { %v1326_v19 = vpop.f32.mrf.mxu0  ;;  %v539_v30 = vmul.f32 %v531_v15, %v1718_v26  ;;  %v540_v34 = vmul.f32 %v531_v15, %v1722_v31  ;;  %v541_v39 = vmul.f32 %v531_v15, %v1726_v36  ;;  %v542_v43 = vmul.f32 %v531_v15, %v1730_v40 }
 0x16e   : > { %v546_v20 = vsel %vm425_vm1, %v536_v17, 0.0  ;;  %v543_v21 = vsel %vm425_vm1, %v535_v18, 0.0  ;;  %v549_v24 = vsel %vm425_vm1, %v537_v22, 0.0  ;;  %v552_v27 = vsel %vm425_vm1, %v538_v25, 0.0 }
 0x16f   : > { %547 = vadd.xlane.f32.xlu1 %v546_v20  ;;  %544 = vadd.xlane.f32.xlu0 %v543_v21  ;;  %v555_v33 = vsel %vm425_vm1, %v539_v30, 0.0  ;;  %v558_v37 = vsel %vm425_vm1, %v540_v34, 0.0  ;;  %v561_v42 = vsel %vm425_vm1, %v541_v39, 0.0  ;;  %v564_v45 = vsel %vm425_vm1, %v542_v43, 0.0 }
 0x173   : > { %550 = vadd.xlane.f32.xlu1 %v549_v24 }
 0x177   : > { %553 = vadd.xlane.f32.xlu1 %v552_v27 }
 0x17b   : > { %556 = vadd.xlane.f32.xlu1 %v555_v33 }
 0x17f   : > { %559 = vadd.xlane.f32.xlu1 %v558_v37 }
 0x183   : > { %562 = vadd.xlane.f32.xlu1 %v561_v42 }
 0x187   : > { %565 = vadd.xlane.f32.xlu1 %v564_v45 }
 0x1f8   : > { %v548_v46 = vpop.xlane.xlu1 %547  ;;  %v545_v58 = vpop.xlane.xlu0 %544 }
 0x1f9   : > { %v591_v61 = vrot.slane %v548_v46, %v1740_v57  ;;  %v587_v63 = vrot.slane %v545_v58, %v1740_v57  ;;  %v1769_v58 = vsub.s32 1, %v1735_v52 }
 0x1fb   : > { %v617_v6 = vsel %vm616_vm2, %v591_v61, %v587_v63 }
 0x1fc   : > { %v551_v48 = vpop.xlane.xlu1 %550 }
 0x1fd   : > { %v595_v0 = vrot.slane %v551_v48, %v1740_v57 }
 0x1ff   : > { %v619_v9 = vsel %vm618_vm3, %v595_v0, %v617_v6 }
 0x200   : > { %v554_v51 = vpop.xlane.xlu1 %553 }
 0x201   : > { %v599_v2 = vrot.slane %v554_v51, %v1740_v57 }
 0x203   : > { %v621_v12 = vsel %vm620_vm4, %v599_v2, %v619_v9  ;;  %v1785_v9 = vsub.s32 7, %v1735_v52 }
 0x204   : > { %v557_v55 = vpop.xlane.xlu1 %556 }
 0x205   : > { %v603_v3 = vrot.slane %v557_v55, %v1740_v57 }
 0x207   : > { %v623_v15 = vsel %vm622_vm5, %v603_v3, %v621_v12  ;;  %v1777_v3 = vsub.s32 5, %v1735_v52 }
 0x208   : > { %v560_v60 = vpop.xlane.xlu1 %559 }
 0x209   : > { %v607_v8 = vrot.slane %v560_v60, %v1740_v57  ;;  %v1772_v60 = vsub.s32 0, %v1735_v52 }
 0x20b   : > { %v625_v18 = vsel %vm624_vm6, %v607_v8, %v623_v15  ;;  %v1793_v15 = vsub.s32 4, %v1735_v52 }
 0x20c   : > { %v563_v5 = vpop.xlane.xlu1 %562 }
 0x20d   : > { %v611_v10 = vrot.slane %v563_v5, %v1740_v57  ;;  %v1780_v5 = vsub.s32 2, %v1735_v52 }
 0x20f   : > { %v627_v20 = vsel %vm626_vm7, %v611_v10, %v625_v18  ;;  %v1788_v10 = vsub.s32 3, %v1735_v52  ;;  %v1797_v18 = vsub.s32 6, %v1735_v52 }
 0x210   : > { %v566_v17 = vpop.xlane.xlu1 %565 }
 0x211   : > { %v615_v19 = vrot.slane %v566_v17, %v1740_v57 }
 0x213   : > { %v629_v21 = vsel %vm628_vm8, %v615_v19, %v627_v20 }
 0x214   : > { %v631_v22 = vsel %vm573_vm9, %v629_v21, -1e+30 }
 0x215   : > { %v633_v24 = vsel %vm632_vm10, %v631_v22, -inf }
 0x216   : > { %v634_v25 = vrot.slane %v633_v24, 4 }
 0x218   : > { %v635_v27 = vmax.f32 %v633_v24, %v634_v25 }
 0x21a   : > { %v636_v30 = vrot.slane %v635_v27, 2 }
 0x21c   : > { %v637_v33 = vmax.f32 %v635_v27, %v636_v30 }
 0x21e   : > { %v638_v34 = vrot.slane %v637_v33, 1 }
 0x220   : > { %v639_v37 = vmax.f32 %v637_v33, %v638_v34 }
 0x222   : > { %v640_v39 = vsub.f32 %v631_v22, %v639_v37 }
 0x224   : > { %v641_v42 = vmul.f32 1.442695, %v640_v39 }
 0x226   : > { %1392 = vpow2.f32 %v641_v42 }
 0x233   : > { %v1393_v43 = vpop.eup %1392 }
 0x234   : > { %v643_v45 = vsel %vm632_vm10, %v1393_v43, 0.0 }
 0x235   : > { %v644_v46 = vrot.slane %v643_v45, 4 }
 0x237   : > { %v645_v48 = vadd.f32 %v644_v46, %v643_v45 }
 0x239   : > { %v646_v49 = vrot.slane %v645_v48, 2 }
 0x23b   : > { %v647_v51 = vadd.f32 %v646_v49, %v645_v48 }
 0x23d   : > { %v648_v54 = vrot.slane %v647_v51, 1 }
 0x23f   : > { %v649_v55 = vadd.f32 %v648_v54, %v647_v51 }
 0x241   : > { %1394 = vrcp.f32 %v649_v55 }
 0x24e   : > { %v1395_v61 = vpop.eup %1394 }
 0x24f   : > { %v651_v63 = vmul.f32 %v1395_v61, %v1393_v43 }
 0x251   : > { %v662_v0 = vrot.slane %v651_v63, %v1769_v58  ;;  %v655_v2 = vrot.slane %v651_v63, %v1772_v60  ;;  %v690_v6 = vrot.slane %v651_v63, %v1777_v3  ;;  %v669_v8 = vrot.slane %v651_v63, %v1780_v5 }
 0x252   : > { %v704_v11 = vrot.slane %v651_v63, %v1785_v9  ;;  %v676_v12 = vrot.slane %v651_v63, %v1788_v10  ;;  %v683_v17 = vrot.slane %v651_v63, %v1793_v15  ;;  %v697_v19 = vrot.slane %v651_v63, %v1797_v18 }
 0x253   : > { %664 = vbcast.lane.b32.xlu0 %v662_v0, 256  ;;  %657 = vbcast.lane.b32.xlu1 %v655_v2, 256 }
 0x257   : > { %692 = vbcast.lane.b32.xlu0 %v690_v6, 256  ;;  %671 = vbcast.lane.b32.xlu1 %v669_v8, 256 }
 0x25b   : > { %706 = vbcast.lane.b32.xlu0 %v704_v11, 256  ;;  %678 = vbcast.lane.b32.xlu1 %v676_v12, 256 }
 0x25f   : > { %685 = vbcast.lane.b32.xlu1 %v683_v17, 256 }
 0x263   : > { %699 = vbcast.lane.b32.xlu1 %v697_v19, 256 }
 0x2c5   : > { %v665_v20 = vpop.permute.xlu0 %664  ;;  %v658_v21 = vpop.permute.xlu1 %657 }
 0x2c6   : > { %v709_v22 = vmul.f32 %v665_v20, %v1703_v13  ;;  %v708_v24 = vmul.f32 %v658_v21, %v1705_v14 }
 0x2c8   : > { %v717_v30 = vsel %vm425_vm1, %v709_v22, 0.0  ;;  %v716_v33 = vsel %vm425_vm1, %v708_v24, 0.0 }
 0x2c9   : > { %v672_v25 = vpop.permute.xlu1 %671  ;;  %v693_v34 = vpop.permute.xlu0 %692  ;;  %v718_v43 = vadd.f32 %v717_v30, %v716_v33 }
 0x2ca   : > { %v710_v27 = vmul.f32 %v672_v25, %v1707_v16  ;;  %v713_v14 = vmul.f32 %v693_v34, %v1722_v31 }
 0x2cc   : > { %v719_v39 = vsel %vm425_vm1, %v710_v27, 0.0  ;;  %v725_v61 = vsel %vm425_vm1, %v713_v14, 0.0 }
 0x2cd   : > { %v679_v37 = vpop.permute.xlu1 %678  ;;  %v720_v46 = vadd.f32 %v719_v39, %v718_v43  ;;  %v707_v16 = vpop.permute.xlu0 %706 }
 0x2ce   : > { %v711_v42 = vmul.f32 %v679_v37, %v1714_v23  ;;  %v715_v63 = vmul.f32 %v707_v16, %v1730_v40 }
 0x2d0   : > { %v721_v45 = vsel %vm425_vm1, %v711_v42, 0.0  ;;  %v729_v31 = vsel %vm425_vm1, %v715_v63, 0.0 }
 0x2d1   : > { %v686_v13 = vpop.permute.xlu1 %685  ;;  %v722_v49 = vadd.f32 %v721_v45, %v720_v46 }
 0x2d2   : > { %v712_v48 = vmul.f32 %v686_v13, %v1718_v26 }
 0x2d4   : > { %v723_v51 = vsel %vm425_vm1, %v712_v48, 0.0 }
 0x2d5   : > { %v724_v54 = vadd.f32 %v723_v51, %v722_v49  ;;  %v700_v55 = vpop.permute.xlu1 %699 }
 0x2d6   : > { %v714_v23 = vmul.f32 %v700_v55, %v1726_v36 }
 0x2d7   : > { %v726_v0 = vadd.f32 %v725_v61, %v724_v54 }
 0x2d8   : > { %v727_v2 = vsel %vm425_vm1, %v714_v23, 0.0 }
 0x2d9   : > { %v728_v6 = vadd.f32 %v727_v2, %v726_v0 }
 0x2db   : > { %v730_v8 = vadd.f32 %v729_v31, %v728_v6 }
 0x2dd   : > { %1360 = vmatmul.mubr.f32.vlgmr.msra.gmra.mxu1 %v730_v8 }
 0x39d   : > { %v797_v26 = vpop.f32.mrf.mxu1 }
 0x39e   : > { %v802_v11 = vmul.f32 %v797_v26, %v1598_v29  ;;  %v801_v12 = vmul.f32 %v797_v26, %v1593_v28  ;;  %v809_v36 = vmul.f32 %v797_v26, %v1649_v50  ;;  %v810_v20 = vmul.f32 %v797_v26, %v1656_v53 }
 0x39f   : > { %v1361_v17 = vpop.f32.mrf.mxu1  ;;  %v803_v24 = vmul.f32 %v797_v26, %v1607_v32  ;;  %v811_v25 = vmul.f32 %v797_v26, %v1663_v56  ;;  %v804_v33 = vmul.f32 %v797_v26, %v1614_v35  ;;  %v812_v34 = vmul.f32 %v797_v26, %v1670_v59 }
 0x3a0   : > { %v820_v19 = vsel %vm425_vm1, %v802_v11, 0.0  ;;  %v817_v40 = vsel %vm425_vm1, %v801_v12, 0.0  ;;  %v841_v21 = vsel %vm425_vm1, %v809_v36, 0.0  ;;  %v844_v22 = vsel %vm425_vm1, %v810_v20, 0.0 }
 0x3a1   : > { %821 = vadd.xlane.f32.xlu0 %v820_v19  ;;  %818 = vadd.xlane.f32.xlu1 %v817_v40  ;;  %v823_v27 = vsel %vm425_vm1, %v803_v24, 0.0  ;;  %v847_v30 = vsel %vm425_vm1, %v811_v25, 0.0  ;;  %v826_v37 = vsel %vm425_vm1, %v804_v33, 0.0  ;;  %v850_v39 = vsel %vm425_vm1, %v812_v34, 0.0 }
 0x3a2   : > { %v805_v42 = vmul.f32 %v797_v26, %v1621_v38  ;;  %v813_v43 = vmul.f32 %v797_v26, %v1677_v62  ;;  %v806_v13 = vmul.f32 %v797_v26, %v1628_v41  ;;  %v814_v14 = vmul.f32 %v797_v26, %v1684_v1 }
 0x3a3   : > { %v807_v49 = vmul.f32 %v797_v26, %v1635_v44  ;;  %v815_v51 = vmul.f32 %v797_v26, %v1691_v4  ;;  %v808_v61 = vmul.f32 %v797_v26, %v1642_v47  ;;  %v816_v63 = vmul.f32 %v797_v26, %v1698_v7 }
 0x3a4   : > { %v829_v45 = vsel %vm425_vm1, %v805_v42, 0.0  ;;  %v853_v46 = vsel %vm425_vm1, %v813_v43, 0.0  ;;  %v832_v48 = vsel %vm425_vm1, %v806_v13, 0.0  ;;  %v856_v16 = vsel %vm425_vm1, %v814_v14, 0.0 }
 0x3a5   : > { %842 = vadd.xlane.f32.xlu0 %v841_v21  ;;  %845 = vadd.xlane.f32.xlu1 %v844_v22  ;;  %v835_v54 = vsel %vm425_vm1, %v807_v49, 0.0  ;;  %v859_v55 = vsel %vm425_vm1, %v815_v51, 0.0  ;;  %v838_v23 = vsel %vm425_vm1, %v808_v61, 0.0  ;;  %v862_v0 = vsel %vm425_vm1, %v816_v63, 0.0 }
 0x3a6   : > { %v865_v61 = vadd.s32 8, %v1735_v52 }
 0x3a9   : > { %824 = vadd.xlane.f32.xlu0 %v823_v27  ;;  %848 = vadd.xlane.f32.xlu1 %v847_v30 }
 0x3ad   : > { %827 = vadd.xlane.f32.xlu0 %v826_v37  ;;  %851 = vadd.xlane.f32.xlu1 %v850_v39 }
 0x3b1   : > { %830 = vadd.xlane.f32.xlu0 %v829_v45  ;;  %854 = vadd.xlane.f32.xlu1 %v853_v46 }
 0x3b5   : > { %833 = vadd.xlane.f32.xlu0 %v832_v48  ;;  %857 = vadd.xlane.f32.xlu1 %v856_v16 }
 0x3b9   : > { %836 = vadd.xlane.f32.xlu0 %v835_v54  ;;  %860 = vadd.xlane.f32.xlu1 %v859_v55 }
 0x3bd   : > { %839 = vadd.xlane.f32.xlu0 %v838_v23  ;;  %863 = vadd.xlane.f32.xlu1 %v862_v0  ;;  %v1254_v0 = vld [vmem:[%s1958_s5] ss:$0 sm:$0xff] }
 0x3be   : > { %vm871_vm11 = vcmp.lt.s32.totalorder %v1735_v52, %v1254_v0  ;;  %vm872_vm12 = vcmp.lt.s32.totalorder %v865_v61, %v1254_v0 }
 0x42a   : > { %v822_v2 = vpop.xlane.xlu0 %821  ;;  %v819_v6 = vpop.xlane.xlu1 %818 }
 0x42b   : > { %v896_v21 = vrot.slane %v822_v2, %v1740_v57  ;;  %v892_v22 = vrot.slane %v819_v6, %v1740_v57 }
 0x42d   : > { %v953_v45 = vsel %vm616_vm2, %v896_v21, %v892_v22 }
 0x42e   : > { %v843_v31 = vpop.xlane.xlu0 %842  ;;  %v846_v8 = vpop.xlane.xlu1 %845 }
 0x42f   : > { %v924_v24 = vrot.slane %v843_v31, %v1740_v57  ;;  %v928_v25 = vrot.slane %v846_v8, %v1740_v57 }
 0x431   : > { %v960_v46 = vsel %vm616_vm2, %v928_v25, %v924_v24 }
 0x432   : > { %v825_v11 = vpop.xlane.xlu0 %824  ;;  %v849_v12 = vpop.xlane.xlu1 %848 }
 0x433   : > { %v900_v27 = vrot.slane %v825_v11, %v1740_v57  ;;  %v932_v30 = vrot.slane %v849_v12, %v1740_v57  ;;  %v390_v11 = vld [vmem:[%s374_s21] sm:$0xff] }
 0x435   : > { %v954_v48 = vsel %vm618_vm3, %v900_v27, %v953_v45  ;;  %v961_v16 = vsel %vm618_vm3, %v932_v30, %v960_v46 }
 0x436   : > { %v828_v17 = vpop.xlane.xlu0 %827  ;;  %v852_v19 = vpop.xlane.xlu1 %851 }
 0x437   : > { %v904_v33 = vrot.slane %v828_v17, %v1740_v57  ;;  %v936_v34 = vrot.slane %v852_v19, %v1740_v57  ;;  %v391_v17 = vld [vmem:[%s374_s21 + $0x8] sm:$0xff] }
 0x439   : > { %v955_v54 = vsel %vm620_vm4, %v904_v33, %v954_v48  ;;  %v962_v55 = vsel %vm620_vm4, %v936_v34, %v961_v16 }
 0x43a   : > { %v831_v40 = vpop.xlane.xlu0 %830  ;;  %v855_v36 = vpop.xlane.xlu1 %854 }
 0x43b   : > { %v908_v37 = vrot.slane %v831_v40, %v1740_v57  ;;  %v940_v39 = vrot.slane %v855_v36, %v1740_v57 }
 0x43d   : > { %v956_v63 = vsel %vm622_vm5, %v908_v37, %v955_v54  ;;  %v963_v23 = vsel %vm622_vm5, %v940_v39, %v962_v55 }
 0x43e   : > { %v834_v26 = vpop.xlane.xlu0 %833  ;;  %v858_v20 = vpop.xlane.xlu1 %857 }
 0x43f   : > { %v912_v13 = vrot.slane %v834_v26, %v1740_v57  ;;  %v944_v14 = vrot.slane %v858_v20, %v1740_v57 }
 0x441   : > { %v957_v31 = vsel %vm624_vm6, %v912_v13, %v956_v63  ;;  %v964_v8 = vsel %vm624_vm6, %v944_v14, %v963_v23 }
 0x442   : > { %v837_v42 = vpop.xlane.xlu0 %836  ;;  %v861_v43 = vpop.xlane.xlu1 %860 }
 0x443   : > { %v916_v49 = vrot.slane %v837_v42, %v1740_v57  ;;  %v948_v51 = vrot.slane %v861_v43, %v1740_v57 }
 0x445   : > { %v958_v40 = vsel %vm626_vm7, %v916_v49, %v957_v31  ;;  %v965_v36 = vsel %vm626_vm7, %v948_v51, %v964_v8 }
 0x446   : > { %v840_v2 = vpop.xlane.xlu0 %839  ;;  %v864_v6 = vpop.xlane.xlu1 %863 }
 0x447   : > { %v920_v12 = vrot.slane %v840_v2, %v1740_v57  ;;  %v952_v19 = vrot.slane %v864_v6, %v1740_v57 }
 0x449   : > { %v959_v26 = vsel %vm628_vm8, %v920_v12, %v958_v40  ;;  %v966_v20 = vsel %vm628_vm8, %v952_v19, %v965_v36 }
 0x44a   : > { %v969_v21 = vmul.f32 %v959_v26, %v390_v11  ;;  %v970_v22 = vmul.f32 %v966_v20, %v391_v17 }
 0x44c   : > { %v971_v24 = vsel %vm871_vm11, %v969_v21, -1e+30  ;;  %v972_v25 = vsel %vm872_vm12, %v970_v22, -1e+30 }
 0x44d   : > { %v973_v27 = vsel %vm632_vm10, %v971_v24, -inf  ;;  %v974_v30 = vsel %vm632_vm10, %v972_v25, -inf }
 0x44e   : > { %v975_v57 = vmax.f32 %v973_v27, %v974_v30 }
 0x450   : > { %v976_v33 = vrot.slane %v975_v57, 4 }
 0x452   : > { %v977_v34 = vmax.f32 %v975_v57, %v976_v33 }
 0x454   : > { %v978_v37 = vrot.slane %v977_v34, 2 }
 0x456   : > { %v979_v39 = vmax.f32 %v977_v34, %v978_v37 }
 0x458   : > { %v980_v42 = vrot.slane %v979_v39, 1 }
 0x45a   : > { %v981_v52 = vmax.f32 %v979_v39, %v980_v42 }
 0x45c   : > { %v982_v43 = vsub.f32 %v971_v24, %v981_v52  ;;  %v983_v45 = vsub.f32 %v972_v25, %v981_v52 }
 0x45e   : > { %v984_v46 = vmul.f32 1.442695, %v982_v43  ;;  %v986_v13 = vmul.f32 1.442695, %v983_v45 }
 0x460   : > { %1396 = vpow2.f32 %v984_v46 }
 0x461   : > { %1398 = vpow2.f32 %v986_v13 }
 0x46d   : > { %v1397_v14 = vpop.eup %1396 }
 0x46e   : > { %v1399_v48 = vpop.eup %1398  ;;  %v988_v16 = vsel %vm632_vm10, %v1397_v14, 0.0 }
 0x46f   : > { %v989_v49 = vsel %vm632_vm10, %v1399_v48, 0.0 }
 0x470   : > { %v990_v51 = vadd.f32 %v989_v49, %v988_v16 }
 0x472   : > { %v991_v54 = vrot.slane %v990_v51, 4 }
 0x474   : > { %v992_v55 = vadd.f32 %v991_v54, %v990_v51 }
 0x476   : > { %v993_v61 = vrot.slane %v992_v55, 2 }
 0x478   : > { %v994_v63 = vadd.f32 %v993_v61, %v992_v55 }
 0x47a   : > { %v995_v23 = vrot.slane %v994_v63, 1 }
 0x47c   : > { %v996_v0 = vadd.f32 %v995_v23, %v994_v63 }
 0x47e   : > { %1400 = vrcp.f32 %v996_v0 }
 0x48b   : > { %v1401_v2 = vpop.eup %1400 }
 0x48c   : > { %v998_v6 = vmul.f32 %v1401_v2, %v1397_v14  ;;  %v999_v36 = vmul.f32 %v1401_v2, %v1399_v48 }
 0x48e   : > { %v1000_v31 = vmul.f32 %v998_v6, %v390_v11  ;;  %v1001_v11 = vmul.f32 %v999_v36, %v391_v17 }
 0x490   : > { %v1012_v8 = vrot.slane %v1000_v31, %v1769_v58  ;;  %v1005_v12 = vrot.slane %v1000_v31, %v1772_v60  ;;  %v1019_v19 = vrot.slane %v1000_v31, %v1780_v5  ;;  %v1026_v40 = vrot.slane %v1000_v31, %v1788_v10 }
 0x491   : > { %v1033_v26 = vrot.slane %v1000_v31, %v1793_v15  ;;  %v1040_v20 = vrot.slane %v1000_v31, %v1777_v3  ;;  %v1047_v21 = vrot.slane %v1000_v31, %v1797_v18  ;;  %v1054_v22 = vrot.slane %v1000_v31, %v1785_v9 }
 0x492   : > { %1014 = vbcast.lane.b32.xlu1 %v1012_v8, 256  ;;  %1007 = vbcast.lane.b32.xlu0 %v1005_v12, 256  ;;  %v1061_v24 = vrot.slane %v1001_v11, %v1772_v60  ;;  %v1068_v25 = vrot.slane %v1001_v11, %v1769_v58  ;;  %v1075_v27 = vrot.slane %v1001_v11, %v1780_v5 }
 0x493   : > { %v1082_v30 = vrot.slane %v1001_v11, %v1788_v10  ;;  %v1089_v17 = vrot.slane %v1001_v11, %v1793_v15  ;;  %v1096_v57 = vrot.slane %v1001_v11, %v1777_v3  ;;  %v1103_v33 = vrot.slane %v1001_v11, %v1797_v18 }
 0x494   : > { %v1110_v60 = vrot.slane %v1001_v11, %v1785_v9 }
 0x496   : > { %1021 = vbcast.lane.b32.xlu1 %v1019_v19, 256  ;;  %1028 = vbcast.lane.b32.xlu0 %v1026_v40, 256 }
 0x49a   : > { %1035 = vbcast.lane.b32.xlu1 %v1033_v26, 256  ;;  %1042 = vbcast.lane.b32.xlu0 %v1040_v20, 256 }
 0x49e   : > { %1049 = vbcast.lane.b32.xlu1 %v1047_v21, 256  ;;  %1056 = vbcast.lane.b32.xlu0 %v1054_v22, 256 }
 0x4a2   : > { %1063 = vbcast.lane.b32.xlu1 %v1061_v24, 256  ;;  %1070 = vbcast.lane.b32.xlu0 %v1068_v25, 256 }
 0x4a6   : > { %1077 = vbcast.lane.b32.xlu1 %v1075_v27, 256  ;;  %1084 = vbcast.lane.b32.xlu0 %v1082_v30, 256 }
 0x4aa   : > { %1091 = vbcast.lane.b32.xlu1 %v1089_v17, 256  ;;  %1098 = vbcast.lane.b32.xlu0 %v1096_v57, 256 }
 0x4ae   : > { %1105 = vbcast.lane.b32.xlu1 %v1103_v33, 256  ;;  %1112 = vbcast.lane.b32.xlu0 %v1110_v60, 256 }
 0x504   : > { %v1015_v58 = vpop.permute.xlu1 %1014  ;;  %v1008_v34 = vpop.permute.xlu0 %1007 }
 0x505   : > { %v1115_v5 = vmul.f32 %v1015_v58, %v1598_v29  ;;  %v1114_v10 = vmul.f32 %v1008_v34, %v1593_v28 }
 0x507   : > { %v1131_v37 = vsel %vm425_vm1, %v1115_v5, 0.0  ;;  %v1130_v15 = vsel %vm425_vm1, %v1114_v10, 0.0 }
 0x508   : > { %v1022_v39 = vpop.permute.xlu1 %1021  ;;  %v1029_v3 = vpop.permute.xlu0 %1028  ;;  %v1132_v52 = vadd.f32 %v1131_v37, %v1130_v15 }
 0x509   : > { %v1116_v42 = vmul.f32 %v1022_v39, %v1607_v32  ;;  %v1117_v18 = vmul.f32 %v1029_v3, %v1614_v35 }
 0x50b   : > { %v1133_v9 = vsel %vm425_vm1, %v1116_v42, 0.0  ;;  %v1135_v29 = vsel %vm425_vm1, %v1117_v18, 0.0 }
 0x50c   : > { %v1134_v43 = vadd.f32 %v1133_v9, %v1132_v52  ;;  %v1036_v45 = vpop.permute.xlu1 %1035  ;;  %v1043_v46 = vpop.permute.xlu0 %1042 }
 0x50d   : > { %v1118_v28 = vmul.f32 %v1036_v45, %v1621_v38  ;;  %v1119_v13 = vmul.f32 %v1043_v46, %v1628_v41 }
 0x50e   : > { %v1136_v14 = vadd.f32 %v1135_v29, %v1134_v43 }
 0x50f   : > { %v1137_v48 = vsel %vm425_vm1, %v1118_v28, 0.0  ;;  %v1139_v35 = vsel %vm425_vm1, %v1119_v13, 0.0 }
 0x510   : > { %v1138_v16 = vadd.f32 %v1137_v48, %v1136_v14  ;;  %v1050_v49 = vpop.permute.xlu1 %1049  ;;  %v1057_v32 = vpop.permute.xlu0 %1056 }
 0x511   : > { %v1120_v51 = vmul.f32 %v1050_v49, %v1635_v44  ;;  %v1121_v54 = vmul.f32 %v1057_v32, %v1642_v47 }
 0x512   : > { %v1140_v55 = vadd.f32 %v1139_v35, %v1138_v16 }
 0x513   : > { %v1141_v61 = vsel %vm425_vm1, %v1120_v51, 0.0  ;;  %v1143_v41 = vsel %vm425_vm1, %v1121_v54, 0.0 }
 0x514   : > { %v1142_v63 = vadd.f32 %v1141_v61, %v1140_v55  ;;  %v1064_v23 = vpop.permute.xlu1 %1063  ;;  %v1071_v38 = vpop.permute.xlu0 %1070 }
 0x515   : > { %v1122_v0 = vmul.f32 %v1064_v23, %v1649_v50  ;;  %v1123_v2 = vmul.f32 %v1071_v38, %v1656_v53 }
 0x516   : > { %v1144_v6 = vadd.f32 %v1143_v41, %v1142_v63 }
 0x517   : > { %v1145_v31 = vsel %vm425_vm1, %v1122_v0, 0.0  ;;  %v1147_v47 = vsel %vm425_vm1, %v1123_v2, 0.0 }
 0x518   : > { %v1146_v8 = vadd.f32 %v1145_v31, %v1144_v6  ;;  %v1078_v12 = vpop.permute.xlu1 %1077  ;;  %v1085_v44 = vpop.permute.xlu0 %1084 }
 0x519   : > { %v1124_v19 = vmul.f32 %v1078_v12, %v1663_v56  ;;  %v1125_v40 = vmul.f32 %v1085_v44, %v1670_v59 }
 0x51a   : > { %v1148_v36 = vadd.f32 %v1147_v47, %v1146_v8 }
 0x51b   : > { %v1149_v26 = vsel %vm425_vm1, %v1124_v19, 0.0  ;;  %v1151_v53 = vsel %vm425_vm1, %v1125_v40, 0.0 }
 0x51c   : > { %v1150_v20 = vadd.f32 %v1149_v26, %v1148_v36  ;;  %v1092_v50 = vpop.permute.xlu1 %1091  ;;  %v1099_v11 = vpop.permute.xlu0 %1098 }
 0x51d   : > { %v1126_v21 = vmul.f32 %v1092_v50, %v1677_v62  ;;  %v1127_v22 = vmul.f32 %v1099_v11, %v1684_v1 }
 0x51e   : > { %v1152_v24 = vadd.f32 %v1151_v53, %v1150_v20 }
 0x51f   : > { %v1153_v25 = vsel %vm425_vm1, %v1126_v21, 0.0  ;;  %v1155_v59 = vsel %vm425_vm1, %v1127_v22, 0.0 }
 0x520   : > { %v1154_v27 = vadd.f32 %v1153_v25, %v1152_v24  ;;  %v1106_v56 = vpop.permute.xlu1 %1105  ;;  %v1113_v30 = vpop.permute.xlu0 %1112 }
 0x521   : > { %v1128_v17 = vmul.f32 %v1106_v56, %v1691_v4  ;;  %v1129_v57 = vmul.f32 %v1113_v30, %v1698_v7 }
 0x522   : > { %v1156_v33 = vadd.f32 %v1155_v59, %v1154_v27 }
 0x523   : > { %v1157_v60 = vsel %vm425_vm1, %v1128_v17, 0.0  ;;  %v1159_v62 = vsel %vm425_vm1, %v1129_v57, 0.0 }
 0x524   : > { %v1158_v58 = vadd.f32 %v1157_v60, %v1156_v33 }
 0x526   : > { %v1160_v1 = vadd.f32 %v1159_v62, %v1158_v58 }
 0x528   : > { %1161 = vst [vmem:[%s381_s10] sm:$0x3] %v1160_v1 }
 0x529 PF: > { %p14_p9 = scmp.ge.s32.totalorder %s1486_s28, 10   ;;  %s1961_s24 = smov %s1420_s25 }
 0x52a   : > { %s1962_s25 = smov %s1495_s8  ;;  %s1963_s26 = smov %s1486_s28 }
 0x52b   :  { %16 = sbr.rel (!%p14_p9) target bundleno = 2 (0x2), region = 130 }

// kernel: sdgcn_forward.4
= control target key start
LH: loop header
LB: loop body
LE: loop exit
PB: predicated region body
PF: predicated region fallthrough
CT: control target
= control target key end

     0   :  { %v3951_v1 = vmov 0   ;;  %v3949_v60 = vmov 0.0   ;;  %s3943_s1 = inlined_call_operand.vmem [shape: bf16[128,512], index: 1, kind: input, shape index: {}]   ;;  %s3944_s0 = inlined_call_operand.vmem [shape: bf16[8,16,128], index: 0, kind: input, shape index: {}]   ;;  %s3945_s2 = inlined_call_operand.vmem [shape: bf16[128,512], index: 2, kind: input, shape index: {}]   ;;  %s3946_s4 = inlined_call_operand.vmem [shape: s32[16,1], index: 4, kind: input, shape index: {}]   ;;  %s3947_s3 = inlined_call_operand.vmem [shape: f32[1,512], index: 3, kind: input, shape index: {}]   ;;  %s3948_s5 = inlined_call_operand.vmem [shape: f32[8,16,128], index: 5, kind: output, shape index: {}]  }
   0x1   :  { %v2362_v0 = vld [vmem:[%s3943_s1 + $0xe4] ss:$16 sps:$4 sm:$0xff]   ;;  %331 = vmatprep.mubr.bf16.mxu0 %v3951_v1  ;;  %444 = vmatprep.mubr.bf16.mxu1 %v3951_v1  ;;  %v2364_v2 = vld [vmem:[%s3943_s1 + $0xec] ss:$16 sps:$4 sm:$0xff]   ;;  %v2366_v3 = vld [vmem:[%s3943_s1 + $0xe0] ss:$16 sps:$4 sm:$0xff]  }
   0x2   :  { %2320 = vset.pattern.permute.xlu0 %v3951_v1  ;;  %2331 = vset.pattern.permute.xlu1 %v3951_v1  ;;  %v2367_v4 = vld [vmem:[%s3943_s1 + $0xe8] ss:$16 sps:$4 sm:$0xff]   ;;  %v2368_v5 = vld [vmem:[%s3943_s1 + $0xc4] ss:$16 sps:$4 sm:$0xff]   ;;  %v2370_v6 = vld [vmem:[%s3943_s1 + $0xcc] ss:$16 sps:$4 sm:$0xff]  }
   0x3   :  { %299 = vmatprep.subr.bf16.mxu0 %v2362_v0  ;;  %412 = vmatprep.subr.bf16.mxu1 %v2364_v2  ;;  %v2372_v7 = vld [vmem:[%s3943_s1 + $0xc0] ss:$16 sps:$4 sm:$0xff]   ;;  %v2373_v8 = vld [vmem:[%s3943_s1 + $0xc8] ss:$16 sps:$4 sm:$0xff]   ;;  %v2374_v9 = vld [vmem:[%s3943_s1 + $0xa4] ss:$16 sps:$4 sm:$0xff]  }
   0x4   :  { %300 = vmatpush1.bf16.msra.mxu0 %v2366_v3  ;;  %413 = vmatpush1.bf16.msra.mxu1 %v2367_v4  ;;  %v2376_v10 = vld [vmem:[%s3943_s1 + $0xac] ss:$16 sps:$4 sm:$0xff]   ;;  %v2378_v11 = vld [vmem:[%s3943_s1 + $0xa0] ss:$16 sps:$4 sm:$0xff]   ;;  %v2379_v12 = vld [vmem:[%s3943_s1 + $0xa8] ss:$16 sps:$4 sm:$0xff]  }
   0x5   :  { %301 = vmatprep.subr.bf16.mxu0 %v2368_v5  ;;  %414 = vmatprep.subr.bf16.mxu1 %v2370_v6  ;;  %v2380_v13 = vld [vmem:[%s3943_s1 + $0x84] ss:$16 sps:$4 sm:$0xff]   ;;  %v2382_v14 = vld [vmem:[%s3943_s1 + $0x8c] ss:$16 sps:$4 sm:$0xff]   ;;  %v2384_v15 = vld [vmem:[%s3943_s1 + $0x80] ss:$16 sps:$4 sm:$0xff]  }
   0x6   :  { %v2385_v16 = vld [vmem:[%s3943_s1 + $0x88] ss:$16 sps:$4 sm:$0xff]   ;;  %v2386_v17 = vld [vmem:[%s3943_s1 + $0x64] ss:$16 sps:$4 sm:$0xff]   ;;  %v2388_v18 = vld [vmem:[%s3943_s1 + $0x6c] ss:$16 sps:$4 sm:$0xff]  }
   0x7   :  { %v2390_v19 = vld [vmem:[%s3943_s1 + $0x60] ss:$16 sps:$4 sm:$0xff]   ;;  %v2391_v20 = vld [vmem:[%s3943_s1 + $0x68] ss:$16 sps:$4 sm:$0xff]   ;;  %v2392_v21 = vld [vmem:[%s3943_s1 + $0x44] ss:$16 sps:$4 sm:$0xff]  }
   0x8   :  { %302 = vmatpush1.bf16.msra.mxu0 %v2372_v7  ;;  %415 = vmatpush1.bf16.msra.mxu1 %v2373_v8  ;;  %v2394_v22 = vld [vmem:[%s3943_s1 + $0x4c] ss:$16 sps:$4 sm:$0xff]   ;;  %v2396_v23 = vld [vmem:[%s3943_s1 + $0x40] ss:$16 sps:$4 sm:$0xff]   ;;  %v2397_v24 = vld [vmem:[%s3943_s1 + $0x48] ss:$16 sps:$4 sm:$0xff]  }
   0x9   :  { %303 = vmatprep.subr.bf16.mxu0 %v2374_v9  ;;  %416 = vmatprep.subr.bf16.mxu1 %v2376_v10  ;;  %v2398_v25 = vld [vmem:[%s3943_s1 + $0x24] ss:$16 sps:$4 sm:$0xff]   ;;  %v2400_v26 = vld [vmem:[%s3943_s1 + $0x2c] ss:$16 sps:$4 sm:$0xff]   ;;  %v2402_v27 = vld [vmem:[%s3943_s1 + $0x20] ss:$16 sps:$4 sm:$0xff]  }
   0xa   :  { %v2403_v28 = vld [vmem:[%s3943_s1 + $0x28] ss:$16 sps:$4 sm:$0xff]   ;;  %v2404_v29 = vld [vmem:[%s3943_s1 + $0x4] ss:$16 sps:$4 sm:$0xff]   ;;  %v2406_v30 = vld [vmem:[%s3943_s1 + $0xc] ss:$16 sps:$4 sm:$0xff]  }
   0xb   :  { %v2408_v31 = vld [vmem:[%s3943_s1] ss:$16 sps:$4 sm:$0xff]   ;;  %v2409_v32 = vld [vmem:[%s3943_s1 + $0x8] ss:$16 sps:$4 sm:$0xff]   ;;  %v2891_v33 = vld [vmem:[%s3945_s2 + $0xe4] ss:$16 sps:$4 sm:$0xff]  }
   0xc   :  { %304 = vmatpush1.bf16.msra.mxu0 %v2378_v11  ;;  %417 = vmatpush1.bf16.msra.mxu1 %v2379_v12  ;;  %v2896_v34 = vld [vmem:[%s3945_s2 + $0xec] ss:$16 sps:$4 sm:$0xff]   ;;  %v2410_v35 = vld [vmem:[%s3944_s0] sm:$0xff]   ;;  %v2916_v38 = vld [vmem:[%s3945_s2 + $0xe8] ss:$16 sps:$4 sm:$0xff]  }
   0xd   :  { %305 = vmatprep.subr.bf16.mxu0 %v2380_v13  ;;  %418 = vmatprep.subr.bf16.mxu1 %v2382_v14  ;;  %v2904_v36 = vld [vmem:[%s3945_s2 + $0xe0] ss:$16 sps:$4 sm:$0xff]   ;;  %v2910_v37 = vld [vmem:[%s3945_s2 + $0xc4] ss:$16 sps:$4 sm:$0xff]   ;;  %v2921_v39 = vld [vmem:[%s3945_s2 + $0xcc] ss:$16 sps:$4 sm:$0xff]  }
   0xe   :  { %v2928_v40 = vld [vmem:[%s3945_s2 + $0xc0] ss:$16 sps:$4 sm:$0xff]   ;;  %v2935_v41 = vld [vmem:[%s3945_s2 + $0xa4] ss:$16 sps:$4 sm:$0xff]   ;;  %v2941_v42 = vld [vmem:[%s3945_s2 + $0xc8] ss:$16 sps:$4 sm:$0xff]  }
   0xf   :  { %v2414_v43 = vld [vmem:[%s3944_s0 + $0x8] sm:$0xff]   ;;  %v2951_v44 = vld [vmem:[%s3945_s2 + $0xa0] ss:$16 sps:$4 sm:$0xff]   ;;  %v2956_v45 = vld [vmem:[%s3945_s2 + $0x84] ss:$16 sps:$4 sm:$0xff]  }
  0x10   :  { %306 = vmatpush1.bf16.msra.mxu0 %v2384_v15  ;;  %419 = vmatpush1.bf16.msra.mxu1 %v2385_v16  ;;  %v2962_v46 = vld [vmem:[%s3945_s2 + $0xac] ss:$16 sps:$4 sm:$0xff]   ;;  %v2968_v47 = vld [vmem:[%s3945_s2 + $0xa8] ss:$16 sps:$4 sm:$0xff]   ;;  %v2981_v49 = vld [vmem:[%s3945_s2 + $0x80] ss:$16 sps:$4 sm:$0xff]   ;;  %v71_v16 = vlaneseq }
  0x11   :  { %307 = vmatprep.subr.bf16.mxu0 %v2386_v17  ;;  %420 = vmatprep.subr.bf16.mxu1 %v2388_v18  ;;  %v2973_v48 = vld [vmem:[%s3945_s2 + $0x8c] ss:$16 sps:$4 sm:$0xff]   ;;  %v2986_v50 = vld [vmem:[%s3945_s2 + $0x64] ss:$16 sps:$4 sm:$0xff]   ;;  %v2994_v51 = vld [vmem:[%s3945_s2 + $0x88] ss:$16 sps:$4 sm:$0xff]  }
  0x12   :  { %v2418_v52 = vld [vmem:[%s3944_s0 + $0x10] sm:$0xff]   ;;  %v3009_v54 = vld [vmem:[%s3945_s2 + $0x6c] ss:$16 sps:$4 sm:$0xff]   ;;  %v3021_v56 = vld [vmem:[%s3945_s2 + $0x68] ss:$16 sps:$4 sm:$0xff]   ;;  %v72_v17 = vshrl.u32 %v71_v16, 7 }
  0x13   :  { %v3003_v53 = vld [vmem:[%s3945_s2 + $0x60] ss:$16 sps:$4 sm:$0xff]   ;;  %v3015_v55 = vld [vmem:[%s3945_s2 + $0x44] ss:$16 sps:$4 sm:$0xff]   ;;  %v3031_v58 = vld [vmem:[%s3945_s2 + $0x4c] ss:$16 sps:$4 sm:$0xff]  }
  0x14   :  { %308 = vmatpush1.bf16.msra.mxu0 %v2390_v19  ;;  %421 = vmatpush1.bf16.msra.mxu1 %v2391_v20  ;;  %v3026_v57 = vld [vmem:[%s3946_s4] sm:$0xff]  ;;  %v3036_v59 = vld [vmem:[%s3946_s4 + $0x8] sm:$0xff]  ;;  %v2425_v4 = vld [vmem:[%s3944_s0 + $0x18] sm:$0xff]  }
  0x15   :  { %309 = vmatprep.subr.bf16.mxu0 %v2392_v21  ;;  %422 = vmatprep.subr.bf16.mxu1 %v2394_v22  ;;  %vm933_vm0 = vcmp.gt.s32.totalorder %v3026_v57, 0  ;;  %vm934_vm1 = vcmp.gt.s32.totalorder %v3036_v59, 0  ;;  %v3047_v62 = vld [vmem:[%s3945_s2 + $0x40] ss:$16 sps:$4 sm:$0xff]   ;;  %v3055_v0 = vld [vmem:[%s3945_s2 + $0x24] ss:$16 sps:$4 sm:$0xff]  }
  0x16   :  { %v2246_v61 = vsel %vm933_vm0, 1.0, %v3949_v60  ;;  %v2247_v63 = vsel %vm934_vm1, 1.0, %v3949_v60  ;;  %v3061_v2 = vld [vmem:[%s3945_s2 + $0x48] ss:$16 sps:$4 sm:$0xff]   ;;  %v3071_v5 = vld [vmem:[%s3945_s2 + $0x20] ss:$16 sps:$4 sm:$0xff]  }
  0x17   :  { %v2321_v3 = vpack.i.bf16 %v2247_v63, %v2246_v61  ;;  %v3076_v6 = vld [vmem:[%s3945_s2 + $0x2c] ss:$16 sps:$4 sm:$0xff]   ;;  %v3083_v7 = vld [vmem:[%s3945_s2 + $0x4] ss:$16 sps:$4 sm:$0xff]   ;;  %v3088_v8 = vld [vmem:[%s3945_s2 + $0x28] ss:$16 sps:$4 sm:$0xff]  }
  0x18   :  { %310 = vmatpush1.bf16.msra.mxu0 %v2396_v23  ;;  %423 = vmatpush1.bf16.msra.mxu1 %v2397_v24  ;;  %v3093_v9 = vld [vmem:[%s3945_s2 + $0xc] ss:$16 sps:$4 sm:$0xff]   ;;  %v3102_v10 = vld [vmem:[%s3945_s2] ss:$16 sps:$4 sm:$0xff]   ;;  %v3109_v11 = vld [vmem:[%s3945_s2 + $0x8] ss:$16 sps:$4 sm:$0xff]  }
  0x19   :  { %311 = vmatprep.subr.bf16.mxu0 %v2398_v25  ;;  %424 = vmatprep.subr.bf16.mxu1 %v2400_v26  ;;  %v2432_v12 = vld [vmem:[%s3944_s0 + $0x20] sm:$0xff]   ;;  %v2439_v13 = vld [vmem:[%s3944_s0 + $0x28] sm:$0xff]   ;;  %v2446_v14 = vld [vmem:[%s3944_s0 + $0x30] sm:$0xff]   ;;  %vm1105_vm2 = vcmp.gt.s32.totalorder %v3026_v57, 1  ;;  %vm1106_vm3 = vcmp.gt.s32.totalorder %v3036_v59, 1  ;;  %v73_v25 = vsub.s32 0, %v72_v17 }
  0x1a   :  { %2322 = vperm.xlu0 %2320, %v2321_v3   ;;  %v2456_v15 = vld [vmem:[%s3944_s0 + $0x38] sm:$0xff]   ;;  %v2254_v20 = vsel %vm1105_vm2, 1.0, %v3949_v60  ;;  %v2255_v21 = vsel %vm1106_vm3, 1.0, %v3949_v60  ;;  %v81_v26 = vsub.s32 2, %v72_v17  ;;  %vm1278_vm4 = vcmp.gt.s32.totalorder %v3026_v57, 2 }
  0x1b   :  { %v2326_v22 = vpack.i.bf16 %v2255_v21, %v2254_v20  ;;  %vm1279_vm5 = vcmp.gt.s32.totalorder %v3036_v59, 2  ;;  %vm1451_vm6 = vcmp.gt.s32.totalorder %v3026_v57, 3  ;;  %vm1452_vm7 = vcmp.gt.s32.totalorder %v3036_v59, 3 }
  0x1c   :  { %312 = vmatpush1.bf16.msra.mxu0 %v2402_v27  ;;  %425 = vmatpush1.bf16.msra.mxu1 %v2403_v28  ;;  %v69_v27 = vld [vmem:[%s3947_s3] sm:$0xf] }
  0x1d   :  { %313 = vmatprep.subr.bf16.mxu0 %v2404_v29  ;;  %426 = vmatprep.subr.bf16.mxu1 %v2406_v30  ;;  %v77_v30 = vsub.s32 1, %v72_v17 }
  0x1e   :  { %2327 = vperm.xlu0 %2320, %v2326_v22  }
  0x1f   :  { %v3199_v3 = vrot.slane %v69_v27, %v77_v30 }
  0x20   :  { %314 = vmatpush1.bf16.msra.mxu0 %v2408_v31  ;;  %427 = vmatpush1.bf16.msra.mxu1 %v2409_v32  ;;  %v85_v31 = vsub.s32 3, %v72_v17 }
  0x21   :  { %791 = vmatprep.subr.bf16.mxu0 %v2891_v33  ;;  %834 = vmatprep.subr.bf16.mxu1 %v2896_v34 }
  0x23   :  { %332 = vmatmul.mubr.bf16.vlgmr.msra.gmra.mxu0 %v2410_v35  ;;  %445 = vmatmul.mubr.bf16.vlgmr.msra.gmra.mxu1 %v2410_v35 }
  0x24   :  { %792 = vmatpush1.bf16.msra.mxu0 %v2904_v36  ;;  %341 = vmatprep.mubr.bf16.mxu0 %v3951_v1 }
  0x25   :  { %454 = vmatprep.mubr.bf16.mxu1 %v3951_v1  ;;  %793 = vmatprep.subr.bf16.mxu0 %v2910_v37 }
  0x26   :  { %835 = vmatpush1.bf16.msra.mxu1 %v2916_v38 }
  0x27   :  { %836 = vmatprep.subr.bf16.mxu1 %v2921_v39 }
  0x28   :  { %794 = vmatpush1.bf16.msra.mxu0 %v2928_v40 }
  0x29   :  { %795 = vmatprep.subr.bf16.mxu0 %v2935_v41 }
  0x2a   :  { %837 = vmatpush1.bf16.msra.mxu1 %v2941_v42 }
  0x2b   :  { %342 = vmatmul.mubr.bf16.gmra.mxu0 %v2414_v43  ;;  %455 = vmatmul.mubr.bf16.gmra.mxu1 %v2414_v43  ;;  %v3195_v43 = vrot.slane %v69_v27, %v73_v25 }
  0x2c   :  { %351 = vmatprep.mubr.bf16.mxu0 %v3951_v1  ;;  %464 = vmatprep.mubr.bf16.mxu1 %v3951_v1 }
  0x2d   :  { %796 = vmatpush1.bf16.msra.mxu0 %v2951_v44  ;;  %838 = vmatprep.subr.bf16.mxu1 %v2962_v46 }
  0x2e   :  { %797 = vmatprep.subr.bf16.mxu0 %v2956_v45  ;;  %839 = vmatpush1.bf16.msra.mxu1 %v2968_v47 }
  0x2f   :  { %840 = vmatprep.subr.bf16.mxu1 %v2973_v48 }
  0x31   :  { %798 = vmatpush1.bf16.msra.mxu0 %v2981_v49 }
  0x32   :  { %799 = vmatprep.subr.bf16.mxu0 %v2986_v50  ;;  %841 = vmatpush1.bf16.msra.mxu1 %v2994_v51 }
  0x33   :  { %352 = vmatmul.mubr.bf16.gmra.mxu0 %v2418_v52  ;;  %465 = vmatmul.mubr.bf16.gmra.mxu1 %v2418_v52  ;;  %v3197_v52 = vrot.slane %v69_v27, %v81_v26 }
  0x34   :  { %361 = vmatprep.mubr.bf16.mxu0 %v3951_v1  ;;  %474 = vmatprep.mubr.bf16.mxu1 %v3951_v1 }
  0x35   :  { %800 = vmatpush1.bf16.msra.mxu0 %v3003_v53  ;;  %842 = vmatprep.subr.bf16.mxu1 %v3009_v54 }
  0x36   :  { %801 = vmatprep.subr.bf16.mxu0 %v3015_v55  ;;  %843 = vmatpush1.bf16.msra.mxu1 %v3021_v56 }
  0x37   :  { %844 = vmatprep.subr.bf16.mxu1 %v3031_v58 }
  0x39   :  { %802 = vmatpush1.bf16.msra.mxu0 %v3047_v62 }
  0x3a   :  { %803 = vmatprep.subr.bf16.mxu0 %v3055_v0  ;;  %845 = vmatpush1.bf16.msra.mxu1 %v3061_v2 }
  0x3b   :  { %362 = vmatmul.mubr.bf16.gmra.mxu0 %v2425_v4  ;;  %475 = vmatmul.mubr.bf16.gmra.mxu1 %v2425_v4  ;;  %v3201_v4 = vrot.slane %v69_v27, %v85_v31 }
  0x3c   :  { %371 = vmatprep.mubr.bf16.mxu0 %v3951_v1  ;;  %484 = vmatprep.mubr.bf16.mxu1 %v3951_v1 }
  0x3d   :  { %804 = vmatpush1.bf16.msra.mxu0 %v3071_v5  ;;  %846 = vmatprep.subr.bf16.mxu1 %v3076_v6 }
  0x3e   :  { %805 = vmatprep.subr.bf16.mxu0 %v3083_v7  ;;  %847 = vmatpush1.bf16.msra.mxu1 %v3088_v8 }
  0x3f   :  { %848 = vmatprep.subr.bf16.mxu1 %v3093_v9 }
  0x41   :  { %806 = vmatpush1.bf16.msra.mxu0 %v3102_v10 }
  0x42   :  { %849 = vmatpush1.bf16.msra.mxu1 %v3109_v11  ;;  %963 = vmatprep.subr.bf16.mxu0 %v2891_v33 }
  0x43   :  { %372 = vmatmul.mubr.bf16.gmra.mxu0 %v2432_v12  ;;  %485 = vmatmul.mubr.bf16.gmra.mxu1 %v2432_v12 }
  0x44   :  { %381 = vmatprep.mubr.bf16.mxu0 %v3951_v1  ;;  %494 = vmatprep.mubr.bf16.mxu1 %v3951_v1 }
  0x45   :  { %1006 = vmatprep.subr.bf16.mxu1 %v2896_v34 }
  0x4b   :  { %382 = vmatmul.mubr.bf16.gmra.mxu0 %v2439_v13  ;;  %495 = vmatmul.mubr.bf16.gmra.mxu1 %v2439_v13 }
  0x4c   :  { %391 = vmatprep.mubr.bf16.mxu0 %v3951_v1  ;;  %504 = vmatprep.mubr.bf16.mxu1 %v3951_v1 }
  0x53   :  { %392 = vmatmul.mubr.bf16.gmra.mxu0 %v2446_v14  ;;  %505 = vmatmul.mubr.bf16.gmra.mxu1 %v2446_v14 }
  0x54   :  { %401 = vmatprep.mubr.bf16.mxu0 %v3951_v1  ;;  %514 = vmatprep.mubr.bf16.mxu1 %v3951_v1 }
  0x5b   :  { %402 = vmatmul.mubr.bf16.gmra.mxu0 %v2456_v15  ;;  %515 = vmatmul.mubr.bf16.gmra.mxu1 %v2456_v15 }
  0x5c   :  { %823 = vmatprep.mubr.bf16.mxu0 %v3951_v1  ;;  %866 = vmatprep.mubr.bf16.mxu1 %v3951_v1 }
  0x63   :  { %824 = vmatmul.mubr.bf16.vlgmr.msra.gmra.mxu0 %v3951_v1  ;;  %867 = vmatmul.mubr.bf16.vlgmr.msra.gmra.mxu1 %v3951_v1 }
  0x64   :  { %964 = vmatpush1.bf16.msra.mxu0 %v2904_v36  ;;  %1007 = vmatpush1.bf16.msra.mxu1 %v2916_v38 }
  0x65   :  { %965 = vmatprep.subr.bf16.mxu0 %v2910_v37  ;;  %1008 = vmatprep.subr.bf16.mxu1 %v2921_v39 }
  0x66   :  { %995 = vmatprep.mubr.bf16.mxu0 %v3951_v1  ;;  %1038 = vmatprep.mubr.bf16.mxu1 %v3951_v1 }
  0x68   :  { %966 = vmatpush1.bf16.msra.mxu0 %v2928_v40  ;;  %1009 = vmatpush1.bf16.msra.mxu1 %v2941_v42 }
  0x69   :  { %967 = vmatprep.subr.bf16.mxu0 %v2935_v41  ;;  %1010 = vmatprep.subr.bf16.mxu1 %v2962_v46 }
  0x6c   :  { %968 = vmatpush1.bf16.msra.mxu0 %v2951_v44  ;;  %1011 = vmatpush1.bf16.msra.mxu1 %v2968_v47 }
  0x6d   :  { %969 = vmatprep.subr.bf16.mxu0 %v2956_v45  ;;  %1012 = vmatprep.subr.bf16.mxu1 %v2973_v48 }
  0x70   :  { %970 = vmatpush1.bf16.msra.mxu0 %v2981_v49  ;;  %1013 = vmatpush1.bf16.msra.mxu1 %v2994_v51 }
  0x71   :  { %971 = vmatprep.subr.bf16.mxu0 %v2986_v50  ;;  %1014 = vmatprep.subr.bf16.mxu1 %v3009_v54 }
  0x74   :  { %972 = vmatpush1.bf16.msra.mxu0 %v3003_v53  ;;  %1015 = vmatpush1.bf16.msra.mxu1 %v3021_v56 }
  0x75   :  { %973 = vmatprep.subr.bf16.mxu0 %v3015_v55  ;;  %1016 = vmatprep.subr.bf16.mxu1 %v3031_v58 }
  0x78   :  { %974 = vmatpush1.bf16.msra.mxu0 %v3047_v62  ;;  %1017 = vmatpush1.bf16.msra.mxu1 %v3061_v2 }
  0x79   :  { %975 = vmatprep.subr.bf16.mxu0 %v3055_v0  ;;  %1018 = vmatprep.subr.bf16.mxu1 %v3076_v6 }
  0x7c   :  { %976 = vmatpush1.bf16.msra.mxu0 %v3071_v5  ;;  %1019 = vmatpush1.bf16.msra.mxu1 %v3088_v8 }
  0x7d   :  { %977 = vmatprep.subr.bf16.mxu0 %v3083_v7  ;;  %1020 = vmatprep.subr.bf16.mxu1 %v3093_v9 }
  0x80   :  { %978 = vmatpush1.bf16.msra.mxu0 %v3102_v10  ;;  %1021 = vmatpush1.bf16.msra.mxu1 %v3109_v11 }
  0x81   :  { %1136 = vmatprep.subr.bf16.mxu0 %v2891_v33  ;;  %1179 = vmatprep.subr.bf16.mxu1 %v2896_v34 }
  0xe3   :  { %v3174_v18 = vpop.f32.mrf.mxu0  ;;  %v3176_v19 = vpop.f32.mrf.mxu1 }
  0xe5   :  { %v3180_v23 = vpop.f32.mrf.mxu0  ;;  %v3182_v24 = vpop.f32.mrf.mxu1 }
  0xe7   :  { %v3187_v28 = vpop.f32.mrf.mxu0  ;;  %v3189_v29 = vpop.f32.mrf.mxu1 }
  0xe9   :  { %v3191_v32 = vpop.f32.mrf.mxu0  ;;  %v3193_v35 = vpop.f32.mrf.mxu1 }
  0xeb   :  { %v343_v61 = vpop.f32.mrf.mxu0  ;;  %v456_v63 = vpop.f32.mrf.mxu1 }
  0xec   :  { %v3204_v12 = vadd.f32 %v343_v61, %v3195_v43  ;;  %v3207_v13 = vadd.f32 %v456_v63, %v3197_v52 }
  0xed   :  { %v345_v14 = vpop.f32.mrf.mxu0  ;;  %v458_v15 = vpop.f32.mrf.mxu1 }
  0xee   :  { %3953 = vst [vmem:[#allocation3_spill] sm:$0xff] %v3207_v13  ;;  %v3210_v16 = vadd.f32 %v345_v14, %v3199_v3  ;;  %v3213_v17 = vadd.f32 %v458_v15, %v3201_v4 }
  0xef   :  { %v347_v20 = vpop.f32.mrf.mxu0  ;;  %v460_v21 = vpop.f32.mrf.mxu1 }
  0xf0   :  { %3954 = vst [vmem:[#allocation4_spill] sm:$0xff] %v3213_v17  ;;  %v3216_v22 = vadd.f32 %v347_v20, %v3195_v43  ;;  %v3219_v25 = vadd.f32 %v460_v21, %v3197_v52 }
  0xf1   :  { %v349_v26 = vpop.f32.mrf.mxu0  ;;  %v462_v27 = vpop.f32.mrf.mxu1 }
  0xf2   :  { %3955 = vst [vmem:[#allocation5_spill] sm:$0xff] %v3219_v25  ;;  %v3222_v30 = vadd.f32 %v349_v26, %v3199_v3  ;;  %v3225_v31 = vadd.f32 %v462_v27, %v3201_v4 }
  0xf3   :  { %v353_v61 = vpop.f32.mrf.mxu0  ;;  %v466_v63 = vpop.f32.mrf.mxu1 }
  0xf4   :  { %3956 = vst [vmem:[#allocation6_spill] sm:$0xff] %v3222_v30  ;;  %3957 = vst [vmem:[#allocation7_spill] sm:$0xff] %v3225_v31  ;;  %v3228_v14 = vadd.f32 %v353_v61, %v3195_v43  ;;  %v3231_v15 = vadd.f32 %v466_v63, %v3197_v52 }
  0xf5   :  { %v355_v20 = vpop.f32.mrf.mxu0  ;;  %v468_v60 = vpop.f32.mrf.mxu1 }
  0xf6   :  { %3958 = vst [vmem:[#allocation8_spill] sm:$0xff] %v3228_v14  ;;  %3959 = vst [vmem:[#allocation9_spill] sm:$0xff] %v3231_v15  ;;  %v3234_v21 = vadd.f32 %v355_v20, %v3199_v3  ;;  %v3237_v1 = vadd.f32 %v468_v60, %v3201_v4 }
  0xf7   :  { %v357_v26 = vpop.f32.mrf.mxu0  ;;  %v470_v25 = vpop.f32.mrf.mxu1 }
  0xf8   :  { %3960 = vst [vmem:[#allocation10_spill] sm:$0xff] %v3234_v21  ;;  %3961 = vst [vmem:[#allocation11_spill] sm:$0xff] %v3237_v1  ;;  %v3240_v27 = vadd.f32 %v357_v26, %v3195_v43  ;;  %v3243_v31 = vadd.f32 %v470_v25, %v3197_v52 }
  0xf9   :  { %v359_v61 = vpop.f32.mrf.mxu0  ;;  %v472_v14 = vpop.f32.mrf.mxu1 }
  0xfa   :  { %3962 = vst [vmem:[#allocation12_spill] sm:$0xff] %v3240_v27  ;;  %3963 = vst [vmem:[#allocation13_spill] sm:$0xff] %v3243_v31  ;;  %v3246_v63 = vadd.f32 %v359_v61, %v3199_v3  ;;  %v3249_v15 = vadd.f32 %v472_v14, %v3201_v4 }
  0xfb   :  { %v363_v20 = vpop.f32.mrf.mxu0  ;;  %v476_v21 = vpop.f32.mrf.mxu1 }
  0xfc   :  { %3964 = vst [vmem:[#allocation14_spill] sm:$0xff] %v3246_v63  ;;  %3965 = vst [vmem:[#allocation15_spill] sm:$0xff] %v3249_v15  ;;  %v3252_v60 = vadd.f32 %v363_v20, %v3195_v43  ;;  %v3255_v1 = vadd.f32 %v476_v21, %v3197_v52 }
  0xfd   :  { %v365_v26 = vpop.f32.mrf.mxu0  ;;  %v478_v27 = vpop.f32.mrf.mxu1 }
  0xfe   :  { %3966 = vst [vmem:[#allocation16_spill] sm:$0xff] %v3252_v60  ;;  %3967 = vst [vmem:[#allocation17_spill] sm:$0xff] %v3255_v1  ;;  %v3258_v25 = vadd.f32 %v365_v26, %v3199_v3  ;;  %v3261_v31 = vadd.f32 %v478_v27, %v3201_v4 }
  0xff   :  { %v367_v61 = vpop.f32.mrf.mxu0  ;;  %v480_v63 = vpop.f32.mrf.mxu1 }
 0x100   :  { %3968 = vst [vmem:[#allocation18_spill] sm:$0xff] %v3258_v25  ;;  %3969 = vst [vmem:[#allocation19_spill] sm:$0xff] %v3261_v31  ;;  %v3264_v14 = vadd.f32 %v367_v61, %v3195_v43  ;;  %v3267_v15 = vadd.f32 %v480_v63, %v3197_v52 }
 0x101   :  { %v369_v20 = vpop.f32.mrf.mxu0  ;;  %v482_v60 = vpop.f32.mrf.mxu1 }
 0x102   :  { %3970 = vst [vmem:[#allocation20_spill] sm:$0xff] %v3264_v14  ;;  %3971 = vst [vmem:[#allocation21_spill] sm:$0xff] %v3267_v15  ;;  %v3270_v21 = vadd.f32 %v369_v20, %v3199_v3  ;;  %v3273_v1 = vadd.f32 %v482_v60, %v3201_v4 }
 0x103   :  { %v373_v26 = vpop.f32.mrf.mxu0  ;;  %v486_v25 = vpop.f32.mrf.mxu1 }
 0x104   :  { %3972 = vst [vmem:[#allocation22_spill] sm:$0xff] %v3270_v21  ;;  %3973 = vst [vmem:[#allocation23_spill] sm:$0xff] %v3273_v1  ;;  %v3276_v27 = vadd.f32 %v373_v26, %v3195_v43  ;;  %v3279_v31 = vadd.f32 %v486_v25, %v3197_v52 }
 0x105   :  { %v375_v61 = vpop.f32.mrf.mxu0  ;;  %v488_v14 = vpop.f32.mrf.mxu1 }
 0x106   :  { %3974 = vst [vmem:[#allocation24_spill] sm:$0xff] %v3276_v27  ;;  %3975 = vst [vmem:[#allocation25_spill] sm:$0xff] %v3279_v31  ;;  %v3282_v63 = vadd.f32 %v375_v61, %v3199_v3  ;;  %v3285_v15 = vadd.f32 %v488_v14, %v3201_v4 }
 0x107   :  { %v377_v20 = vpop.f32.mrf.mxu0  ;;  %v490_v21 = vpop.f32.mrf.mxu1 }
 0x108   :  { %3976 = vst [vmem:[#allocation26_spill] sm:$0xff] %v3282_v63  ;;  %3977 = vst [vmem:[#allocation27_spill] sm:$0xff] %v3285_v15  ;;  %v3288_v60 = vadd.f32 %v377_v20, %v3195_v43  ;;  %v3291_v1 = vadd.f32 %v490_v21, %v3197_v52 }
 0x109   :  { %v379_v26 = vpop.f32.mrf.mxu0  ;;  %v492_v27 = vpop.f32.mrf.mxu1 }
 0x10a   :  { %3978 = vst [vmem:[#allocation28_spill] sm:$0xff] %v3288_v60  ;;  %3979 = vst [vmem:[#allocation29_spill] sm:$0xff] %v3291_v1  ;;  %v3294_v25 = vadd.f32 %v379_v26, %v3199_v3  ;;  %v3297_v31 = vadd.f32 %v492_v27, %v3201_v4 }
 0x10b   :  { %v383_v61 = vpop.f32.mrf.mxu0  ;;  %v496_v63 = vpop.f32.mrf.mxu1 }
 0x10c   :  { %3980 = vst [vmem:[#allocation30_spill] sm:$0xff] %v3294_v25  ;;  %3981 = vst [vmem:[#allocation31_spill] sm:$0xff] %v3297_v31  ;;  %v3300_v14 = vadd.f32 %v383_v61, %v3195_v43  ;;  %v3303_v15 = vadd.f32 %v496_v63, %v3197_v52 }
 0x10d   :  { %v385_v20 = vpop.f32.mrf.mxu0  ;;  %v498_v60 = vpop.f32.mrf.mxu1 }
 0x10e   :  { %3982 = vst [vmem:[#allocation32_spill] sm:$0xff] %v3300_v14  ;;  %3983 = vst [vmem:[#allocation33_spill] sm:$0xff] %v3303_v15  ;;  %v3306_v21 = vadd.f32 %v385_v20, %v3199_v3  ;;  %v3309_v1 = vadd.f32 %v498_v60, %v3201_v4 }
 0x10f   :  { %v387_v26 = vpop.f32.mrf.mxu0  ;;  %v500_v25 = vpop.f32.mrf.mxu1 }
 0x110   :  { %3984 = vst [vmem:[#allocation34_spill] sm:$0xff] %v3306_v21  ;;  %3985 = vst [vmem:[#allocation35_spill] sm:$0xff] %v3309_v1  ;;  %v3312_v27 = vadd.f32 %v387_v26, %v3195_v43  ;;  %v3315_v31 = vadd.f32 %v500_v25, %v3197_v52 }
 0x111   :  { %v389_v61 = vpop.f32.mrf.mxu0  ;;  %v502_v14 = vpop.f32.mrf.mxu1 }
 0x112   :  { %3986 = vst [vmem:[#allocation36_spill] sm:$0xff] %v3312_v27  ;;  %3987 = vst [vmem:[#allocation37_spill] sm:$0xff] %v3315_v31  ;;  %v3318_v63 = vadd.f32 %v389_v61, %v3199_v3  ;;  %v3321_v15 = vadd.f32 %v502_v14, %v3201_v4 }
 0x113   :  { %v393_v20 = vpop.f32.mrf.mxu0  ;;  %v506_v21 = vpop.f32.mrf.mxu1 }
 0x114   :  { %3988 = vst [vmem:[#allocation38_spill] sm:$0xff] %v3318_v63  ;;  %3989 = vst [vmem:[#allocation39_spill] sm:$0xff] %v3321_v15  ;;  %v3324_v60 = vadd.f32 %v393_v20, %v3195_v43  ;;  %v3327_v1 = vadd.f32 %v506_v21, %v3197_v52 }
 0x115   :  { %v395_v26 = vpop.f32.mrf.mxu0  ;;  %v508_v27 = vpop.f32.mrf.mxu1 }
 0x116   :  { %3990 = vst [vmem:[#allocation40_spill] sm:$0xff] %v3324_v60  ;;  %3991 = vst [vmem:[#allocation41_spill] sm:$0xff] %v3327_v1  ;;  %v3330_v25 = vadd.f32 %v395_v26, %v3199_v3  ;;  %v3333_v31 = vadd.f32 %v508_v27, %v3201_v4 }
 0x117   :  { %v397_v61 = vpop.f32.mrf.mxu0  ;;  %v510_v63 = vpop.f32.mrf.mxu1 }
 0x118   :  { %3992 = vst [vmem:[#allocation42_spill] sm:$0xff] %v3330_v25  ;;  %3993 = vst [vmem:[#allocation43_spill] sm:$0xff] %v3333_v31  ;;  %v3336_v14 = vadd.f32 %v397_v61, %v3195_v43  ;;  %v3339_v15 = vadd.f32 %v510_v63, %v3197_v52 }
 0x119   :  { %v399_v20 = vpop.f32.mrf.mxu0  ;;  %v512_v60 = vpop.f32.mrf.mxu1 }
 0x11a   :  { %3994 = vst [vmem:[#allocation44_spill] sm:$0xff] %v3336_v14  ;;  %3995 = vst [vmem:[#allocation45_spill] sm:$0xff] %v3339_v15  ;;  %v3342_v21 = vadd.f32 %v399_v20, %v3199_v3  ;;  %v3345_v1 = vadd.f32 %v512_v60, %v3201_v4 }
 0x11b   :  { %v403_v26 = vpop.f32.mrf.mxu0  ;;  %v516_v25 = vpop.f32.mrf.mxu1 }
 0x11c   :  { %3996 = vst [vmem:[#allocation46_spill] sm:$0xff] %v3342_v21  ;;  %3997 = vst [vmem:[#allocation47_spill] sm:$0xff] %v3345_v1  ;;  %v3348_v27 = vadd.f32 %v403_v26, %v3195_v43  ;;  %v3351_v31 = vadd.f32 %v516_v25, %v3197_v52  ;;  %v334_v25 = vadd.f32 %v3174_v18, %v3195_v43 }
 0x11d   :  { %v405_v61 = vpop.f32.mrf.mxu0  ;;  %v518_v14 = vpop.f32.mrf.mxu1  ;;  %v340_v18 = vadd.f32 %v3191_v32, %v3199_v3 }
 0x11e   :  { %3998 = vst [vmem:[#allocation48_spill] sm:$0xff] %v3348_v27  ;;  %3999 = vst [vmem:[#allocation49_spill] sm:$0xff] %v3351_v31  ;;  %v3354_v63 = vadd.f32 %v405_v61, %v3199_v3  ;;  %v3357_v15 = vadd.f32 %v518_v14, %v3201_v4 }
 0x11f   :  { %v407_v20 = vpop.f32.mrf.mxu0  ;;  %v520_v21 = vpop.f32.mrf.mxu1 }
 0x120   :  { %4000 = vst [vmem:[#allocation50_spill] sm:$0xff] %v3354_v63  ;;  %4001 = vst [vmem:[#allocation51_spill] sm:$0xff] %v3357_v15  ;;  %v3360_v60 = vadd.f32 %v407_v20, %v3195_v43  ;;  %v3363_v1 = vadd.f32 %v520_v21, %v3197_v52  ;;  %v336_v15 = vadd.f32 %v3180_v23, %v3199_v3 }
 0x121   :  { %v409_v26 = vpop.f32.mrf.mxu0  ;;  %v522_v27 = vpop.f32.mrf.mxu1  ;;  %v338_v21 = vadd.f32 %v3187_v28, %v3195_v43  ;;  %v449_v28 = vadd.f32 %v3182_v24, %v3201_v4 }
 0x122   :  { %4002 = vst [vmem:[#allocation52_spill] sm:$0xff] %v3360_v60  ;;  %4003 = vst [vmem:[#allocation53_spill] sm:$0xff] %v3363_v1  ;;  %v3368_v31 = vadd.f32 %v409_v26, %v3199_v3  ;;  %v3371_v61 = vadd.f32 %v522_v27, %v3201_v4 }
 0x123   :  { %v825_v14 = vpop.f32.mrf.mxu0  ;;  %v868_v60 = vpop.f32.mrf.mxu1 }
 0x124   :  { %4004 = vst [vmem:[#allocation54_spill] sm:$0xff] %v3368_v31  ;;  %4005 = vst [vmem:[#allocation55_spill] sm:$0xff] %v3371_v61  ;;  %v877_v20 = vadd.f32 %v825_v14, %v334_v25 }
 0x125   :  { %v827_v63 = vpop.f32.mrf.mxu0  ;;  %v870_v27 = vpop.f32.mrf.mxu1 }
 0x126   :  { %v2240_v1 = vmul.f32 -1.442695, %v877_v20  ;;  %v878_v13 = vadd.f32 %v827_v63, %v336_v15  ;;  %v880_v43 = vadd.f32 %v870_v27, %v449_v28  ;;  %v447_v15 = vadd.f32 %v3176_v19, %v3197_v52 }
 0x127   :  { %v829_v17 = vpop.f32.mrf.mxu0  ;;  %v872_v25 = vpop.f32.mrf.mxu1 }
 0x128   :  { %2466 = vpow2.f32 %v2240_v1  ;;  %v2242_v26 = vmul.f32 -1.442695, %v878_v13  ;;  %v881_v61 = vadd.f32 %v829_v17, %v338_v21  ;;  %v453_v1 = vadd.f32 %v3193_v35, %v3201_v4 }
 0x129   :  { %v831_v31 = vpop.f32.mrf.mxu0  ;;  %v874_v32 = vpop.f32.mrf.mxu1  ;;  %v879_v3 = vadd.f32 %v868_v60, %v447_v15  ;;  %v451_v13 = vadd.f32 %v3189_v29, %v3197_v52  ;;  %v2244_v17 = vmul.f32 -1.442695, %v880_v43 }
 0x12a   :  { %2468 = vpow2.f32 %v2242_v26  ;;  %v2241_v30 = vmul.f32 -1.442695, %v881_v61  ;;  %v882_v23 = vadd.f32 %v831_v31, %v340_v18 }
 0x12b   :  { %v883_v63 = vadd.f32 %v872_v25, %v451_v13 }
 0x12c   :  { %2470 = vpow2.f32 %v2241_v30  ;;  %v2243_v14 = vmul.f32 -1.442695, %v882_v23  ;;  %v884_v30 = vadd.f32 %v874_v32, %v453_v1 }
 0x12e   :  { %2472 = vpow2.f32 %v2243_v14  ;;  %v2245_v20 = vmul.f32 -1.442695, %v884_v30  ;;  %v2323_v30 = vpop.permute.xlu0 %2322 }
 0x12f   :  { %2474 = vtanh.f32 %v879_v3 }
 0x130   :  { %2476 = vpow2.f32 %v2244_v17 }
 0x135   :  { %v2467_v31 = vpop.eup %2466 }
 0x136   :  { %v891_v61 = vadd.f32 1.0, %v2467_v31 }
 0x137   :  { %v2469_v24 = vpop.eup %2468 }
 0x138   :  { %2478 = vrcp.f32 %v891_v61  ;;  %v903_v21 = vadd.f32 1.0, %v2469_v24 }
 0x139   :  { %v2471_v19 = vpop.eup %2470  ;;  %2480 = vtanh.f32 %v883_v63  ;;  %v2324_v63 = vunpack.i.l.bf16 %v2323_v30 }
 0x13a   :  { %2482 = vrcp.f32 %v903_v21  ;;  %v892_v18 = vadd.f32 1.0, %v2471_v19  ;;  %v2325_v21 = vunpack.i.h.bf16 %v2323_v30 }
 0x13b   :  { %v2473_v35 = vpop.eup %2472  ;;  %2484 = vpow2.f32 %v2245_v20 }
 0x13c   :  { %2486 = vrcp.f32 %v892_v18  ;;  %v904_v4 = vadd.f32 1.0, %v2473_v35  ;;  %v2475_v29 = vpop.eup %2474 }
 0x13d   :  { %v2477_v52 = vpop.eup %2476 }
 0x13e   :  { %2488 = vrcp.f32 %v904_v4  ;;  %v917_v25 = vadd.f32 1.0, %v2477_v52  ;;  %v4006_v52 = vmov 0  }
 0x140   :  { %2490 = vrcp.f32 %v917_v25 }
 0x145   :  { %v2479_v60 = vpop.eup %2478 }
 0x146   :  { %v2481_v26 = vpop.eup %2480  ;;  %v925_v27 = vmul.f32 %v2479_v60, %v2475_v29 }
 0x147   :  { %v2483_v23 = vpop.eup %2482 }
 0x148   :  { %v2485_v14 = vpop.eup %2484  ;;  %v923_v28 = vmul.f32 0.0, %v2483_v23 }
 0x149   :  { %v2487_v43 = vpop.eup %2486  ;;  %v918_v3 = vadd.f32 1.0, %v2485_v14 }
 0x14a   :  { %v3387_v15 = vadd.f32 %v925_v27, %v923_v28  ;;  %v926_v32 = vmul.f32 %v2487_v43, %v2481_v26 }
 0x14b   :  { %v2489_v1 = vpop.eup %2488 }
 0x14c   :  { %2492 = vtanh.f32 %v3387_v15  ;;  %v924_v13 = vmul.f32 0.0, %v2489_v1 }
 0x14d   :  { %2494 = vrcp.f32 %v918_v3  ;;  %v2491_v31 = vpop.eup %2490  ;;  %v4008_v3 = vld [vmem:[#allocation6_spill] sm:$0xff] }
 0x14e   :  { %v3390_v17 = vadd.f32 %v926_v32, %v924_v13 }
 0x150   :  { %2496 = vtanh.f32 %v3390_v17 }
 0x159   :  { %v2493_v61 = vpop.eup %2492 }
 0x15a   :  { %v931_v24 = vmul.f32 %v2493_v61, %v2491_v31  ;;  %v2495_v20 = vpop.eup %2494 }
 0x15c   :  { %v949_v19 = vmul.f32 %v2324_v63, %v931_v24 }
 0x15d   :  { %v2497_v18 = vpop.eup %2496 }
 0x15e   :  { %v932_v35 = vmul.f32 %v2497_v18, %v2495_v20  ;;  %951 = vst [vmem:[%s3948_s5] sm:$0xff] %v949_v19 }
 0x160   :  { %v950_v4 = vmul.f32 %v2325_v21, %v932_v35  ;;  %v962_v29 = vpack.c.bf16 %v932_v35, %v931_v24  ;;  %v4010_v24 = vld [vmem:[#allocation3_spill] sm:$0xff]  ;;  %v4012_v35 = vld [vmem:[#allocation5_spill] sm:$0xff] }
 0x161   :  { %v4011_v21 = vld [vmem:[#allocation7_spill] sm:$0xff] }
 0x162   :  { %952 = vst [vmem:[%s3948_s5 + $0x8] sm:$0xff] %v950_v4  ;;  %996 = vmatmul.mubr.bf16.vlgmr.msra.gmra.mxu0 %v962_v29  ;;  %1039 = vmatmul.mubr.bf16.vlgmr.msra.gmra.mxu1 %v962_v29 }
 0x163   :  { %1137 = vmatpush1.bf16.msra.mxu0 %v2904_v36  ;;  %1180 = vmatpush1.bf16.msra.mxu1 %v2916_v38  ;;  %v4007_v36 = vmov 0.0  }
 0x164   :  { %1138 = vmatprep.subr.bf16.mxu0 %v2910_v37  ;;  %1181 = vmatprep.subr.bf16.mxu1 %v2921_v39  ;;  %v2264_v37 = vsel %vm1278_vm4, 1.0, %v4007_v36  ;;  %v2265_v38 = vsel %vm1279_vm5, 1.0, %v4007_v36 }
 0x165   :  { %1168 = vmatprep.mubr.bf16.mxu0 %v4006_v52  ;;  %1211 = vmatprep.mubr.bf16.mxu1 %v4006_v52  ;;  %v2332_v39 = vpack.i.bf16 %v2265_v38, %v2264_v37 }
 0x167   :  { %1139 = vmatpush1.bf16.msra.mxu0 %v2928_v40  ;;  %1182 = vmatpush1.bf16.msra.mxu1 %v2941_v42 }
 0x168   :  { %1140 = vmatprep.subr.bf16.mxu0 %v2935_v41  ;;  %1183 = vmatprep.subr.bf16.mxu1 %v2962_v46 }
 0x169   :  { %2333 = vperm.xlu1 %2331, %v2332_v39  }
 0x16b   :  { %1141 = vmatpush1.bf16.msra.mxu0 %v2951_v44  ;;  %1184 = vmatpush1.bf16.msra.mxu1 %v2968_v47 }
 0x16c   :  { %1142 = vmatprep.subr.bf16.mxu0 %v2956_v45  ;;  %1185 = vmatprep.subr.bf16.mxu1 %v2973_v48 }
 0x16f   :  { %1143 = vmatpush1.bf16.msra.mxu0 %v2981_v49  ;;  %1186 = vmatpush1.bf16.msra.mxu1 %v2994_v51 }
 0x170   :  { %1144 = vmatprep.subr.bf16.mxu0 %v2986_v50  ;;  %1187 = vmatprep.subr.bf16.mxu1 %v3009_v54 }
 0x173   :  { %1145 = vmatpush1.bf16.msra.mxu0 %v3003_v53  ;;  %1188 = vmatpush1.bf16.msra.mxu1 %v3021_v56 }
 0x174   :  { %1146 = vmatprep.subr.bf16.mxu0 %v3015_v55  ;;  %1189 = vmatprep.subr.bf16.mxu1 %v3031_v58 }
 0x177   :  { %1147 = vmatpush1.bf16.msra.mxu0 %v3047_v62  ;;  %1190 = vmatpush1.bf16.msra.mxu1 %v3061_v2 }
 0x178   :  { %1148 = vmatprep.subr.bf16.mxu0 %v3055_v0  ;;  %1191 = vmatprep.subr.bf16.mxu1 %v3076_v6 }
 0x17b   :  { %1149 = vmatpush1.bf16.msra.mxu0 %v3071_v5  ;;  %1192 = vmatpush1.bf16.msra.mxu1 %v3088_v8 }
 0x17c   :  { %1150 = vmatprep.subr.bf16.mxu0 %v3083_v7  ;;  %1193 = vmatprep.subr.bf16.mxu1 %v3093_v9 }
 0x17f   :  { %1151 = vmatpush1.bf16.msra.mxu0 %v3102_v10  ;;  %1194 = vmatpush1.bf16.msra.mxu1 %v3109_v11 }
 0x180   :  { %1309 = vmatprep.subr.bf16.mxu0 %v2891_v33  ;;  %1352 = vmatprep.subr.bf16.mxu1 %v2896_v34 }
 0x222   :  { %v997_v60 = vpop.f32.mrf.mxu0  ;;  %v1040_v27 = vpop.f32.mrf.mxu1 }
 0x223   :  { %v1049_v26 = vadd.f32 %v997_v60, %v3204_v12  ;;  %v4009_v12 = vld [vmem:[#allocation4_spill] sm:$0xff] }
 0x224   :  { %v999_v23 = vpop.f32.mrf.mxu0  ;;  %v1042_v28 = vpop.f32.mrf.mxu1 }
 0x225   :  { %v2248_v25 = vmul.f32 -1.442695, %v1049_v26  ;;  %v1050_v33 = vadd.f32 %v999_v23, %v3210_v16  ;;  %v1052_v63 = vadd.f32 %v1042_v28, %v4009_v12  ;;  %v1051_v16 = vadd.f32 %v1040_v27, %v4010_v24  ;;  %v2328_v24 = vpop.permute.xlu0 %2327 }
 0x226   :  { %v1001_v14 = vpop.f32.mrf.mxu0  ;;  %v1044_v30 = vpop.f32.mrf.mxu1 }
 0x227   :  { %2498 = vpow2.f32 %v2248_v25  ;;  %v2250_v34 = vmul.f32 -1.442695, %v1050_v33  ;;  %v1053_v43 = vadd.f32 %v1001_v14, %v3216_v22  ;;  %v2252_v20 = vmul.f32 -1.442695, %v1052_v63 }
 0x228   :  { %v1003_v32 = vpop.f32.mrf.mxu0  ;;  %v1046_v61 = vpop.f32.mrf.mxu1  ;;  %v1055_v22 = vadd.f32 %v1044_v30, %v4012_v35 }
 0x229   :  { %2500 = vpow2.f32 %v2250_v34  ;;  %v2249_v1 = vmul.f32 -1.442695, %v1053_v43  ;;  %v1054_v13 = vadd.f32 %v1003_v32, %v4008_v3  ;;  %v1056_v19 = vadd.f32 %v1046_v61, %v4011_v21 }
 0x22b   :  { %2502 = vpow2.f32 %v2249_v1  ;;  %v2251_v31 = vmul.f32 -1.442695, %v1054_v13  ;;  %v2253_v37 = vmul.f32 -1.442695, %v1056_v19 }
 0x22d   :  { %2504 = vpow2.f32 %v2251_v31 }
 0x22e   :  { %2506 = vtanh.f32 %v1051_v16 }
 0x22f   :  { %2508 = vpow2.f32 %v2252_v20  ;;  %v2329_v20 = vunpack.i.l.bf16 %v2328_v24 }
 0x234   :  { %v2499_v18 = vpop.eup %2498 }
 0x235   :  { %v1063_v4 = vadd.f32 1.0, %v2499_v18  ;;  %v2330_v18 = vunpack.i.h.bf16 %v2328_v24 }
 0x236   :  { %v2501_v29 = vpop.eup %2500 }
 0x237   :  { %2510 = vrcp.f32 %v1063_v4  ;;  %v1075_v38 = vadd.f32 1.0, %v2501_v29 }
 0x238   :  { %v2503_v39 = vpop.eup %2502  ;;  %2512 = vtanh.f32 %v1055_v22 }
 0x239   :  { %2514 = vrcp.f32 %v1075_v38  ;;  %v1064_v60 = vadd.f32 1.0, %v2503_v39  ;;  %v3468_v38 = vld [vmem:[%s3945_s2 + $0xe8] ss:$16 sps:$4 sm:$0xff]   ;;  %v3474_v39 = vld [vmem:[%s3945_s2 + $0xc4] ss:$16 sps:$4 sm:$0xff]  }
 0x23a   :  { %v2505_v26 = vpop.eup %2504  ;;  %2516 = vpow2.f32 %v2253_v37  ;;  %v3462_v37 = vld [vmem:[%s3945_s2 + $0xe0] ss:$16 sps:$4 sm:$0xff]  }
 0x23b   :  { %2518 = vrcp.f32 %v1064_v60  ;;  %v1076_v27 = vadd.f32 1.0, %v2505_v26  ;;  %v2507_v23 = vpop.eup %2506  ;;  %v3480_v60 = vld [vmem:[%s3945_s2 + $0xcc] ss:$16 sps:$4 sm:$0xff]  }
 0x23c   :  { %v2509_v25 = vpop.eup %2508 }
 0x23d   :  { %2520 = vrcp.f32 %v1076_v27  ;;  %v1089_v43 = vadd.f32 1.0, %v2509_v25 }
 0x23f   :  { %2522 = vrcp.f32 %v1089_v43 }
 0x244   :  { %v2511_v33 = vpop.eup %2510 }
 0x245   :  { %v2513_v14 = vpop.eup %2512  ;;  %v1097_v34 = vmul.f32 %v2511_v33, %v2507_v23  ;;  %v4019_v23 = vld [vmem:[#allocation15_spill] sm:$0xff] }
 0x246   :  { %v2515_v28 = vpop.eup %2514 }
 0x247   :  { %v2517_v32 = vpop.eup %2516  ;;  %v1095_v1 = vmul.f32 %v2515_v28, %v3387_v15 }
 0x248   :  { %v2519_v3 = vpop.eup %2518  ;;  %v1090_v12 = vadd.f32 1.0, %v2517_v32 }
 0x249   :  { %v3446_v13 = vadd.f32 %v1097_v34, %v1095_v1  ;;  %v1098_v30 = vmul.f32 %v2519_v3, %v2513_v14  ;;  %v4020_v14 = vld [vmem:[#allocation13_spill] sm:$0xff] }
 0x24a   :  { %v2521_v31 = vpop.eup %2520 }
 0x24b   :  { %v1096_v63 = vmul.f32 %v2521_v31, %v3390_v17  ;;  %2524 = vtanh.f32 %v3446_v13 }
 0x24c   :  { %2526 = vrcp.f32 %v1090_v12  ;;  %v2523_v16 = vpop.eup %2522 }
 0x24d   :  { %v3450_v61 = vadd.f32 %v1098_v30, %v1096_v63 }
 0x24f   :  { %2528 = vtanh.f32 %v3450_v61 }
 0x258   :  { %v2525_v15 = vpop.eup %2524 }
 0x259   :  { %v1103_v21 = vmul.f32 %v2525_v15, %v2523_v16  ;;  %v2527_v19 = vpop.eup %2526 }
 0x25b   :  { %v1121_v35 = vmul.f32 %v2329_v20, %v1103_v21 }
 0x25c   :  { %v2529_v22 = vpop.eup %2528 }
 0x25d   :  { %v1104_v4 = vmul.f32 %v2529_v22, %v2527_v19  ;;  %2256 = vst [vmem:[%s3948_s5 + $0x10] sm:$0xff] %v1121_v35 }
 0x25f   :  { %v1122_v17 = vmul.f32 %v2330_v18, %v1104_v4  ;;  %v1135_v29 = vpack.c.bf16 %v1104_v4, %v1103_v21 }
 0x261   :  { %2257 = vst [vmem:[%s3948_s5 + $0x18] sm:$0xff] %v1122_v17  ;;  %1169 = vmatmul.mubr.bf16.vlgmr.msra.gmra.mxu0 %v1135_v29  ;;  %1212 = vmatmul.mubr.bf16.vlgmr.msra.gmra.mxu1 %v1135_v29 }
 0x262   :  { %1310 = vmatpush1.bf16.msra.mxu0 %v3462_v37  ;;  %1353 = vmatpush1.bf16.msra.mxu1 %v3468_v38 }
 0x263   :  { %1311 = vmatprep.subr.bf16.mxu0 %v3474_v39  ;;  %1354 = vmatprep.subr.bf16.mxu1 %v3480_v60 }
 0x264   :  { %1341 = vmatprep.mubr.bf16.mxu0 %v4006_v52  ;;  %1384 = vmatprep.mubr.bf16.mxu1 %v4006_v52 }
 0x266   :  { %1312 = vmatpush1.bf16.msra.mxu0 %v2928_v40  ;;  %1355 = vmatpush1.bf16.msra.mxu1 %v2941_v42  ;;  %v3514_v40 = vld [vmem:[%s3945_s2 + $0xe4] ss:$16 sps:$4 sm:$0xff]   ;;  %v2274_v42 = vsel %vm1451_vm6, 1.0, %v4007_v36 }
 0x267   :  { %1313 = vmatprep.subr.bf16.mxu0 %v2935_v41  ;;  %1356 = vmatprep.subr.bf16.mxu1 %v2962_v46  ;;  %v3520_v41 = vld [vmem:[%s3945_s2 + $0xec] ss:$16 sps:$4 sm:$0xff]  }
 0x26a   :  { %1314 = vmatpush1.bf16.msra.mxu0 %v2951_v44  ;;  %1357 = vmatpush1.bf16.msra.mxu1 %v2968_v47  ;;  %v2275_v44 = vsel %vm1452_vm7, 1.0, %v4007_v36  ;;  %v4013_v47 = vld [vmem:[#allocation8_spill] sm:$0xff] }
 0x26b   :  { %1315 = vmatprep.subr.bf16.mxu0 %v2956_v45  ;;  %1358 = vmatprep.subr.bf16.mxu1 %v2973_v48  ;;  %v2337_v45 = vpack.i.bf16 %v2275_v44, %v2274_v42 }
 0x26d   :  { %2338 = vperm.xlu1 %2331, %v2337_v45  }
 0x26e   :  { %1316 = vmatpush1.bf16.msra.mxu0 %v2981_v49  ;;  %1359 = vmatpush1.bf16.msra.mxu1 %v2994_v51 }
 0x26f   :  { %1317 = vmatprep.subr.bf16.mxu0 %v2986_v50  ;;  %1360 = vmatprep.subr.bf16.mxu1 %v3009_v54 }
 0x272   :  { %1318 = vmatpush1.bf16.msra.mxu0 %v3003_v53  ;;  %1361 = vmatpush1.bf16.msra.mxu1 %v3021_v56  ;;  %v4014_v53 = vld [vmem:[#allocation10_spill] sm:$0xff] }
 0x273   :  { %1319 = vmatprep.subr.bf16.mxu0 %v3015_v55  ;;  %1362 = vmatprep.subr.bf16.mxu1 %v3031_v58  ;;  %v4015_v58 = vld [vmem:[#allocation12_spill] sm:$0xff] }
 0x276   :  { %1320 = vmatpush1.bf16.msra.mxu0 %v3047_v62  ;;  %1363 = vmatpush1.bf16.msra.mxu1 %v3061_v2  ;;  %v4016_v2 = vld [vmem:[#allocation14_spill] sm:$0xff] }
 0x277   :  { %1321 = vmatprep.subr.bf16.mxu0 %v3055_v0  ;;  %1364 = vmatprep.subr.bf16.mxu1 %v3076_v6 }
 0x27a   :  { %1322 = vmatpush1.bf16.msra.mxu0 %v3071_v5  ;;  %1365 = vmatpush1.bf16.msra.mxu1 %v3088_v8  ;;  %v4017_v8 = vld [vmem:[#allocation11_spill] sm:$0xff] }
 0x27b   :  { %1323 = vmatprep.subr.bf16.mxu0 %v3083_v7  ;;  %1366 = vmatprep.subr.bf16.mxu1 %v3093_v9 }
 0x27e   :  { %1324 = vmatpush1.bf16.msra.mxu0 %v3102_v10  ;;  %1367 = vmatpush1.bf16.msra.mxu1 %v3109_v11  ;;  %v4018_v11 = vld [vmem:[#allocation9_spill] sm:$0xff] }
 0x27f   :  { %1482 = vmatprep.subr.bf16.mxu0 %v3514_v40  ;;  %1525 = vmatprep.subr.bf16.mxu1 %v3520_v41 }
 0x321   :  { %v1170_v46 = vpop.f32.mrf.mxu0  ;;  %v1213_v49 = vpop.f32.mrf.mxu1 }
 0x322   :  { %v1222_v48 = vadd.f32 %v1170_v46, %v4013_v47  ;;  %v1224_v26 = vadd.f32 %v1213_v49, %v4018_v11  ;;  %v2334_v46 = vpop.permute.xlu1 %2333  ;;  %v3630_v11 = vld [vmem:[%s3945_s2 + $0x60] ss:$16 sps:$4 sm:$0xff]  }
 0x323   :  { %v1172_v50 = vpop.f32.mrf.mxu0  ;;  %v1215_v57 = vpop.f32.mrf.mxu1 }
 0x324   :  { %v2258_v51 = vmul.f32 -1.442695, %v1222_v48  ;;  %v1223_v54 = vadd.f32 %v1172_v50, %v4014_v53  ;;  %v1225_v9 = vadd.f32 %v1215_v57, %v4017_v8  ;;  %v2335_v48 = vunpack.i.l.bf16 %v2334_v46  ;;  %v3558_v57 = vld [vmem:[%s3945_s2 + $0xc0] ss:$16 sps:$4 sm:$0xff]   ;;  %v3612_v8 = vld [vmem:[%s3945_s2 + $0x88] ss:$16 sps:$4 sm:$0xff]  }
 0x325   :  { %v1174_v55 = vpop.f32.mrf.mxu0  ;;  %v1217_v6 = vpop.f32.mrf.mxu1 }
 0x326   :  { %2530 = vpow2.f32 %v2258_v51  ;;  %v2260_v56 = vmul.f32 -1.442695, %v1223_v54  ;;  %v1226_v59 = vadd.f32 %v1174_v55, %v4015_v58  ;;  %v2262_v27 = vmul.f32 -1.442695, %v1225_v9  ;;  %v3564_v58 = vld [vmem:[%s3945_s2 + $0xc8] ss:$16 sps:$4 sm:$0xff]  }
 0x327   :  { %v1176_v62 = vpop.f32.mrf.mxu0  ;;  %v1219_v10 = vpop.f32.mrf.mxu1  ;;  %v1228_v34 = vadd.f32 %v1217_v6, %v4020_v14  ;;  %v2336_v51 = vunpack.i.h.bf16 %v2334_v46  ;;  %v3600_v6 = vld [vmem:[%s3945_s2 + $0x8c] ss:$16 sps:$4 sm:$0xff]   ;;  %v3618_v9 = vld [vmem:[%s3945_s2 + $0x64] ss:$16 sps:$4 sm:$0xff]  }
 0x328   :  { %2532 = vpow2.f32 %v2260_v56  ;;  %v2259_v0 = vmul.f32 -1.442695, %v1226_v59  ;;  %v1227_v5 = vadd.f32 %v1176_v62, %v4016_v2  ;;  %v1229_v25 = vadd.f32 %v1219_v10, %v4019_v23  ;;  %v3570_v59 = vld [vmem:[%s3945_s2 + $0xa4] ss:$16 sps:$4 sm:$0xff]   ;;  %v3576_v62 = vld [vmem:[%s3945_s2 + $0xac] ss:$16 sps:$4 sm:$0xff]  }
 0x329   :  { %v3588_v2 = vld [vmem:[%s3945_s2 + $0xa8] ss:$16 sps:$4 sm:$0xff]   ;;  %v3624_v10 = vld [vmem:[%s3945_s2 + $0x6c] ss:$16 sps:$4 sm:$0xff]   ;;  %v3666_v14 = vld [vmem:[%s3945_s2 + $0x24] ss:$16 sps:$4 sm:$0xff]  }
 0x32a   :  { %2534 = vpow2.f32 %v2259_v0  ;;  %v2261_v7 = vmul.f32 -1.442695, %v1227_v5  ;;  %v2263_v32 = vmul.f32 -1.442695, %v1229_v25  ;;  %v3582_v0 = vld [vmem:[%s3945_s2 + $0xa0] ss:$16 sps:$4 sm:$0xff]  }
 0x32b   :  { %v3594_v5 = vld [vmem:[%s3945_s2 + $0x84] ss:$16 sps:$4 sm:$0xff]   ;;  %v3648_v23 = vld [vmem:[%s3945_s2 + $0x4c] ss:$16 sps:$4 sm:$0xff]   ;;  %v3654_v25 = vld [vmem:[%s3945_s2 + $0x40] ss:$16 sps:$4 sm:$0xff]  }
 0x32c   :  { %2536 = vpow2.f32 %v2261_v7  ;;  %v3606_v7 = vld [vmem:[%s3945_s2 + $0x80] ss:$16 sps:$4 sm:$0xff]   ;;  %v4023_v46 = vld [vmem:[#allocation20_spill] sm:$0xff] }
 0x32d   :  { %2538 = vtanh.f32 %v1224_v26  ;;  %v3636_v26 = vld [vmem:[%s3945_s2 + $0x68] ss:$16 sps:$4 sm:$0xff]  }
 0x32e   :  { %2540 = vpow2.f32 %v2262_v27  ;;  %v3642_v27 = vld [vmem:[%s3945_s2 + $0x44] ss:$16 sps:$4 sm:$0xff]  }
 0x333   :  { %v2531_v33 = vpop.eup %2530 }
 0x334   :  { %v1236_v28 = vadd.f32 1.0, %v2531_v33  ;;  %v3660_v33 = vld [vmem:[%s3945_s2 + $0x48] ss:$16 sps:$4 sm:$0xff]  }
 0x335   :  { %v2533_v43 = vpop.eup %2532 }
 0x336   :  { %2542 = vrcp.f32 %v1236_v28  ;;  %v1248_v1 = vadd.f32 1.0, %v2533_v43  ;;  %v3678_v28 = vld [vmem:[%s3945_s2 + $0x20] ss:$16 sps:$4 sm:$0xff]   ;;  %v3684_v43 = vld [vmem:[%s3945_s2 + $0x28] ss:$16 sps:$4 sm:$0xff]  }
 0x337   :  { %v2535_v3 = vpop.eup %2534  ;;  %2544 = vtanh.f32 %v1228_v34  ;;  %v3672_v34 = vld [vmem:[%s3945_s2 + $0x2c] ss:$16 sps:$4 sm:$0xff]  }
 0x338   :  { %2546 = vrcp.f32 %v1248_v1  ;;  %v1237_v30 = vadd.f32 1.0, %v2535_v3  ;;  %v3696_v1 = vld [vmem:[%s3945_s2 + $0xc] ss:$16 sps:$4 sm:$0xff]   ;;  %v3702_v3 = vld [vmem:[%s3945_s2] ss:$16 sps:$4 sm:$0xff]  }
 0x339   :  { %v2537_v31 = vpop.eup %2536  ;;  %2548 = vpow2.f32 %v2263_v32  ;;  %v3690_v32 = vld [vmem:[%s3945_s2 + $0x4] ss:$16 sps:$4 sm:$0xff]  }
 0x33a   :  { %2550 = vrcp.f32 %v1237_v30  ;;  %v1249_v12 = vadd.f32 1.0, %v2537_v31  ;;  %v2539_v63 = vpop.eup %2538  ;;  %v3708_v30 = vld [vmem:[%s3945_s2 + $0x8] ss:$16 sps:$4 sm:$0xff]   ;;  %v3716_v31 = vld [vmem:[%s3946_s4] sm:$0xff] }
 0x33b   :  { %v2541_v24 = vpop.eup %2540  ;;  %vm1624_vm8 = vcmp.gt.s32.totalorder %v3716_v31, 4  ;;  %vm1797_vm10 = vcmp.gt.s32.totalorder %v3716_v31, 5  ;;  %vm1970_vm12 = vcmp.gt.s32.totalorder %v3716_v31, 6  ;;  %vm2143_vm14 = vcmp.gt.s32.totalorder %v3716_v31, 7 }
 0x33c   :  { %2552 = vrcp.f32 %v1249_v12  ;;  %v1262_v19 = vadd.f32 1.0, %v2541_v24  ;;  %v3722_v12 = vld [vmem:[%s3946_s4 + $0x8] sm:$0xff] }
 0x33d   :  { %vm1625_vm9 = vcmp.gt.s32.totalorder %v3722_v12, 4  ;;  %vm1798_vm11 = vcmp.gt.s32.totalorder %v3722_v12, 5  ;;  %vm1971_vm13 = vcmp.gt.s32.totalorder %v3722_v12, 6  ;;  %vm2144_vm15 = vcmp.gt.s32.totalorder %v3722_v12, 7 }
 0x33e   :  { %2554 = vrcp.f32 %v1262_v19  ;;  %v2285_v24 = vsel %vm1625_vm9, 1.0, %v4007_v36 }
 0x343   :  { %v2543_v16 = vpop.eup %2542 }
 0x344   :  { %v2545_v20 = vpop.eup %2544  ;;  %v1270_v15 = vmul.f32 %v2543_v16, %v2539_v63  ;;  %v2284_v63 = vsel %vm1624_vm8, 1.0, %v4007_v36 }
 0x345   :  { %v2547_v21 = vpop.eup %2546  ;;  %v2342_v16 = vpack.i.bf16 %v2285_v24, %v2284_v63 }
 0x346   :  { %v2549_v18 = vpop.eup %2548  ;;  %v1268_v35 = vmul.f32 %v2547_v21, %v3446_v13 }
 0x347   :  { %v2551_v22 = vpop.eup %2550  ;;  %v1263_v42 = vadd.f32 1.0, %v2549_v18  ;;  %2343 = vperm.xlu0 %2320, %v2342_v16   ;;  %v4027_v16 = vld [vmem:[#allocation23_spill] sm:$0xff] }
 0x348   :  { %v3536_v4 = vadd.f32 %v1270_v15, %v1268_v35  ;;  %v1271_v17 = vmul.f32 %v2551_v22, %v2545_v20  ;;  %v4021_v15 = vld [vmem:[#allocation16_spill] sm:$0xff]  ;;  %v4022_v22 = vld [vmem:[#allocation18_spill] sm:$0xff] }
 0x349   :  { %v2553_v29 = vpop.eup %2552 }
 0x34a   :  { %v1269_v44 = vmul.f32 %v2553_v29, %v3450_v61  ;;  %2556 = vtanh.f32 %v3536_v4 }
 0x34b   :  { %2558 = vrcp.f32 %v1263_v42  ;;  %v2555_v47 = vpop.eup %2554 }
 0x34c   :  { %v3540_v45 = vadd.f32 %v1271_v17, %v1269_v44 }
 0x34e   :  { %2560 = vtanh.f32 %v3540_v45 }
 0x357   :  { %v2557_v13 = vpop.eup %2556 }
 0x358   :  { %v1276_v49 = vmul.f32 %v2557_v13, %v2555_v47  ;;  %v2559_v50 = vpop.eup %2558 }
 0x35a   :  { %v1294_v53 = vmul.f32 %v2335_v48, %v1276_v49 }
 0x35b   :  { %v2561_v54 = vpop.eup %2560 }
 0x35c   :  { %v1277_v55 = vmul.f32 %v2561_v54, %v2559_v50  ;;  %2266 = vst [vmem:[%s3948_s5 + $0x20] sm:$0xff] %v1294_v53  ;;  %v4025_v54 = vld [vmem:[#allocation19_spill] sm:$0xff] }
 0x35e   :  { %v1295_v61 = vmul.f32 %v2336_v51, %v1277_v55  ;;  %v1308_v56 = vpack.c.bf16 %v1277_v55, %v1276_v49  ;;  %v4024_v49 = vld [vmem:[#allocation22_spill] sm:$0xff] }
 0x360   :  { %2267 = vst [vmem:[%s3948_s5 + $0x28] sm:$0xff] %v1295_v61  ;;  %1342 = vmatmul.mubr.bf16.vlgmr.msra.gmra.mxu0 %v1308_v56  ;;  %1385 = vmatmul.mubr.bf16.vlgmr.msra.gmra.mxu1 %v1308_v56  ;;  %v4026_v56 = vld [vmem:[#allocation17_spill] sm:$0xff] }
 0x361   :  { %1483 = vmatpush1.bf16.msra.mxu0 %v3462_v37  ;;  %1526 = vmatpush1.bf16.msra.mxu1 %v3468_v38 }
 0x362   :  { %1484 = vmatprep.subr.bf16.mxu0 %v3474_v39  ;;  %1527 = vmatprep.subr.bf16.mxu1 %v3480_v60 }
 0x363   :  { %1514 = vmatprep.mubr.bf16.mxu0 %v4006_v52  ;;  %1557 = vmatprep.mubr.bf16.mxu1 %v4006_v52 }
 0x365   :  { %1485 = vmatpush1.bf16.msra.mxu0 %v3558_v57  ;;  %1528 = vmatpush1.bf16.msra.mxu1 %v3564_v58 }
 0x366   :  { %1486 = vmatprep.subr.bf16.mxu0 %v3570_v59  ;;  %1529 = vmatprep.subr.bf16.mxu1 %v3576_v62 }
 0x369   :  { %1487 = vmatpush1.bf16.msra.mxu0 %v3582_v0  ;;  %1530 = vmatpush1.bf16.msra.mxu1 %v3588_v2 }
 0x36a   :  { %1488 = vmatprep.subr.bf16.mxu0 %v3594_v5  ;;  %1531 = vmatprep.subr.bf16.mxu1 %v3600_v6 }
 0x36d   :  { %1489 = vmatpush1.bf16.msra.mxu0 %v3606_v7  ;;  %1532 = vmatpush1.bf16.msra.mxu1 %v3612_v8 }
 0x36e   :  { %1490 = vmatprep.subr.bf16.mxu0 %v3618_v9  ;;  %1533 = vmatprep.subr.bf16.mxu1 %v3624_v10 }
 0x371   :  { %1491 = vmatpush1.bf16.msra.mxu0 %v3630_v11  ;;  %1534 = vmatpush1.bf16.msra.mxu1 %v3636_v26 }
 0x372   :  { %1492 = vmatprep.subr.bf16.mxu0 %v3642_v27  ;;  %1535 = vmatprep.subr.bf16.mxu1 %v3648_v23 }
 0x375   :  { %1493 = vmatpush1.bf16.msra.mxu0 %v3654_v25  ;;  %1536 = vmatpush1.bf16.msra.mxu1 %v3660_v33 }
 0x376   :  { %1494 = vmatprep.subr.bf16.mxu0 %v3666_v14  ;;  %1537 = vmatprep.subr.bf16.mxu1 %v3672_v34 }
 0x379   :  { %1495 = vmatpush1.bf16.msra.mxu0 %v3678_v28  ;;  %1538 = vmatpush1.bf16.msra.mxu1 %v3684_v43 }
 0x37a   :  { %1496 = vmatprep.subr.bf16.mxu0 %v3690_v32  ;;  %1539 = vmatprep.subr.bf16.mxu1 %v3696_v1 }
 0x37d   :  { %1497 = vmatpush1.bf16.msra.mxu0 %v3702_v3  ;;  %1540 = vmatpush1.bf16.msra.mxu1 %v3708_v30 }
 0x37e   :  { %1655 = vmatprep.subr.bf16.mxu0 %v3514_v40  ;;  %1698 = vmatprep.subr.bf16.mxu1 %v3520_v41 }
 0x420   :  { %v1343_v20 = vpop.f32.mrf.mxu0  ;;  %v1386_v19 = vpop.f32.mrf.mxu1 }
 0x421   :  { %v1395_v21 = vadd.f32 %v1343_v20, %v4021_v15  ;;  %v1397_v63 = vadd.f32 %v1386_v19, %v4026_v56 }
 0x422   :  { %v1345_v18 = vpop.f32.mrf.mxu0  ;;  %v1388_v44 = vpop.f32.mrf.mxu1 }
 0x423   :  { %v2268_v35 = vmul.f32 -1.442695, %v1395_v21  ;;  %v1396_v17 = vadd.f32 %v1345_v18, %v4022_v22  ;;  %v1398_v55 = vadd.f32 %v1388_v44, %v4025_v54  ;;  %v4028_v21 = vld [vmem:[#allocation21_spill] sm:$0xff] }
 0x424   :  { %v1347_v29 = vpop.f32.mrf.mxu0  ;;  %v1390_v51 = vpop.f32.mrf.mxu1 }
 0x425   :  { %2562 = vpow2.f32 %v2268_v35  ;;  %v2270_v42 = vmul.f32 -1.442695, %v1396_v17  ;;  %v1399_v47 = vadd.f32 %v1347_v29, %v4023_v46  ;;  %v2272_v24 = vmul.f32 -1.442695, %v1398_v55 }
 0x426   :  { %v1349_v48 = vpop.f32.mrf.mxu0  ;;  %v1392_v61 = vpop.f32.mrf.mxu1  ;;  %v1401_v18 = vadd.f32 %v1390_v51, %v4028_v21 }
 0x427   :  { %2564 = vpow2.f32 %v2270_v42  ;;  %v2269_v13 = vmul.f32 -1.442695, %v1399_v47  ;;  %v1400_v50 = vadd.f32 %v1349_v48, %v4024_v49  ;;  %v1402_v20 = vadd.f32 %v1392_v61, %v4027_v16  ;;  %v2339_v21 = vpop.permute.xlu1 %2338 }
 0x429   :  { %2566 = vpow2.f32 %v2269_v13  ;;  %v2271_v53 = vmul.f32 -1.442695, %v1400_v50  ;;  %v2273_v17 = vmul.f32 -1.442695, %v1402_v20 }
 0x42b   :  { %2568 = vpow2.f32 %v2271_v53 }
 0x42c   :  { %2570 = vtanh.f32 %v1397_v63 }
 0x42d   :  { %2572 = vpow2.f32 %v2272_v24 }
 0x432   :  { %v2563_v15 = vpop.eup %2562 }
 0x433   :  { %v1409_v35 = vadd.f32 1.0, %v2563_v15 }
 0x434   :  { %v2565_v22 = vpop.eup %2564 }
 0x435   :  { %2574 = vrcp.f32 %v1409_v35  ;;  %v1421_v29 = vadd.f32 1.0, %v2565_v22  ;;  %v2340_v35 = vunpack.i.l.bf16 %v2339_v21 }
 0x436   :  { %v2567_v42 = vpop.eup %2566  ;;  %2576 = vtanh.f32 %v1401_v18 }
 0x437   :  { %2578 = vrcp.f32 %v1421_v29  ;;  %v1410_v44 = vadd.f32 1.0, %v2567_v42  ;;  %v2341_v29 = vunpack.i.h.bf16 %v2339_v21  ;;  %v4031_v21 = vld [vmem:[#allocation28_spill] sm:$0xff] }
 0x438   :  { %v2569_v46 = vpop.eup %2568  ;;  %2580 = vpow2.f32 %v2273_v17 }
 0x439   :  { %2582 = vrcp.f32 %v1410_v44  ;;  %v1422_v19 = vadd.f32 1.0, %v2569_v46  ;;  %v2571_v47 = vpop.eup %2570 }
 0x43a   :  { %v2573_v48 = vpop.eup %2572 }
 0x43b   :  { %2584 = vrcp.f32 %v1422_v19  ;;  %v1435_v53 = vadd.f32 1.0, %v2573_v48  ;;  %v2295_v48 = vsel %vm1798_vm11, 1.0, %v4007_v36 }
 0x43d   :  { %2586 = vrcp.f32 %v1435_v53 }
 0x442   :  { %v2575_v13 = vpop.eup %2574 }
 0x443   :  { %v2577_v49 = vpop.eup %2576  ;;  %v1443_v50 = vmul.f32 %v2575_v13, %v2571_v47  ;;  %v2294_v47 = vsel %vm1797_vm10, 1.0, %v4007_v36 }
 0x444   :  { %v2579_v51 = vpop.eup %2578  ;;  %v2347_v13 = vpack.i.bf16 %v2295_v48, %v2294_v47 }
 0x445   :  { %v2581_v54 = vpop.eup %2580  ;;  %v1441_v55 = vmul.f32 %v2579_v51, %v3536_v4 }
 0x446   :  { %v2583_v61 = vpop.eup %2582  ;;  %v1436_v16 = vadd.f32 1.0, %v2581_v54  ;;  %2348 = vperm.xlu1 %2331, %v2347_v13   ;;  %v4035_v13 = vld [vmem:[#allocation31_spill] sm:$0xff] }
 0x447   :  { %v3736_v56 = vadd.f32 %v1443_v50, %v1441_v55  ;;  %v1444_v63 = vmul.f32 %v2583_v61, %v2577_v49  ;;  %v4029_v50 = vld [vmem:[#allocation24_spill] sm:$0xff]  ;;  %v4030_v61 = vld [vmem:[#allocation26_spill] sm:$0xff] }
 0x448   :  { %v2585_v24 = vpop.eup %2584 }
 0x449   :  { %v1442_v20 = vmul.f32 %v2585_v24, %v3540_v45  ;;  %2588 = vtanh.f32 %v3736_v56 }
 0x44a   :  { %2590 = vrcp.f32 %v1436_v16  ;;  %v2587_v18 = vpop.eup %2586 }
 0x44b   :  { %v3740_v15 = vadd.f32 %v1444_v63, %v1442_v20 }
 0x44d   :  { %2592 = vtanh.f32 %v3740_v15 }
 0x456   :  { %v2589_v4 = vpop.eup %2588 }
 0x457   :  { %v1449_v22 = vmul.f32 %v2589_v4, %v2587_v18  ;;  %v2591_v17 = vpop.eup %2590 }
 0x459   :  { %v1467_v42 = vmul.f32 %v2340_v35, %v1449_v22 }
 0x45a   :  { %v2593_v44 = vpop.eup %2592 }
 0x45b   :  { %v1450_v46 = vmul.f32 %v2593_v44, %v2591_v17  ;;  %2276 = vst [vmem:[%s3948_s5 + $0x30] sm:$0xff] %v1467_v42  ;;  %v4033_v44 = vld [vmem:[#allocation27_spill] sm:$0xff] }
 0x45d   :  { %v1468_v45 = vmul.f32 %v2341_v29, %v1450_v46  ;;  %v1481_v19 = vpack.c.bf16 %v1450_v46, %v1449_v22  ;;  %v4032_v22 = vld [vmem:[#allocation30_spill] sm:$0xff] }
 0x45f   :  { %2277 = vst [vmem:[%s3948_s5 + $0x38] sm:$0xff] %v1468_v45  ;;  %1515 = vmatmul.mubr.bf16.vlgmr.msra.gmra.mxu0 %v1481_v19  ;;  %1558 = vmatmul.mubr.bf16.vlgmr.msra.gmra.mxu1 %v1481_v19  ;;  %v4034_v19 = vld [vmem:[#allocation25_spill] sm:$0xff] }
 0x460   :  { %1656 = vmatpush1.bf16.msra.mxu0 %v3462_v37  ;;  %1699 = vmatpush1.bf16.msra.mxu1 %v3468_v38 }
 0x461   :  { %1657 = vmatprep.subr.bf16.mxu0 %v3474_v39  ;;  %1700 = vmatprep.subr.bf16.mxu1 %v3480_v60 }
 0x462   :  { %1687 = vmatprep.mubr.bf16.mxu0 %v4006_v52  ;;  %1730 = vmatprep.mubr.bf16.mxu1 %v4006_v52 }
 0x464   :  { %1658 = vmatpush1.bf16.msra.mxu0 %v3558_v57  ;;  %1701 = vmatpush1.bf16.msra.mxu1 %v3564_v58 }
 0x465   :  { %1659 = vmatprep.subr.bf16.mxu0 %v3570_v59  ;;  %1702 = vmatprep.subr.bf16.mxu1 %v3576_v62 }
 0x468   :  { %1660 = vmatpush1.bf16.msra.mxu0 %v3582_v0  ;;  %1703 = vmatpush1.bf16.msra.mxu1 %v3588_v2 }
 0x469   :  { %1661 = vmatprep.subr.bf16.mxu0 %v3594_v5  ;;  %1704 = vmatprep.subr.bf16.mxu1 %v3600_v6 }
 0x46c   :  { %1662 = vmatpush1.bf16.msra.mxu0 %v3606_v7  ;;  %1705 = vmatpush1.bf16.msra.mxu1 %v3612_v8 }
 0x46d   :  { %1663 = vmatprep.subr.bf16.mxu0 %v3618_v9  ;;  %1706 = vmatprep.subr.bf16.mxu1 %v3624_v10 }
 0x470   :  { %1664 = vmatpush1.bf16.msra.mxu0 %v3630_v11  ;;  %1707 = vmatpush1.bf16.msra.mxu1 %v3636_v26 }
 0x471   :  { %1665 = vmatprep.subr.bf16.mxu0 %v3642_v27  ;;  %1708 = vmatprep.subr.bf16.mxu1 %v3648_v23 }
 0x474   :  { %1666 = vmatpush1.bf16.msra.mxu0 %v3654_v25  ;;  %1709 = vmatpush1.bf16.msra.mxu1 %v3660_v33 }
 0x475   :  { %1667 = vmatprep.subr.bf16.mxu0 %v3666_v14  ;;  %1710 = vmatprep.subr.bf16.mxu1 %v3672_v34 }
 0x478   :  { %1668 = vmatpush1.bf16.msra.mxu0 %v3678_v28  ;;  %1711 = vmatpush1.bf16.msra.mxu1 %v3684_v43 }
 0x479   :  { %1669 = vmatprep.subr.bf16.mxu0 %v3690_v32  ;;  %1712 = vmatprep.subr.bf16.mxu1 %v3696_v1 }
 0x47c   :  { %1670 = vmatpush1.bf16.msra.mxu0 %v3702_v3  ;;  %1713 = vmatpush1.bf16.msra.mxu1 %v3708_v30 }
 0x47d   :  { %1828 = vmatprep.subr.bf16.mxu0 %v3514_v40  ;;  %1871 = vmatprep.subr.bf16.mxu1 %v3520_v41 }
 0x51f   :  { %v1516_v49 = vpop.f32.mrf.mxu0  ;;  %v1559_v53 = vpop.f32.mrf.mxu1 }
 0x520   :  { %v1568_v51 = vadd.f32 %v1516_v49, %v4029_v50  ;;  %v1570_v47 = vadd.f32 %v1559_v53, %v4034_v19 }
 0x521   :  { %v1518_v54 = vpop.f32.mrf.mxu0  ;;  %v1561_v20 = vpop.f32.mrf.mxu1 }
 0x522   :  { %v2278_v55 = vmul.f32 -1.442695, %v1568_v51  ;;  %v1569_v63 = vadd.f32 %v1518_v54, %v4030_v61  ;;  %v1571_v46 = vadd.f32 %v1561_v20, %v4033_v44  ;;  %v4036_v51 = vld [vmem:[#allocation29_spill] sm:$0xff] }
 0x523   :  { %v1520_v24 = vpop.f32.mrf.mxu0  ;;  %v1563_v29 = vpop.f32.mrf.mxu1 }
 0x524   :  { %2594 = vpow2.f32 %v2278_v55  ;;  %v2280_v16 = vmul.f32 -1.442695, %v1569_v63  ;;  %v1572_v18 = vadd.f32 %v1520_v24, %v4031_v21  ;;  %v2282_v48 = vmul.f32 -1.442695, %v1571_v46 }
 0x525   :  { %v1522_v35 = vpop.f32.mrf.mxu0  ;;  %v1565_v45 = vpop.f32.mrf.mxu1  ;;  %v1574_v54 = vadd.f32 %v1563_v29, %v4036_v51 }
 0x526   :  { %2596 = vpow2.f32 %v2280_v16  ;;  %v2279_v4 = vmul.f32 -1.442695, %v1572_v18  ;;  %v1573_v17 = vadd.f32 %v1522_v35, %v4032_v22  ;;  %v1575_v49 = vadd.f32 %v1565_v45, %v4035_v13  ;;  %v2344_v51 = vpop.permute.xlu0 %2343 }
 0x528   :  { %2598 = vpow2.f32 %v2279_v4  ;;  %v2281_v42 = vmul.f32 -1.442695, %v1573_v17  ;;  %v2283_v63 = vmul.f32 -1.442695, %v1575_v49 }
 0x52a   :  { %2600 = vpow2.f32 %v2281_v42 }
 0x52b   :  { %2602 = vtanh.f32 %v1570_v47 }
 0x52c   :  { %2604 = vpow2.f32 %v2282_v48 }
 0x531   :  { %v2595_v50 = vpop.eup %2594 }
 0x532   :  { %v1582_v55 = vadd.f32 1.0, %v2595_v50 }
 0x533   :  { %v2597_v61 = vpop.eup %2596 }
 0x534   :  { %2606 = vrcp.f32 %v1582_v55  ;;  %v1594_v24 = vadd.f32 1.0, %v2597_v61  ;;  %v2345_v55 = vunpack.i.l.bf16 %v2344_v51 }
 0x535   :  { %v2599_v16 = vpop.eup %2598  ;;  %2608 = vtanh.f32 %v1574_v54 }
 0x536   :  { %2610 = vrcp.f32 %v1594_v24  ;;  %v1583_v20 = vadd.f32 1.0, %v2599_v16  ;;  %v2346_v24 = vunpack.i.h.bf16 %v2344_v51 }
 0x537   :  { %v2601_v21 = vpop.eup %2600  ;;  %2612 = vpow2.f32 %v2283_v63 }
 0x538   :  { %2614 = vrcp.f32 %v1583_v20  ;;  %v1595_v53 = vadd.f32 1.0, %v2601_v21  ;;  %v2603_v18 = vpop.eup %2602 }
 0x539   :  { %v2605_v35 = vpop.eup %2604 }
 0x53a   :  { %2616 = vrcp.f32 %v1595_v53  ;;  %v1608_v42 = vadd.f32 1.0, %v2605_v35  ;;  %v2305_v35 = vsel %vm1971_vm13, 1.0, %v4007_v36 }
 0x53c   :  { %2618 = vrcp.f32 %v1608_v42 }
 0x541   :  { %v2607_v4 = vpop.eup %2606 }
 0x542   :  { %v2609_v22 = vpop.eup %2608  ;;  %v1616_v17 = vmul.f32 %v2607_v4, %v2603_v18  ;;  %v2304_v18 = vsel %vm1970_vm12, 1.0, %v4007_v36 }
 0x543   :  { %v2611_v29 = vpop.eup %2610  ;;  %v2352_v4 = vpack.i.bf16 %v2305_v35, %v2304_v18  ;;  %v4043_v18 = vld [vmem:[#allocation39_spill] sm:$0xff] }
 0x544   :  { %v2613_v44 = vpop.eup %2612  ;;  %v1614_v46 = vmul.f32 %v2611_v29, %v3736_v56 }
 0x545   :  { %v2615_v45 = vpop.eup %2614  ;;  %v1609_v13 = vadd.f32 1.0, %v2613_v44  ;;  %2353 = vperm.xlu0 %2320, %v2352_v4  }
 0x546   :  { %v3796_v19 = vadd.f32 %v1616_v17, %v1614_v46  ;;  %v1617_v47 = vmul.f32 %v2615_v45, %v2609_v22  ;;  %v4037_v17 = vld [vmem:[#allocation32_spill] sm:$0xff]  ;;  %v4038_v45 = vld [vmem:[#allocation34_spill] sm:$0xff] }
 0x547   :  { %v2617_v48 = vpop.eup %2616 }
 0x548   :  { %v1615_v49 = vmul.f32 %v2617_v48, %v3740_v15  ;;  %2620 = vtanh.f32 %v3796_v19 }
 0x549   :  { %2622 = vrcp.f32 %v1609_v13  ;;  %v2619_v54 = vpop.eup %2618  ;;  %v4039_v13 = vld [vmem:[#allocation36_spill] sm:$0xff] }
 0x54a   :  { %v3800_v50 = vadd.f32 %v1617_v47, %v1615_v49 }
 0x54c   :  { %2624 = vtanh.f32 %v3800_v50 }
 0x555   :  { %v2621_v56 = vpop.eup %2620 }
 0x556   :  { %v1622_v61 = vmul.f32 %v2621_v56, %v2619_v54  ;;  %v2623_v63 = vpop.eup %2622 }
 0x558   :  { %v1640_v16 = vmul.f32 %v2345_v55, %v1622_v61  ;;  %v4040_v55 = vld [vmem:[#allocation38_spill] sm:$0xff] }
 0x559   :  { %v2625_v20 = vpop.eup %2624 }
 0x55a   :  { %v1623_v21 = vmul.f32 %v2625_v20, %v2623_v63  ;;  %2286 = vst [vmem:[%s3948_s5 + $0x40] sm:$0xff] %v1640_v16 }
 0x55c   :  { %v1641_v15 = vmul.f32 %v2346_v24, %v1623_v21  ;;  %v1654_v53 = vpack.c.bf16 %v1623_v21, %v1622_v61  ;;  %v4041_v24 = vld [vmem:[#allocation35_spill] sm:$0xff]  ;;  %v4042_v21 = vld [vmem:[#allocation33_spill] sm:$0xff] }
 0x55e   :  { %2287 = vst [vmem:[%s3948_s5 + $0x48] sm:$0xff] %v1641_v15  ;;  %1688 = vmatmul.mubr.bf16.vlgmr.msra.gmra.mxu0 %v1654_v53  ;;  %1731 = vmatmul.mubr.bf16.vlgmr.msra.gmra.mxu1 %v1654_v53 }
 0x55f   :  { %1829 = vmatpush1.bf16.msra.mxu0 %v3462_v37  ;;  %1872 = vmatpush1.bf16.msra.mxu1 %v3468_v38 }
 0x560   :  { %1830 = vmatprep.subr.bf16.mxu0 %v3474_v39  ;;  %1873 = vmatprep.subr.bf16.mxu1 %v3480_v60 }
 0x561   :  { %1860 = vmatprep.mubr.bf16.mxu0 %v4006_v52  ;;  %1903 = vmatprep.mubr.bf16.mxu1 %v4006_v52 }
 0x563   :  { %1831 = vmatpush1.bf16.msra.mxu0 %v3558_v57  ;;  %1874 = vmatpush1.bf16.msra.mxu1 %v3564_v58 }
 0x564   :  { %1832 = vmatprep.subr.bf16.mxu0 %v3570_v59  ;;  %1875 = vmatprep.subr.bf16.mxu1 %v3576_v62 }
 0x567   :  { %1833 = vmatpush1.bf16.msra.mxu0 %v3582_v0  ;;  %1876 = vmatpush1.bf16.msra.mxu1 %v3588_v2 }
 0x568   :  { %1834 = vmatprep.subr.bf16.mxu0 %v3594_v5  ;;  %1877 = vmatprep.subr.bf16.mxu1 %v3600_v6 }
 0x56b   :  { %1835 = vmatpush1.bf16.msra.mxu0 %v3606_v7  ;;  %1878 = vmatpush1.bf16.msra.mxu1 %v3612_v8 }
 0x56c   :  { %1836 = vmatprep.subr.bf16.mxu0 %v3618_v9  ;;  %1879 = vmatprep.subr.bf16.mxu1 %v3624_v10 }
 0x56f   :  { %1837 = vmatpush1.bf16.msra.mxu0 %v3630_v11  ;;  %1880 = vmatpush1.bf16.msra.mxu1 %v3636_v26 }
 0x570   :  { %1838 = vmatprep.subr.bf16.mxu0 %v3642_v27  ;;  %1881 = vmatprep.subr.bf16.mxu1 %v3648_v23 }
 0x573   :  { %1839 = vmatpush1.bf16.msra.mxu0 %v3654_v25  ;;  %1882 = vmatpush1.bf16.msra.mxu1 %v3660_v33 }
 0x574   :  { %1840 = vmatprep.subr.bf16.mxu0 %v3666_v14  ;;  %1883 = vmatprep.subr.bf16.mxu1 %v3672_v34 }
 0x577   :  { %1841 = vmatpush1.bf16.msra.mxu0 %v3678_v28  ;;  %1884 = vmatpush1.bf16.msra.mxu1 %v3684_v43 }
 0x578   :  { %1842 = vmatprep.subr.bf16.mxu0 %v3690_v32  ;;  %1885 = vmatprep.subr.bf16.mxu1 %v3696_v1 }
 0x57b   :  { %1843 = vmatpush1.bf16.msra.mxu0 %v3702_v3  ;;  %1886 = vmatpush1.bf16.msra.mxu1 %v3708_v30 }
 0x57c   :  { %2001 = vmatprep.subr.bf16.mxu0 %v3514_v40  ;;  %2044 = vmatprep.subr.bf16.mxu1 %v3520_v41 }
 0x61e   :  { %v1689_v22 = vpop.f32.mrf.mxu0  ;;  %v1732_v42 = vpop.f32.mrf.mxu1 }
 0x61f   :  { %v1741_v29 = vadd.f32 %v1689_v22, %v4037_v17  ;;  %v1743_v15 = vadd.f32 %v1732_v42, %v4042_v21  ;;  %v4044_v22 = vld [vmem:[#allocation37_spill] sm:$0xff] }
 0x620   :  { %v1691_v44 = vpop.f32.mrf.mxu0  ;;  %v1734_v48 = vpop.f32.mrf.mxu1 }
 0x621   :  { %v2288_v46 = vmul.f32 -1.442695, %v1741_v29  ;;  %v1742_v40 = vadd.f32 %v1691_v44, %v4038_v45  ;;  %v1744_v16 = vadd.f32 %v1734_v48, %v4041_v24 }
 0x622   :  { %v1693_v47 = vpop.f32.mrf.mxu0  ;;  %v1736_v61 = vpop.f32.mrf.mxu1 }
 0x623   :  { %2626 = vpow2.f32 %v2288_v46  ;;  %v2290_v41 = vmul.f32 -1.442695, %v1742_v40  ;;  %v1745_v49 = vadd.f32 %v1693_v47, %v4039_v13  ;;  %v2292_v53 = vmul.f32 -1.442695, %v1744_v16 }
 0x624   :  { %v1695_v51 = vpop.f32.mrf.mxu0  ;;  %v1738_v20 = vpop.f32.mrf.mxu1  ;;  %v1747_v17 = vadd.f32 %v1736_v61, %v4044_v22 }
 0x625   :  { %2628 = vpow2.f32 %v2290_v41  ;;  %v2289_v54 = vmul.f32 -1.442695, %v1745_v49  ;;  %v1746_v56 = vadd.f32 %v1695_v51, %v4040_v55  ;;  %v1748_v35 = vadd.f32 %v1738_v20, %v4043_v18 }
 0x627   :  { %2630 = vpow2.f32 %v2289_v54  ;;  %v2291_v63 = vmul.f32 -1.442695, %v1746_v56  ;;  %v2293_v46 = vmul.f32 -1.442695, %v1748_v35  ;;  %v2349_v35 = vpop.permute.xlu1 %2348 }
 0x628   :  { %v2350_v22 = vunpack.i.l.bf16 %v2349_v35 }
 0x629   :  { %2632 = vpow2.f32 %v2291_v63 }
 0x62a   :  { %2634 = vtanh.f32 %v1743_v15 }
 0x62b   :  { %2636 = vpow2.f32 %v2292_v53 }
 0x630   :  { %v2627_v4 = vpop.eup %2626 }
 0x631   :  { %v1755_v29 = vadd.f32 1.0, %v2627_v4 }
 0x632   :  { %v2629_v44 = vpop.eup %2628 }
 0x633   :  { %2638 = vrcp.f32 %v1755_v29  ;;  %v1767_v45 = vadd.f32 1.0, %v2629_v44  ;;  %v2351_v44 = vunpack.i.h.bf16 %v2349_v35 }
 0x634   :  { %v2631_v40 = vpop.eup %2630  ;;  %2640 = vtanh.f32 %v1747_v17 }
 0x635   :  { %2642 = vrcp.f32 %v1767_v45  ;;  %v1756_v47 = vadd.f32 1.0, %v2631_v40 }
 0x636   :  { %v2633_v41 = vpop.eup %2632  ;;  %2644 = vpow2.f32 %v2293_v46 }
 0x637   :  { %2646 = vrcp.f32 %v1756_v47  ;;  %v1768_v42 = vadd.f32 1.0, %v2633_v41  ;;  %v2635_v48 = vpop.eup %2634 }
 0x638   :  { %v2637_v13 = vpop.eup %2636 }
 0x639   :  { %2648 = vrcp.f32 %v1768_v42  ;;  %v1781_v56 = vadd.f32 1.0, %v2637_v13 }
 0x63b   :  { %2650 = vrcp.f32 %v1781_v56 }
 0x640   :  { %v2639_v49 = vpop.eup %2638 }
 0x641   :  { %v2641_v51 = vpop.eup %2640  ;;  %v1789_v54 = vmul.f32 %v2639_v49, %v2635_v48 }
 0x642   :  { %v2643_v55 = vpop.eup %2642 }
 0x643   :  { %v2645_v61 = vpop.eup %2644  ;;  %v1787_v63 = vmul.f32 %v2643_v55, %v3796_v19 }
 0x644   :  { %v2647_v24 = vpop.eup %2646  ;;  %v1782_v15 = vadd.f32 1.0, %v2645_v61 }
 0x645   :  { %v3856_v16 = vadd.f32 %v1789_v54, %v1787_v63  ;;  %v1790_v20 = vmul.f32 %v2647_v24, %v2641_v51 }
 0x646   :  { %v2649_v21 = vpop.eup %2648 }
 0x647   :  { %v1788_v53 = vmul.f32 %v2649_v21, %v3800_v50  ;;  %2652 = vtanh.f32 %v3856_v16 }
 0x648   :  { %2654 = vrcp.f32 %v1782_v15  ;;  %v2651_v4 = vpop.eup %2650 }
 0x649   :  { %v3860_v18 = vadd.f32 %v1790_v20, %v1788_v53 }
 0x64b   :  { %2656 = vtanh.f32 %v3860_v18 }
 0x654   :  { %v2653_v19 = vpop.eup %2652 }
 0x655   :  { %v1795_v17 = vmul.f32 %v2653_v19, %v2651_v4  ;;  %v2655_v29 = vpop.eup %2654 }
 0x657   :  { %v1813_v46 = vmul.f32 %v2350_v22, %v1795_v17 }
 0x658   :  { %v2657_v45 = vpop.eup %2656 }
 0x659   :  { %v1796_v40 = vmul.f32 %v2657_v45, %v2655_v29  ;;  %2296 = vst [vmem:[%s3948_s5 + $0x50] sm:$0xff] %v1813_v46  ;;  %v2354_v46 = vpop.permute.xlu0 %2353 }
 0x65b   :  { %v1814_v50 = vmul.f32 %v2351_v44, %v1796_v40  ;;  %v1827_v47 = vpack.c.bf16 %v1796_v40, %v1795_v17  ;;  %v2355_v40 = vunpack.i.l.bf16 %v2354_v46 }
 0x65d   :  { %2297 = vst [vmem:[%s3948_s5 + $0x58] sm:$0xff] %v1814_v50  ;;  %1861 = vmatmul.mubr.bf16.vlgmr.msra.gmra.mxu0 %v1827_v47  ;;  %1904 = vmatmul.mubr.bf16.vlgmr.msra.gmra.mxu1 %v1827_v47 }
 0x65e   :  { %2002 = vmatpush1.bf16.msra.mxu0 %v3462_v37  ;;  %2045 = vmatpush1.bf16.msra.mxu1 %v3468_v38  ;;  %v2315_v37 = vsel %vm2144_vm15, 1.0, %v4007_v36 }
 0x65f   :  { %2003 = vmatprep.subr.bf16.mxu0 %v3474_v39  ;;  %2046 = vmatprep.subr.bf16.mxu1 %v3480_v60  ;;  %v4045_v60 = vld [vmem:[#allocation40_spill] sm:$0xff] }
 0x660   :  { %2033 = vmatprep.mubr.bf16.mxu0 %v4006_v52  ;;  %2076 = vmatprep.mubr.bf16.mxu1 %v4006_v52  ;;  %v2314_v52 = vsel %vm2143_vm14, 1.0, %v4007_v36  ;;  %v4048_v36 = vld [vmem:[#allocation46_spill] sm:$0xff] }
 0x661   :  { %v2357_v38 = vpack.i.bf16 %v2315_v37, %v2314_v52  ;;  %v2356_v52 = vunpack.i.h.bf16 %v2354_v46 }
 0x662   :  { %2004 = vmatpush1.bf16.msra.mxu0 %v3558_v57  ;;  %2047 = vmatpush1.bf16.msra.mxu1 %v3564_v58 }
 0x663   :  { %2005 = vmatprep.subr.bf16.mxu0 %v3570_v59  ;;  %2048 = vmatprep.subr.bf16.mxu1 %v3576_v62 }
 0x664   :  { %2358 = vperm.xlu1 %2331, %v2357_v38  }
 0x666   :  { %2006 = vmatpush1.bf16.msra.mxu0 %v3582_v0  ;;  %2049 = vmatpush1.bf16.msra.mxu1 %v3588_v2  ;;  %v4046_v0 = vld [vmem:[#allocation42_spill] sm:$0xff] }
 0x667   :  { %2007 = vmatprep.subr.bf16.mxu0 %v3594_v5  ;;  %2050 = vmatprep.subr.bf16.mxu1 %v3600_v6 }
 0x66a   :  { %2008 = vmatpush1.bf16.msra.mxu0 %v3606_v7  ;;  %2051 = vmatpush1.bf16.msra.mxu1 %v3612_v8  ;;  %v4047_v8 = vld [vmem:[#allocation44_spill] sm:$0xff] }
 0x66b   :  { %2009 = vmatprep.subr.bf16.mxu0 %v3618_v9  ;;  %2052 = vmatprep.subr.bf16.mxu1 %v3624_v10 }
 0x66e   :  { %2010 = vmatpush1.bf16.msra.mxu0 %v3630_v11  ;;  %2053 = vmatpush1.bf16.msra.mxu1 %v3636_v26 }
 0x66f   :  { %2011 = vmatprep.subr.bf16.mxu0 %v3642_v27  ;;  %2054 = vmatprep.subr.bf16.mxu1 %v3648_v23 }
 0x672   :  { %2012 = vmatpush1.bf16.msra.mxu0 %v3654_v25  ;;  %2055 = vmatpush1.bf16.msra.mxu1 %v3660_v33  ;;  %v4049_v25 = vld [vmem:[#allocation43_spill] sm:$0xff] }
 0x673   :  { %2013 = vmatprep.subr.bf16.mxu0 %v3666_v14  ;;  %2056 = vmatprep.subr.bf16.mxu1 %v3672_v34  ;;  %v4050_v34 = vld [vmem:[#allocation41_spill] sm:$0xff] }
 0x676   :  { %2014 = vmatpush1.bf16.msra.mxu0 %v3678_v28  ;;  %2057 = vmatpush1.bf16.msra.mxu1 %v3684_v43 }
 0x677   :  { %2015 = vmatprep.subr.bf16.mxu0 %v3690_v32  ;;  %2058 = vmatprep.subr.bf16.mxu1 %v3696_v1  ;;  %v4051_v32 = vld [vmem:[#allocation47_spill] sm:$0xff] }
 0x67a   :  { %2016 = vmatpush1.bf16.msra.mxu0 %v3702_v3  ;;  %2059 = vmatpush1.bf16.msra.mxu1 %v3708_v30  ;;  %v4052_v30 = vld [vmem:[#allocation45_spill] sm:$0xff] }
 0x71d   :  { %v1862_v39 = vpop.f32.mrf.mxu0  ;;  %v1905_v58 = vpop.f32.mrf.mxu1 }
 0x71e   :  { %v1914_v57 = vadd.f32 %v1862_v39, %v4045_v60  ;;  %v1916_v28 = vadd.f32 %v1905_v58, %v4050_v34  ;;  %v4053_v58 = vld [vmem:[#allocation48_spill] sm:$0xff] }
 0x71f   :  { %v1864_v59 = vpop.f32.mrf.mxu0  ;;  %v1907_v7 = vpop.f32.mrf.mxu1 }
 0x720   :  { %v2298_v62 = vmul.f32 -1.442695, %v1914_v57  ;;  %v1915_v2 = vadd.f32 %v1864_v59, %v4046_v0  ;;  %v1917_v33 = vadd.f32 %v1907_v7, %v4049_v25 }
 0x721   :  { %v1866_v5 = vpop.f32.mrf.mxu0  ;;  %v1909_v27 = vpop.f32.mrf.mxu1 }
 0x722   :  { %2658 = vpow2.f32 %v2298_v62  ;;  %v2300_v6 = vmul.f32 -1.442695, %v1915_v2  ;;  %v1918_v9 = vadd.f32 %v1866_v5, %v4047_v8  ;;  %v2302_v43 = vmul.f32 -1.442695, %v1917_v33  ;;  %v4054_v5 = vld [vmem:[#allocation50_spill] sm:$0xff] }
 0x723   :  { %v1868_v10 = vpop.f32.mrf.mxu0  ;;  %v1911_v14 = vpop.f32.mrf.mxu1  ;;  %v1920_v31 = vadd.f32 %v1909_v27, %v4052_v30  ;;  %v4056_v27 = vld [vmem:[#allocation54_spill] sm:$0xff] }
 0x724   :  { %2660 = vpow2.f32 %v2300_v6  ;;  %v2299_v11 = vmul.f32 -1.442695, %v1918_v9  ;;  %v1919_v26 = vadd.f32 %v1868_v10, %v4048_v36  ;;  %v1921_v1 = vadd.f32 %v1911_v14, %v4051_v32  ;;  %v4055_v10 = vld [vmem:[#allocation52_spill] sm:$0xff]  ;;  %v4057_v14 = vld [vmem:[#allocation51_spill] sm:$0xff] }
 0x726   :  { %2662 = vpow2.f32 %v2299_v11  ;;  %v2301_v23 = vmul.f32 -1.442695, %v1919_v26  ;;  %v2303_v42 = vmul.f32 -1.442695, %v1921_v1 }
 0x728   :  { %2664 = vpow2.f32 %v2301_v23 }
 0x729   :  { %2666 = vtanh.f32 %v1916_v28 }
 0x72a   :  { %2668 = vpow2.f32 %v2302_v43  ;;  %v4058_v43 = vld [vmem:[#allocation49_spill] sm:$0xff] }
 0x72f   :  { %v2659_v3 = vpop.eup %2658 }
 0x730   :  { %v1928_v12 = vadd.f32 1.0, %v2659_v3  ;;  %v4059_v3 = vld [vmem:[#allocation55_spill] sm:$0xff] }
 0x731   :  { %v2661_v41 = vpop.eup %2660 }
 0x732   :  { %2670 = vrcp.f32 %v1928_v12  ;;  %v1940_v48 = vadd.f32 1.0, %v2661_v41  ;;  %v4060_v12 = vld [vmem:[#allocation53_spill] sm:$0xff] }
 0x733   :  { %v2663_v13 = vpop.eup %2662  ;;  %2672 = vtanh.f32 %v1920_v31 }
 0x734   :  { %2674 = vrcp.f32 %v1940_v48  ;;  %v1929_v49 = vadd.f32 1.0, %v2663_v13 }
 0x735   :  { %v2665_v51 = vpop.eup %2664  ;;  %2676 = vpow2.f32 %v2303_v42 }
 0x736   :  { %2678 = vrcp.f32 %v1929_v49  ;;  %v1941_v54 = vadd.f32 1.0, %v2665_v51  ;;  %v2667_v55 = vpop.eup %2666 }
 0x737   :  { %v2669_v56 = vpop.eup %2668 }
 0x738   :  { %2680 = vrcp.f32 %v1941_v54  ;;  %v1954_v21 = vadd.f32 1.0, %v2669_v56 }
 0x73a   :  { %2682 = vrcp.f32 %v1954_v21 }
 0x73f   :  { %v2671_v61 = vpop.eup %2670 }
 0x740   :  { %v2673_v63 = vpop.eup %2672  ;;  %v1962_v24 = vmul.f32 %v2671_v61, %v2667_v55 }
 0x741   :  { %v2675_v20 = vpop.eup %2674 }
 0x742   :  { %v2677_v15 = vpop.eup %2676  ;;  %v1960_v53 = vmul.f32 %v2675_v20, %v3856_v16 }
 0x743   :  { %v2679_v35 = vpop.eup %2678  ;;  %v1955_v17 = vadd.f32 1.0, %v2677_v15 }
 0x744   :  { %v1963_v4 = vmul.f32 %v2679_v35, %v2673_v63  ;;  %v3914_v22 = vadd.f32 %v1962_v24, %v1960_v53 }
 0x745   :  { %v2681_v19 = vpop.eup %2680 }
 0x746   :  { %v1961_v29 = vmul.f32 %v2681_v19, %v3860_v18  ;;  %2684 = vtanh.f32 %v3914_v22 }
 0x747   :  { %2686 = vrcp.f32 %v1955_v17  ;;  %v2683_v45 = vpop.eup %2682 }
 0x748   :  { %v3918_v44 = vadd.f32 %v1963_v4, %v1961_v29 }
 0x74a   :  { %2688 = vtanh.f32 %v3918_v44 }
 0x753   :  { %v2685_v16 = vpop.eup %2684 }
 0x754   :  { %v1968_v50 = vmul.f32 %v2685_v16, %v2683_v45  ;;  %v2687_v47 = vpop.eup %2686 }
 0x756   :  { %v1986_v37 = vmul.f32 %v2355_v40, %v1968_v50 }
 0x757   :  { %v2689_v38 = vpop.eup %2688 }
 0x758   :  { %v1969_v39 = vmul.f32 %v2689_v38, %v2687_v47  ;;  %2306 = vst [vmem:[%s3948_s5 + $0x60] sm:$0xff] %v1986_v37 }
 0x75a   :  { %v1987_v18 = vmul.f32 %v2356_v52, %v1969_v39  ;;  %v2000_v60 = vpack.c.bf16 %v1969_v39, %v1968_v50  ;;  %v2359_v50 = vpop.permute.xlu1 %2358 }
 0x75b   :  { %v2360_v37 = vunpack.i.l.bf16 %v2359_v50 }
 0x75c   :  { %2307 = vst [vmem:[%s3948_s5 + $0x68] sm:$0xff] %v1987_v18  ;;  %2034 = vmatmul.mubr.bf16.vlgmr.msra.gmra.mxu0 %v2000_v60  ;;  %2077 = vmatmul.mubr.bf16.vlgmr.msra.gmra.mxu1 %v2000_v60  ;;  %v2361_v60 = vunpack.i.h.bf16 %v2359_v50 }
 0x81c   :  { %v2035_v57 = vpop.f32.mrf.mxu0  ;;  %v2078_v62 = vpop.f32.mrf.mxu1 }
 0x81d   :  { %v2087_v59 = vadd.f32 %v2035_v57, %v4053_v58  ;;  %v2089_v32 = vadd.f32 %v2078_v62, %v4058_v43 }
 0x81e   :  { %v2037_v0 = vpop.f32.mrf.mxu0  ;;  %v2080_v9 = vpop.f32.mrf.mxu1 }
 0x81f   :  { %v2308_v2 = vmul.f32 -1.442695, %v2087_v59  ;;  %v2088_v6 = vadd.f32 %v2037_v0, %v4054_v5  ;;  %v2090_v34 = vadd.f32 %v2080_v9, %v4057_v14 }
 0x820   :  { %v2039_v7 = vpop.f32.mrf.mxu0  ;;  %v2082_v25 = vpop.f32.mrf.mxu1 }
 0x821   :  { %2690 = vpow2.f32 %v2308_v2  ;;  %v2310_v8 = vmul.f32 -1.442695, %v2088_v6  ;;  %v2091_v11 = vadd.f32 %v2039_v7, %v4055_v10  ;;  %v2312_v1 = vmul.f32 -1.442695, %v2090_v34 }
 0x822   :  { %v2041_v36 = vpop.f32.mrf.mxu0  ;;  %v2084_v28 = vpop.f32.mrf.mxu1  ;;  %v2093_v41 = vadd.f32 %v2082_v25, %v4060_v12 }
 0x823   :  { %2692 = vpow2.f32 %v2310_v8  ;;  %v2309_v26 = vmul.f32 -1.442695, %v2091_v11  ;;  %v2092_v23 = vadd.f32 %v2041_v36, %v4056_v27  ;;  %v2094_v30 = vadd.f32 %v2084_v28, %v4059_v3 }
 0x825   :  { %2694 = vpow2.f32 %v2309_v26  ;;  %v2311_v33 = vmul.f32 -1.442695, %v2092_v23  ;;  %v2313_v13 = vmul.f32 -1.442695, %v2094_v30 }
 0x827   :  { %2696 = vpow2.f32 %v2311_v33 }
 0x828   :  { %2698 = vtanh.f32 %v2089_v32 }
 0x829   :  { %2700 = vpow2.f32 %v2312_v1 }
 0x82e   :  { %v2691_v31 = vpop.eup %2690 }
 0x82f   :  { %v2101_v42 = vadd.f32 1.0, %v2691_v31 }
 0x830   :  { %v2693_v48 = vpop.eup %2692 }
 0x831   :  { %2702 = vrcp.f32 %v2101_v42  ;;  %v2113_v49 = vadd.f32 1.0, %v2693_v48 }
 0x832   :  { %v2695_v51 = vpop.eup %2694  ;;  %2704 = vtanh.f32 %v2093_v41 }
 0x833   :  { %2706 = vrcp.f32 %v2113_v49  ;;  %v2102_v54 = vadd.f32 1.0, %v2695_v51 }
 0x834   :  { %v2697_v55 = vpop.eup %2696  ;;  %2708 = vpow2.f32 %v2313_v13 }
 0x835   :  { %2710 = vrcp.f32 %v2102_v54  ;;  %v2114_v56 = vadd.f32 1.0, %v2697_v55  ;;  %v2699_v61 = vpop.eup %2698 }
 0x836   :  { %v2701_v63 = vpop.eup %2700 }
 0x837   :  { %2712 = vrcp.f32 %v2114_v56  ;;  %v2127_v53 = vadd.f32 1.0, %v2701_v63 }
 0x839   :  { %2714 = vrcp.f32 %v2127_v53 }
 0x83e   :  { %v2703_v24 = vpop.eup %2702 }
 0x83f   :  { %v2705_v20 = vpop.eup %2704  ;;  %v2135_v21 = vmul.f32 %v2703_v24, %v2699_v61 }
 0x840   :  { %v2707_v15 = vpop.eup %2706 }
 0x841   :  { %v2709_v35 = vpop.eup %2708  ;;  %v2133_v4 = vmul.f32 %v2707_v15, %v3914_v22 }
 0x842   :  { %v2711_v19 = vpop.eup %2710  ;;  %v2128_v45 = vadd.f32 1.0, %v2709_v35 }
 0x843   :  { %v2136_v17 = vmul.f32 %v2711_v19, %v2705_v20  ;;  %v2137_v29 = vadd.f32 %v2135_v21, %v2133_v4 }
 0x844   :  { %v2713_v46 = vpop.eup %2712 }
 0x845   :  { %v2134_v40 = vmul.f32 %v2713_v46, %v3918_v44  ;;  %2716 = vtanh.f32 %v2137_v29 }
 0x846   :  { %2718 = vrcp.f32 %v2128_v45  ;;  %v2715_v47 = vpop.eup %2714 }
 0x847   :  { %v2138_v16 = vadd.f32 %v2136_v17, %v2134_v40 }
 0x849   :  { %2720 = vtanh.f32 %v2138_v16 }
 0x852   :  { %v2717_v52 = vpop.eup %2716 }
 0x853   :  { %v2141_v38 = vmul.f32 %v2717_v52, %v2715_v47  ;;  %v2719_v39 = vpop.eup %2718 }
 0x855   :  { %v2159_v18 = vmul.f32 %v2360_v37, %v2141_v38 }
 0x856   :  { %v2721_v22 = vpop.eup %2720 }
 0x857   :  { %v2142_v57 = vmul.f32 %v2721_v22, %v2719_v39  ;;  %2316 = vst [vmem:[%s3948_s5 + $0x70] sm:$0xff] %v2159_v18 }
 0x859   :  { %v2160_v58 = vmul.f32 %v2361_v60, %v2142_v57 }
 0x85b   :  { %2317 = vst [vmem:[%s3948_s5 + $0x78] sm:$0xff] %v2160_v58 }

// kernel: sdgcn_forward.3
= control target key start
LH: loop header
LB: loop body
LE: loop exit
PB: predicated region body
PF: predicated region fallthrough
CT: control target
= control target key end

     0   :  { %v5459_v1 = vmov 0   ;;  %v71_v18 = vlaneseq  ;;  %v3867_v19 = vmov 1966171168   ;;  %s5451_s1 = inlined_call_operand.vmem [shape: bf16[128,512], index: 1, kind: input, shape index: {}]   ;;  %s5452_s0 = inlined_call_operand.vmem [shape: bf16[16,2,128], index: 0, kind: input, shape index: {}]   ;;  %s5453_s2 = inlined_call_operand.vmem [shape: bf16[128,512], index: 2, kind: input, shape index: {}]   ;;  %s5454_s4 = inlined_call_operand.vmem [shape: s32[2,1], index: 4, kind: input, shape index: {}]   ;;  %s5455_s3 = inlined_call_operand.vmem [shape: f32[1,512], index: 3, kind: input, shape index: {}]   ;;  %s5456_s5 = inlined_call_operand.vmem [shape: f32[16,2,128], index: 5, kind: output, shape index: {}]  }
   0x1   :  { %v3448_v0 = vld [vmem:[%s5451_s1 + $0xe4] ss:$16 sps:$4 sm:$0xff]   ;;  %399 = vmatprep.mubr.bf16.mxu0 %v5459_v1  ;;  %452 = vmatprep.mubr.bf16.mxu1 %v5459_v1  ;;  %v3450_v2 = vld [vmem:[%s5451_s1 + $0xec] ss:$16 sps:$4 sm:$0xff]   ;;  %v3452_v3 = vld [vmem:[%s5451_s1 + $0xe0] ss:$16 sps:$4 sm:$0xff]   ;;  %v112_v20 = vunpack.c.l.s4 %v3867_v19 }
   0x2   :  { %3406 = vset.pattern.permute.xlu0 %v5459_v1  ;;  %3417 = vset.pattern.permute.xlu1 %v5459_v1  ;;  %v3453_v4 = vld [vmem:[%s5451_s1 + $0xe8] ss:$16 sps:$4 sm:$0xff]   ;;  %v3454_v5 = vld [vmem:[%s5451_s1 + $0xc4] ss:$16 sps:$4 sm:$0xff]   ;;  %v3456_v6 = vld [vmem:[%s5451_s1 + $0xcc] ss:$16 sps:$4 sm:$0xff]  }
   0x3   :  { %367 = vmatprep.subr.bf16.mxu0 %v3448_v0  ;;  %420 = vmatprep.subr.bf16.mxu1 %v3450_v2  ;;  %v3458_v7 = vld [vmem:[%s5451_s1 + $0xc0] ss:$16 sps:$4 sm:$0xff]   ;;  %v3459_v8 = vld [vmem:[%s5451_s1 + $0xc8] ss:$16 sps:$4 sm:$0xff]   ;;  %v3460_v9 = vld [vmem:[%s5451_s1 + $0xa4] ss:$16 sps:$4 sm:$0xff]   ;;  %v113_v26 = vunpack.c.0.s8 %v112_v20 }
   0x4   :  { %368 = vmatpush1.bf16.msra.mxu0 %v3452_v3  ;;  %421 = vmatpush1.bf16.msra.mxu1 %v3453_v4  ;;  %v3462_v10 = vld [vmem:[%s5451_s1 + $0xac] ss:$16 sps:$4 sm:$0xff]   ;;  %v3464_v11 = vld [vmem:[%s5451_s1 + $0xa0] ss:$16 sps:$4 sm:$0xff]   ;;  %v3465_v12 = vld [vmem:[%s5451_s1 + $0xa8] ss:$16 sps:$4 sm:$0xff]  }
   0x5   :  { %369 = vmatprep.subr.bf16.mxu0 %v3454_v5  ;;  %422 = vmatprep.subr.bf16.mxu1 %v3456_v6  ;;  %v3466_v13 = vld [vmem:[%s5451_s1 + $0x84] ss:$16 sps:$4 sm:$0xff]   ;;  %v3468_v14 = vld [vmem:[%s5451_s1 + $0x8c] ss:$16 sps:$4 sm:$0xff]   ;;  %v3470_v15 = vld [vmem:[%s5451_s1 + $0x80] ss:$16 sps:$4 sm:$0xff]  }
   0x6   :  { %v3471_v16 = vld [vmem:[%s5451_s1 + $0x88] ss:$16 sps:$4 sm:$0xff]   ;;  %v3472_v17 = vld [vmem:[%s5451_s1 + $0x64] ss:$16 sps:$4 sm:$0xff]   ;;  %v3474_v21 = vld [vmem:[%s5451_s1 + $0x6c] ss:$16 sps:$4 sm:$0xff]  }
   0x7   :  { %v3476_v22 = vld [vmem:[%s5451_s1 + $0x60] ss:$16 sps:$4 sm:$0xff]   ;;  %v3477_v23 = vld [vmem:[%s5451_s1 + $0x68] ss:$16 sps:$4 sm:$0xff]   ;;  %v3478_v24 = vld [vmem:[%s5451_s1 + $0x44] ss:$16 sps:$4 sm:$0xff]  }
   0x8   :  { %370 = vmatpush1.bf16.msra.mxu0 %v3458_v7  ;;  %423 = vmatpush1.bf16.msra.mxu1 %v3459_v8  ;;  %v3967_v25 = vshrl.u32 %v71_v18, 7  ;;  %v3480_v27 = vld [vmem:[%s5451_s1 + $0x4c] ss:$16 sps:$4 sm:$0xff]   ;;  %v3482_v28 = vld [vmem:[%s5451_s1 + $0x40] ss:$16 sps:$4 sm:$0xff]  }
   0x9   :  { %371 = vmatprep.subr.bf16.mxu0 %v3460_v9  ;;  %424 = vmatprep.subr.bf16.mxu1 %v3462_v10  ;;  %v3483_v29 = vld [vmem:[%s5451_s1 + $0x48] ss:$16 sps:$4 sm:$0xff]   ;;  %v3484_v30 = vld [vmem:[%s5451_s1 + $0x24] ss:$16 sps:$4 sm:$0xff]   ;;  %v3486_v32 = vld [vmem:[%s5451_s1 + $0x2c] ss:$16 sps:$4 sm:$0xff]  }
   0xa   :  { %v3982_v31 = vsub.s32 %v113_v26, %v3967_v25  ;;  %v21_v33 = vld [vmem:[%s5452_s0] sm:$0x1]  ;;  %v22_v34 = vld [vmem:[%s5452_s0 + $0x1] sm:$0x1]  ;;  %v3489_v36 = vld [vmem:[%s5451_s1 + $0x28] ss:$16 sps:$4 sm:$0xff]  }
   0xb   :  { %v3488_v35 = vld [vmem:[%s5451_s1 + $0x20] ss:$16 sps:$4 sm:$0xff]   ;;  %v25_v39 = vld [vmem:[%s5452_s0 + $0x4] sm:$0x1]  ;;  %v107_v40 = vcombine.low %v21_v33, %v22_v34  ;;  %v26_v41 = vld [vmem:[%s5452_s0 + $0x5] sm:$0x1] }
   0xc   :  { %372 = vmatpush1.bf16.msra.mxu0 %v3464_v11  ;;  %425 = vmatpush1.bf16.msra.mxu1 %v3465_v12  ;;  %v23_v37 = vld [vmem:[%s5452_s0 + $0x2] sm:$0x1]  ;;  %v24_v38 = vld [vmem:[%s5452_s0 + $0x3] sm:$0x1]  ;;  %v27_v42 = vld [vmem:[%s5452_s0 + $0x6] sm:$0x1]  ;;  %v109_v46 = vcombine.low %v25_v39, %v26_v41 }
   0xd   :  { %373 = vmatprep.subr.bf16.mxu0 %v3466_v13  ;;  %426 = vmatprep.subr.bf16.mxu1 %v3468_v14  ;;  %v28_v43 = vld [vmem:[%s5452_s0 + $0x7] sm:$0x1]  ;;  %v108_v44 = vcombine.low %v23_v37, %v24_v38  ;;  %v117_v48 = vrot.slane %v107_v40, %v3982_v31  ;;  %v3492_v49 = vld [vmem:[%s5451_s1 + $0xc] ss:$16 sps:$4 sm:$0xff]   ;;  %v3494_v53 = vld [vmem:[%s5451_s1] ss:$16 sps:$4 sm:$0xff]  }
   0xe   :  { %v3490_v45 = vld [vmem:[%s5451_s1 + $0x4] ss:$16 sps:$4 sm:$0xff]   ;;  %v110_v47 = vcombine.low %v27_v42, %v28_v43  ;;  %v131_v51 = vrot.slane %v109_v46, %v3982_v31  ;;  %v3495_v55 = vld [vmem:[%s5451_s1 + $0x8] ss:$16 sps:$4 sm:$0xff]   ;;  %v4042_v59 = vld [vmem:[%s5453_s2 + $0xec] ss:$16 sps:$4 sm:$0xff]  }
   0xf   :  { %v124_v50 = vrot.slane %v108_v44, %v3982_v31  ;;  %v4036_v57 = vld [vmem:[%s5453_s2 + $0xe4] ss:$16 sps:$4 sm:$0xff]   ;;  %v4048_v61 = vld [vmem:[%s5453_s2 + $0xe0] ss:$16 sps:$4 sm:$0xff]   ;;  %v4053_v62 = vld [vmem:[%s5453_s2 + $0xe8] ss:$16 sps:$4 sm:$0xff]  }
  0x10   :  { %374 = vmatpush1.bf16.msra.mxu0 %v3470_v15  ;;  %427 = vmatpush1.bf16.msra.mxu1 %v3471_v16  ;;  %v138_v52 = vrot.slane %v110_v47, %v3982_v31  ;;  %v4058_v0 = vld [vmem:[%s5453_s2 + $0xc4] ss:$16 sps:$4 sm:$0xff]   ;;  %v4065_v2 = vld [vmem:[%s5453_s2 + $0xcc] ss:$16 sps:$4 sm:$0xff]   ;;  %v4070_v3 = vld [vmem:[%s5453_s2 + $0xc0] ss:$16 sps:$4 sm:$0xff]  }
  0x11   :  { %375 = vmatprep.subr.bf16.mxu0 %v3472_v17  ;;  %428 = vmatprep.subr.bf16.mxu1 %v3474_v21  ;;  %v139_v54 = vcombine.low %v117_v48, %v124_v50  ;;  %v4077_v4 = vld [vmem:[%s5453_s2 + $0xc8] ss:$16 sps:$4 sm:$0xff]   ;;  %v4082_v5 = vld [vmem:[%s5453_s2 + $0xa4] ss:$16 sps:$4 sm:$0xff]   ;;  %v4089_v6 = vld [vmem:[%s5453_s2 + $0xac] ss:$16 sps:$4 sm:$0xff]  }
  0x12   :  { %v140_v56 = vcombine.low %v131_v51, %v138_v52  ;;  %v29_v7 = vld [vmem:[%s5452_s0 + $0x8] sm:$0x1]  ;;  %v30_v8 = vld [vmem:[%s5452_s0 + $0x9] sm:$0x1]  ;;  %v4100_v9 = vld [vmem:[%s5453_s2 + $0xa0] ss:$16 sps:$4 sm:$0xff]  }
  0x13   :  { %v147_v58 = vrot.slane %v139_v54, %v3982_v31  ;;  %v4105_v10 = vld [vmem:[%s5453_s2 + $0xa8] ss:$16 sps:$4 sm:$0xff]   ;;  %v33_v13 = vld [vmem:[%s5452_s0 + $0xc] sm:$0x1]  ;;  %v156_v14 = vcombine.low %v29_v7, %v30_v8  ;;  %v34_v15 = vld [vmem:[%s5452_s0 + $0xd] sm:$0x1] }
  0x14   :  { %376 = vmatpush1.bf16.msra.mxu0 %v3476_v22  ;;  %429 = vmatpush1.bf16.msra.mxu1 %v3477_v23  ;;  %v154_v60 = vrot.slane %v140_v56, %v3982_v31  ;;  %v31_v11 = vld [vmem:[%s5452_s0 + $0xa] sm:$0x1]  ;;  %v32_v12 = vld [vmem:[%s5452_s0 + $0xb] sm:$0x1]  ;;  %v35_v16 = vld [vmem:[%s5452_s0 + $0xe] sm:$0x1]  ;;  %v158_v20 = vcombine.low %v33_v13, %v34_v15 }
  0x15   :  { %377 = vmatprep.subr.bf16.mxu0 %v3478_v24  ;;  %430 = vmatprep.subr.bf16.mxu1 %v3480_v27  ;;  %v36_v17 = vld [vmem:[%s5452_s0 + $0xf] sm:$0x1]  ;;  %v157_v18 = vcombine.low %v31_v11, %v32_v12  ;;  %v4132_v19 = vld [vmem:[%s5453_s2 + $0x84] ss:$16 sps:$4 sm:$0xff]   ;;  %v166_v22 = vrot.slane %v156_v14, %v3982_v31  ;;  %v4176_v37 = vld [vmem:[%s5453_s2 + $0x60] ss:$16 sps:$4 sm:$0xff]  }
  0x16   :  { %v155_v63 = vcombine.low %v147_v58, %v154_v60  ;;  %v159_v21 = vcombine.low %v35_v16, %v36_v17  ;;  %v4140_v23 = vld [vmem:[%s5453_s2 + $0x8c] ss:$16 sps:$4 sm:$0xff]   ;;  %v180_v26 = vrot.slane %v158_v20, %v3982_v31  ;;  %v4181_v38 = vld [vmem:[%s5453_s2 + $0x68] ss:$16 sps:$4 sm:$0xff]   ;;  %v4186_v40 = vld [vmem:[%s5454_s4] sm:$0x3] }
  0x17   :  { %v173_v24 = vrot.slane %v157_v18, %v3982_v31  ;;  %v4167_v34 = vld [vmem:[%s5453_s2 + $0x6c] ss:$16 sps:$4 sm:$0xff]   ;;  %vm995_vm0 = vcmp.gt.s32.totalorder %v4186_v40, 0  ;;  %vm1144_vm1 = vcmp.gt.s32.totalorder %v4186_v40, 1  ;;  %v5457_v42 = vmov 0.0  }
  0x18   :  { %378 = vmatpush1.bf16.msra.mxu0 %v3482_v28  ;;  %431 = vmatpush1.bf16.msra.mxu1 %v3483_v29  ;;  %v187_v27 = vrot.slane %v159_v21, %v3982_v31  ;;  %v4148_v28 = vld [vmem:[%s5453_s2 + $0x80] ss:$16 sps:$4 sm:$0xff]   ;;  %v4198_v41 = vld [vmem:[%s5453_s2 + $0x4c] ss:$16 sps:$4 sm:$0xff]   ;;  %v3326_v43 = vsel %vm995_vm0, 1.0, %v5457_v42  ;;  %v3330_v44 = vsel %vm1144_vm1, 1.0, %v5457_v42 }
  0x19   :  { %379 = vmatprep.subr.bf16.mxu0 %v3484_v30  ;;  %432 = vmatprep.subr.bf16.mxu1 %v3486_v32  ;;  %v188_v29 = vcombine.low %v166_v22, %v173_v24  ;;  %v4155_v30 = vld [vmem:[%s5453_s2 + $0x88] ss:$16 sps:$4 sm:$0xff]   ;;  %v4160_v32 = vld [vmem:[%s5453_s2 + $0x64] ss:$16 sps:$4 sm:$0xff]   ;;  %v4211_v46 = vld [vmem:[%s5453_s2 + $0x40] ss:$16 sps:$4 sm:$0xff]  }
  0x1a   :  { %v189_v33 = vcombine.low %v180_v26, %v187_v27  ;;  %v4216_v47 = vld [vmem:[%s5453_s2 + $0x48] ss:$16 sps:$4 sm:$0xff]   ;;  %v4223_v48 = vld [vmem:[%s5453_s2 + $0x24] ss:$16 sps:$4 sm:$0xff]   ;;  %v4235_v50 = vld [vmem:[%s5453_s2 + $0x20] ss:$16 sps:$4 sm:$0xff]  }
  0x1b   :  { %v4240_v51 = vld [vmem:[%s5453_s2 + $0x28] ss:$16 sps:$4 sm:$0xff]   ;;  %v4247_v52 = vld [vmem:[%s5453_s2 + $0x4] ss:$16 sps:$4 sm:$0xff]   ;;  %v4259_v54 = vld [vmem:[%s5453_s2] ss:$16 sps:$4 sm:$0xff]  }
  0x1c   :  { %380 = vmatpush1.bf16.msra.mxu0 %v3488_v35  ;;  %433 = vmatpush1.bf16.msra.mxu1 %v3489_v36  ;;  %v196_v35 = vrot.slane %v188_v29, %v3982_v31  ;;  %v203_v36 = vrot.slane %v189_v33, %v3982_v31  ;;  %v4193_v31 = vld [vmem:[%s5453_s2 + $0x44] ss:$16 sps:$4 sm:$0xff]   ;;  %v73_v56 = vsub.s32 0, %v3967_v25  ;;  %v81_v58 = vsub.s32 2, %v3967_v25  ;;  %v69_v60 = vld [vmem:[%s5455_s3] sm:$0xf] }
  0x1d   :  { %381 = vmatprep.subr.bf16.mxu0 %v3490_v45  ;;  %434 = vmatprep.subr.bf16.mxu1 %v3492_v49  ;;  %v3407_v45 = vpack.i.bf16 %v3330_v44, %v3326_v43  ;;  %v4228_v49 = vld [vmem:[%s5453_s2 + $0x2c] ss:$16 sps:$4 sm:$0xff]   ;;  %v77_v8 = vsub.s32 1, %v3967_v25  ;;  %v85_v11 = vsub.s32 3, %v3967_v25  ;;  %vm1294_vm2 = vcmp.gt.s32.totalorder %v4186_v40, 2 }
  0x1e   :  { %v204_v39 = vcombine.low %v196_v35, %v203_v36  ;;  %v74_v12 = vrot.slane %v69_v60, %v73_v56  ;;  %v82_v13 = vrot.slane %v69_v60, %v81_v58  ;;  %vm1444_vm3 = vcmp.gt.s32.totalorder %v4186_v40, 3 }
  0x1f   :  { %3408 = vperm.xlu0 %3406, %v3407_v45   ;;  %v4315_v15 = vrot.slane %v69_v60, %v77_v8  ;;  %v4317_v16 = vrot.slane %v69_v60, %v85_v11  ;;  %vm1594_vm4 = vcmp.gt.s32.totalorder %v4186_v40, 4  ;;  %vm1744_vm5 = vcmp.gt.s32.totalorder %v4186_v40, 5 }
  0x20   :  { %382 = vmatpush1.bf16.msra.mxu0 %v3494_v53  ;;  %435 = vmatpush1.bf16.msra.mxu1 %v3495_v55  ;;  %v4252_v53 = vld [vmem:[%s5453_s2 + $0xc] ss:$16 sps:$4 sm:$0xff]   ;;  %v4264_v55 = vld [vmem:[%s5453_s2 + $0x8] ss:$16 sps:$4 sm:$0xff]  }
  0x21   :  { %859 = vmatprep.subr.bf16.mxu0 %v4036_v57  ;;  %900 = vmatprep.subr.bf16.mxu1 %v4042_v59 }
  0x23   :  { %400 = vmatmul.mubr.bf16.vlgmr.msra.gmra.mxu0 %v155_v63  ;;  %453 = vmatmul.mubr.bf16.vlgmr.msra.gmra.mxu1 %v155_v63  ;;  %v3869_v63 = vmov 1983009808  }
  0x24   :  { %860 = vmatpush1.bf16.msra.mxu0 %v4048_v61  ;;  %901 = vmatpush1.bf16.msra.mxu1 %v4053_v62  ;;  %v494_v7 = vunpack.c.l.s4 %v3869_v63 }
  0x25   :  { %861 = vmatprep.subr.bf16.mxu0 %v4058_v0  ;;  %902 = vmatprep.subr.bf16.mxu1 %v4065_v2 }
  0x26   :  { %409 = vmatprep.mubr.bf16.mxu0 %v5459_v1  ;;  %462 = vmatprep.mubr.bf16.mxu1 %v5459_v1  ;;  %v495_v14 = vunpack.c.0.s8 %v494_v7 }
  0x28   :  { %862 = vmatpush1.bf16.msra.mxu0 %v4070_v3  ;;  %903 = vmatpush1.bf16.msra.mxu1 %v4077_v4  ;;  %v4320_v26 = vsub.s32 %v495_v14, %v3967_v25 }
  0x29   :  { %863 = vmatprep.subr.bf16.mxu0 %v4082_v5  ;;  %904 = vmatprep.subr.bf16.mxu1 %v4089_v6 }
  0x2b   :  { %410 = vmatmul.mubr.bf16.gmra.mxu0 %v204_v39  ;;  %463 = vmatmul.mubr.bf16.gmra.mxu1 %v204_v39 }
  0x2c   :  { %864 = vmatpush1.bf16.msra.mxu0 %v4100_v9  ;;  %905 = vmatpush1.bf16.msra.mxu1 %v4105_v10 }
  0x2d   :  { %865 = vmatprep.subr.bf16.mxu0 %v4132_v19  ;;  %906 = vmatprep.subr.bf16.mxu1 %v4140_v23 }
  0x2e   :  { %891 = vmatprep.mubr.bf16.mxu0 %v5459_v1  ;;  %932 = vmatprep.mubr.bf16.mxu1 %v5459_v1 }
  0x30   :  { %866 = vmatpush1.bf16.msra.mxu0 %v4148_v28  ;;  %907 = vmatpush1.bf16.msra.mxu1 %v4155_v30 }
  0x31   :  { %867 = vmatprep.subr.bf16.mxu0 %v4160_v32  ;;  %908 = vmatprep.subr.bf16.mxu1 %v4167_v34 }
  0x34   :  { %868 = vmatpush1.bf16.msra.mxu0 %v4176_v37  ;;  %909 = vmatpush1.bf16.msra.mxu1 %v4181_v38 }
  0x35   :  { %869 = vmatprep.subr.bf16.mxu0 %v4193_v31  ;;  %910 = vmatprep.subr.bf16.mxu1 %v4198_v41 }
  0x38   :  { %870 = vmatpush1.bf16.msra.mxu0 %v4211_v46  ;;  %911 = vmatpush1.bf16.msra.mxu1 %v4216_v47 }
  0x39   :  { %871 = vmatprep.subr.bf16.mxu0 %v4223_v48  ;;  %912 = vmatprep.subr.bf16.mxu1 %v4228_v49 }
  0x3c   :  { %872 = vmatpush1.bf16.msra.mxu0 %v4235_v50  ;;  %913 = vmatpush1.bf16.msra.mxu1 %v4240_v51 }
  0x3d   :  { %873 = vmatprep.subr.bf16.mxu0 %v4247_v52  ;;  %914 = vmatprep.subr.bf16.mxu1 %v4252_v53 }
  0x40   :  { %874 = vmatpush1.bf16.msra.mxu0 %v4259_v54  ;;  %915 = vmatpush1.bf16.msra.mxu1 %v4264_v55 }
  0x41   :  { %1008 = vmatprep.subr.bf16.mxu0 %v4036_v57  ;;  %1049 = vmatprep.subr.bf16.mxu1 %v4042_v59 }
  0x43   :  { %892 = vmatmul.mubr.bf16.vlgmr.msra.gmra.mxu0 %v5459_v1  ;;  %933 = vmatmul.mubr.bf16.vlgmr.msra.gmra.mxu1 %v5459_v1 }
  0x44   :  { %1009 = vmatpush1.bf16.msra.mxu0 %v4048_v61  ;;  %1050 = vmatpush1.bf16.msra.mxu1 %v4053_v62 }
  0x45   :  { %1010 = vmatprep.subr.bf16.mxu0 %v4058_v0  ;;  %1051 = vmatprep.subr.bf16.mxu1 %v4065_v2 }
  0x46   :  { %1040 = vmatprep.mubr.bf16.mxu0 %v5459_v1  ;;  %1081 = vmatprep.mubr.bf16.mxu1 %v5459_v1 }
  0x48   :  { %1011 = vmatpush1.bf16.msra.mxu0 %v4070_v3  ;;  %1052 = vmatpush1.bf16.msra.mxu1 %v4077_v4 }
  0x49   :  { %1012 = vmatprep.subr.bf16.mxu0 %v4082_v5  ;;  %1053 = vmatprep.subr.bf16.mxu1 %v4089_v6 }
  0x4c   :  { %1013 = vmatpush1.bf16.msra.mxu0 %v4100_v9  ;;  %1054 = vmatpush1.bf16.msra.mxu1 %v4105_v10 }
  0x4d   :  { %1014 = vmatprep.subr.bf16.mxu0 %v4132_v19  ;;  %1055 = vmatprep.subr.bf16.mxu1 %v4140_v23 }
  0x50   :  { %1015 = vmatpush1.bf16.msra.mxu0 %v4148_v28  ;;  %1056 = vmatpush1.bf16.msra.mxu1 %v4155_v30 }
  0x51   :  { %1016 = vmatprep.subr.bf16.mxu0 %v4160_v32  ;;  %1057 = vmatprep.subr.bf16.mxu1 %v4167_v34 }
  0x54   :  { %1017 = vmatpush1.bf16.msra.mxu0 %v4176_v37  ;;  %1058 = vmatpush1.bf16.msra.mxu1 %v4181_v38 }
  0x55   :  { %1018 = vmatprep.subr.bf16.mxu0 %v4193_v31  ;;  %1059 = vmatprep.subr.bf16.mxu1 %v4198_v41 }
  0x58   :  { %1019 = vmatpush1.bf16.msra.mxu0 %v4211_v46  ;;  %1060 = vmatpush1.bf16.msra.mxu1 %v4216_v47 }
  0x59   :  { %1020 = vmatprep.subr.bf16.mxu0 %v4223_v48  ;;  %1061 = vmatprep.subr.bf16.mxu1 %v4228_v49 }
  0x5c   :  { %1021 = vmatpush1.bf16.msra.mxu0 %v4235_v50  ;;  %1062 = vmatpush1.bf16.msra.mxu1 %v4240_v51 }
  0x5d   :  { %1022 = vmatprep.subr.bf16.mxu0 %v4247_v52  ;;  %1063 = vmatprep.subr.bf16.mxu1 %v4252_v53 }
  0x60   :  { %1023 = vmatpush1.bf16.msra.mxu0 %v4259_v54  ;;  %1064 = vmatpush1.bf16.msra.mxu1 %v4264_v55 }
  0x61   :  { %1158 = vmatprep.subr.bf16.mxu0 %v4036_v57  ;;  %1199 = vmatprep.subr.bf16.mxu1 %v4042_v59 }
  0xe3   :  { %v401_v17 = vpop.f32.mrf.mxu0  ;;  %v454_v18 = vpop.f32.mrf.mxu1 }
  0xe4   :  { %v402_v20 = vadd.f32 %v401_v17, %v74_v12  ;;  %v455_v21 = vadd.f32 %v454_v18, %v82_v13 }
  0xe5   :  { %v403_v22 = vpop.f32.mrf.mxu0  ;;  %v456_v24 = vpop.f32.mrf.mxu1 }
  0xe6   :  { %v404_v27 = vadd.f32 %v403_v22, %v4315_v15  ;;  %v457_v29 = vadd.f32 %v456_v24, %v4317_v16 }
  0xe7   :  { %v405_v33 = vpop.f32.mrf.mxu0  ;;  %v458_v35 = vpop.f32.mrf.mxu1 }
  0xe8   :  { %v489_v36 = vcombine.low %v402_v20, %v404_v27  ;;  %v490_v39 = vcombine.high %v402_v20, %v404_v27  ;;  %v491_v43 = vcombine.low %v455_v21, %v457_v29  ;;  %v492_v44 = vcombine.high %v455_v21, %v457_v29 }
  0xe9   :  { %v406_v45 = vadd.f32 %v405_v33, %v74_v12  ;;  %v459_v56 = vadd.f32 %v458_v35, %v82_v13  ;;  %v407_v58 = vpop.f32.mrf.mxu0  ;;  %v460_v60 = vpop.f32.mrf.mxu1 }
  0xea   :  { %v4325_v63 = vrot.slane %v489_v36, %v4320_v26  ;;  %v4328_v25 = vrot.slane %v490_v39, %v4320_v26  ;;  %v4331_v7 = vrot.slane %v491_v43, %v4320_v26  ;;  %v4334_v8 = vrot.slane %v492_v44, %v4320_v26 }
  0xeb   :  { %v408_v11 = vadd.f32 %v407_v58, %v4315_v15  ;;  %v461_v14 = vadd.f32 %v460_v60, %v4317_v16  ;;  %v464_v58 = vpop.f32.mrf.mxu1 }
  0xed   :  { %v525_v21 = vcombine.low %v406_v45, %v408_v11  ;;  %v526_v22 = vcombine.high %v406_v45, %v408_v11  ;;  %v527_v24 = vcombine.low %v459_v56, %v461_v14  ;;  %v528_v27 = vcombine.high %v459_v56, %v461_v14  ;;  %v411_v56 = vpop.f32.mrf.mxu0 }
  0xee   :  { %v412_v60 = vadd.f32 %v411_v56, %v74_v12  ;;  %v465_v11 = vadd.f32 %v464_v58, %v82_v13 }
  0xef   :  { %v4345_v29 = vrot.slane %v525_v21, %v4320_v26  ;;  %v4348_v33 = vrot.slane %v526_v22, %v4320_v26  ;;  %v4351_v35 = vrot.slane %v527_v24, %v4320_v26  ;;  %v4354_v36 = vrot.slane %v528_v27, %v4320_v26  ;;  %v413_v14 = vpop.f32.mrf.mxu0  ;;  %v466_v21 = vpop.f32.mrf.mxu1 }
  0xf0   :  { %v414_v22 = vadd.f32 %v413_v14, %v4315_v15  ;;  %v467_v24 = vadd.f32 %v466_v21, %v4317_v16 }
  0xf1   :  { %5477 = vst [vmem:[#allocation3_spill] sm:$0xff] %v4354_v36  ;;  %v415_v27 = vpop.f32.mrf.mxu0  ;;  %v468_v39 = vpop.f32.mrf.mxu1 }
  0xf2   :  { %v561_v20 = vcombine.low %v412_v60, %v414_v22  ;;  %v562_v43 = vcombine.high %v412_v60, %v414_v22  ;;  %v563_v18 = vcombine.low %v465_v11, %v467_v24  ;;  %v564_v17 = vcombine.high %v465_v11, %v467_v24 }
  0xf3   :  { %v416_v44 = vadd.f32 %v415_v27, %v74_v12  ;;  %v469_v42 = vadd.f32 %v468_v39, %v82_v13  ;;  %v417_v1 = vpop.f32.mrf.mxu0  ;;  %v470_v45 = vpop.f32.mrf.mxu1 }
  0xf4   :  { %v4367_v36 = vrot.slane %v561_v20, %v4320_v26  ;;  %v4370_v56 = vrot.slane %v562_v43, %v4320_v26  ;;  %v4373_v58 = vrot.slane %v563_v18, %v4320_v26  ;;  %v4376_v14 = vrot.slane %v564_v17, %v4320_v26 }
  0xf5   :  { %v418_v60 = vadd.f32 %v417_v1, %v4315_v15  ;;  %v471_v11 = vadd.f32 %v470_v45, %v4317_v16 }
  0xf6   :  { %5478 = vst [vmem:[#allocation4_spill] sm:$0xff] %v4370_v56  ;;  %5479 = vst [vmem:[#allocation5_spill] sm:$0xff] %v4373_v58  ;;  %v5487_v56 = vcombine.high %v4325_v63, %v4331_v7 }
  0xf7   :  { %5480 = vst [vmem:[#allocation6_spill] sm:$0xff] %v4376_v14  ;;  %v597_v39 = vcombine.low %v416_v44, %v418_v60  ;;  %v598_v43 = vcombine.high %v416_v44, %v418_v60  ;;  %v599_v17 = vcombine.low %v469_v42, %v471_v11  ;;  %v600_v21 = vcombine.high %v469_v42, %v471_v11 }
  0xf8   :  { %v521_v42 = vcombine.low %v4325_v63, %v4331_v7 }
  0xf9   :  { %v4389_v1 = vrot.slane %v597_v39, %v4320_v26  ;;  %v4392_v15 = vrot.slane %v598_v43, %v4320_v26  ;;  %v4395_v16 = vrot.slane %v599_v17, %v4320_v26  ;;  %v4398_v45 = vrot.slane %v600_v21, %v4320_v26 }
  0xfb   :  { %5481 = vst [vmem:[#allocation7_spill] sm:$0xff] %v4389_v1  ;;  %5482 = vst [vmem:[#allocation8_spill] sm:$0xff] %v4392_v15 }
  0xfc   :  { %5483 = vst [vmem:[#allocation9_spill] sm:$0xff] %v4395_v16  ;;  %5484 = vst [vmem:[#allocation10_spill] sm:$0xff] %v4398_v45 }
 0x103   :  { %v893_v27 = vpop.f32.mrf.mxu0  ;;  %v934_v60 = vpop.f32.mrf.mxu1 }
 0x105   :  { %v895_v11 = vpop.f32.mrf.mxu0  ;;  %v936_v39 = vpop.f32.mrf.mxu1 }
 0x106   :  { %v945_v43 = vcombine.low %v893_v27, %v895_v11  ;;  %v946_v17 = vcombine.low %v934_v60, %v936_v39 }
 0x107   :  { %v897_v21 = vpop.f32.mrf.mxu0  ;;  %v938_v18 = vpop.f32.mrf.mxu1 }
 0x108   :  { %v953_v20 = vrot.slane %v945_v43, %v4320_v26  ;;  %v960_v22 = vrot.slane %v946_v17, %v4320_v26 }
 0x109   :  { %v898_v13 = vpop.f32.mrf.mxu0  ;;  %v939_v44 = vpop.f32.mrf.mxu1 }
 0x10a   :  { %v961_v12 = vcombine.low %v953_v20, %v960_v22 }
 0x10c   :  { %v963_v16 = vadd.f32 %v961_v12, %v521_v42 }
 0x10e   :  { %v3323_v24 = vmul.f32 -1.442695, %v963_v16  ;;  %v971_v45 = vrot.slane %v963_v16, 2  ;;  %v982_v27 = vrot.slane %v963_v16, 6  ;;  %v979_v18 = vrot.slane %v963_v16, 4 }
 0x110   :  { %3544 = vpow2.f32 %v3323_v24  ;;  %v3324_v15 = vmul.f32 -1.442695, %v971_v45  ;;  %v3325_v60 = vmul.f32 -1.442695, %v982_v27 }
 0x112   :  { %3546 = vpow2.f32 %v3324_v15  ;;  %v4415_v15 = vpop.permute.xlu0 %3408 }
 0x113   :  { %3548 = vpow2.f32 %v3325_v60  ;;  %v3410_v21 = vunpack.i.l.bf16 %v4415_v15 }
 0x11d   :  { %v3545_v11 = vpop.eup %3544 }
 0x11e   :  { %v967_v39 = vadd.f32 1.0, %v3545_v11 }
 0x11f   :  { %v3547_v43 = vpop.eup %3546 }
 0x120   :  { %3550 = vrcp.f32 %v967_v39  ;;  %v976_v13 = vadd.f32 1.0, %v3547_v43  ;;  %v3549_v44 = vpop.eup %3548  ;;  %v5485_v39 = vmov 0   ;;  %v5486_v43 = vmov 0.0  }
 0x121   :  { %3552 = vtanh.f32 %v979_v18  ;;  %v987_v22 = vadd.f32 1.0, %v3549_v44  ;;  %v3340_v44 = vsel %vm1444_vm3, 1.0, %v5486_v43 }
 0x122   :  { %3554 = vrcp.f32 %v976_v13  ;;  %v3335_v13 = vsel %vm1294_vm2, 1.0, %v5486_v43 }
 0x123   :  { %3556 = vrcp.f32 %v987_v22 }
 0x12d   :  { %v3551_v17 = vpop.eup %3550 }
 0x12e   :  { %v3553_v20 = vpop.eup %3552 }
 0x12f   :  { %v3555_v12 = vpop.eup %3554  ;;  %v991_v24 = vmul.f32 %v3553_v20, %v3551_v17  ;;  %v3412_v17 = vpack.i.bf16 %v3340_v44, %v3335_v13 }
 0x130   :  { %v990_v42 = vmul.f32 0.0, %v3555_v12  ;;  %v3557_v16 = vpop.eup %3556 }
 0x131   :  { %3413 = vperm.xlu0 %3406, %v3412_v17  }
 0x132   :  { %v4412_v45 = vadd.f32 %v991_v24, %v990_v42 }
 0x134   :  { %3558 = vtanh.f32 %v4412_v45 }
 0x141   :  { %v3559_v27 = vpop.eup %3558 }
 0x142   :  { %v994_v60 = vmul.f32 %v3559_v27, %v3557_v16 }
 0x144   :  { %v1003_v11 = vmul.f32 %v3410_v21, %v994_v60  ;;  %v1007_v18 = vpack.c.bf16 %v994_v60, %v994_v60 }
 0x146   :  { %1004 = vst [vmem:[%s5456_s5] sm:$0x3] %v1003_v11  ;;  %1041 = vmatmul.mubr.bf16.vlgmr.msra.gmra.mxu0 %v1007_v18  ;;  %1082 = vmatmul.mubr.bf16.vlgmr.msra.gmra.mxu1 %v1007_v18 }
 0x147   :  { %1159 = vmatpush1.bf16.msra.mxu0 %v4048_v61  ;;  %1200 = vmatpush1.bf16.msra.mxu1 %v4053_v62 }
 0x148   :  { %1160 = vmatprep.subr.bf16.mxu0 %v4058_v0  ;;  %1201 = vmatprep.subr.bf16.mxu1 %v4065_v2 }
 0x149   :  { %1190 = vmatprep.mubr.bf16.mxu0 %v5485_v39  ;;  %1231 = vmatprep.mubr.bf16.mxu1 %v5485_v39 }
 0x14b   :  { %1161 = vmatpush1.bf16.msra.mxu0 %v4070_v3  ;;  %1202 = vmatpush1.bf16.msra.mxu1 %v4077_v4 }
 0x14c   :  { %1162 = vmatprep.subr.bf16.mxu0 %v4082_v5  ;;  %1203 = vmatprep.subr.bf16.mxu1 %v4089_v6 }
 0x14f   :  { %1163 = vmatpush1.bf16.msra.mxu0 %v4100_v9  ;;  %1204 = vmatpush1.bf16.msra.mxu1 %v4105_v10 }
 0x150   :  { %1164 = vmatprep.subr.bf16.mxu0 %v4132_v19  ;;  %1205 = vmatprep.subr.bf16.mxu1 %v4140_v23 }
 0x153   :  { %1165 = vmatpush1.bf16.msra.mxu0 %v4148_v28  ;;  %1206 = vmatpush1.bf16.msra.mxu1 %v4155_v30 }
 0x154   :  { %1166 = vmatprep.subr.bf16.mxu0 %v4160_v32  ;;  %1207 = vmatprep.subr.bf16.mxu1 %v4167_v34 }
 0x157   :  { %1167 = vmatpush1.bf16.msra.mxu0 %v4176_v37  ;;  %1208 = vmatpush1.bf16.msra.mxu1 %v4181_v38 }
 0x158   :  { %1168 = vmatprep.subr.bf16.mxu0 %v4193_v31  ;;  %1209 = vmatprep.subr.bf16.mxu1 %v4198_v41 }
 0x15b   :  { %1169 = vmatpush1.bf16.msra.mxu0 %v4211_v46  ;;  %1210 = vmatpush1.bf16.msra.mxu1 %v4216_v47 }
 0x15c   :  { %1170 = vmatprep.subr.bf16.mxu0 %v4223_v48  ;;  %1211 = vmatprep.subr.bf16.mxu1 %v4228_v49 }
 0x15f   :  { %1171 = vmatpush1.bf16.msra.mxu0 %v4235_v50  ;;  %1212 = vmatpush1.bf16.msra.mxu1 %v4240_v51 }
 0x160   :  { %1172 = vmatprep.subr.bf16.mxu0 %v4247_v52  ;;  %1213 = vmatprep.subr.bf16.mxu1 %v4252_v53 }
 0x163   :  { %1173 = vmatpush1.bf16.msra.mxu0 %v4259_v54  ;;  %1214 = vmatpush1.bf16.msra.mxu1 %v4264_v55 }
 0x164   :  { %1308 = vmatprep.subr.bf16.mxu0 %v4036_v57  ;;  %1349 = vmatprep.subr.bf16.mxu1 %v4042_v59 }
 0x206   :  { %v1042_v20 = vpop.f32.mrf.mxu0  ;;  %v1083_v12 = vpop.f32.mrf.mxu1 }
 0x208   :  { %v1044_v22 = vpop.f32.mrf.mxu0  ;;  %v1085_v42 = vpop.f32.mrf.mxu1 }
 0x209   :  { %v1094_v24 = vcombine.low %v1042_v20, %v1044_v22  ;;  %v1095_v16 = vcombine.low %v1083_v12, %v1085_v42 }
 0x20a   :  { %v1046_v21 = vpop.f32.mrf.mxu0  ;;  %v1087_v27 = vpop.f32.mrf.mxu1 }
 0x20b   :  { %v1102_v60 = vrot.slane %v1094_v24, %v4320_v26  ;;  %v1109_v11 = vrot.slane %v1095_v16, %v4320_v26 }
 0x20c   :  { %v1047_v18 = vpop.f32.mrf.mxu0  ;;  %v1088_v1 = vpop.f32.mrf.mxu1 }
 0x20d   :  { %v1110_v14 = vcombine.low %v1102_v60, %v1109_v11  ;;  %v3411_v18 = vunpack.i.h.bf16 %v4415_v15 }
 0x20f   :  { %v1112_v13 = vadd.f32 %v1110_v14, %v5487_v56 }
 0x211   :  { %v3327_v44 = vmul.f32 -1.442695, %v1112_v13  ;;  %v1120_v17 = vrot.slane %v1112_v13, 2  ;;  %v1131_v20 = vrot.slane %v1112_v13, 6  ;;  %v1128_v42 = vrot.slane %v1112_v13, 4 }
 0x213   :  { %3560 = vpow2.f32 %v3327_v44  ;;  %v3328_v58 = vmul.f32 -1.442695, %v1120_v17  ;;  %v3329_v12 = vmul.f32 -1.442695, %v1131_v20 }
 0x215   :  { %3562 = vpow2.f32 %v3328_v58 }
 0x216   :  { %3564 = vpow2.f32 %v3329_v12 }
 0x220   :  { %v3561_v22 = vpop.eup %3560 }
 0x221   :  { %v1116_v21 = vadd.f32 1.0, %v3561_v22 }
 0x222   :  { %v3563_v24 = vpop.eup %3562 }
 0x223   :  { %3566 = vrcp.f32 %v1116_v21  ;;  %v1125_v16 = vadd.f32 1.0, %v3563_v24  ;;  %v3565_v1 = vpop.eup %3564 }
 0x224   :  { %3568 = vtanh.f32 %v1128_v42  ;;  %v1136_v56 = vadd.f32 1.0, %v3565_v1 }
 0x225   :  { %3570 = vrcp.f32 %v1125_v16 }
 0x226   :  { %3572 = vrcp.f32 %v1136_v56 }
 0x230   :  { %v3567_v27 = vpop.eup %3566 }
 0x231   :  { %v3569_v63 = vpop.eup %3568 }
 0x232   :  { %v3571_v7 = vpop.eup %3570  ;;  %v1140_v60 = vmul.f32 %v3569_v63, %v3567_v27 }
 0x233   :  { %v1139_v14 = vmul.f32 %v3571_v7, %v4412_v45  ;;  %v3573_v11 = vpop.eup %3572 }
 0x235   :  { %v4465_v58 = vadd.f32 %v1140_v60, %v1139_v14 }
 0x237   :  { %3574 = vtanh.f32 %v4465_v58 }
 0x244   :  { %v3575_v13 = vpop.eup %3574 }
 0x245   :  { %v1143_v44 = vmul.f32 %v3575_v13, %v3573_v11 }
 0x247   :  { %v1152_v17 = vmul.f32 %v3411_v18, %v1143_v44  ;;  %v1157_v20 = vpack.c.bf16 %v1143_v44, %v1143_v44 }
 0x249   :  { %3331 = vst [vmem:[%s5456_s5 + $0x2] sm:$0x3] %v1152_v17  ;;  %1191 = vmatmul.mubr.bf16.vlgmr.msra.gmra.mxu0 %v1157_v20  ;;  %1232 = vmatmul.mubr.bf16.vlgmr.msra.gmra.mxu1 %v1157_v20 }
 0x24a   :  { %1309 = vmatpush1.bf16.msra.mxu0 %v4048_v61  ;;  %1350 = vmatpush1.bf16.msra.mxu1 %v4053_v62 }
 0x24b   :  { %1310 = vmatprep.subr.bf16.mxu0 %v4058_v0  ;;  %1351 = vmatprep.subr.bf16.mxu1 %v4065_v2 }
 0x24c   :  { %1340 = vmatprep.mubr.bf16.mxu0 %v5485_v39  ;;  %1381 = vmatprep.mubr.bf16.mxu1 %v5485_v39 }
 0x24e   :  { %1311 = vmatpush1.bf16.msra.mxu0 %v4070_v3  ;;  %1352 = vmatpush1.bf16.msra.mxu1 %v4077_v4 }
 0x24f   :  { %1312 = vmatprep.subr.bf16.mxu0 %v4082_v5  ;;  %1353 = vmatprep.subr.bf16.mxu1 %v4089_v6 }
 0x252   :  { %1313 = vmatpush1.bf16.msra.mxu0 %v4100_v9  ;;  %1354 = vmatpush1.bf16.msra.mxu1 %v4105_v10 }
 0x253   :  { %1314 = vmatprep.subr.bf16.mxu0 %v4132_v19  ;;  %1355 = vmatprep.subr.bf16.mxu1 %v4140_v23 }
 0x256   :  { %1315 = vmatpush1.bf16.msra.mxu0 %v4148_v28  ;;  %1356 = vmatpush1.bf16.msra.mxu1 %v4155_v30 }
 0x257   :  { %1316 = vmatprep.subr.bf16.mxu0 %v4160_v32  ;;  %1357 = vmatprep.subr.bf16.mxu1 %v4167_v34 }
 0x25a   :  { %1317 = vmatpush1.bf16.msra.mxu0 %v4176_v37  ;;  %1358 = vmatpush1.bf16.msra.mxu1 %v4181_v38 }
 0x25b   :  { %1318 = vmatprep.subr.bf16.mxu0 %v4193_v31  ;;  %1359 = vmatprep.subr.bf16.mxu1 %v4198_v41 }
 0x25e   :  { %1319 = vmatpush1.bf16.msra.mxu0 %v4211_v46  ;;  %1360 = vmatpush1.bf16.msra.mxu1 %v4216_v47 }
 0x25f   :  { %1320 = vmatprep.subr.bf16.mxu0 %v4223_v48  ;;  %1361 = vmatprep.subr.bf16.mxu1 %v4228_v49 }
 0x262   :  { %1321 = vmatpush1.bf16.msra.mxu0 %v4235_v50  ;;  %1362 = vmatpush1.bf16.msra.mxu1 %v4240_v51 }
 0x263   :  { %1322 = vmatprep.subr.bf16.mxu0 %v4247_v52  ;;  %1363 = vmatprep.subr.bf16.mxu1 %v4252_v53 }
 0x266   :  { %1323 = vmatpush1.bf16.msra.mxu0 %v4259_v54  ;;  %1364 = vmatpush1.bf16.msra.mxu1 %v4264_v55 }
 0x267   :  { %1458 = vmatprep.subr.bf16.mxu0 %v4036_v57  ;;  %1499 = vmatprep.subr.bf16.mxu1 %v4042_v59  ;;  %v5488_v57 = vcombine.low %v4328_v25, %v4334_v8 }
 0x309   :  { %v1192_v45 = vpop.f32.mrf.mxu0  ;;  %v1233_v15 = vpop.f32.mrf.mxu1 }
 0x30b   :  { %v1194_v12 = vpop.f32.mrf.mxu0  ;;  %v1235_v22 = vpop.f32.mrf.mxu1 }
 0x30c   :  { %v1244_v42 = vcombine.low %v1192_v45, %v1194_v12  ;;  %v1245_v21 = vcombine.low %v1233_v15, %v1235_v22 }
 0x30d   :  { %v1196_v24 = vpop.f32.mrf.mxu0  ;;  %v1237_v16 = vpop.f32.mrf.mxu1 }
 0x30e   :  { %v1252_v1 = vrot.slane %v1244_v42, %v4320_v26  ;;  %v1259_v27 = vrot.slane %v1245_v21, %v4320_v26 }
 0x30f   :  { %v1197_v63 = vpop.f32.mrf.mxu0  ;;  %v1238_v7 = vpop.f32.mrf.mxu1 }
 0x310   :  { %v1260_v56 = vcombine.low %v1252_v1, %v1259_v27  ;;  %v4515_v63 = vpop.permute.xlu0 %3413 }
 0x312   :  { %v1262_v14 = vadd.f32 %v1260_v56, %v5488_v57  ;;  %v3415_v56 = vunpack.i.l.bf16 %v4515_v63 }
 0x314   :  { %v3332_v59 = vmul.f32 -1.442695, %v1262_v14  ;;  %v1270_v60 = vrot.slane %v1262_v14, 2  ;;  %v1281_v18 = vrot.slane %v1262_v14, 6  ;;  %v1278_v17 = vrot.slane %v1262_v14, 4 }
 0x316   :  { %3576 = vpow2.f32 %v3332_v59  ;;  %v3333_v11 = vmul.f32 -1.442695, %v1270_v60  ;;  %v3334_v13 = vmul.f32 -1.442695, %v1281_v18 }
 0x318   :  { %3578 = vpow2.f32 %v3333_v11  ;;  %v5489_v11 = vcombine.high %v4328_v25, %v4334_v8 }
 0x319   :  { %3580 = vpow2.f32 %v3334_v13 }
 0x323   :  { %v3577_v44 = vpop.eup %3576 }
 0x324   :  { %v1266_v20 = vadd.f32 1.0, %v3577_v44 }
 0x325   :  { %v3579_v45 = vpop.eup %3578 }
 0x326   :  { %3582 = vrcp.f32 %v1266_v20  ;;  %v1275_v15 = vadd.f32 1.0, %v3579_v45  ;;  %v3581_v12 = vpop.eup %3580 }
 0x327   :  { %3584 = vtanh.f32 %v1278_v17  ;;  %v1286_v24 = vadd.f32 1.0, %v3581_v12 }
 0x328   :  { %3586 = vrcp.f32 %v1275_v15 }
 0x329   :  { %3588 = vrcp.f32 %v1286_v24 }
 0x333   :  { %v3583_v22 = vpop.eup %3582 }
 0x334   :  { %v3585_v42 = vpop.eup %3584 }
 0x335   :  { %v3587_v21 = vpop.eup %3586  ;;  %v1290_v1 = vmul.f32 %v3585_v42, %v3583_v22 }
 0x336   :  { %v1289_v16 = vmul.f32 %v3587_v21, %v4465_v58  ;;  %v3589_v7 = vpop.eup %3588 }
 0x338   :  { %v4512_v27 = vadd.f32 %v1290_v1, %v1289_v16 }
 0x33a   :  { %3590 = vtanh.f32 %v4512_v27 }
 0x347   :  { %v3591_v57 = vpop.eup %3590 }
 0x348   :  { %v1293_v14 = vmul.f32 %v3591_v57, %v3589_v7 }
 0x34a   :  { %v1302_v59 = vmul.f32 %v3415_v56, %v1293_v14  ;;  %v1307_v60 = vpack.c.bf16 %v1293_v14, %v1293_v14 }
 0x34c   :  { %3336 = vst [vmem:[%s5456_s5 + $0x4] sm:$0x3] %v1302_v59  ;;  %1341 = vmatmul.mubr.bf16.vlgmr.msra.gmra.mxu0 %v1307_v60  ;;  %1382 = vmatmul.mubr.bf16.vlgmr.msra.gmra.mxu1 %v1307_v60  ;;  %v3416_v59 = vunpack.i.h.bf16 %v4515_v63  ;;  %v4591_v63 = vld [vmem:[%s5453_s2 + $0xe8] ss:$16 sps:$4 sm:$0xff]  }
 0x34d   :  { %1459 = vmatpush1.bf16.msra.mxu0 %v4048_v61  ;;  %1500 = vmatpush1.bf16.msra.mxu1 %v4053_v62  ;;  %v4556_v61 = vld [vmem:[%s5453_s2 + $0xe4] ss:$16 sps:$4 sm:$0xff]   ;;  %v4562_v62 = vld [vmem:[%s5453_s2 + $0xec] ss:$16 sps:$4 sm:$0xff]  }
 0x34e   :  { %1460 = vmatprep.subr.bf16.mxu0 %v4058_v0  ;;  %1501 = vmatprep.subr.bf16.mxu1 %v4065_v2  ;;  %v3345_v0 = vsel %vm1594_vm4, 1.0, %v5486_v43  ;;  %v3350_v2 = vsel %vm1744_vm5, 1.0, %v5486_v43 }
 0x34f   :  { %1490 = vmatprep.mubr.bf16.mxu0 %v5485_v39  ;;  %1531 = vmatprep.mubr.bf16.mxu1 %v5485_v39 }
 0x351   :  { %1461 = vmatpush1.bf16.msra.mxu0 %v4070_v3  ;;  %1502 = vmatpush1.bf16.msra.mxu1 %v4077_v4  ;;  %v3418_v3 = vpack.i.bf16 %v3350_v2, %v3345_v0 }
 0x352   :  { %1462 = vmatprep.subr.bf16.mxu0 %v4082_v5  ;;  %1503 = vmatprep.subr.bf16.mxu1 %v4089_v6 }
 0x353   :  { %3419 = vperm.xlu1 %3417, %v3418_v3  }
 0x355   :  { %1463 = vmatpush1.bf16.msra.mxu0 %v4100_v9  ;;  %1504 = vmatpush1.bf16.msra.mxu1 %v4105_v10 }
 0x356   :  { %1464 = vmatprep.subr.bf16.mxu0 %v4132_v19  ;;  %1505 = vmatprep.subr.bf16.mxu1 %v4140_v23 }
 0x359   :  { %1465 = vmatpush1.bf16.msra.mxu0 %v4148_v28  ;;  %1506 = vmatpush1.bf16.msra.mxu1 %v4155_v30 }
 0x35a   :  { %1466 = vmatprep.subr.bf16.mxu0 %v4160_v32  ;;  %1507 = vmatprep.subr.bf16.mxu1 %v4167_v34 }
 0x35d   :  { %1467 = vmatpush1.bf16.msra.mxu0 %v4176_v37  ;;  %1508 = vmatpush1.bf16.msra.mxu1 %v4181_v38 }
 0x35e   :  { %1468 = vmatprep.subr.bf16.mxu0 %v4193_v31  ;;  %1509 = vmatprep.subr.bf16.mxu1 %v4198_v41 }
 0x361   :  { %1469 = vmatpush1.bf16.msra.mxu0 %v4211_v46  ;;  %1510 = vmatpush1.bf16.msra.mxu1 %v4216_v47 }
 0x362   :  { %1470 = vmatprep.subr.bf16.mxu0 %v4223_v48  ;;  %1511 = vmatprep.subr.bf16.mxu1 %v4228_v49 }
 0x365   :  { %1471 = vmatpush1.bf16.msra.mxu0 %v4235_v50  ;;  %1512 = vmatpush1.bf16.msra.mxu1 %v4240_v51 }
 0x366   :  { %1472 = vmatprep.subr.bf16.mxu0 %v4247_v52  ;;  %1513 = vmatprep.subr.bf16.mxu1 %v4252_v53 }
 0x369   :  { %1473 = vmatpush1.bf16.msra.mxu0 %v4259_v54  ;;  %1514 = vmatpush1.bf16.msra.mxu1 %v4264_v55 }
 0x36a   :  { %1608 = vmatprep.subr.bf16.mxu0 %v4556_v61  ;;  %1649 = vmatprep.subr.bf16.mxu1 %v4562_v62 }
 0x40c   :  { %v1342_v4 = vpop.f32.mrf.mxu0  ;;  %v1383_v5 = vpop.f32.mrf.mxu1 }
 0x40e   :  { %v1344_v6 = vpop.f32.mrf.mxu0  ;;  %v1385_v9 = vpop.f32.mrf.mxu1 }
 0x40f   :  { %v1394_v10 = vcombine.low %v1342_v4, %v1344_v6  ;;  %v1395_v19 = vcombine.low %v1383_v5, %v1385_v9  ;;  %v4597_v4 = vld [vmem:[%s5453_s2 + $0xc4] ss:$16 sps:$4 sm:$0xff]   ;;  %v4603_v5 = vld [vmem:[%s5453_s2 + $0xcc] ss:$16 sps:$4 sm:$0xff]   ;;  %v4611_v6 = vld [vmem:[%s5453_s2 + $0xc0] ss:$16 sps:$4 sm:$0xff]  }
 0x410   :  { %v1346_v23 = vpop.f32.mrf.mxu0  ;;  %v1387_v28 = vpop.f32.mrf.mxu1  ;;  %v4617_v9 = vld [vmem:[%s5453_s2 + $0xc8] ss:$16 sps:$4 sm:$0xff]  }
 0x411   :  { %v1402_v30 = vrot.slane %v1394_v10, %v4320_v26  ;;  %v1409_v32 = vrot.slane %v1395_v19, %v4320_v26  ;;  %v4623_v10 = vld [vmem:[%s5453_s2 + $0xa4] ss:$16 sps:$4 sm:$0xff]   ;;  %v4629_v19 = vld [vmem:[%s5453_s2 + $0xac] ss:$16 sps:$4 sm:$0xff]   ;;  %v4635_v23 = vld [vmem:[%s5453_s2 + $0xa0] ss:$16 sps:$4 sm:$0xff]  }
 0x412   :  { %v1347_v34 = vpop.f32.mrf.mxu0  ;;  %v1388_v40 = vpop.f32.mrf.mxu1  ;;  %v4641_v28 = vld [vmem:[%s5453_s2 + $0xa8] ss:$16 sps:$4 sm:$0xff]  }
 0x413   :  { %v1410_v58 = vcombine.low %v1402_v30, %v1409_v32  ;;  %v4647_v30 = vld [vmem:[%s5453_s2 + $0x84] ss:$16 sps:$4 sm:$0xff]   ;;  %v4653_v32 = vld [vmem:[%s5453_s2 + $0x8c] ss:$16 sps:$4 sm:$0xff]   ;;  %v4659_v34 = vld [vmem:[%s5453_s2 + $0x80] ss:$16 sps:$4 sm:$0xff]  }
 0x414   :  { %v4665_v40 = vld [vmem:[%s5453_s2 + $0x88] ss:$16 sps:$4 sm:$0xff]  }
 0x415   :  { %v1412_v18 = vadd.f32 %v1410_v58, %v5489_v11  ;;  %v4671_v58 = vld [vmem:[%s5453_s2 + $0x64] ss:$16 sps:$4 sm:$0xff]   ;;  %v4677_v11 = vld [vmem:[%s5453_s2 + $0x6c] ss:$16 sps:$4 sm:$0xff]  }
 0x417   :  { %v3337_v13 = vmul.f32 -1.442695, %v1412_v18  ;;  %v1420_v44 = vrot.slane %v1412_v18, 2  ;;  %v1431_v20 = vrot.slane %v1412_v18, 6  ;;  %v1428_v12 = vrot.slane %v1412_v18, 4 }
 0x419   :  { %3592 = vpow2.f32 %v3337_v13  ;;  %v3338_v17 = vmul.f32 -1.442695, %v1420_v44  ;;  %v3339_v45 = vmul.f32 -1.442695, %v1431_v20 }
 0x41b   :  { %3594 = vpow2.f32 %v3338_v17 }
 0x41c   :  { %3596 = vpow2.f32 %v3339_v45 }
 0x426   :  { %v3593_v15 = vpop.eup %3592 }
 0x427   :  { %v1416_v22 = vadd.f32 1.0, %v3593_v15 }
 0x428   :  { %v3595_v42 = vpop.eup %3594 }
 0x429   :  { %3598 = vrcp.f32 %v1416_v22  ;;  %v1425_v21 = vadd.f32 1.0, %v3595_v42  ;;  %v3597_v24 = vpop.eup %3596 }
 0x42a   :  { %3600 = vtanh.f32 %v1428_v12  ;;  %v1436_v1 = vadd.f32 1.0, %v3597_v24 }
 0x42b   :  { %3602 = vrcp.f32 %v1425_v21 }
 0x42c   :  { %3604 = vrcp.f32 %v1436_v1 }
 0x436   :  { %v3599_v16 = vpop.eup %3598 }
 0x437   :  { %v3601_v25 = vpop.eup %3600 }
 0x438   :  { %v3603_v8 = vpop.eup %3602  ;;  %v1440_v56 = vmul.f32 %v3601_v25, %v3599_v16 }
 0x439   :  { %v1439_v7 = vmul.f32 %v3603_v8, %v4512_v27  ;;  %v3605_v14 = vpop.eup %3604  ;;  %v4585_v27 = vld [vmem:[%s5453_s2 + $0xe0] ss:$16 sps:$4 sm:$0xff]  }
 0x43b   :  { %v4575_v57 = vadd.f32 %v1440_v56, %v1439_v7 }
 0x43d   :  { %3606 = vtanh.f32 %v4575_v57 }
 0x44a   :  { %v3607_v60 = vpop.eup %3606 }
 0x44b   :  { %v1443_v0 = vmul.f32 %v3607_v60, %v3605_v14 }
 0x44d   :  { %v1452_v2 = vmul.f32 %v3416_v59, %v1443_v0  ;;  %v1457_v3 = vpack.c.bf16 %v1443_v0, %v1443_v0  ;;  %v4705_v59 = vpop.permute.xlu1 %3419 }
 0x44e   :  { %v3421_v0 = vunpack.i.l.bf16 %v4705_v59 }
 0x44f   :  { %3341 = vst [vmem:[%s5456_s5 + $0x6] sm:$0x3] %v1452_v2  ;;  %1491 = vmatmul.mubr.bf16.vlgmr.msra.gmra.mxu0 %v1457_v3  ;;  %1532 = vmatmul.mubr.bf16.vlgmr.msra.gmra.mxu1 %v1457_v3 }
 0x450   :  { %1609 = vmatpush1.bf16.msra.mxu0 %v4585_v27  ;;  %1650 = vmatpush1.bf16.msra.mxu1 %v4591_v63 }
 0x451   :  { %1610 = vmatprep.subr.bf16.mxu0 %v4597_v4  ;;  %1651 = vmatprep.subr.bf16.mxu1 %v4603_v5 }
 0x452   :  { %1640 = vmatprep.mubr.bf16.mxu0 %v5485_v39  ;;  %1681 = vmatprep.mubr.bf16.mxu1 %v5485_v39 }
 0x454   :  { %1611 = vmatpush1.bf16.msra.mxu0 %v4611_v6  ;;  %1652 = vmatpush1.bf16.msra.mxu1 %v4617_v9 }
 0x455   :  { %1612 = vmatprep.subr.bf16.mxu0 %v4623_v10  ;;  %1653 = vmatprep.subr.bf16.mxu1 %v4629_v19 }
 0x458   :  { %1613 = vmatpush1.bf16.msra.mxu0 %v4635_v23  ;;  %1654 = vmatpush1.bf16.msra.mxu1 %v4641_v28 }
 0x459   :  { %1614 = vmatprep.subr.bf16.mxu0 %v4647_v30  ;;  %1655 = vmatprep.subr.bf16.mxu1 %v4653_v32 }
 0x45c   :  { %1615 = vmatpush1.bf16.msra.mxu0 %v4659_v34  ;;  %1656 = vmatpush1.bf16.msra.mxu1 %v4665_v40 }
 0x45d   :  { %1616 = vmatprep.subr.bf16.mxu0 %v4671_v58  ;;  %1657 = vmatprep.subr.bf16.mxu1 %v4677_v11 }
 0x460   :  { %1617 = vmatpush1.bf16.msra.mxu0 %v4176_v37  ;;  %1658 = vmatpush1.bf16.msra.mxu1 %v4181_v38 }
 0x461   :  { %1618 = vmatprep.subr.bf16.mxu0 %v4193_v31  ;;  %1659 = vmatprep.subr.bf16.mxu1 %v4198_v41 }
 0x464   :  { %1619 = vmatpush1.bf16.msra.mxu0 %v4211_v46  ;;  %1660 = vmatpush1.bf16.msra.mxu1 %v4216_v47 }
 0x465   :  { %1620 = vmatprep.subr.bf16.mxu0 %v4223_v48  ;;  %1661 = vmatprep.subr.bf16.mxu1 %v4228_v49 }
 0x468   :  { %1621 = vmatpush1.bf16.msra.mxu0 %v4235_v50  ;;  %1662 = vmatpush1.bf16.msra.mxu1 %v4240_v51 }
 0x469   :  { %1622 = vmatprep.subr.bf16.mxu0 %v4247_v52  ;;  %1663 = vmatprep.subr.bf16.mxu1 %v4252_v53 }
 0x46c   :  { %1623 = vmatpush1.bf16.msra.mxu0 %v4259_v54  ;;  %1664 = vmatpush1.bf16.msra.mxu1 %v4264_v55  ;;  %v5490_v55 = vcombine.low %v4345_v29, %v4351_v35 }
 0x46d   :  { %1758 = vmatprep.subr.bf16.mxu0 %v4556_v61  ;;  %1799 = vmatprep.subr.bf16.mxu1 %v4562_v62 }
 0x50f   :  { %v1492_v37 = vpop.f32.mrf.mxu0  ;;  %v1533_v38 = vpop.f32.mrf.mxu1 }
 0x511   :  { %v1494_v31 = vpop.f32.mrf.mxu0  ;;  %v1535_v41 = vpop.f32.mrf.mxu1 }
 0x512   :  { %v1544_v46 = vcombine.low %v1492_v37, %v1494_v31  ;;  %v1545_v47 = vcombine.low %v1533_v38, %v1535_v41  ;;  %v4738_v31 = vld [vmem:[%s5453_s2 + $0x68] ss:$16 sps:$4 sm:$0xff]   ;;  %v4744_v41 = vld [vmem:[%s5453_s2 + $0x44] ss:$16 sps:$4 sm:$0xff]  }
 0x513   :  { %v1496_v48 = vpop.f32.mrf.mxu0  ;;  %v1537_v49 = vpop.f32.mrf.mxu1 }
 0x514   :  { %v1552_v50 = vrot.slane %v1544_v46, %v4320_v26  ;;  %v1559_v51 = vrot.slane %v1545_v47, %v4320_v26  ;;  %v4750_v46 = vld [vmem:[%s5453_s2 + $0x4c] ss:$16 sps:$4 sm:$0xff]   ;;  %v4756_v47 = vld [vmem:[%s5453_s2 + $0x40] ss:$16 sps:$4 sm:$0xff]   ;;  %v4762_v48 = vld [vmem:[%s5453_s2 + $0x48] ss:$16 sps:$4 sm:$0xff]  }
 0x515   :  { %v1497_v52 = vpop.f32.mrf.mxu0  ;;  %v1538_v53 = vpop.f32.mrf.mxu1  ;;  %v4768_v49 = vld [vmem:[%s5453_s2 + $0x24] ss:$16 sps:$4 sm:$0xff]  }
 0x516   :  { %v1560_v54 = vcombine.low %v1552_v50, %v1559_v51  ;;  %v4774_v50 = vld [vmem:[%s5453_s2 + $0x2c] ss:$16 sps:$4 sm:$0xff]   ;;  %v4780_v51 = vld [vmem:[%s5453_s2 + $0x20] ss:$16 sps:$4 sm:$0xff]   ;;  %v4786_v52 = vld [vmem:[%s5453_s2 + $0x28] ss:$16 sps:$4 sm:$0xff]  }
 0x517   :  { %v4792_v53 = vld [vmem:[%s5453_s2 + $0x4] ss:$16 sps:$4 sm:$0xff]  }
 0x518   :  { %v1562_v18 = vadd.f32 %v1560_v54, %v5490_v55  ;;  %v4798_v54 = vld [vmem:[%s5453_s2 + $0xc] ss:$16 sps:$4 sm:$0xff]   ;;  %v4804_v55 = vld [vmem:[%s5453_s2] ss:$16 sps:$4 sm:$0xff]  }
 0x51a   :  { %v3342_v13 = vmul.f32 -1.442695, %v1562_v18  ;;  %v1570_v44 = vrot.slane %v1562_v18, 2  ;;  %v1581_v20 = vrot.slane %v1562_v18, 6  ;;  %v1578_v12 = vrot.slane %v1562_v18, 4 }
 0x51b   :  { %v4810_v18 = vld [vmem:[%s5453_s2 + $0x8] ss:$16 sps:$4 sm:$0xff]  }
 0x51c   :  { %3608 = vpow2.f32 %v3342_v13  ;;  %v3343_v17 = vmul.f32 -1.442695, %v1570_v44  ;;  %v3344_v45 = vmul.f32 -1.442695, %v1581_v20  ;;  %v4818_v13 = vld [vmem:[%s5454_s4] sm:$0x3] }
 0x51d   :  { %vm1894_vm6 = vcmp.gt.s32.totalorder %v4818_v13, 6  ;;  %vm2044_vm7 = vcmp.gt.s32.totalorder %v4818_v13, 7  ;;  %vm2194_vm8 = vcmp.gt.s32.totalorder %v4818_v13, 8  ;;  %vm2344_vm9 = vcmp.gt.s32.totalorder %v4818_v13, 9 }
 0x51e   :  { %3610 = vpow2.f32 %v3343_v17  ;;  %v3355_v44 = vsel %vm1894_vm6, 1.0, %v5486_v43  ;;  %v3360_v17 = vsel %vm2044_vm7, 1.0, %v5486_v43  ;;  %vm2494_vm10 = vcmp.gt.s32.totalorder %v4818_v13, 10 }
 0x51f   :  { %3612 = vpow2.f32 %v3344_v45  ;;  %v3423_v20 = vpack.i.bf16 %v3360_v17, %v3355_v44  ;;  %vm2644_vm11 = vcmp.gt.s32.totalorder %v4818_v13, 11 }
 0x521   :  { %3424 = vperm.xlu1 %3417, %v3423_v20  }
 0x529   :  { %v3609_v15 = vpop.eup %3608 }
 0x52a   :  { %v1566_v22 = vadd.f32 1.0, %v3609_v15 }
 0x52b   :  { %v3611_v42 = vpop.eup %3610 }
 0x52c   :  { %3614 = vrcp.f32 %v1566_v22  ;;  %v1575_v21 = vadd.f32 1.0, %v3611_v42  ;;  %v3613_v24 = vpop.eup %3612 }
 0x52d   :  { %3616 = vtanh.f32 %v1578_v12  ;;  %v1586_v1 = vadd.f32 1.0, %v3613_v24 }
 0x52e   :  { %3618 = vrcp.f32 %v1575_v21 }
 0x52f   :  { %3620 = vrcp.f32 %v1586_v1 }
 0x539   :  { %v3615_v16 = vpop.eup %3614 }
 0x53a   :  { %v3617_v25 = vpop.eup %3616 }
 0x53b   :  { %v3619_v8 = vpop.eup %3618  ;;  %v1590_v56 = vmul.f32 %v3617_v25, %v3615_v16 }
 0x53c   :  { %v1589_v7 = vmul.f32 %v3619_v8, %v4575_v57  ;;  %v3621_v60 = vpop.eup %3620  ;;  %v4732_v57 = vld [vmem:[%s5453_s2 + $0x60] ss:$16 sps:$4 sm:$0xff]  }
 0x53e   :  { %v4702_v14 = vadd.f32 %v1590_v56, %v1589_v7 }
 0x540   :  { %3622 = vtanh.f32 %v4702_v14 }
 0x54d   :  { %v3623_v2 = vpop.eup %3622 }
 0x54e   :  { %v1593_v3 = vmul.f32 %v3623_v2, %v3621_v60  ;;  %v5491_v60 = vcombine.high %v4345_v29, %v4351_v35 }
 0x550   :  { %v1602_v37 = vmul.f32 %v3421_v0, %v1593_v3  ;;  %v1607_v38 = vpack.c.bf16 %v1593_v3, %v1593_v3 }
 0x552   :  { %3346 = vst [vmem:[%s5456_s5 + $0x8] sm:$0x3] %v1602_v37  ;;  %1641 = vmatmul.mubr.bf16.vlgmr.msra.gmra.mxu0 %v1607_v38  ;;  %1682 = vmatmul.mubr.bf16.vlgmr.msra.gmra.mxu1 %v1607_v38 }
 0x553   :  { %1759 = vmatpush1.bf16.msra.mxu0 %v4585_v27  ;;  %1800 = vmatpush1.bf16.msra.mxu1 %v4591_v63 }
 0x554   :  { %1760 = vmatprep.subr.bf16.mxu0 %v4597_v4  ;;  %1801 = vmatprep.subr.bf16.mxu1 %v4603_v5 }
 0x555   :  { %1790 = vmatprep.mubr.bf16.mxu0 %v5485_v39  ;;  %1831 = vmatprep.mubr.bf16.mxu1 %v5485_v39 }
 0x557   :  { %1761 = vmatpush1.bf16.msra.mxu0 %v4611_v6  ;;  %1802 = vmatpush1.bf16.msra.mxu1 %v4617_v9 }
 0x558   :  { %1762 = vmatprep.subr.bf16.mxu0 %v4623_v10  ;;  %1803 = vmatprep.subr.bf16.mxu1 %v4629_v19 }
 0x55b   :  { %1763 = vmatpush1.bf16.msra.mxu0 %v4635_v23  ;;  %1804 = vmatpush1.bf16.msra.mxu1 %v4641_v28 }
 0x55c   :  { %1764 = vmatprep.subr.bf16.mxu0 %v4647_v30  ;;  %1805 = vmatprep.subr.bf16.mxu1 %v4653_v32 }
 0x55f   :  { %1765 = vmatpush1.bf16.msra.mxu0 %v4659_v34  ;;  %1806 = vmatpush1.bf16.msra.mxu1 %v4665_v40 }
 0x560   :  { %1766 = vmatprep.subr.bf16.mxu0 %v4671_v58  ;;  %1807 = vmatprep.subr.bf16.mxu1 %v4677_v11 }
 0x563   :  { %1767 = vmatpush1.bf16.msra.mxu0 %v4732_v57  ;;  %1808 = vmatpush1.bf16.msra.mxu1 %v4738_v31 }
 0x564   :  { %1768 = vmatprep.subr.bf16.mxu0 %v4744_v41  ;;  %1809 = vmatprep.subr.bf16.mxu1 %v4750_v46 }
 0x567   :  { %1769 = vmatpush1.bf16.msra.mxu0 %v4756_v47  ;;  %1810 = vmatpush1.bf16.msra.mxu1 %v4762_v48 }
 0x568   :  { %1770 = vmatprep.subr.bf16.mxu0 %v4768_v49  ;;  %1811 = vmatprep.subr.bf16.mxu1 %v4774_v50 }
 0x56b   :  { %1771 = vmatpush1.bf16.msra.mxu0 %v4780_v51  ;;  %1812 = vmatpush1.bf16.msra.mxu1 %v4786_v52 }
 0x56c   :  { %1772 = vmatprep.subr.bf16.mxu0 %v4792_v53  ;;  %1813 = vmatprep.subr.bf16.mxu1 %v4798_v54 }
 0x56f   :  { %1773 = vmatpush1.bf16.msra.mxu0 %v4804_v55  ;;  %1814 = vmatpush1.bf16.msra.mxu1 %v4810_v18 }
 0x570   :  { %1908 = vmatprep.subr.bf16.mxu0 %v4556_v61  ;;  %1949 = vmatprep.subr.bf16.mxu1 %v4562_v62 }
 0x612   :  { %v1642_v45 = vpop.f32.mrf.mxu0  ;;  %v1683_v15 = vpop.f32.mrf.mxu1 }
 0x614   :  { %v1644_v12 = vpop.f32.mrf.mxu0  ;;  %v1685_v22 = vpop.f32.mrf.mxu1 }
 0x615   :  { %v1694_v42 = vcombine.low %v1642_v45, %v1644_v12  ;;  %v1695_v21 = vcombine.low %v1683_v15, %v1685_v22 }
 0x616   :  { %v1646_v24 = vpop.f32.mrf.mxu0  ;;  %v1687_v16 = vpop.f32.mrf.mxu1 }
 0x617   :  { %v1702_v25 = vrot.slane %v1694_v42, %v4320_v26  ;;  %v1709_v8 = vrot.slane %v1695_v21, %v4320_v26 }
 0x618   :  { %v1647_v1 = vpop.f32.mrf.mxu0  ;;  %v1688_v7 = vpop.f32.mrf.mxu1 }
 0x619   :  { %v1710_v56 = vcombine.low %v1702_v25, %v1709_v8  ;;  %v3422_v1 = vunpack.i.h.bf16 %v4705_v59 }
 0x61b   :  { %v1712_v0 = vadd.f32 %v1710_v56, %v5491_v60 }
 0x61d   :  { %v3347_v2 = vmul.f32 -1.442695, %v1712_v0  ;;  %v1720_v3 = vrot.slane %v1712_v0, 2  ;;  %v1731_v38 = vrot.slane %v1712_v0, 6  ;;  %v1728_v20 = vrot.slane %v1712_v0, 4 }
 0x61f   :  { %3624 = vpow2.f32 %v3347_v2  ;;  %v3348_v37 = vmul.f32 -1.442695, %v1720_v3  ;;  %v3349_v44 = vmul.f32 -1.442695, %v1731_v38 }
 0x621   :  { %3626 = vpow2.f32 %v3348_v37 }
 0x622   :  { %3628 = vpow2.f32 %v3349_v44 }
 0x62c   :  { %v3625_v17 = vpop.eup %3624 }
 0x62d   :  { %v1716_v45 = vadd.f32 1.0, %v3625_v17 }
 0x62e   :  { %v3627_v15 = vpop.eup %3626 }
 0x62f   :  { %3630 = vrcp.f32 %v1716_v45  ;;  %v1725_v12 = vadd.f32 1.0, %v3627_v15  ;;  %v3629_v22 = vpop.eup %3628 }
 0x630   :  { %3632 = vtanh.f32 %v1728_v20  ;;  %v1736_v21 = vadd.f32 1.0, %v3629_v22 }
 0x631   :  { %3634 = vrcp.f32 %v1725_v12 }
 0x632   :  { %3636 = vrcp.f32 %v1736_v21 }
 0x63c   :  { %v3631_v42 = vpop.eup %3630 }
 0x63d   :  { %v3633_v29 = vpop.eup %3632 }
 0x63e   :  { %v3635_v35 = vpop.eup %3634  ;;  %v1740_v16 = vmul.f32 %v3633_v29, %v3631_v42  ;;  %v5492_v42 = vld [vmem:[#allocation3_spill] sm:$0xff] }
 0x63f   :  { %v1739_v24 = vmul.f32 %v3635_v35, %v4702_v14  ;;  %v3637_v8 = vpop.eup %3636  ;;  %v5493_v29 = vcombine.low %v4348_v33, %v5492_v42 }
 0x641   :  { %v4830_v25 = vadd.f32 %v1740_v16, %v1739_v24 }
 0x643   :  { %3638 = vtanh.f32 %v4830_v25 }
 0x650   :  { %v3639_v7 = vpop.eup %3638 }
 0x651   :  { %v1743_v56 = vmul.f32 %v3639_v7, %v3637_v8 }
 0x653   :  { %v1752_v60 = vmul.f32 %v3422_v1, %v1743_v56  ;;  %v1757_v0 = vpack.c.bf16 %v1743_v56, %v1743_v56 }
 0x655   :  { %3351 = vst [vmem:[%s5456_s5 + $0xa] sm:$0x3] %v1752_v60  ;;  %1791 = vmatmul.mubr.bf16.vlgmr.msra.gmra.mxu0 %v1757_v0  ;;  %1832 = vmatmul.mubr.bf16.vlgmr.msra.gmra.mxu1 %v1757_v0 }
 0x656   :  { %1909 = vmatpush1.bf16.msra.mxu0 %v4585_v27  ;;  %1950 = vmatpush1.bf16.msra.mxu1 %v4591_v63 }
 0x657   :  { %1910 = vmatprep.subr.bf16.mxu0 %v4597_v4  ;;  %1951 = vmatprep.subr.bf16.mxu1 %v4603_v5 }
 0x658   :  { %1940 = vmatprep.mubr.bf16.mxu0 %v5485_v39  ;;  %1981 = vmatprep.mubr.bf16.mxu1 %v5485_v39 }
 0x65a   :  { %1911 = vmatpush1.bf16.msra.mxu0 %v4611_v6  ;;  %1952 = vmatpush1.bf16.msra.mxu1 %v4617_v9 }
 0x65b   :  { %1912 = vmatprep.subr.bf16.mxu0 %v4623_v10  ;;  %1953 = vmatprep.subr.bf16.mxu1 %v4629_v19 }
 0x65e   :  { %1913 = vmatpush1.bf16.msra.mxu0 %v4635_v23  ;;  %1954 = vmatpush1.bf16.msra.mxu1 %v4641_v28 }
 0x65f   :  { %1914 = vmatprep.subr.bf16.mxu0 %v4647_v30  ;;  %1955 = vmatprep.subr.bf16.mxu1 %v4653_v32 }
 0x662   :  { %1915 = vmatpush1.bf16.msra.mxu0 %v4659_v34  ;;  %1956 = vmatpush1.bf16.msra.mxu1 %v4665_v40 }
 0x663   :  { %1916 = vmatprep.subr.bf16.mxu0 %v4671_v58  ;;  %1957 = vmatprep.subr.bf16.mxu1 %v4677_v11 }
 0x666   :  { %1917 = vmatpush1.bf16.msra.mxu0 %v4732_v57  ;;  %1958 = vmatpush1.bf16.msra.mxu1 %v4738_v31 }
 0x667   :  { %1918 = vmatprep.subr.bf16.mxu0 %v4744_v41  ;;  %1959 = vmatprep.subr.bf16.mxu1 %v4750_v46 }
 0x66a   :  { %1919 = vmatpush1.bf16.msra.mxu0 %v4756_v47  ;;  %1960 = vmatpush1.bf16.msra.mxu1 %v4762_v48 }
 0x66b   :  { %1920 = vmatprep.subr.bf16.mxu0 %v4768_v49  ;;  %1961 = vmatprep.subr.bf16.mxu1 %v4774_v50 }
 0x66e   :  { %1921 = vmatpush1.bf16.msra.mxu0 %v4780_v51  ;;  %1962 = vmatpush1.bf16.msra.mxu1 %v4786_v52 }
 0x66f   :  { %1922 = vmatprep.subr.bf16.mxu0 %v4792_v53  ;;  %1963 = vmatprep.subr.bf16.mxu1 %v4798_v54 }
 0x672   :  { %1923 = vmatpush1.bf16.msra.mxu0 %v4804_v55  ;;  %1964 = vmatpush1.bf16.msra.mxu1 %v4810_v18 }
 0x673   :  { %2058 = vmatprep.subr.bf16.mxu0 %v4556_v61  ;;  %2099 = vmatprep.subr.bf16.mxu1 %v4562_v62 }
 0x715   :  { %v1792_v14 = vpop.f32.mrf.mxu0  ;;  %v1833_v59 = vpop.f32.mrf.mxu1 }
 0x717   :  { %v1794_v2 = vpop.f32.mrf.mxu0  ;;  %v1835_v3 = vpop.f32.mrf.mxu1 }
 0x718   :  { %v1844_v37 = vcombine.low %v1792_v14, %v1794_v2  ;;  %v1845_v38 = vcombine.low %v1833_v59, %v1835_v3 }
 0x719   :  { %v1796_v44 = vpop.f32.mrf.mxu0  ;;  %v1837_v17 = vpop.f32.mrf.mxu1 }
 0x71a   :  { %v1852_v20 = vrot.slane %v1844_v37, %v4320_v26  ;;  %v1859_v45 = vrot.slane %v1845_v38, %v4320_v26 }
 0x71b   :  { %v1797_v15 = vpop.f32.mrf.mxu0  ;;  %v1838_v12 = vpop.f32.mrf.mxu1 }
 0x71c   :  { %v1860_v22 = vcombine.low %v1852_v20, %v1859_v45  ;;  %v4880_v45 = vpop.permute.xlu1 %3424 }
 0x71d   :  { %v3426_v12 = vunpack.i.l.bf16 %v4880_v45 }
 0x71e   :  { %v1862_v35 = vadd.f32 %v1860_v22, %v5493_v29 }
 0x720   :  { %v3352_v21 = vmul.f32 -1.442695, %v1862_v35  ;;  %v1870_v24 = vrot.slane %v1862_v35, 2  ;;  %v1881_v8 = vrot.slane %v1862_v35, 6  ;;  %v1878_v56 = vrot.slane %v1862_v35, 4 }
 0x722   :  { %3640 = vpow2.f32 %v3352_v21  ;;  %v3353_v16 = vmul.f32 -1.442695, %v1870_v24  ;;  %v3354_v1 = vmul.f32 -1.442695, %v1881_v8  ;;  %v3370_v24 = vsel %vm2344_vm9, 1.0, %v5486_v43 }
 0x724   :  { %3642 = vpow2.f32 %v3353_v16 }
 0x725   :  { %3644 = vpow2.f32 %v3354_v1 }
 0x72f   :  { %v3641_v7 = vpop.eup %3640 }
 0x730   :  { %v1866_v60 = vadd.f32 1.0, %v3641_v7 }
 0x731   :  { %v3643_v0 = vpop.eup %3642 }
 0x732   :  { %3646 = vrcp.f32 %v1866_v60  ;;  %v1875_v14 = vadd.f32 1.0, %v3643_v0  ;;  %v3645_v59 = vpop.eup %3644 }
 0x733   :  { %3648 = vtanh.f32 %v1878_v56  ;;  %v1886_v38 = vadd.f32 1.0, %v3645_v59 }
 0x734   :  { %3650 = vrcp.f32 %v1875_v14 }
 0x735   :  { %3652 = vrcp.f32 %v1886_v38 }
 0x73f   :  { %v3647_v2 = vpop.eup %3646 }
 0x740   :  { %v3649_v3 = vpop.eup %3648 }
 0x741   :  { %v3651_v37 = vpop.eup %3650  ;;  %v1890_v17 = vmul.f32 %v3649_v3, %v3647_v2 }
 0x742   :  { %v1889_v44 = vmul.f32 %v3651_v37, %v4830_v25  ;;  %v3653_v15 = vpop.eup %3652  ;;  %v3365_v25 = vsel %vm2194_vm8, 1.0, %v5486_v43 }
 0x743   :  { %v3428_v16 = vpack.i.bf16 %v3370_v24, %v3365_v25 }
 0x744   :  { %v4877_v20 = vadd.f32 %v1890_v17, %v1889_v44  ;;  %v5494_v17 = vcombine.high %v4348_v33, %v5492_v42 }
 0x745   :  { %3429 = vperm.xlu0 %3406, %v3428_v16  }
 0x746   :  { %3654 = vtanh.f32 %v4877_v20 }
 0x753   :  { %v3655_v22 = vpop.eup %3654 }
 0x754   :  { %v1893_v29 = vmul.f32 %v3655_v22, %v3653_v15 }
 0x756   :  { %v1902_v35 = vmul.f32 %v3426_v12, %v1893_v29  ;;  %v1907_v21 = vpack.c.bf16 %v1893_v29, %v1893_v29 }
 0x758   :  { %3356 = vst [vmem:[%s5456_s5 + $0xc] sm:$0x3] %v1902_v35  ;;  %1941 = vmatmul.mubr.bf16.vlgmr.msra.gmra.mxu0 %v1907_v21  ;;  %1982 = vmatmul.mubr.bf16.vlgmr.msra.gmra.mxu1 %v1907_v21 }
 0x759   :  { %2059 = vmatpush1.bf16.msra.mxu0 %v4585_v27  ;;  %2100 = vmatpush1.bf16.msra.mxu1 %v4591_v63 }
 0x75a   :  { %2060 = vmatprep.subr.bf16.mxu0 %v4597_v4  ;;  %2101 = vmatprep.subr.bf16.mxu1 %v4603_v5 }
 0x75b   :  { %2090 = vmatprep.mubr.bf16.mxu0 %v5485_v39  ;;  %2131 = vmatprep.mubr.bf16.mxu1 %v5485_v39 }
 0x75d   :  { %2061 = vmatpush1.bf16.msra.mxu0 %v4611_v6  ;;  %2102 = vmatpush1.bf16.msra.mxu1 %v4617_v9 }
 0x75e   :  { %2062 = vmatprep.subr.bf16.mxu0 %v4623_v10  ;;  %2103 = vmatprep.subr.bf16.mxu1 %v4629_v19 }
 0x761   :  { %2063 = vmatpush1.bf16.msra.mxu0 %v4635_v23  ;;  %2104 = vmatpush1.bf16.msra.mxu1 %v4641_v28 }
 0x762   :  { %2064 = vmatprep.subr.bf16.mxu0 %v4647_v30  ;;  %2105 = vmatprep.subr.bf16.mxu1 %v4653_v32 }
 0x765   :  { %2065 = vmatpush1.bf16.msra.mxu0 %v4659_v34  ;;  %2106 = vmatpush1.bf16.msra.mxu1 %v4665_v40 }
 0x766   :  { %2066 = vmatprep.subr.bf16.mxu0 %v4671_v58  ;;  %2107 = vmatprep.subr.bf16.mxu1 %v4677_v11 }
 0x769   :  { %2067 = vmatpush1.bf16.msra.mxu0 %v4732_v57  ;;  %2108 = vmatpush1.bf16.msra.mxu1 %v4738_v31 }
 0x76a   :  { %2068 = vmatprep.subr.bf16.mxu0 %v4744_v41  ;;  %2109 = vmatprep.subr.bf16.mxu1 %v4750_v46 }
 0x76d   :  { %2069 = vmatpush1.bf16.msra.mxu0 %v4756_v47  ;;  %2110 = vmatpush1.bf16.msra.mxu1 %v4762_v48 }
 0x76e   :  { %2070 = vmatprep.subr.bf16.mxu0 %v4768_v49  ;;  %2111 = vmatprep.subr.bf16.mxu1 %v4774_v50 }
 0x771   :  { %2071 = vmatpush1.bf16.msra.mxu0 %v4780_v51  ;;  %2112 = vmatpush1.bf16.msra.mxu1 %v4786_v52 }
 0x772   :  { %2072 = vmatprep.subr.bf16.mxu0 %v4792_v53  ;;  %2113 = vmatprep.subr.bf16.mxu1 %v4798_v54 }
 0x775   :  { %2073 = vmatpush1.bf16.msra.mxu0 %v4804_v55  ;;  %2114 = vmatpush1.bf16.msra.mxu1 %v4810_v18 }
 0x776   :  { %2208 = vmatprep.subr.bf16.mxu0 %v4556_v61  ;;  %2249 = vmatprep.subr.bf16.mxu1 %v4562_v62 }
 0x818   :  { %v1942_v8 = vpop.f32.mrf.mxu0  ;;  %v1983_v1 = vpop.f32.mrf.mxu1 }
 0x81a   :  { %v1944_v7 = vpop.f32.mrf.mxu0  ;;  %v1985_v56 = vpop.f32.mrf.mxu1 }
 0x81b   :  { %v1994_v60 = vcombine.low %v1942_v8, %v1944_v7  ;;  %v1995_v0 = vcombine.low %v1983_v1, %v1985_v56 }
 0x81c   :  { %v1946_v14 = vpop.f32.mrf.mxu0  ;;  %v1987_v59 = vpop.f32.mrf.mxu1 }
 0x81d   :  { %v2002_v2 = vrot.slane %v1994_v60, %v4320_v26  ;;  %v2009_v3 = vrot.slane %v1995_v0, %v4320_v26 }
 0x81e   :  { %v1947_v37 = vpop.f32.mrf.mxu0  ;;  %v1988_v38 = vpop.f32.mrf.mxu1 }
 0x81f   :  { %v2010_v44 = vcombine.low %v2002_v2, %v2009_v3  ;;  %v3427_v3 = vunpack.i.h.bf16 %v4880_v45 }
 0x821   :  { %v2012_v15 = vadd.f32 %v2010_v44, %v5494_v17 }
 0x823   :  { %v3357_v12 = vmul.f32 -1.442695, %v2012_v15  ;;  %v2020_v22 = vrot.slane %v2012_v15, 2  ;;  %v2031_v35 = vrot.slane %v2012_v15, 6  ;;  %v2028_v24 = vrot.slane %v2012_v15, 4 }
 0x825   :  { %3656 = vpow2.f32 %v3357_v12  ;;  %v3358_v29 = vmul.f32 -1.442695, %v2020_v22  ;;  %v3359_v21 = vmul.f32 -1.442695, %v2031_v35 }
 0x827   :  { %3658 = vpow2.f32 %v3358_v29 }
 0x828   :  { %3660 = vpow2.f32 %v3359_v21 }
 0x832   :  { %v3657_v25 = vpop.eup %3656 }
 0x833   :  { %v2016_v16 = vadd.f32 1.0, %v3657_v25 }
 0x834   :  { %v3659_v8 = vpop.eup %3658 }
 0x835   :  { %3662 = vrcp.f32 %v2016_v16  ;;  %v2025_v1 = vadd.f32 1.0, %v3659_v8  ;;  %v3661_v7 = vpop.eup %3660 }
 0x836   :  { %3664 = vtanh.f32 %v2028_v24  ;;  %v2036_v60 = vadd.f32 1.0, %v3661_v7  ;;  %v5495_v7 = vld [vmem:[#allocation5_spill] sm:$0xff] }
 0x837   :  { %3666 = vrcp.f32 %v2025_v1 }
 0x838   :  { %3668 = vrcp.f32 %v2036_v60 }
 0x842   :  { %v3663_v56 = vpop.eup %3662 }
 0x843   :  { %v3665_v33 = vpop.eup %3664 }
 0x844   :  { %v3667_v42 = vpop.eup %3666  ;;  %v2040_v14 = vmul.f32 %v3665_v33, %v3663_v56 }
 0x845   :  { %v2039_v0 = vmul.f32 %v3667_v42, %v4877_v20  ;;  %v3669_v2 = vpop.eup %3668 }
 0x847   :  { %v4930_v59 = vadd.f32 %v2040_v14, %v2039_v0 }
 0x849   :  { %3670 = vtanh.f32 %v4930_v59 }
 0x856   :  { %v3671_v37 = vpop.eup %3670 }
 0x857   :  { %v2043_v38 = vmul.f32 %v3671_v37, %v3669_v2 }
 0x859   :  { %v2052_v44 = vmul.f32 %v3427_v3, %v2043_v38  ;;  %v2057_v17 = vpack.c.bf16 %v2043_v38, %v2043_v38 }
 0x85b   :  { %3361 = vst [vmem:[%s5456_s5 + $0xe] sm:$0x3] %v2052_v44  ;;  %2091 = vmatmul.mubr.bf16.vlgmr.msra.gmra.mxu0 %v2057_v17  ;;  %2132 = vmatmul.mubr.bf16.vlgmr.msra.gmra.mxu1 %v2057_v17 }
 0x85c   :  { %2209 = vmatpush1.bf16.msra.mxu0 %v4585_v27  ;;  %2250 = vmatpush1.bf16.msra.mxu1 %v4591_v63 }
 0x85d   :  { %2210 = vmatprep.subr.bf16.mxu0 %v4597_v4  ;;  %2251 = vmatprep.subr.bf16.mxu1 %v4603_v5 }
 0x85e   :  { %2240 = vmatprep.mubr.bf16.mxu0 %v5485_v39  ;;  %2281 = vmatprep.mubr.bf16.mxu1 %v5485_v39 }
 0x860   :  { %2211 = vmatpush1.bf16.msra.mxu0 %v4611_v6  ;;  %2252 = vmatpush1.bf16.msra.mxu1 %v4617_v9 }
 0x861   :  { %2212 = vmatprep.subr.bf16.mxu0 %v4623_v10  ;;  %2253 = vmatprep.subr.bf16.mxu1 %v4629_v19 }
 0x864   :  { %2213 = vmatpush1.bf16.msra.mxu0 %v4635_v23  ;;  %2254 = vmatpush1.bf16.msra.mxu1 %v4641_v28 }
 0x865   :  { %2214 = vmatprep.subr.bf16.mxu0 %v4647_v30  ;;  %2255 = vmatprep.subr.bf16.mxu1 %v4653_v32 }
 0x868   :  { %2215 = vmatpush1.bf16.msra.mxu0 %v4659_v34  ;;  %2256 = vmatpush1.bf16.msra.mxu1 %v4665_v40 }
 0x869   :  { %2216 = vmatprep.subr.bf16.mxu0 %v4671_v58  ;;  %2257 = vmatprep.subr.bf16.mxu1 %v4677_v11 }
 0x86c   :  { %2217 = vmatpush1.bf16.msra.mxu0 %v4732_v57  ;;  %2258 = vmatpush1.bf16.msra.mxu1 %v4738_v31 }
 0x86d   :  { %2218 = vmatprep.subr.bf16.mxu0 %v4744_v41  ;;  %2259 = vmatprep.subr.bf16.mxu1 %v4750_v46 }
 0x870   :  { %2219 = vmatpush1.bf16.msra.mxu0 %v4756_v47  ;;  %2260 = vmatpush1.bf16.msra.mxu1 %v4762_v48 }
 0x871   :  { %2220 = vmatprep.subr.bf16.mxu0 %v4768_v49  ;;  %2261 = vmatprep.subr.bf16.mxu1 %v4774_v50 }
 0x874   :  { %2221 = vmatpush1.bf16.msra.mxu0 %v4780_v51  ;;  %2262 = vmatpush1.bf16.msra.mxu1 %v4786_v52 }
 0x875   :  { %2222 = vmatprep.subr.bf16.mxu0 %v4792_v53  ;;  %2263 = vmatprep.subr.bf16.mxu1 %v4798_v54 }
 0x878   :  { %2223 = vmatpush1.bf16.msra.mxu0 %v4804_v55  ;;  %2264 = vmatpush1.bf16.msra.mxu1 %v4810_v18 }
 0x879   :  { %2358 = vmatprep.subr.bf16.mxu0 %v4556_v61  ;;  %2399 = vmatprep.subr.bf16.mxu1 %v4562_v62  ;;  %v5496_v61 = vcombine.low %v4367_v36, %v5495_v7 }
 0x91b   :  { %v2092_v20 = vpop.f32.mrf.mxu0  ;;  %v2133_v45 = vpop.f32.mrf.mxu1 }
 0x91d   :  { %v2094_v15 = vpop.f32.mrf.mxu0  ;;  %v2135_v12 = vpop.f32.mrf.mxu1 }
 0x91e   :  { %v2144_v22 = vcombine.low %v2092_v20, %v2094_v15  ;;  %v2145_v29 = vcombine.low %v2133_v45, %v2135_v12 }
 0x91f   :  { %v2096_v35 = vpop.f32.mrf.mxu0  ;;  %v2137_v21 = vpop.f32.mrf.mxu1 }
 0x920   :  { %v2152_v25 = vrot.slane %v2144_v22, %v4320_v26  ;;  %v2159_v24 = vrot.slane %v2145_v29, %v4320_v26  ;;  %v4980_v35 = vpop.permute.xlu0 %3429 }
 0x921   :  { %v2097_v16 = vpop.f32.mrf.mxu0  ;;  %v2138_v8 = vpop.f32.mrf.mxu1 }
 0x922   :  { %v2160_v1 = vcombine.low %v2152_v25, %v2159_v24  ;;  %v3431_v25 = vunpack.i.l.bf16 %v4980_v35 }
 0x924   :  { %v2162_v56 = vadd.f32 %v2160_v1, %v5496_v61  ;;  %v5497_v61 = vcombine.high %v4367_v36, %v5495_v7 }
 0x926   :  { %v3362_v62 = vmul.f32 -1.442695, %v2162_v56  ;;  %v2170_v33 = vrot.slane %v2162_v56, 2  ;;  %v2181_v60 = vrot.slane %v2162_v56, 6  ;;  %v2178_v2 = vrot.slane %v2162_v56, 4 }
 0x928   :  { %3672 = vpow2.f32 %v3362_v62  ;;  %v3363_v42 = vmul.f32 -1.442695, %v2170_v33  ;;  %v3364_v0 = vmul.f32 -1.442695, %v2181_v60 }
 0x92a   :  { %3674 = vpow2.f32 %v3363_v42 }
 0x92b   :  { %3676 = vpow2.f32 %v3364_v0 }
 0x935   :  { %v3673_v14 = vpop.eup %3672 }
 0x936   :  { %v2166_v3 = vadd.f32 1.0, %v3673_v14 }
 0x937   :  { %v3675_v37 = vpop.eup %3674 }
 0x938   :  { %3678 = vrcp.f32 %v2166_v3  ;;  %v2175_v38 = vadd.f32 1.0, %v3675_v37  ;;  %v3677_v44 = vpop.eup %3676 }
 0x939   :  { %3680 = vtanh.f32 %v2178_v2  ;;  %v2186_v15 = vadd.f32 1.0, %v3677_v44 }
 0x93a   :  { %3682 = vrcp.f32 %v2175_v38 }
 0x93b   :  { %3684 = vrcp.f32 %v2186_v15 }
 0x945   :  { %v3679_v17 = vpop.eup %3678 }
 0x946   :  { %v3681_v20 = vpop.eup %3680 }
 0x947   :  { %v3683_v45 = vpop.eup %3682  ;;  %v2190_v22 = vmul.f32 %v3681_v20, %v3679_v17 }
 0x948   :  { %v2189_v12 = vmul.f32 %v3683_v45, %v4930_v59  ;;  %v3685_v21 = vpop.eup %3684 }
 0x94a   :  { %v4977_v29 = vadd.f32 %v2190_v22, %v2189_v12 }
 0x94c   :  { %3686 = vtanh.f32 %v4977_v29 }
 0x959   :  { %v3687_v24 = vpop.eup %3686 }
 0x95a   :  { %v2193_v16 = vmul.f32 %v3687_v24, %v3685_v21  ;;  %v3432_v21 = vunpack.i.h.bf16 %v4980_v35  ;;  %v5056_v35 = vld [vmem:[%s5453_s2 + $0xe8] ss:$16 sps:$4 sm:$0xff]  }
 0x95c   :  { %v2202_v8 = vmul.f32 %v3431_v25, %v2193_v16  ;;  %v2207_v1 = vpack.c.bf16 %v2193_v16, %v2193_v16 }
 0x95e   :  { %3366 = vst [vmem:[%s5456_s5 + $0x10] sm:$0x3] %v2202_v8  ;;  %2241 = vmatmul.mubr.bf16.vlgmr.msra.gmra.mxu0 %v2207_v1  ;;  %2282 = vmatmul.mubr.bf16.vlgmr.msra.gmra.mxu1 %v2207_v1  ;;  %v5062_v1 = vld [vmem:[%s5453_s2 + $0xc4] ss:$16 sps:$4 sm:$0xff]  }
 0x95f   :  { %2359 = vmatpush1.bf16.msra.mxu0 %v4585_v27  ;;  %2400 = vmatpush1.bf16.msra.mxu1 %v4591_v63  ;;  %v5021_v27 = vld [vmem:[%s5453_s2 + $0xe4] ss:$16 sps:$4 sm:$0xff]   ;;  %v5027_v63 = vld [vmem:[%s5453_s2 + $0xec] ss:$16 sps:$4 sm:$0xff]  }
 0x960   :  { %2360 = vmatprep.subr.bf16.mxu0 %v4597_v4  ;;  %2401 = vmatprep.subr.bf16.mxu1 %v4603_v5  ;;  %v3375_v4 = vsel %vm2494_vm10, 1.0, %v5486_v43  ;;  %v3380_v5 = vsel %vm2644_vm11, 1.0, %v5486_v43 }
 0x961   :  { %2390 = vmatprep.mubr.bf16.mxu0 %v5485_v39  ;;  %2431 = vmatprep.mubr.bf16.mxu1 %v5485_v39 }
 0x963   :  { %2361 = vmatpush1.bf16.msra.mxu0 %v4611_v6  ;;  %2402 = vmatpush1.bf16.msra.mxu1 %v4617_v9  ;;  %v3433_v6 = vpack.i.bf16 %v3380_v5, %v3375_v4  ;;  %v5068_v4 = vld [vmem:[%s5453_s2 + $0xcc] ss:$16 sps:$4 sm:$0xff]   ;;  %v5076_v5 = vld [vmem:[%s5453_s2 + $0xc0] ss:$16 sps:$4 sm:$0xff]  }
 0x964   :  { %2362 = vmatprep.subr.bf16.mxu0 %v4623_v10  ;;  %2403 = vmatprep.subr.bf16.mxu1 %v4629_v19 }
 0x965   :  { %3434 = vperm.xlu1 %3417, %v3433_v6   ;;  %v5082_v6 = vld [vmem:[%s5453_s2 + $0xc8] ss:$16 sps:$4 sm:$0xff]  }
 0x967   :  { %2363 = vmatpush1.bf16.msra.mxu0 %v4635_v23  ;;  %2404 = vmatpush1.bf16.msra.mxu1 %v4641_v28 }
 0x968   :  { %2364 = vmatprep.subr.bf16.mxu0 %v4647_v30  ;;  %2405 = vmatprep.subr.bf16.mxu1 %v4653_v32 }
 0x96b   :  { %2365 = vmatpush1.bf16.msra.mxu0 %v4659_v34  ;;  %2406 = vmatpush1.bf16.msra.mxu1 %v4665_v40 }
 0x96c   :  { %2366 = vmatprep.subr.bf16.mxu0 %v4671_v58  ;;  %2407 = vmatprep.subr.bf16.mxu1 %v4677_v11 }
 0x96f   :  { %2367 = vmatpush1.bf16.msra.mxu0 %v4732_v57  ;;  %2408 = vmatpush1.bf16.msra.mxu1 %v4738_v31 }
 0x970   :  { %2368 = vmatprep.subr.bf16.mxu0 %v4744_v41  ;;  %2409 = vmatprep.subr.bf16.mxu1 %v4750_v46 }
 0x973   :  { %2369 = vmatpush1.bf16.msra.mxu0 %v4756_v47  ;;  %2410 = vmatpush1.bf16.msra.mxu1 %v4762_v48 }
 0x974   :  { %2370 = vmatprep.subr.bf16.mxu0 %v4768_v49  ;;  %2411 = vmatprep.subr.bf16.mxu1 %v4774_v50 }
 0x977   :  { %2371 = vmatpush1.bf16.msra.mxu0 %v4780_v51  ;;  %2412 = vmatpush1.bf16.msra.mxu1 %v4786_v52 }
 0x978   :  { %2372 = vmatprep.subr.bf16.mxu0 %v4792_v53  ;;  %2413 = vmatprep.subr.bf16.mxu1 %v4798_v54 }
 0x97b   :  { %2373 = vmatpush1.bf16.msra.mxu0 %v4804_v55  ;;  %2414 = vmatpush1.bf16.msra.mxu1 %v4810_v18 }
 0x97c   :  { %2508 = vmatprep.subr.bf16.mxu0 %v5021_v27  ;;  %2549 = vmatprep.subr.bf16.mxu1 %v5027_v63 }
 0xa1e   :  { %v2242_v9 = vpop.f32.mrf.mxu0  ;;  %v2283_v10 = vpop.f32.mrf.mxu1 }
 0xa20   :  { %v2244_v19 = vpop.f32.mrf.mxu0  ;;  %v2285_v23 = vpop.f32.mrf.mxu1 }
 0xa21   :  { %v2294_v28 = vcombine.low %v2242_v9, %v2244_v19  ;;  %v2295_v30 = vcombine.low %v2283_v10, %v2285_v23  ;;  %v5088_v9 = vld [vmem:[%s5453_s2 + $0xa4] ss:$16 sps:$4 sm:$0xff]   ;;  %v5094_v10 = vld [vmem:[%s5453_s2 + $0xac] ss:$16 sps:$4 sm:$0xff]   ;;  %v5100_v19 = vld [vmem:[%s5453_s2 + $0xa0] ss:$16 sps:$4 sm:$0xff]  }
 0xa22   :  { %v2246_v32 = vpop.f32.mrf.mxu0  ;;  %v2287_v34 = vpop.f32.mrf.mxu1  ;;  %v5106_v23 = vld [vmem:[%s5453_s2 + $0xa8] ss:$16 sps:$4 sm:$0xff]  }
 0xa23   :  { %v2302_v40 = vrot.slane %v2294_v28, %v4320_v26  ;;  %v2309_v58 = vrot.slane %v2295_v30, %v4320_v26  ;;  %v5112_v28 = vld [vmem:[%s5453_s2 + $0x84] ss:$16 sps:$4 sm:$0xff]   ;;  %v5118_v30 = vld [vmem:[%s5453_s2 + $0x8c] ss:$16 sps:$4 sm:$0xff]   ;;  %v5124_v32 = vld [vmem:[%s5453_s2 + $0x80] ss:$16 sps:$4 sm:$0xff]  }
 0xa24   :  { %v2247_v11 = vpop.f32.mrf.mxu0  ;;  %v2288_v13 = vpop.f32.mrf.mxu1  ;;  %v5130_v34 = vld [vmem:[%s5453_s2 + $0x88] ss:$16 sps:$4 sm:$0xff]  }
 0xa25   :  { %v2310_v59 = vcombine.low %v2302_v40, %v2309_v58  ;;  %v5136_v40 = vld [vmem:[%s5453_s2 + $0x64] ss:$16 sps:$4 sm:$0xff]   ;;  %v5142_v58 = vld [vmem:[%s5453_s2 + $0x6c] ss:$16 sps:$4 sm:$0xff]  }
 0xa26   :  { %v5499_v11 = vld [vmem:[#allocation6_spill] sm:$0xff] }
 0xa27   :  { %v2312_v56 = vadd.f32 %v2310_v59, %v5497_v61 }
 0xa29   :  { %v3367_v62 = vmul.f32 -1.442695, %v2312_v56  ;;  %v2320_v33 = vrot.slane %v2312_v56, 2  ;;  %v2331_v60 = vrot.slane %v2312_v56, 6  ;;  %v2328_v2 = vrot.slane %v2312_v56, 4 }
 0xa2b   :  { %3688 = vpow2.f32 %v3367_v62  ;;  %v3368_v42 = vmul.f32 -1.442695, %v2320_v33  ;;  %v3369_v0 = vmul.f32 -1.442695, %v2331_v60 }
 0xa2d   :  { %3690 = vpow2.f32 %v3368_v42 }
 0xa2e   :  { %3692 = vpow2.f32 %v3369_v0 }
 0xa38   :  { %v3689_v14 = vpop.eup %3688 }
 0xa39   :  { %v2316_v3 = vadd.f32 1.0, %v3689_v14 }
 0xa3a   :  { %v3691_v37 = vpop.eup %3690 }
 0xa3b   :  { %3694 = vrcp.f32 %v2316_v3  ;;  %v2325_v38 = vadd.f32 1.0, %v3691_v37  ;;  %v3693_v44 = vpop.eup %3692 }
 0xa3c   :  { %3696 = vtanh.f32 %v2328_v2  ;;  %v2336_v20 = vadd.f32 1.0, %v3693_v44 }
 0xa3d   :  { %3698 = vrcp.f32 %v2325_v38 }
 0xa3e   :  { %3700 = vrcp.f32 %v2336_v20 }
 0xa48   :  { %v3695_v17 = vpop.eup %3694 }
 0xa49   :  { %v3697_v36 = vpop.eup %3696 }
 0xa4a   :  { %v3699_v7 = vpop.eup %3698  ;;  %v2340_v15 = vmul.f32 %v3697_v36, %v3695_v17 }
 0xa4b   :  { %v2339_v45 = vmul.f32 %v3699_v7, %v4977_v29  ;;  %v3701_v22 = vpop.eup %3700  ;;  %v5050_v29 = vld [vmem:[%s5453_s2 + $0xe0] ss:$16 sps:$4 sm:$0xff]  }
 0xa4d   :  { %v5040_v12 = vadd.f32 %v2340_v15, %v2339_v45  ;;  %v5170_v15 = vpop.permute.xlu1 %3434 }
 0xa4f   :  { %3702 = vtanh.f32 %v5040_v12 }
 0xa5c   :  { %v3703_v25 = vpop.eup %3702 }
 0xa5d   :  { %v2343_v24 = vmul.f32 %v3703_v25, %v3701_v22 }
 0xa5f   :  { %v2352_v16 = vmul.f32 %v3432_v21, %v2343_v24  ;;  %v2357_v8 = vpack.c.bf16 %v2343_v24, %v2343_v24  ;;  %v3436_v21 = vunpack.i.l.bf16 %v5170_v15 }
 0xa61   :  { %3371 = vst [vmem:[%s5456_s5 + $0x12] sm:$0x3] %v2352_v16  ;;  %2391 = vmatmul.mubr.bf16.vlgmr.msra.gmra.mxu0 %v2357_v8  ;;  %2432 = vmatmul.mubr.bf16.vlgmr.msra.gmra.mxu1 %v2357_v8 }
 0xa62   :  { %2509 = vmatpush1.bf16.msra.mxu0 %v5050_v29  ;;  %2550 = vmatpush1.bf16.msra.mxu1 %v5056_v35 }
 0xa63   :  { %2510 = vmatprep.subr.bf16.mxu0 %v5062_v1  ;;  %2551 = vmatprep.subr.bf16.mxu1 %v5068_v4 }
 0xa64   :  { %2540 = vmatprep.mubr.bf16.mxu0 %v5485_v39  ;;  %2581 = vmatprep.mubr.bf16.mxu1 %v5485_v39 }
 0xa66   :  { %2511 = vmatpush1.bf16.msra.mxu0 %v5076_v5  ;;  %2552 = vmatpush1.bf16.msra.mxu1 %v5082_v6 }
 0xa67   :  { %2512 = vmatprep.subr.bf16.mxu0 %v5088_v9  ;;  %2553 = vmatprep.subr.bf16.mxu1 %v5094_v10 }
 0xa6a   :  { %2513 = vmatpush1.bf16.msra.mxu0 %v5100_v19  ;;  %2554 = vmatpush1.bf16.msra.mxu1 %v5106_v23 }
 0xa6b   :  { %2514 = vmatprep.subr.bf16.mxu0 %v5112_v28  ;;  %2555 = vmatprep.subr.bf16.mxu1 %v5118_v30 }
 0xa6e   :  { %2515 = vmatpush1.bf16.msra.mxu0 %v5124_v32  ;;  %2556 = vmatpush1.bf16.msra.mxu1 %v5130_v34 }
 0xa6f   :  { %2516 = vmatprep.subr.bf16.mxu0 %v5136_v40  ;;  %2557 = vmatprep.subr.bf16.mxu1 %v5142_v58 }
 0xa72   :  { %2517 = vmatpush1.bf16.msra.mxu0 %v4732_v57  ;;  %2558 = vmatpush1.bf16.msra.mxu1 %v4738_v31 }
 0xa73   :  { %2518 = vmatprep.subr.bf16.mxu0 %v4744_v41  ;;  %2559 = vmatprep.subr.bf16.mxu1 %v4750_v46 }
 0xa76   :  { %2519 = vmatpush1.bf16.msra.mxu0 %v4756_v47  ;;  %2560 = vmatpush1.bf16.msra.mxu1 %v4762_v48 }
 0xa77   :  { %2520 = vmatprep.subr.bf16.mxu0 %v4768_v49  ;;  %2561 = vmatprep.subr.bf16.mxu1 %v4774_v50 }
 0xa7a   :  { %2521 = vmatpush1.bf16.msra.mxu0 %v4780_v51  ;;  %2562 = vmatpush1.bf16.msra.mxu1 %v4786_v52 }
 0xa7b   :  { %2522 = vmatprep.subr.bf16.mxu0 %v4792_v53  ;;  %2563 = vmatprep.subr.bf16.mxu1 %v4798_v54 }
 0xa7e   :  { %2523 = vmatpush1.bf16.msra.mxu0 %v4804_v55  ;;  %2564 = vmatpush1.bf16.msra.mxu1 %v4810_v18  ;;  %v5498_v18 = vld [vmem:[#allocation4_spill] sm:$0xff] }
 0xa7f   :  { %2658 = vmatprep.subr.bf16.mxu0 %v5021_v27  ;;  %2699 = vmatprep.subr.bf16.mxu1 %v5027_v63  ;;  %v5500_v13 = vcombine.low %v5498_v18, %v5499_v11 }
 0xb21   :  { %v2392_v57 = vpop.f32.mrf.mxu0  ;;  %v2433_v31 = vpop.f32.mrf.mxu1 }
 0xb23   :  { %v2394_v41 = vpop.f32.mrf.mxu0  ;;  %v2435_v46 = vpop.f32.mrf.mxu1 }
 0xb24   :  { %v2444_v47 = vcombine.low %v2392_v57, %v2394_v41  ;;  %v2445_v48 = vcombine.low %v2433_v31, %v2435_v46  ;;  %v5203_v57 = vld [vmem:[%s5453_s2 + $0x68] ss:$16 sps:$4 sm:$0xff]   ;;  %v5209_v31 = vld [vmem:[%s5453_s2 + $0x44] ss:$16 sps:$4 sm:$0xff]   ;;  %v5215_v41 = vld [vmem:[%s5453_s2 + $0x4c] ss:$16 sps:$4 sm:$0xff]  }
 0xb25   :  { %v2396_v49 = vpop.f32.mrf.mxu0  ;;  %v2437_v50 = vpop.f32.mrf.mxu1  ;;  %v5221_v46 = vld [vmem:[%s5453_s2 + $0x40] ss:$16 sps:$4 sm:$0xff]  }
 0xb26   :  { %v2452_v51 = vrot.slane %v2444_v47, %v4320_v26  ;;  %v2459_v52 = vrot.slane %v2445_v48, %v4320_v26  ;;  %v5227_v47 = vld [vmem:[%s5453_s2 + $0x48] ss:$16 sps:$4 sm:$0xff]   ;;  %v5233_v48 = vld [vmem:[%s5453_s2 + $0x24] ss:$16 sps:$4 sm:$0xff]   ;;  %v5239_v49 = vld [vmem:[%s5453_s2 + $0x2c] ss:$16 sps:$4 sm:$0xff]  }
 0xb27   :  { %v2397_v53 = vpop.f32.mrf.mxu0  ;;  %v2438_v54 = vpop.f32.mrf.mxu1  ;;  %v5245_v50 = vld [vmem:[%s5453_s2 + $0x20] ss:$16 sps:$4 sm:$0xff]  }
 0xb28   :  { %v2460_v55 = vcombine.low %v2452_v51, %v2459_v52  ;;  %v5251_v51 = vld [vmem:[%s5453_s2 + $0x28] ss:$16 sps:$4 sm:$0xff]   ;;  %v5257_v52 = vld [vmem:[%s5453_s2 + $0x4] ss:$16 sps:$4 sm:$0xff]   ;;  %v5263_v53 = vld [vmem:[%s5453_s2 + $0xc] ss:$16 sps:$4 sm:$0xff]  }
 0xb29   :  { %v5269_v54 = vld [vmem:[%s5453_s2] ss:$16 sps:$4 sm:$0xff]  }
 0xb2a   :  { %v2462_v59 = vadd.f32 %v2460_v55, %v5500_v13  ;;  %v5275_v55 = vld [vmem:[%s5453_s2 + $0x8] ss:$16 sps:$4 sm:$0xff]   ;;  %v5283_v13 = vld [vmem:[%s5454_s4] sm:$0x3] }
 0xb2b   :  { %vm2794_vm12 = vcmp.gt.s32.totalorder %v5283_v13, 12  ;;  %vm2944_vm13 = vcmp.gt.s32.totalorder %v5283_v13, 13  ;;  %vm3094_vm14 = vcmp.gt.s32.totalorder %v5283_v13, 14  ;;  %vm3244_vm15 = vcmp.gt.s32.totalorder %v5283_v13, 15 }
 0xb2c   :  { %v3372_v61 = vmul.f32 -1.442695, %v2462_v59  ;;  %v2470_v56 = vrot.slane %v2462_v59, 2  ;;  %v2481_v33 = vrot.slane %v2462_v59, 6  ;;  %v2478_v0 = vrot.slane %v2462_v59, 4 }
 0xb2d   :  { %v3385_v59 = vsel %vm2794_vm12, 1.0, %v5486_v43 }
 0xb2e   :  { %3704 = vpow2.f32 %v3372_v61  ;;  %v3373_v62 = vmul.f32 -1.442695, %v2470_v56  ;;  %v3374_v42 = vmul.f32 -1.442695, %v2481_v33  ;;  %v3390_v61 = vsel %vm2944_vm13, 1.0, %v5486_v43 }
 0xb2f   :  { %v3438_v56 = vpack.i.bf16 %v3390_v61, %v3385_v59 }
 0xb30   :  { %3706 = vpow2.f32 %v3373_v62 }
 0xb31   :  { %3708 = vpow2.f32 %v3374_v42  ;;  %3439 = vperm.xlu0 %3406, %v3438_v56  }
 0xb3b   :  { %v3705_v60 = vpop.eup %3704 }
 0xb3c   :  { %v2466_v14 = vadd.f32 1.0, %v3705_v60 }
 0xb3d   :  { %v3707_v2 = vpop.eup %3706 }
 0xb3e   :  { %3710 = vrcp.f32 %v2466_v14  ;;  %v2475_v3 = vadd.f32 1.0, %v3707_v2  ;;  %v3709_v37 = vpop.eup %3708 }
 0xb3f   :  { %3712 = vtanh.f32 %v2478_v0  ;;  %v2486_v36 = vadd.f32 1.0, %v3709_v37 }
 0xb40   :  { %3714 = vrcp.f32 %v2475_v3 }
 0xb41   :  { %3716 = vrcp.f32 %v2486_v36 }
 0xb4b   :  { %v3711_v38 = vpop.eup %3710 }
 0xb4c   :  { %v3713_v44 = vpop.eup %3712 }
 0xb4d   :  { %v3715_v17 = vpop.eup %3714  ;;  %v2490_v20 = vmul.f32 %v3713_v44, %v3711_v38 }
 0xb4e   :  { %v2489_v7 = vmul.f32 %v3715_v17, %v5040_v12  ;;  %v3717_v22 = vpop.eup %3716  ;;  %v5197_v12 = vld [vmem:[%s5453_s2 + $0x60] ss:$16 sps:$4 sm:$0xff]  }
 0xb50   :  { %v5167_v45 = vadd.f32 %v2490_v20, %v2489_v7  ;;  %v5501_v7 = vcombine.high %v5498_v18, %v5499_v11 }
 0xb52   :  { %3718 = vtanh.f32 %v5167_v45 }
 0xb5f   :  { %v3719_v25 = vpop.eup %3718 }
 0xb60   :  { %v2493_v24 = vmul.f32 %v3719_v25, %v3717_v22 }
 0xb62   :  { %v2502_v16 = vmul.f32 %v3436_v21, %v2493_v24  ;;  %v2507_v8 = vpack.c.bf16 %v2493_v24, %v2493_v24 }
 0xb64   :  { %3376 = vst [vmem:[%s5456_s5 + $0x14] sm:$0x3] %v2502_v16  ;;  %2541 = vmatmul.mubr.bf16.vlgmr.msra.gmra.mxu0 %v2507_v8  ;;  %2582 = vmatmul.mubr.bf16.vlgmr.msra.gmra.mxu1 %v2507_v8 }
 0xb65   :  { %2659 = vmatpush1.bf16.msra.mxu0 %v5050_v29  ;;  %2700 = vmatpush1.bf16.msra.mxu1 %v5056_v35 }
 0xb66   :  { %2660 = vmatprep.subr.bf16.mxu0 %v5062_v1  ;;  %2701 = vmatprep.subr.bf16.mxu1 %v5068_v4 }
 0xb67   :  { %2690 = vmatprep.mubr.bf16.mxu0 %v5485_v39  ;;  %2731 = vmatprep.mubr.bf16.mxu1 %v5485_v39 }
 0xb69   :  { %2661 = vmatpush1.bf16.msra.mxu0 %v5076_v5  ;;  %2702 = vmatpush1.bf16.msra.mxu1 %v5082_v6 }
 0xb6a   :  { %2662 = vmatprep.subr.bf16.mxu0 %v5088_v9  ;;  %2703 = vmatprep.subr.bf16.mxu1 %v5094_v10 }
 0xb6d   :  { %2663 = vmatpush1.bf16.msra.mxu0 %v5100_v19  ;;  %2704 = vmatpush1.bf16.msra.mxu1 %v5106_v23 }
 0xb6e   :  { %2664 = vmatprep.subr.bf16.mxu0 %v5112_v28  ;;  %2705 = vmatprep.subr.bf16.mxu1 %v5118_v30 }
 0xb71   :  { %2665 = vmatpush1.bf16.msra.mxu0 %v5124_v32  ;;  %2706 = vmatpush1.bf16.msra.mxu1 %v5130_v34 }
 0xb72   :  { %2666 = vmatprep.subr.bf16.mxu0 %v5136_v40  ;;  %2707 = vmatprep.subr.bf16.mxu1 %v5142_v58 }
 0xb75   :  { %2667 = vmatpush1.bf16.msra.mxu0 %v5197_v12  ;;  %2708 = vmatpush1.bf16.msra.mxu1 %v5203_v57 }
 0xb76   :  { %2668 = vmatprep.subr.bf16.mxu0 %v5209_v31  ;;  %2709 = vmatprep.subr.bf16.mxu1 %v5215_v41 }
 0xb79   :  { %2669 = vmatpush1.bf16.msra.mxu0 %v5221_v46  ;;  %2710 = vmatpush1.bf16.msra.mxu1 %v5227_v47 }
 0xb7a   :  { %2670 = vmatprep.subr.bf16.mxu0 %v5233_v48  ;;  %2711 = vmatprep.subr.bf16.mxu1 %v5239_v49 }
 0xb7d   :  { %2671 = vmatpush1.bf16.msra.mxu0 %v5245_v50  ;;  %2712 = vmatpush1.bf16.msra.mxu1 %v5251_v51 }
 0xb7e   :  { %2672 = vmatprep.subr.bf16.mxu0 %v5257_v52  ;;  %2713 = vmatprep.subr.bf16.mxu1 %v5263_v53 }
 0xb81   :  { %2673 = vmatpush1.bf16.msra.mxu0 %v5269_v54  ;;  %2714 = vmatpush1.bf16.msra.mxu1 %v5275_v55 }
 0xb82   :  { %2808 = vmatprep.subr.bf16.mxu0 %v5021_v27  ;;  %2849 = vmatprep.subr.bf16.mxu1 %v5027_v63 }
 0xc24   :  { %v2542_v62 = vpop.f32.mrf.mxu0  ;;  %v2583_v33 = vpop.f32.mrf.mxu1 }
 0xc26   :  { %v2544_v42 = vpop.f32.mrf.mxu0  ;;  %v2585_v60 = vpop.f32.mrf.mxu1 }
 0xc27   :  { %v2594_v0 = vcombine.low %v2542_v62, %v2544_v42  ;;  %v2595_v14 = vcombine.low %v2583_v33, %v2585_v60 }
 0xc28   :  { %v2546_v2 = vpop.f32.mrf.mxu0  ;;  %v2587_v3 = vpop.f32.mrf.mxu1 }
 0xc29   :  { %v2602_v37 = vrot.slane %v2594_v0, %v4320_v26  ;;  %v2609_v38 = vrot.slane %v2595_v14, %v4320_v26 }
 0xc2a   :  { %v2547_v44 = vpop.f32.mrf.mxu0  ;;  %v2588_v17 = vpop.f32.mrf.mxu1 }
 0xc2b   :  { %v2610_v36 = vcombine.low %v2602_v37, %v2609_v38  ;;  %v3437_v37 = vunpack.i.h.bf16 %v5170_v15 }
 0xc2d   :  { %v2612_v20 = vadd.f32 %v2610_v36, %v5501_v7 }
 0xc2f   :  { %v3377_v22 = vmul.f32 -1.442695, %v2612_v20  ;;  %v2620_v21 = vrot.slane %v2612_v20, 2  ;;  %v2631_v24 = vrot.slane %v2612_v20, 6  ;;  %v2628_v59 = vrot.slane %v2612_v20, 4 }
 0xc31   :  { %3720 = vpow2.f32 %v3377_v22  ;;  %v3378_v25 = vmul.f32 -1.442695, %v2620_v21  ;;  %v3379_v16 = vmul.f32 -1.442695, %v2631_v24 }
 0xc33   :  { %3722 = vpow2.f32 %v3378_v25 }
 0xc34   :  { %3724 = vpow2.f32 %v3379_v16 }
 0xc3e   :  { %v3721_v8 = vpop.eup %3720 }
 0xc3f   :  { %v2616_v61 = vadd.f32 1.0, %v3721_v8 }
 0xc40   :  { %v3723_v56 = vpop.eup %3722 }
 0xc41   :  { %3726 = vrcp.f32 %v2616_v61  ;;  %v2625_v62 = vadd.f32 1.0, %v3723_v56  ;;  %v3725_v33 = vpop.eup %3724 }
 0xc42   :  { %3728 = vtanh.f32 %v2628_v59  ;;  %v2636_v60 = vadd.f32 1.0, %v3725_v33  ;;  %v5503_v33 = vld [vmem:[#allocation9_spill] sm:$0xff] }
 0xc43   :  { %3730 = vrcp.f32 %v2625_v62  ;;  %v5502_v62 = vld [vmem:[#allocation7_spill] sm:$0xff] }
 0xc44   :  { %3732 = vrcp.f32 %v2636_v60 }
 0xc4e   :  { %v3727_v42 = vpop.eup %3726 }
 0xc4f   :  { %v3729_v18 = vpop.eup %3728 }
 0xc50   :  { %v3731_v11 = vpop.eup %3730  ;;  %v2640_v14 = vmul.f32 %v3729_v18, %v3727_v42  ;;  %v5504_v42 = vcombine.low %v5502_v62, %v5503_v33 }
 0xc51   :  { %v2639_v0 = vmul.f32 %v3731_v11, %v5167_v45  ;;  %v3733_v3 = vpop.eup %3732 }
 0xc53   :  { %v5295_v2 = vadd.f32 %v2640_v14, %v2639_v0 }
 0xc55   :  { %3734 = vtanh.f32 %v5295_v2 }
 0xc62   :  { %v3735_v38 = vpop.eup %3734 }
 0xc63   :  { %v2643_v44 = vmul.f32 %v3735_v38, %v3733_v3 }
 0xc65   :  { %v2652_v17 = vmul.f32 %v3437_v37, %v2643_v44  ;;  %v2657_v36 = vpack.c.bf16 %v2643_v44, %v2643_v44 }
 0xc67   :  { %3381 = vst [vmem:[%s5456_s5 + $0x16] sm:$0x3] %v2652_v17  ;;  %2691 = vmatmul.mubr.bf16.vlgmr.msra.gmra.mxu0 %v2657_v36  ;;  %2732 = vmatmul.mubr.bf16.vlgmr.msra.gmra.mxu1 %v2657_v36 }
 0xc68   :  { %2809 = vmatpush1.bf16.msra.mxu0 %v5050_v29  ;;  %2850 = vmatpush1.bf16.msra.mxu1 %v5056_v35 }
 0xc69   :  { %2810 = vmatprep.subr.bf16.mxu0 %v5062_v1  ;;  %2851 = vmatprep.subr.bf16.mxu1 %v5068_v4 }
 0xc6a   :  { %2840 = vmatprep.mubr.bf16.mxu0 %v5485_v39  ;;  %2881 = vmatprep.mubr.bf16.mxu1 %v5485_v39 }
 0xc6c   :  { %2811 = vmatpush1.bf16.msra.mxu0 %v5076_v5  ;;  %2852 = vmatpush1.bf16.msra.mxu1 %v5082_v6 }
 0xc6d   :  { %2812 = vmatprep.subr.bf16.mxu0 %v5088_v9  ;;  %2853 = vmatprep.subr.bf16.mxu1 %v5094_v10 }
 0xc70   :  { %2813 = vmatpush1.bf16.msra.mxu0 %v5100_v19  ;;  %2854 = vmatpush1.bf16.msra.mxu1 %v5106_v23 }
 0xc71   :  { %2814 = vmatprep.subr.bf16.mxu0 %v5112_v28  ;;  %2855 = vmatprep.subr.bf16.mxu1 %v5118_v30 }
 0xc74   :  { %2815 = vmatpush1.bf16.msra.mxu0 %v5124_v32  ;;  %2856 = vmatpush1.bf16.msra.mxu1 %v5130_v34 }
 0xc75   :  { %2816 = vmatprep.subr.bf16.mxu0 %v5136_v40  ;;  %2857 = vmatprep.subr.bf16.mxu1 %v5142_v58 }
 0xc78   :  { %2817 = vmatpush1.bf16.msra.mxu0 %v5197_v12  ;;  %2858 = vmatpush1.bf16.msra.mxu1 %v5203_v57 }
 0xc79   :  { %2818 = vmatprep.subr.bf16.mxu0 %v5209_v31  ;;  %2859 = vmatprep.subr.bf16.mxu1 %v5215_v41 }
 0xc7c   :  { %2819 = vmatpush1.bf16.msra.mxu0 %v5221_v46  ;;  %2860 = vmatpush1.bf16.msra.mxu1 %v5227_v47 }
 0xc7d   :  { %2820 = vmatprep.subr.bf16.mxu0 %v5233_v48  ;;  %2861 = vmatprep.subr.bf16.mxu1 %v5239_v49 }
 0xc80   :  { %2821 = vmatpush1.bf16.msra.mxu0 %v5245_v50  ;;  %2862 = vmatpush1.bf16.msra.mxu1 %v5251_v51 }
 0xc81   :  { %2822 = vmatprep.subr.bf16.mxu0 %v5257_v52  ;;  %2863 = vmatprep.subr.bf16.mxu1 %v5263_v53 }
 0xc84   :  { %2823 = vmatpush1.bf16.msra.mxu0 %v5269_v54  ;;  %2864 = vmatpush1.bf16.msra.mxu1 %v5275_v55 }
 0xc85   :  { %2958 = vmatprep.subr.bf16.mxu0 %v5021_v27  ;;  %2999 = vmatprep.subr.bf16.mxu1 %v5027_v63 }
 0xd27   :  { %v2692_v45 = vpop.f32.mrf.mxu0  ;;  %v2733_v15 = vpop.f32.mrf.mxu1 }
 0xd29   :  { %v2694_v7 = vpop.f32.mrf.mxu0  ;;  %v2735_v20 = vpop.f32.mrf.mxu1 }
 0xd2a   :  { %v2744_v22 = vcombine.low %v2692_v45, %v2694_v7  ;;  %v2745_v21 = vcombine.low %v2733_v15, %v2735_v20 }
 0xd2b   :  { %v2696_v25 = vpop.f32.mrf.mxu0  ;;  %v2737_v24 = vpop.f32.mrf.mxu1 }
 0xd2c   :  { %v2752_v16 = vrot.slane %v2744_v22, %v4320_v26  ;;  %v2759_v8 = vrot.slane %v2745_v21, %v4320_v26 }
 0xd2d   :  { %v2697_v59 = vpop.f32.mrf.mxu0  ;;  %v2738_v61 = vpop.f32.mrf.mxu1 }
 0xd2e   :  { %v2760_v56 = vcombine.low %v2752_v16, %v2759_v8  ;;  %v5345_v16 = vpop.permute.xlu0 %3439 }
 0xd2f   :  { %v3441_v59 = vunpack.i.l.bf16 %v5345_v16 }
 0xd30   :  { %v2762_v18 = vadd.f32 %v2760_v56, %v5504_v42 }
 0xd32   :  { %v3382_v11 = vmul.f32 -1.442695, %v2762_v18  ;;  %v2770_v60 = vrot.slane %v2762_v18, 2  ;;  %v2781_v14 = vrot.slane %v2762_v18, 6  ;;  %v2778_v38 = vrot.slane %v2762_v18, 4 }
 0xd34   :  { %3736 = vpow2.f32 %v3382_v11  ;;  %v3383_v0 = vmul.f32 -1.442695, %v2770_v60  ;;  %v3384_v3 = vmul.f32 -1.442695, %v2781_v14  ;;  %v3400_v11 = vsel %vm3244_vm15, 1.0, %v5486_v43 }
 0xd36   :  { %3738 = vpow2.f32 %v3383_v0 }
 0xd37   :  { %3740 = vpow2.f32 %v3384_v3 }
 0xd41   :  { %v3737_v37 = vpop.eup %3736 }
 0xd42   :  { %v2766_v44 = vadd.f32 1.0, %v3737_v37 }
 0xd43   :  { %v3739_v17 = vpop.eup %3738 }
 0xd44   :  { %3742 = vrcp.f32 %v2766_v44  ;;  %v2775_v36 = vadd.f32 1.0, %v3739_v17  ;;  %v3741_v45 = vpop.eup %3740 }
 0xd45   :  { %3744 = vtanh.f32 %v2778_v38  ;;  %v2786_v22 = vadd.f32 1.0, %v3741_v45 }
 0xd46   :  { %3746 = vrcp.f32 %v2775_v36 }
 0xd47   :  { %3748 = vrcp.f32 %v2786_v22 }
 0xd51   :  { %v3743_v15 = vpop.eup %3742 }
 0xd52   :  { %v3745_v7 = vpop.eup %3744 }
 0xd53   :  { %v3747_v20 = vpop.eup %3746  ;;  %v2790_v25 = vmul.f32 %v3745_v7, %v3743_v15 }
 0xd54   :  { %v2789_v21 = vmul.f32 %v3747_v20, %v5295_v2  ;;  %v3749_v8 = vpop.eup %3748  ;;  %v3395_v2 = vsel %vm3094_vm14, 1.0, %v5486_v43  ;;  %v5505_v43 = vcombine.high %v5502_v62, %v5503_v33 }
 0xd55   :  { %v3443_v60 = vpack.i.bf16 %v3400_v11, %v3395_v2 }
 0xd56   :  { %v5342_v24 = vadd.f32 %v2790_v25, %v2789_v21 }
 0xd57   :  { %3444 = vperm.xlu1 %3417, %v3443_v60  }
 0xd58   :  { %3750 = vtanh.f32 %v5342_v24 }
 0xd65   :  { %v3751_v61 = vpop.eup %3750 }
 0xd66   :  { %v2793_v56 = vmul.f32 %v3751_v61, %v3749_v8 }
 0xd68   :  { %v2802_v42 = vmul.f32 %v3441_v59, %v2793_v56  ;;  %v2807_v18 = vpack.c.bf16 %v2793_v56, %v2793_v56 }
 0xd6a   :  { %3386 = vst [vmem:[%s5456_s5 + $0x18] sm:$0x3] %v2802_v42  ;;  %2841 = vmatmul.mubr.bf16.vlgmr.msra.gmra.mxu0 %v2807_v18  ;;  %2882 = vmatmul.mubr.bf16.vlgmr.msra.gmra.mxu1 %v2807_v18 }
 0xd6b   :  { %2959 = vmatpush1.bf16.msra.mxu0 %v5050_v29  ;;  %3000 = vmatpush1.bf16.msra.mxu1 %v5056_v35 }
 0xd6c   :  { %2960 = vmatprep.subr.bf16.mxu0 %v5062_v1  ;;  %3001 = vmatprep.subr.bf16.mxu1 %v5068_v4 }
 0xd6d   :  { %2990 = vmatprep.mubr.bf16.mxu0 %v5485_v39  ;;  %3031 = vmatprep.mubr.bf16.mxu1 %v5485_v39 }
 0xd6f   :  { %2961 = vmatpush1.bf16.msra.mxu0 %v5076_v5  ;;  %3002 = vmatpush1.bf16.msra.mxu1 %v5082_v6 }
 0xd70   :  { %2962 = vmatprep.subr.bf16.mxu0 %v5088_v9  ;;  %3003 = vmatprep.subr.bf16.mxu1 %v5094_v10 }
 0xd73   :  { %2963 = vmatpush1.bf16.msra.mxu0 %v5100_v19  ;;  %3004 = vmatpush1.bf16.msra.mxu1 %v5106_v23 }
 0xd74   :  { %2964 = vmatprep.subr.bf16.mxu0 %v5112_v28  ;;  %3005 = vmatprep.subr.bf16.mxu1 %v5118_v30 }
 0xd77   :  { %2965 = vmatpush1.bf16.msra.mxu0 %v5124_v32  ;;  %3006 = vmatpush1.bf16.msra.mxu1 %v5130_v34 }
 0xd78   :  { %2966 = vmatprep.subr.bf16.mxu0 %v5136_v40  ;;  %3007 = vmatprep.subr.bf16.mxu1 %v5142_v58 }
 0xd7b   :  { %2967 = vmatpush1.bf16.msra.mxu0 %v5197_v12  ;;  %3008 = vmatpush1.bf16.msra.mxu1 %v5203_v57 }
 0xd7c   :  { %2968 = vmatprep.subr.bf16.mxu0 %v5209_v31  ;;  %3009 = vmatprep.subr.bf16.mxu1 %v5215_v41 }
 0xd7f   :  { %2969 = vmatpush1.bf16.msra.mxu0 %v5221_v46  ;;  %3010 = vmatpush1.bf16.msra.mxu1 %v5227_v47 }
 0xd80   :  { %2970 = vmatprep.subr.bf16.mxu0 %v5233_v48  ;;  %3011 = vmatprep.subr.bf16.mxu1 %v5239_v49 }
 0xd83   :  { %2971 = vmatpush1.bf16.msra.mxu0 %v5245_v50  ;;  %3012 = vmatpush1.bf16.msra.mxu1 %v5251_v51 }
 0xd84   :  { %2972 = vmatprep.subr.bf16.mxu0 %v5257_v52  ;;  %3013 = vmatprep.subr.bf16.mxu1 %v5263_v53 }
 0xd87   :  { %2973 = vmatpush1.bf16.msra.mxu0 %v5269_v54  ;;  %3014 = vmatpush1.bf16.msra.mxu1 %v5275_v55 }
 0xd88   :  { %3108 = vmatprep.subr.bf16.mxu0 %v5021_v27  ;;  %3149 = vmatprep.subr.bf16.mxu1 %v5027_v63 }
 0xe2a   :  { %v2842_v0 = vpop.f32.mrf.mxu0  ;;  %v2883_v14 = vpop.f32.mrf.mxu1 }
 0xe2c   :  { %v2844_v3 = vpop.f32.mrf.mxu0  ;;  %v2885_v37 = vpop.f32.mrf.mxu1 }
 0xe2d   :  { %v2894_v38 = vcombine.low %v2842_v0, %v2844_v3  ;;  %v2895_v44 = vcombine.low %v2883_v14, %v2885_v37 }
 0xe2e   :  { %v2846_v17 = vpop.f32.mrf.mxu0  ;;  %v2887_v27 = vpop.f32.mrf.mxu1 }
 0xe2f   :  { %v2902_v63 = vrot.slane %v2894_v38, %v4320_v26  ;;  %v2909_v36 = vrot.slane %v2895_v44, %v4320_v26  ;;  %v3442_v38 = vunpack.i.h.bf16 %v5345_v16 }
 0xe30   :  { %v2847_v45 = vpop.f32.mrf.mxu0  ;;  %v2888_v13 = vpop.f32.mrf.mxu1 }
 0xe31   :  { %v2910_v15 = vcombine.low %v2902_v63, %v2909_v36  ;;  %v3445_v13 = vpop.permute.xlu1 %3444 }
 0xe33   :  { %v2912_v7 = vadd.f32 %v2910_v15, %v5505_v43  ;;  %v3446_v43 = vunpack.i.l.bf16 %v3445_v13 }
 0xe35   :  { %v3387_v20 = vmul.f32 -1.442695, %v2912_v7  ;;  %v2920_v22 = vrot.slane %v2912_v7, 2  ;;  %v2931_v25 = vrot.slane %v2912_v7, 6  ;;  %v2928_v61 = vrot.slane %v2912_v7, 4 }
 0xe37   :  { %3752 = vpow2.f32 %v3387_v20  ;;  %v3388_v21 = vmul.f32 -1.442695, %v2920_v22  ;;  %v3389_v8 = vmul.f32 -1.442695, %v2931_v25 }
 0xe39   :  { %3754 = vpow2.f32 %v3388_v21 }
 0xe3a   :  { %3756 = vpow2.f32 %v3389_v8 }
 0xe44   :  { %v3753_v59 = vpop.eup %3752 }
 0xe45   :  { %v2916_v56 = vadd.f32 1.0, %v3753_v59 }
 0xe46   :  { %v3755_v42 = vpop.eup %3754 }
 0xe47   :  { %3758 = vrcp.f32 %v2916_v56  ;;  %v2925_v18 = vadd.f32 1.0, %v3755_v42  ;;  %v3757_v2 = vpop.eup %3756 }
 0xe48   :  { %3760 = vtanh.f32 %v2928_v61  ;;  %v2936_v60 = vadd.f32 1.0, %v3757_v2 }
 0xe49   :  { %3762 = vrcp.f32 %v2925_v18 }
 0xe4a   :  { %3764 = vrcp.f32 %v2936_v60 }
 0xe54   :  { %v3759_v11 = vpop.eup %3758 }
 0xe55   :  { %v3761_v62 = vpop.eup %3760 }
 0xe56   :  { %v3763_v33 = vpop.eup %3762  ;;  %v2940_v14 = vmul.f32 %v3761_v62, %v3759_v11 }
 0xe57   :  { %v2939_v0 = vmul.f32 %v3763_v33, %v5342_v24  ;;  %v3765_v37 = vpop.eup %3764 }
 0xe59   :  { %v5395_v3 = vadd.f32 %v2940_v14, %v2939_v0 }
 0xe5b   :  { %3766 = vtanh.f32 %v5395_v3 }
 0xe68   :  { %v3767_v44 = vpop.eup %3766 }
 0xe69   :  { %v2943_v17 = vmul.f32 %v3767_v44, %v3765_v37 }
 0xe6b   :  { %v2952_v27 = vmul.f32 %v3442_v38, %v2943_v17  ;;  %v2957_v63 = vpack.c.bf16 %v2943_v17, %v2943_v17 }
 0xe6d   :  { %3391 = vst [vmem:[%s5456_s5 + $0x1a] sm:$0x3] %v2952_v27  ;;  %2991 = vmatmul.mubr.bf16.vlgmr.msra.gmra.mxu0 %v2957_v63  ;;  %3032 = vmatmul.mubr.bf16.vlgmr.msra.gmra.mxu1 %v2957_v63 }
 0xe6e   :  { %3109 = vmatpush1.bf16.msra.mxu0 %v5050_v29  ;;  %3150 = vmatpush1.bf16.msra.mxu1 %v5056_v35 }
 0xe6f   :  { %3110 = vmatprep.subr.bf16.mxu0 %v5062_v1  ;;  %3151 = vmatprep.subr.bf16.mxu1 %v5068_v4 }
 0xe70   :  { %3140 = vmatprep.mubr.bf16.mxu0 %v5485_v39  ;;  %3181 = vmatprep.mubr.bf16.mxu1 %v5485_v39 }
 0xe72   :  { %3111 = vmatpush1.bf16.msra.mxu0 %v5076_v5  ;;  %3152 = vmatpush1.bf16.msra.mxu1 %v5082_v6 }
 0xe73   :  { %3112 = vmatprep.subr.bf16.mxu0 %v5088_v9  ;;  %3153 = vmatprep.subr.bf16.mxu1 %v5094_v10 }
 0xe76   :  { %3113 = vmatpush1.bf16.msra.mxu0 %v5100_v19  ;;  %3154 = vmatpush1.bf16.msra.mxu1 %v5106_v23 }
 0xe77   :  { %3114 = vmatprep.subr.bf16.mxu0 %v5112_v28  ;;  %3155 = vmatprep.subr.bf16.mxu1 %v5118_v30 }
 0xe7a   :  { %3115 = vmatpush1.bf16.msra.mxu0 %v5124_v32  ;;  %3156 = vmatpush1.bf16.msra.mxu1 %v5130_v34  ;;  %v5506_v32 = vld [vmem:[#allocation8_spill] sm:$0xff]  ;;  %v5507_v34 = vld [vmem:[#allocation10_spill] sm:$0xff] }
 0xe7b   :  { %3116 = vmatprep.subr.bf16.mxu0 %v5136_v40  ;;  %3157 = vmatprep.subr.bf16.mxu1 %v5142_v58  ;;  %v5508_v40 = vcombine.low %v5506_v32, %v5507_v34  ;;  %v5509_v14 = vcombine.high %v5506_v32, %v5507_v34  ;;  %v3447_v32 = vunpack.i.h.bf16 %v3445_v13 }
 0xe7e   :  { %3117 = vmatpush1.bf16.msra.mxu0 %v5197_v12  ;;  %3158 = vmatpush1.bf16.msra.mxu1 %v5203_v57 }
 0xe7f   :  { %3118 = vmatprep.subr.bf16.mxu0 %v5209_v31  ;;  %3159 = vmatprep.subr.bf16.mxu1 %v5215_v41 }
 0xe82   :  { %3119 = vmatpush1.bf16.msra.mxu0 %v5221_v46  ;;  %3160 = vmatpush1.bf16.msra.mxu1 %v5227_v47 }
 0xe83   :  { %3120 = vmatprep.subr.bf16.mxu0 %v5233_v48  ;;  %3161 = vmatprep.subr.bf16.mxu1 %v5239_v49 }
 0xe86   :  { %3121 = vmatpush1.bf16.msra.mxu0 %v5245_v50  ;;  %3162 = vmatpush1.bf16.msra.mxu1 %v5251_v51 }
 0xe87   :  { %3122 = vmatprep.subr.bf16.mxu0 %v5257_v52  ;;  %3163 = vmatprep.subr.bf16.mxu1 %v5263_v53 }
 0xe8a   :  { %3123 = vmatpush1.bf16.msra.mxu0 %v5269_v54  ;;  %3164 = vmatpush1.bf16.msra.mxu1 %v5275_v55 }
 0xf2d   :  { %v2992_v39 = vpop.f32.mrf.mxu0  ;;  %v3033_v29 = vpop.f32.mrf.mxu1 }
 0xf2f   :  { %v2994_v35 = vpop.f32.mrf.mxu0  ;;  %v3035_v1 = vpop.f32.mrf.mxu1 }
 0xf30   :  { %v3044_v4 = vcombine.low %v2992_v39, %v2994_v35  ;;  %v3045_v5 = vcombine.low %v3033_v29, %v3035_v1 }
 0xf31   :  { %v2996_v6 = vpop.f32.mrf.mxu0  ;;  %v3037_v9 = vpop.f32.mrf.mxu1 }
 0xf32   :  { %v3052_v10 = vrot.slane %v3044_v4, %v4320_v26  ;;  %v3059_v19 = vrot.slane %v3045_v5, %v4320_v26 }
 0xf33   :  { %v2997_v23 = vpop.f32.mrf.mxu0  ;;  %v3038_v28 = vpop.f32.mrf.mxu1 }
 0xf34   :  { %v3060_v30 = vcombine.low %v3052_v10, %v3059_v19 }
 0xf36   :  { %v3062_v58 = vadd.f32 %v3060_v30, %v5508_v40 }
 0xf38   :  { %v3392_v12 = vmul.f32 -1.442695, %v3062_v58  ;;  %v3070_v57 = vrot.slane %v3062_v58, 2  ;;  %v3081_v41 = vrot.slane %v3062_v58, 6  ;;  %v3078_v48 = vrot.slane %v3062_v58, 4 }
 0xf3a   :  { %3768 = vpow2.f32 %v3392_v12  ;;  %v3393_v31 = vmul.f32 -1.442695, %v3070_v57  ;;  %v3394_v46 = vmul.f32 -1.442695, %v3081_v41 }
 0xf3c   :  { %3770 = vpow2.f32 %v3393_v31 }
 0xf3d   :  { %3772 = vpow2.f32 %v3394_v46 }
 0xf47   :  { %v3769_v47 = vpop.eup %3768 }
 0xf48   :  { %v3066_v49 = vadd.f32 1.0, %v3769_v47 }
 0xf49   :  { %v3771_v50 = vpop.eup %3770 }
 0xf4a   :  { %3774 = vrcp.f32 %v3066_v49  ;;  %v3075_v51 = vadd.f32 1.0, %v3771_v50  ;;  %v3773_v52 = vpop.eup %3772 }
 0xf4b   :  { %3776 = vtanh.f32 %v3078_v48  ;;  %v3086_v24 = vadd.f32 1.0, %v3773_v52 }
 0xf4c   :  { %3778 = vrcp.f32 %v3075_v51 }
 0xf4d   :  { %3780 = vrcp.f32 %v3086_v24 }
 0xf57   :  { %v3775_v53 = vpop.eup %3774 }
 0xf58   :  { %v3777_v54 = vpop.eup %3776 }
 0xf59   :  { %v3779_v55 = vpop.eup %3778  ;;  %v3090_v36 = vmul.f32 %v3777_v54, %v3775_v53 }
 0xf5a   :  { %v3089_v16 = vmul.f32 %v3779_v55, %v5395_v3  ;;  %v3781_v15 = vpop.eup %3780 }
 0xf5c   :  { %v3091_v45 = vadd.f32 %v3090_v36, %v3089_v16 }
 0xf5e   :  { %3782 = vtanh.f32 %v3091_v45 }
 0xf6b   :  { %v3783_v7 = vpop.eup %3782 }
 0xf6c   :  { %v3093_v20 = vmul.f32 %v3783_v7, %v3781_v15 }
 0xf6e   :  { %v3102_v22 = vmul.f32 %v3446_v43, %v3093_v20  ;;  %v3107_v21 = vpack.c.bf16 %v3093_v20, %v3093_v20 }
 0xf70   :  { %3396 = vst [vmem:[%s5456_s5 + $0x1c] sm:$0x3] %v3102_v22  ;;  %3141 = vmatmul.mubr.bf16.vlgmr.msra.gmra.mxu0 %v3107_v21  ;;  %3182 = vmatmul.mubr.bf16.vlgmr.msra.gmra.mxu1 %v3107_v21 }
0x1030   :  { %v3142_v25 = vpop.f32.mrf.mxu0  ;;  %v3183_v8 = vpop.f32.mrf.mxu1 }
0x1032   :  { %v3144_v59 = vpop.f32.mrf.mxu0  ;;  %v3185_v61 = vpop.f32.mrf.mxu1 }
0x1033   :  { %v3194_v56 = vcombine.low %v3142_v25, %v3144_v59  ;;  %v3195_v42 = vcombine.low %v3183_v8, %v3185_v61 }
0x1034   :  { %v3146_v18 = vpop.f32.mrf.mxu0  ;;  %v3187_v2 = vpop.f32.mrf.mxu1 }
0x1035   :  { %v3202_v11 = vrot.slane %v3194_v56, %v4320_v26  ;;  %v3209_v62 = vrot.slane %v3195_v42, %v4320_v26 }
0x1036   :  { %v3147_v33 = vpop.f32.mrf.mxu0  ;;  %v3188_v60 = vpop.f32.mrf.mxu1 }
0x1037   :  { %v3210_v0 = vcombine.low %v3202_v11, %v3209_v62 }
0x1039   :  { %v3212_v3 = vadd.f32 %v3210_v0, %v5509_v14 }
0x103b   :  { %v3397_v37 = vmul.f32 -1.442695, %v3212_v3  ;;  %v3220_v38 = vrot.slane %v3212_v3, 2  ;;  %v3231_v17 = vrot.slane %v3212_v3, 6  ;;  %v3228_v39 = vrot.slane %v3212_v3, 4 }
0x103d   :  { %3784 = vpow2.f32 %v3397_v37  ;;  %v3398_v44 = vmul.f32 -1.442695, %v3220_v38  ;;  %v3399_v27 = vmul.f32 -1.442695, %v3231_v17 }
0x103f   :  { %3786 = vpow2.f32 %v3398_v44 }
0x1040   :  { %3788 = vpow2.f32 %v3399_v27 }
0x104a   :  { %v3785_v63 = vpop.eup %3784 }
0x104b   :  { %v3216_v29 = vadd.f32 1.0, %v3785_v63 }
0x104c   :  { %v3787_v35 = vpop.eup %3786 }
0x104d   :  { %3790 = vrcp.f32 %v3216_v29  ;;  %v3225_v26 = vadd.f32 1.0, %v3787_v35  ;;  %v3789_v1 = vpop.eup %3788 }
0x104e   :  { %3792 = vtanh.f32 %v3228_v39  ;;  %v3236_v9 = vadd.f32 1.0, %v3789_v1 }
0x104f   :  { %3794 = vrcp.f32 %v3225_v26 }
0x1050   :  { %3796 = vrcp.f32 %v3236_v9 }
0x105a   :  { %v3791_v4 = vpop.eup %3790 }
0x105b   :  { %v3793_v5 = vpop.eup %3792 }
0x105c   :  { %v3795_v6 = vpop.eup %3794  ;;  %v3240_v19 = vmul.f32 %v3793_v5, %v3791_v4 }
0x105d   :  { %v3239_v10 = vmul.f32 %v3795_v6, %v3091_v45  ;;  %v3797_v28 = vpop.eup %3796 }
0x105f   :  { %v3241_v23 = vadd.f32 %v3240_v19, %v3239_v10 }
0x1061   :  { %3798 = vtanh.f32 %v3241_v23 }
0x106e   :  { %v3799_v30 = vpop.eup %3798 }
0x106f   :  { %v3243_v34 = vmul.f32 %v3799_v30, %v3797_v28 }
0x1071   :  { %v3252_v40 = vmul.f32 %v3447_v32, %v3243_v34 }
0x1073   :  { %3401 = vst [vmem:[%s5456_s5 + $0x1e] sm:$0x3] %v3252_v40 }

</bundles_post_ra>
